<compile_context>
chip_gen: v7x
topology: tpu7x:2x2x1
jax: 0.10.0
libtpu: 0.0.40
codegen_flags: <defaults>
</compile_context>

<pallas_src>
import functools

import jax
import jax.numpy as jnp
from jax.experimental import pallas as pl
from jax.experimental.pallas import tpu as pltpu


# ----------------------------------------------------------------------------
# Fused kernel: whole Net forward for one batch tile (TB images) per grid step
# ----------------------------------------------------------------------------
def fused_net_kernel(x_ref, r1_ref, r2_ref, w1_ref, w2_ref, vecs_ref,
                     out_ref, a1_ref, a2_ref):
    """Operand layouts (cdt = compute dtype: f32 or bf16):
      x_ref   : [12, TB, 168] cdt  x_ref[pr, b, e*28+w] = img[b, 2*pr+e, w]
      r1_ref  : [168, 512]    cdt  conv1 banded wts, K=(e,w), N=(dh,dw | j*10+c pad->128)
      r2_ref  : [768, 512]    cdt  conv2 banded wts, K=(e | j*10+c pad->128), N=(dg,de | q*20+d pad->128)
      w1_ref  : [512, 64]     cdt  fc1, rows=(p | q*20+d pad->128), cols pad 50->64
      w2_ref  : [64, 10]      cdt  fc2 (rows 50..63 zero)
      vecs_ref: [6, 128]      f32  rows: conv1_b | bn_scale | bn_shift | conv2_b | fc1_b | fc2_b
      out_ref : [TB, 10]      f32  log-probabilities
      a1_ref  : [TB, 1536]    cdt  scratch: pooled conv1 act (12 rows x 128 lanes)
      a2_ref  : [TB, 512]     cdt  scratch: pooled conv2 act (4 rows x 128 lanes)
    """
    cdt = r1_ref.dtype
    vecs = vecs_ref[...]                       # hoisted: loaded once, reused everywhere
    cb1, bns, bnsh, cb2 = vecs[0:1], vecs[1:2], vecs[2:3], vecs[3:4]
    fb1 = vecs[4:5, :64]
    fb2 = vecs[5:6, :10]

    # ---- conv1 -> maxpool(2x2) -> relu -> BatchNorm (eval, folded affine) ----
    # One matmul per pooled row; both pool parities (dh,dw) are the 4 x 128-lane
    # N slabs, the 5 kh taps are folded into K (=168).
    for pr in range(12):
        y = jnp.dot(x_ref[pr], r1_ref[...],
                    preferred_element_type=jnp.float32)            # [TB, 512]
        m = jnp.maximum(jnp.maximum(y[:, 0:128], y[:, 128:256]),
                        jnp.maximum(y[:, 256:384], y[:, 384:512]))  # max-pool
        a1 = jnp.maximum(m + cb1, 0.0) * bns + bnsh                 # bias,relu,BN
        a1_ref[:, pr * 128:(pr + 1) * 128] = a1.astype(cdt)

    # ---- conv2 -> Dropout2d (identity, eval) -> maxpool(2x2) -> relu ----
    # kh folded into K (6 aligned 128-lane a1 rows -> K=768); (dg,de) in N.
    for p2 in range(4):
        y = jnp.dot(a1_ref[:, p2 * 256:p2 * 256 + 768], r2_ref[...],
                    preferred_element_type=jnp.float32)            # [TB, 512]
        m = jnp.maximum(jnp.maximum(y[:, 0:128], y[:, 128:256]),
                        jnp.maximum(y[:, 256:384], y[:, 384:512]))
        a2 = jnp.maximum(m + cb2, 0.0)
        a2_ref[:, p2 * 128:(p2 + 1) * 128] = a2.astype(cdt)

    # ---- fc1 -> relu -> dropout (identity, eval) -> fc2 -> log_softmax ----
    # TODO(synk): training-mode F.dropout / Dropout2d (stochastic) not implemented.
    h = jnp.dot(a2_ref[...], w1_ref[...],
                preferred_element_type=jnp.float32) + fb1           # [TB, 64]
    h = jnp.maximum(h, 0.0).astype(cdt)
    z = jnp.dot(h, w2_ref[...],
                preferred_element_type=jnp.float32) + fb2           # [TB, 10]
    zmax = jnp.max(z, axis=-1, keepdims=True)
    lse = jnp.log(jnp.sum(jnp.exp(z - zmax), axis=-1, keepdims=True))
    out_ref[...] = z - zmax - lse                                   # one batched store / step


# ----------------------------------------------------------------------------
# One-time parameter packing (plain JAX at init; zero per-forward cost)
# ----------------------------------------------------------------------------
def _build_r1(conv1_w, dtype):
    """R1[e*28+w, (dh*2+dw)*128 + j*10+c] = conv1_w[c,0,e-dh,w-2j-dw], 0 outside taps."""
    w = conv1_w[:, 0]                                               # [10(c),5,5]
    e = jnp.arange(6).reshape(6, 1, 1, 1, 1, 1)
    wr = jnp.arange(28).reshape(1, 28, 1, 1, 1, 1)
    dh = jnp.arange(2).reshape(1, 1, 2, 1, 1, 1)
    dw = jnp.arange(2).reshape(1, 1, 1, 2, 1, 1)
    j = jnp.arange(12).reshape(1, 1, 1, 1, 12, 1)
    c = jnp.arange(10).reshape(1, 1, 1, 1, 1, 10)
    kh = e - dh
    kw = wr - 2 * j - dw
    valid = (kh >= 0) & (kh <= 4) & (kw >= 0) & (kw <= 4)
    vals = w[c, jnp.clip(kh, 0, 4), jnp.clip(kw, 0, 4)]             # [6,28,2,2,12,10]
    vals = jnp.where(valid, vals, 0.0)
    r1 = jnp.zeros((6, 28, 2, 2, 128), jnp.float32)
    r1 = r1.at[..., :120].set(vals.reshape(6, 28, 2, 2, 120))
    return r1.reshape(168, 512).astype(dtype)


def _build_r2(conv2_w, dtype):
    """R2[e*128 + j*10+c, (dg*2+de)*128 + q*20+d] = conv2_w[d,c,e-dg,j-2q-de]."""
    e = jnp.arange(6).reshape(6, 1, 1, 1, 1, 1, 1)
    j = jnp.arange(12).reshape(1, 12, 1, 1, 1, 1, 1)
    c = jnp.arange(10).reshape(1, 1, 10, 1, 1, 1, 1)
    dg = jnp.arange(2).reshape(1, 1, 1, 2, 1, 1, 1)
    de = jnp.arange(2).reshape(1, 1, 1, 1, 2, 1, 1)
    q = jnp.arange(4).reshape(1, 1, 1, 1, 1, 4, 1)
    d = jnp.arange(20).reshape(1, 1, 1, 1, 1, 1, 20)
    kh = e - dg
    kw = j - 2 * q - de
    valid = (kh >= 0) & (kh <= 4) & (kw >= 0) & (kw <= 4)
    vals = conv2_w[d, c, jnp.clip(kh, 0, 4), jnp.clip(kw, 0, 4)]    # [6,12,10,2,2,4,20]
    vals = jnp.where(valid, vals, 0.0)
    r2 = jnp.zeros((6, 128, 2, 2, 128), jnp.float32)
    r2 = r2.at[:, :120, :, :, :80].set(vals.reshape(6, 120, 2, 2, 80))
    return r2.reshape(768, 512).astype(dtype)


def _build_w1(fc1_w, dtype):
    """W1[p*128 + q*20+d, o] = fc1_w[o, d*16 + p*4 + q]; N padded 50 -> 64."""
    wt = fc1_w.reshape(50, 20, 4, 4).transpose(2, 3, 1, 0).reshape(4, 80, 50)
    w1 = jnp.zeros((4, 128, 64), jnp.float32).at[:, :80, :50].set(wt)
    return w1.reshape(512, 64).astype(dtype)


def _build_w2(fc2_w, dtype):
    return jnp.zeros((64, 10), jnp.float32).at[:50, :].set(fc2_w.T).astype(dtype)


def build_params(key):
    ks = jax.random.split(key, 10)
    return {
        "conv1_w": 0.1 * jax.random.normal(ks[0], (10, 1, 5, 5), jnp.float32),
        "conv1_b": 0.1 * jax.random.normal(ks[1], (10,), jnp.float32),
        "conv2_w": 0.1 * jax.random.normal(ks[2], (20, 10, 5, 5), jnp.float32),
        "conv2_b": 0.1 * jax.random.normal(ks[3], (20,), jnp.float32),
        "fc1_w": 0.1 * jax.random.normal(ks[4], (50, 320), jnp.float32),
        "fc1_b": 0.1 * jax.random.normal(ks[5], (50,), jnp.float32),
        "fc2_w": 0.1 * jax.random.normal(ks[6], (10, 50), jnp.float32),
        "fc2_b": 0.1 * jax.random.normal(ks[7], (10,), jnp.float32),
        # BatchNorm2d(10) eval-mode parameters / running stats
        "bn_gamma": 1.0 + 0.1 * jax.random.normal(ks[8], (10,), jnp.float32),
        "bn_beta": 0.1 * jax.random.normal(ks[9], (10,), jnp.float32),
        "bn_mean": jnp.zeros((10,), jnp.float32),
        "bn_var": jnp.ones((10,), jnp.float32),
    }


def prepare(params, compute_dtype=jnp.float32, eps=1e-5):
    scale = params["bn_gamma"] * jax.lax.rsqrt(params["bn_var"] + eps)
    shift = params["bn_beta"] - params["bn_mean"] * scale
    vecs = jnp.zeros((6, 128), jnp.float32)
    vecs = vecs.at[0, :120].set(jnp.tile(params["conv1_b"], 12))
    vecs = vecs.at[1, :120].set(jnp.tile(scale, 12))
    vecs = vecs.at[2, :120].set(jnp.tile(shift, 12))
    vecs = vecs.at[3, :80].set(jnp.tile(params["conv2_b"], 4))
    vecs = vecs.at[4, :50].set(params["fc1_b"])
    vecs = vecs.at[5, :10].set(params["fc2_b"])
    return {
        "r1": _build_r1(params["conv1_w"], compute_dtype),
        "r2": _build_r2(params["conv2_w"], compute_dtype),
        "w1": _build_w1(params["fc1_w"], compute_dtype),
        "w2": _build_w2(params["fc2_w"], compute_dtype),
        "vecs": vecs,                                   # stays f32
    }


# ----------------------------------------------------------------------------
# Forward wrapper: single fused pallas_call, "parallel" grid over batch tiles
# ----------------------------------------------------------------------------
def _const_spec(a):
    zeros = (0,) * a.ndim
    return pl.BlockSpec(a.shape, lambda i, z=zeros: z)  # VMEM-resident across grid


@functools.partial(jax.jit, static_argnames=("tile_b",))
def net_forward(x, prep, tile_b=None):
    B = x.shape[0]
    if tile_b is None:
        # Keep the batch tile <= 256: ~28 KB/image of live batched intermediates
        # + ~2 MB resident weights stays well inside even v7x's 32 MiB scoped VMEM.
        tile_b = B if B <= 256 else 256
    cdt = prep["r1"].dtype
    bp = ((B + tile_b - 1) // tile_b) * tile_b

    img = x.reshape(B, 28, 28)
    if bp != B:
        img = jnp.concatenate([img, jnp.zeros((bp - B, 28, 28), img.dtype)], 0)
    # Row slabs for conv1: x_exp[pr, b, e*28+w] = img[b, 2*pr+e, w]  (2.6x of a 3 KB
    # image, done once in XLA -> every in-kernel conv1 LHS is an aligned slice).
    rows = (2 * jnp.arange(12)[:, None] + jnp.arange(6)[None, :]).reshape(-1)
    x_exp = img[:, rows, :].reshape(bp, 12, 168).transpose(1, 0, 2).astype(cdt)

    out = pl.pallas_call(
        fused_net_kernel,
        out_shape=jax.ShapeDtypeStruct((bp, 10), jnp.float32),
        grid=(bp // tile_b,),
        in_specs=[
            pl.BlockSpec((12, tile_b, 168), lambda i: (0, i, 0)),
            _const_spec(prep["r1"]),
            _const_spec(prep["r2"]),
            _const_spec(prep["w1"]),
            _const_spec(prep["w2"]),
            _const_spec(prep["vecs"]),
        ],
        out_specs=pl.BlockSpec((tile_b, 10), lambda i: (i, 0)),
        scratch_shapes=[pltpu.VMEM((tile_b, 1536), cdt),
                        pltpu.VMEM((tile_b, 512), cdt)],
        compiler_params=pltpu.CompilerParams(
            dimension_semantics=("parallel",)),
    )(x_exp, prep["r1"], prep["r2"], prep["w1"], prep["w2"], prep["vecs"])
    return out[:B]


# ----------------------------------------------------------------------------
# Pure-JAX reference (independent formulation, matches the PyTorch op order:
# conv1 -> maxpool -> relu -> BN -> conv2 -> maxpool -> relu -> fc1 -> relu ->
# fc2 -> log_softmax; dropout layers are identity in eval mode)
# ----------------------------------------------------------------------------
def reference_forward(x, params, eps=1e-5):
    def conv(z, w, b):
        y = jax.lax.conv_general_dilated(
            z, w, (1, 1), "VALID", dimension_numbers=("NCHW", "OIHW", "NCHW"))
        return y + b[None, :, None, None]

    def maxpool2(z):
        return jax.lax.reduce_window(z, -jnp.inf, jax.lax.max,
                                     (1, 1, 2, 2), (1, 1, 2, 2), "VALID")

    scale = params["bn_gamma"] * jax.lax.rsqrt(params["bn_var"] + eps)
    shift = params["bn_beta"] - params["bn_mean"] * scale
    y = jnp.maximum(maxpool2(conv(x, params["conv1_w"], params["conv1_b"])), 0.0)
    y = y * scale[None, :, None, None] + shift[None, :, None, None]
    y = jnp.maximum(maxpool2(conv(y, params["conv2_w"], params["conv2_b"])), 0.0)
    y = y.reshape(y.shape[0], 320)
    h = jnp.maximum(y @ params["fc1_w"].T + params["fc1_b"], 0.0)
    z = h @ params["fc2_w"].T + params["fc2_b"]
    return jax.nn.log_softmax(z, axis=-1)


if __name__ == "__main__":
    key = jax.random.PRNGKey(0)
    kx, kx2, kp = jax.random.split(key, 3)
    params = build_params(kp)

    # --- Run A: small batch, float32 packing, TIGHT tolerance (catches any
    #     weight-packing / indexing bug; only f32 reassociation differs). ---
    B = 2
    x = jax.random.normal(kx, (B, 1, 28, 28), jnp.float32)      # NCHW, like PyTorch
    prep32 = prepare(params, compute_dtype=jnp.float32)
    out32 = jax.block_until_ready(net_forward(x, prep32, tile_b=B))
    assert out32.shape == (B, 10), out32.shape
    assert bool(jnp.allclose(jnp.sum(jnp.exp(out32), -1), 1.0, atol=1e-3))
    ref = jax.block_until_ready(reference_forward(x, params))
    err32 = float(jnp.max(jnp.abs(out32 - ref)))
    assert err32 < 1e-3, f"f32 kernel vs reference: max abs diff {err32}"

    # --- Run B: batched path (grid = 2 "parallel" steps -> both v7x TCs),
    #     bf16 operands with f32 accumulation. Looser tolerance reflects bf16
    #     quantization only; packing correctness is proven by Run A. ---
    B2 = 64
    x2 = jax.random.normal(kx2, (B2, 1, 28, 28), jnp.float32)
    prep16 = prepare(params, compute_dtype=jnp.bfloat16)
    out16 = jax.block_until_ready(net_forward(x2, prep16, tile_b=32))
    assert out16.shape == (B2, 10), out16.shape
    assert bool(jnp.allclose(jnp.sum(jnp.exp(out16), -1), 1.0, atol=1e-2))
    ref2 = jax.block_until_ready(reference_forward(x2, params))
    err16 = float(jnp.max(jnp.abs(out16 - ref2)))
    mean16 = float(jnp.mean(jnp.abs(out16 - ref2)))
    assert err16 < 1.2e-1 and mean16 < 2.5e-2, (err16, mean16)

    print("KERNEL_OK")
</pallas_src>

<mosaic_0001>
module attributes {stable_mosaic.version = 11 : i64} {
  func.func @fused_net_kernel(%arg0: i32, %arg1: memref<12x2x168xf32, #tpu.memory_space<vmem>>, %arg2: memref<168x512xf32, #tpu.memory_space<vmem>>, %arg3: memref<768x512xf32, #tpu.memory_space<vmem>>, %arg4: memref<512x64xf32, #tpu.memory_space<vmem>>, %arg5: memref<64x10xf32, #tpu.memory_space<vmem>>, %arg6: memref<6x128xf32, #tpu.memory_space<vmem>>, %arg7: memref<2x10xf32, #tpu.memory_space<vmem>>, %arg8: memref<2x1536xf32, #tpu.memory_space<vmem>>, %arg9: memref<2x512xf32, #tpu.memory_space<vmem>>) attributes {dimension_semantics = [#tpu.dimension_semantics<parallel>], iteration_bounds = array<i64: 1>, scalar_prefetch = 0 : i64, scratch_operands = 2 : i64, tpu.core_type = #tpu.core_type<tc>, window_params = [{transform_indices = @transform_0, window_bounds = array<i64: 12, 2, 168>}, {pipeline_mode = #tpu.pipeline_mode<synchronous>, transform_indices = @transform_1, window_bounds = array<i64: 168, 512>}, {pipeline_mode = #tpu.pipeline_mode<synchronous>, transform_indices = @transform_2, window_bounds = array<i64: 768, 512>}, {pipeline_mode = #tpu.pipeline_mode<synchronous>, transform_indices = @transform_3, window_bounds = array<i64: 512, 64>}, {pipeline_mode = #tpu.pipeline_mode<synchronous>, transform_indices = @transform_4, window_bounds = array<i64: 64, 10>}, {pipeline_mode = #tpu.pipeline_mode<synchronous>, transform_indices = @transform_5, window_bounds = array<i64: 6, 128>}, {transform_indices = @transform_6, window_bounds = array<i64: 2, 10>}]} {
    %c0 = arith.constant 0 : index
    %c0_0 = arith.constant 0 : index
    %0 = vector.load %arg6[%c0, %c0_0] : memref<6x128xf32, #tpu.memory_space<vmem>>, vector<6x128xf32>
    %1 = vector.extract_strided_slice %0 {offsets = [0, 0], sizes = [1, 128], strides = [1, 1]} : vector<6x128xf32> to vector<1x128xf32>
    %2 = vector.extract_strided_slice %0 {offsets = [1, 0], sizes = [1, 128], strides = [1, 1]} : vector<6x128xf32> to vector<1x128xf32>
    %3 = vector.extract_strided_slice %0 {offsets = [2, 0], sizes = [1, 128], strides = [1, 1]} : vector<6x128xf32> to vector<1x128xf32>
    %4 = vector.extract_strided_slice %0 {offsets = [3, 0], sizes = [1, 128], strides = [1, 1]} : vector<6x128xf32> to vector<1x128xf32>
    %5 = vector.extract_strided_slice %0 {offsets = [4, 0], sizes = [1, 64], strides = [1, 1]} : vector<6x128xf32> to vector<1x64xf32>
    %6 = vector.extract_strided_slice %0 {offsets = [5, 0], sizes = [1, 10], strides = [1, 1]} : vector<6x128xf32> to vector<1x10xf32>
    %c0_1 = arith.constant 0 : index
    %c0_2 = arith.constant 0 : index
    %c0_3 = arith.constant 0 : index
    %7 = vector.load %arg1[%c0_1, %c0_2, %c0_3] : memref<12x2x168xf32, #tpu.memory_space<vmem>>, vector<1x2x168xf32>
    %8 = vector.shape_cast %7 : vector<1x2x168xf32> to vector<2x168xf32>
    %c0_4 = arith.constant 0 : index
    %c0_5 = arith.constant 0 : index
    %9 = vector.load %arg2[%c0_4, %c0_5] : memref<168x512xf32, #tpu.memory_space<vmem>>, vector<168x512xf32>
    %cst = arith.constant dense<0.000000e+00> : vector<2x512xf32>
    %10 = tpu.matmul %8, %9, %cst {dimension_numbers = #tpu.dot_dimension_numbers<[1], [0], [0], [1], [0, 0, 1, 1], [], []>} : vector<2x168xf32>, vector<168x512xf32>, vector<2x512xf32> -> vector<2x512xf32>
    %11 = vector.extract_strided_slice %10 {offsets = [0, 0], sizes = [2, 128], strides = [1, 1]} : vector<2x512xf32> to vector<2x128xf32>
    %12 = vector.extract_strided_slice %10 {offsets = [0, 128], sizes = [2, 128], strides = [1, 1]} : vector<2x512xf32> to vector<2x128xf32>
    %13 = arith.maximumf %11, %12 : vector<2x128xf32>
    %14 = vector.extract_strided_slice %10 {offsets = [0, 256], sizes = [2, 128], strides = [1, 1]} : vector<2x512xf32> to vector<2x128xf32>
    %15 = vector.extract_strided_slice %10 {offsets = [0, 384], sizes = [2, 128], strides = [1, 1]} : vector<2x512xf32> to vector<2x128xf32>
    %16 = arith.maximumf %14, %15 : vector<2x128xf32>
    %17 = arith.maximumf %13, %16 : vector<2x128xf32>
    %18 = vector.broadcast %1 : vector<1x128xf32> to vector<2x128xf32>
    %19 = arith.addf %17, %18 : vector<2x128xf32>
    %cst_6 = arith.constant 0.000000e+00 : f32
    %20 = vector.broadcast %cst_6 : f32 to vector<2x128xf32>
    %21 = arith.maximumf %19, %20 : vector<2x128xf32>
    %22 = vector.broadcast %2 : vector<1x128xf32> to vector<2x128xf32>
    %23 = arith.mulf %21, %22 : vector<2x128xf32>
    %24 = vector.broadcast %3 : vector<1x128xf32> to vector<2x128xf32>
    %25 = arith.addf %23, %24 : vector<2x128xf32>
    %c0_7 = arith.constant 0 : index
    %c0_8 = arith.constant 0 : index
    %26 = vector.load %arg8[%c0_7, %c0_8] : memref<2x1536xf32, #tpu.memory_space<vmem>>, vector<2x128xf32>
    tpu.vector_store %arg8[%c0_7, %c0_8], %25 {strides = array<i32>} : memref<2x1536xf32, #tpu.memory_space<vmem>>, vector<2x128xf32>,
    %c1 = arith.constant 1 : index
    %c0_9 = arith.constant 0 : index
    %c0_10 = arith.constant 0 : index
    %27 = vector.load %arg1[%c1, %c0_9, %c0_10] : memref<12x2x168xf32, #tpu.memory_space<vmem>>, vector<1x2x168xf32>
    %28 = vector.shape_cast %27 : vector<1x2x168xf32> to vector<2x168xf32>
    %c0_11 = arith.constant 0 : index
    %c0_12 = arith.constant 0 : index
    %29 = vector.load %arg2[%c0_11, %c0_12] : memref<168x512xf32, #tpu.memory_space<vmem>>, vector<168x512xf32>
    %cst_13 = arith.constant dense<0.000000e+00> : vector<2x512xf32>
    %30 = tpu.matmul %28, %29, %cst_13 {dimension_numbers = #tpu.dot_dimension_numbers<[1], [0], [0], [1], [0, 0, 1, 1], [], []>} : vector<2x168xf32>, vector<168x512xf32>, vector<2x512xf32> -> vector<2x512xf32>
    %31 = vector.extract_strided_slice %30 {offsets = [0, 0], sizes = [2, 128], strides = [1, 1]} : vector<2x512xf32> to vector<2x128xf32>
    %32 = vector.extract_strided_slice %30 {offsets = [0, 128], sizes = [2, 128], strides = [1, 1]} : vector<2x512xf32> to vector<2x128xf32>
    %33 = arith.maximumf %31, %32 : vector<2x128xf32>
    %34 = vector.extract_strided_slice %30 {offsets = [0, 256], sizes = [2, 128], strides = [1, 1]} : vector<2x512xf32> to vector<2x128xf32>
    %35 = vector.extract_strided_slice %30 {offsets = [0, 384], sizes = [2, 128], strides = [1, 1]} : vector<2x512xf32> to vector<2x128xf32>
    %36 = arith.maximumf %34, %35 : vector<2x128xf32>
    %37 = arith.maximumf %33, %36 : vector<2x128xf32>
    %38 = vector.broadcast %1 : vector<1x128xf32> to vector<2x128xf32>
    %39 = arith.addf %37, %38 : vector<2x128xf32>
    %cst_14 = arith.constant 0.000000e+00 : f32
    %40 = vector.broadcast %cst_14 : f32 to vector<2x128xf32>
    %41 = arith.maximumf %39, %40 : vector<2x128xf32>
    %42 = vector.broadcast %2 : vector<1x128xf32> to vector<2x128xf32>
    %43 = arith.mulf %41, %42 : vector<2x128xf32>
    %44 = vector.broadcast %3 : vector<1x128xf32> to vector<2x128xf32>
    %45 = arith.addf %43, %44 : vector<2x128xf32>
    %c0_15 = arith.constant 0 : index
    %c128 = arith.constant 128 : index
    %46 = vector.load %arg8[%c0_15, %c128] : memref<2x1536xf32, #tpu.memory_space<vmem>>, vector<2x128xf32>
    tpu.vector_store %arg8[%c0_15, %c128], %45 {strides = array<i32>} : memref<2x1536xf32, #tpu.memory_space<vmem>>, vector<2x128xf32>,
    %c2 = arith.constant 2 : index
    %c0_16 = arith.constant 0 : index
    %c0_17 = arith.constant 0 : index
    %47 = vector.load %arg1[%c2, %c0_16, %c0_17] : memref<12x2x168xf32, #tpu.memory_space<vmem>>, vector<1x2x168xf32>
    %48 = vector.shape_cast %47 : vector<1x2x168xf32> to vector<2x168xf32>
    %c0_18 = arith.constant 0 : index
    %c0_19 = arith.constant 0 : index
    %49 = vector.load %arg2[%c0_18, %c0_19] : memref<168x512xf32, #tpu.memory_space<vmem>>, vector<168x512xf32>
    %cst_20 = arith.constant dense<0.000000e+00> : vector<2x512xf32>
    %50 = tpu.matmul %48, %49, %cst_20 {dimension_numbers = #tpu.dot_dimension_numbers<[1], [0], [0], [1], [0, 0, 1, 1], [], []>} : vector<2x168xf32>, vector<168x512xf32>, vector<2x512xf32> -> vector<2x512xf32>
    %51 = vector.extract_strided_slice %50 {offsets = [0, 0], sizes = [2, 128], strides = [1, 1]} : vector<2x512xf32> to vector<2x128xf32>
    %52 = vector.extract_strided_slice %50 {offsets = [0, 128], sizes = [2, 128], strides = [1, 1]} : vector<2x512xf32> to vector<2x128xf32>
    %53 = arith.maximumf %51, %52 : vector<2x128xf32>
    %54 = vector.extract_strided_slice %50 {offsets = [0, 256], sizes = [2, 128], strides = [1, 1]} : vector<2x512xf32> to vector<2x128xf32>
    %55 = vector.extract_strided_slice %50 {offsets = [0, 384], sizes = [2, 128], strides = [1, 1]} : vector<2x512xf32> to vector<2x128xf32>
    %56 = arith.maximumf %54, %55 : vector<2x128xf32>
    %57 = arith.maximumf %53, %56 : vector<2x128xf32>
    %58 = vector.broadcast %1 : vector<1x128xf32> to vector<2x128xf32>
    %59 = arith.addf %57, %58 : vector<2x128xf32>
    %cst_21 = arith.constant 0.000000e+00 : f32
    %60 = vector.broadcast %cst_21 : f32 to vector<2x128xf32>
    %61 = arith.maximumf %59, %60 : vector<2x128xf32>
    %62 = vector.broadcast %2 : vector<1x128xf32> to vector<2x128xf32>
    %63 = arith.mulf %61, %62 : vector<2x128xf32>
    %64 = vector.broadcast %3 : vector<1x128xf32> to vector<2x128xf32>
    %65 = arith.addf %63, %64 : vector<2x128xf32>
    %c0_22 = arith.constant 0 : index
    %c256 = arith.constant 256 : index
    %66 = vector.load %arg8[%c0_22, %c256] : memref<2x1536xf32, #tpu.memory_space<vmem>>, vector<2x128xf32>
    tpu.vector_store %arg8[%c0_22, %c256], %65 {strides = array<i32>} : memref<2x1536xf32, #tpu.memory_space<vmem>>, vector<2x128xf32>,
    %c3 = arith.constant 3 : index
    %c0_23 = arith.constant 0 : index
    %c0_24 = arith.constant 0 : index
    %67 = vector.load %arg1[%c3, %c0_23, %c0_24] : memref<12x2x168xf32, #tpu.memory_space<vmem>>, vector<1x2x168xf32>
    %68 = vector.shape_cast %67 : vector<1x2x168xf32> to vector<2x168xf32>
    %c0_25 = arith.constant 0 : index
    %c0_26 = arith.constant 0 : index
    %69 = vector.load %arg2[%c0_25, %c0_26] : memref<168x512xf32, #tpu.memory_space<vmem>>, vector<168x512xf32>
    %cst_27 = arith.constant dense<0.000000e+00> : vector<2x512xf32>
    %70 = tpu.matmul %68, %69, %cst_27 {dimension_numbers = #tpu.dot_dimension_numbers<[1], [0], [0], [1], [0, 0, 1, 1], [], []>} : vector<2x168xf32>, vector<168x512xf32>, vector<2x512xf32> -> vector<2x512xf32>
    %71 = vector.extract_strided_slice %70 {offsets = [0, 0], sizes = [2, 128], strides = [1, 1]} : vector<2x512xf32> to vector<2x128xf32>
    %72 = vector.extract_strided_slice %70 {offsets = [0, 128], sizes = [2, 128], strides = [1, 1]} : vector<2x512xf32> to vector<2x128xf32>
    %73 = arith.maximumf %71, %72 : vector<2x128xf32>
    %74 = vector.extract_strided_slice %70 {offsets = [0, 256], sizes = [2, 128], strides = [1, 1]} : vector<2x512xf32> to vector<2x128xf32>
    %75 = vector.extract_strided_slice %70 {offsets = [0, 384], sizes = [2, 128], strides = [1, 1]} : vector<2x512xf32> to vector<2x128xf32>
    %76 = arith.maximumf %74, %75 : vector<2x128xf32>
    %77 = arith.maximumf %73, %76 : vector<2x128xf32>
    %78 = vector.broadcast %1 : vector<1x128xf32> to vector<2x128xf32>
    %79 = arith.addf %77, %78 : vector<2x128xf32>
    %cst_28 = arith.constant 0.000000e+00 : f32
    %80 = vector.broadcast %cst_28 : f32 to vector<2x128xf32>
    %81 = arith.maximumf %79, %80 : vector<2x128xf32>
    %82 = vector.broadcast %2 : vector<1x128xf32> to vector<2x128xf32>
    %83 = arith.mulf %81, %82 : vector<2x128xf32>
    %84 = vector.broadcast %3 : vector<1x128xf32> to vector<2x128xf32>
    %85 = arith.addf %83, %84 : vector<2x128xf32>
    %c0_29 = arith.constant 0 : index
    %c384 = arith.constant 384 : index
    %86 = vector.load %arg8[%c0_29, %c384] : memref<2x1536xf32, #tpu.memory_space<vmem>>, vector<2x128xf32>
    tpu.vector_store %arg8[%c0_29, %c384], %85 {strides = array<i32>} : memref<2x1536xf32, #tpu.memory_space<vmem>>, vector<2x128xf32>,
    %c4 = arith.constant 4 : index
    %c0_30 = arith.constant 0 : index
    %c0_31 = arith.constant 0 : index
    %87 = vector.load %arg1[%c4, %c0_30, %c0_31] : memref<12x2x168xf32, #tpu.memory_space<vmem>>, vector<1x2x168xf32>
    %88 = vector.shape_cast %87 : vector<1x2x168xf32> to vector<2x168xf32>
    %c0_32 = arith.constant 0 : index
    %c0_33 = arith.constant 0 : index
    %89 = vector.load %arg2[%c0_32, %c0_33] : memref<168x512xf32, #tpu.memory_space<vmem>>, vector<168x512xf32>
    %cst_34 = arith.constant dense<0.000000e+00> : vector<2x512xf32>
    %90 = tpu.matmul %88, %89, %cst_34 {dimension_numbers = #tpu.dot_dimension_numbers<[1], [0], [0], [1], [0, 0, 1, 1], [], []>} : vector<2x168xf32>, vector<168x512xf32>, vector<2x512xf32> -> vector<2x512xf32>
    %91 = vector.extract_strided_slice %90 {offsets = [0, 0], sizes = [2, 128], strides = [1, 1]} : vector<2x512xf32> to vector<2x128xf32>
    %92 = vector.extract_strided_slice %90 {offsets = [0, 128], sizes = [2, 128], strides = [1, 1]} : vector<2x512xf32> to vector<2x128xf32>
    %93 = arith.maximumf %91, %92 : vector<2x128xf32>
    %94 = vector.extract_strided_slice %90 {offsets = [0, 256], sizes = [2, 128], strides = [1, 1]} : vector<2x512xf32> to vector<2x128xf32>
    %95 = vector.extract_strided_slice %90 {offsets = [0, 384], sizes = [2, 128], strides = [1, 1]} : vector<2x512xf32> to vector<2x128xf32>
    %96 = arith.maximumf %94, %95 : vector<2x128xf32>
    %97 = arith.maximumf %93, %96 : vector<2x128xf32>
    %98 = vector.broadcast %1 : vector<1x128xf32> to vector<2x128xf32>
    %99 = arith.addf %97, %98 : vector<2x128xf32>
    %cst_35 = arith.constant 0.000000e+00 : f32
    %100 = vector.broadcast %cst_35 : f32 to vector<2x128xf32>
    %101 = arith.maximumf %99, %100 : vector<2x128xf32>
    %102 = vector.broadcast %2 : vector<1x128xf32> to vector<2x128xf32>
    %103 = arith.mulf %101, %102 : vector<2x128xf32>
    %104 = vector.broadcast %3 : vector<1x128xf32> to vector<2x128xf32>
    %105 = arith.addf %103, %104 : vector<2x128xf32>
    %c0_36 = arith.constant 0 : index
    %c512 = arith.constant 512 : index
    %106 = vector.load %arg8[%c0_36, %c512] : memref<2x1536xf32, #tpu.memory_space<vmem>>, vector<2x128xf32>
    tpu.vector_store %arg8[%c0_36, %c512], %105 {strides = array<i32>} : memref<2x1536xf32, #tpu.memory_space<vmem>>, vector<2x128xf32>,
    %c5 = arith.constant 5 : index
    %c0_37 = arith.constant 0 : index
    %c0_38 = arith.constant 0 : index
    %107 = vector.load %arg1[%c5, %c0_37, %c0_38] : memref<12x2x168xf32, #tpu.memory_space<vmem>>, vector<1x2x168xf32>
    %108 = vector.shape_cast %107 : vector<1x2x168xf32> to vector<2x168xf32>
    %c0_39 = arith.constant 0 : index
    %c0_40 = arith.constant 0 : index
    %109 = vector.load %arg2[%c0_39, %c0_40] : memref<168x512xf32, #tpu.memory_space<vmem>>, vector<168x512xf32>
    %cst_41 = arith.constant dense<0.000000e+00> : vector<2x512xf32>
    %110 = tpu.matmul %108, %109, %cst_41 {dimension_numbers = #tpu.dot_dimension_numbers<[1], [0], [0], [1], [0, 0, 1, 1], [], []>} : vector<2x168xf32>, vector<168x512xf32>, vector<2x512xf32> -> vector<2x512xf32>
    %111 = vector.extract_strided_slice %110 {offsets = [0, 0], sizes = [2, 128], strides = [1, 1]} : vector<2x512xf32> to vector<2x128xf32>
    %112 = vector.extract_strided_slice %110 {offsets = [0, 128], sizes = [2, 128], strides = [1, 1]} : vector<2x512xf32> to vector<2x128xf32>
    %113 = arith.maximumf %111, %112 : vector<2x128xf32>
    %114 = vector.extract_strided_slice %110 {offsets = [0, 256], sizes = [2, 128], strides = [1, 1]} : vector<2x512xf32> to vector<2x128xf32>
    %115 = vector.extract_strided_slice %110 {offsets = [0, 384], sizes = [2, 128], strides = [1, 1]} : vector<2x512xf32> to vector<2x128xf32>
    %116 = arith.maximumf %114, %115 : vector<2x128xf32>
    %117 = arith.maximumf %113, %116 : vector<2x128xf32>
    %118 = vector.broadcast %1 : vector<1x128xf32> to vector<2x128xf32>
    %119 = arith.addf %117, %118 : vector<2x128xf32>
    %cst_42 = arith.constant 0.000000e+00 : f32
    %120 = vector.broadcast %cst_42 : f32 to vector<2x128xf32>
    %121 = arith.maximumf %119, %120 : vector<2x128xf32>
    %122 = vector.broadcast %2 : vector<1x128xf32> to vector<2x128xf32>
    %123 = arith.mulf %121, %122 : vector<2x128xf32>
    %124 = vector.broadcast %3 : vector<1x128xf32> to vector<2x128xf32>
    %125 = arith.addf %123, %124 : vector<2x128xf32>
    %c0_43 = arith.constant 0 : index
    %c640 = arith.constant 640 : index
    %126 = vector.load %arg8[%c0_43, %c640] : memref<2x1536xf32, #tpu.memory_space<vmem>>, vector<2x128xf32>
    tpu.vector_store %arg8[%c0_43, %c640], %125 {strides = array<i32>} : memref<2x1536xf32, #tpu.memory_space<vmem>>, vector<2x128xf32>,
    %c6 = arith.constant 6 : index
    %c0_44 = arith.constant 0 : index
    %c0_45 = arith.constant 0 : index
    %127 = vector.load %arg1[%c6, %c0_44, %c0_45] : memref<12x2x168xf32, #tpu.memory_space<vmem>>, vector<1x2x168xf32>
    %128 = vector.shape_cast %127 : vector<1x2x168xf32> to vector<2x168xf32>
    %c0_46 = arith.constant 0 : index
    %c0_47 = arith.constant 0 : index
    %129 = vector.load %arg2[%c0_46, %c0_47] : memref<168x512xf32, #tpu.memory_space<vmem>>, vector<168x512xf32>
    %cst_48 = arith.constant dense<0.000000e+00> : vector<2x512xf32>
    %130 = tpu.matmul %128, %129, %cst_48 {dimension_numbers = #tpu.dot_dimension_numbers<[1], [0], [0], [1], [0, 0, 1, 1], [], []>} : vector<2x168xf32>, vector<168x512xf32>, vector<2x512xf32> -> vector<2x512xf32>
    %131 = vector.extract_strided_slice %130 {offsets = [0, 0], sizes = [2, 128], strides = [1, 1]} : vector<2x512xf32> to vector<2x128xf32>
    %132 = vector.extract_strided_slice %130 {offsets = [0, 128], sizes = [2, 128], strides = [1, 1]} : vector<2x512xf32> to vector<2x128xf32>
    %133 = arith.maximumf %131, %132 : vector<2x128xf32>
    %134 = vector.extract_strided_slice %130 {offsets = [0, 256], sizes = [2, 128], strides = [1, 1]} : vector<2x512xf32> to vector<2x128xf32>
    %135 = vector.extract_strided_slice %130 {offsets = [0, 384], sizes = [2, 128], strides = [1, 1]} : vector<2x512xf32> to vector<2x128xf32>
    %136 = arith.maximumf %134, %135 : vector<2x128xf32>
    %137 = arith.maximumf %133, %136 : vector<2x128xf32>
    %138 = vector.broadcast %1 : vector<1x128xf32> to vector<2x128xf32>
    %139 = arith.addf %137, %138 : vector<2x128xf32>
    %cst_49 = arith.constant 0.000000e+00 : f32
    %140 = vector.broadcast %cst_49 : f32 to vector<2x128xf32>
    %141 = arith.maximumf %139, %140 : vector<2x128xf32>
    %142 = vector.broadcast %2 : vector<1x128xf32> to vector<2x128xf32>
    %143 = arith.mulf %141, %142 : vector<2x128xf32>
    %144 = vector.broadcast %3 : vector<1x128xf32> to vector<2x128xf32>
    %145 = arith.addf %143, %144 : vector<2x128xf32>
    %c0_50 = arith.constant 0 : index
    %c768 = arith.constant 768 : index
    %146 = vector.load %arg8[%c0_50, %c768] : memref<2x1536xf32, #tpu.memory_space<vmem>>, vector<2x128xf32>
    tpu.vector_store %arg8[%c0_50, %c768], %145 {strides = array<i32>} : memref<2x1536xf32, #tpu.memory_space<vmem>>, vector<2x128xf32>,
    %c7 = arith.constant 7 : index
    %c0_51 = arith.constant 0 : index
    %c0_52 = arith.constant 0 : index
    %147 = vector.load %arg1[%c7, %c0_51, %c0_52] : memref<12x2x168xf32, #tpu.memory_space<vmem>>, vector<1x2x168xf32>
    %148 = vector.shape_cast %147 : vector<1x2x168xf32> to vector<2x168xf32>
    %c0_53 = arith.constant 0 : index
    %c0_54 = arith.constant 0 : index
    %149 = vector.load %arg2[%c0_53, %c0_54] : memref<168x512xf32, #tpu.memory_space<vmem>>, vector<168x512xf32>
    %cst_55 = arith.constant dense<0.000000e+00> : vector<2x512xf32>
    %150 = tpu.matmul %148, %149, %cst_55 {dimension_numbers = #tpu.dot_dimension_numbers<[1], [0], [0], [1], [0, 0, 1, 1], [], []>} : vector<2x168xf32>, vector<168x512xf32>, vector<2x512xf32> -> vector<2x512xf32>
    %151 = vector.extract_strided_slice %150 {offsets = [0, 0], sizes = [2, 128], strides = [1, 1]} : vector<2x512xf32> to vector<2x128xf32>
    %152 = vector.extract_strided_slice %150 {offsets = [0, 128], sizes = [2, 128], strides = [1, 1]} : vector<2x512xf32> to vector<2x128xf32>
    %153 = arith.maximumf %151, %152 : vector<2x128xf32>
    %154 = vector.extract_strided_slice %150 {offsets = [0, 256], sizes = [2, 128], strides = [1, 1]} : vector<2x512xf32> to vector<2x128xf32>
    %155 = vector.extract_strided_slice %150 {offsets = [0, 384], sizes = [2, 128], strides = [1, 1]} : vector<2x512xf32> to vector<2x128xf32>
    %156 = arith.maximumf %154, %155 : vector<2x128xf32>
    %157 = arith.maximumf %153, %156 : vector<2x128xf32>
    %158 = vector.broadcast %1 : vector<1x128xf32> to vector<2x128xf32>
    %159 = arith.addf %157, %158 : vector<2x128xf32>
    %cst_56 = arith.constant 0.000000e+00 : f32
    %160 = vector.broadcast %cst_56 : f32 to vector<2x128xf32>
    %161 = arith.maximumf %159, %160 : vector<2x128xf32>
    %162 = vector.broadcast %2 : vector<1x128xf32> to vector<2x128xf32>
    %163 = arith.mulf %161, %162 : vector<2x128xf32>
    %164 = vector.broadcast %3 : vector<1x128xf32> to vector<2x128xf32>
    %165 = arith.addf %163, %164 : vector<2x128xf32>
    %c0_57 = arith.constant 0 : index
    %c896 = arith.constant 896 : index
    %166 = vector.load %arg8[%c0_57, %c896] : memref<2x1536xf32, #tpu.memory_space<vmem>>, vector<2x128xf32>
    tpu.vector_store %arg8[%c0_57, %c896], %165 {strides = array<i32>} : memref<2x1536xf32, #tpu.memory_space<vmem>>, vector<2x128xf32>,
    %c8 = arith.constant 8 : index
    %c0_58 = arith.constant 0 : index
    %c0_59 = arith.constant 0 : index
    %167 = vector.load %arg1[%c8, %c0_58, %c0_59] : memref<12x2x168xf32, #tpu.memory_space<vmem>>, vector<1x2x168xf32>
    %168 = vector.shape_cast %167 : vector<1x2x168xf32> to vector<2x168xf32>
    %c0_60 = arith.constant 0 : index
    %c0_61 = arith.constant 0 : index
    %169 = vector.load %arg2[%c0_60, %c0_61] : memref<168x512xf32, #tpu.memory_space<vmem>>, vector<168x512xf32>
    %cst_62 = arith.constant dense<0.000000e+00> : vector<2x512xf32>
    %170 = tpu.matmul %168, %169, %cst_62 {dimension_numbers = #tpu.dot_dimension_numbers<[1], [0], [0], [1], [0, 0, 1, 1], [], []>} : vector<2x168xf32>, vector<168x512xf32>, vector<2x512xf32> -> vector<2x512xf32>
    %171 = vector.extract_strided_slice %170 {offsets = [0, 0], sizes = [2, 128], strides = [1, 1]} : vector<2x512xf32> to vector<2x128xf32>
    %172 = vector.extract_strided_slice %170 {offsets = [0, 128], sizes = [2, 128], strides = [1, 1]} : vector<2x512xf32> to vector<2x128xf32>
    %173 = arith.maximumf %171, %172 : vector<2x128xf32>
    %174 = vector.extract_strided_slice %170 {offsets = [0, 256], sizes = [2, 128], strides = [1, 1]} : vector<2x512xf32> to vector<2x128xf32>
    %175 = vector.extract_strided_slice %170 {offsets = [0, 384], sizes = [2, 128], strides = [1, 1]} : vector<2x512xf32> to vector<2x128xf32>
    %176 = arith.maximumf %174, %175 : vector<2x128xf32>
    %177 = arith.maximumf %173, %176 : vector<2x128xf32>
    %178 = vector.broadcast %1 : vector<1x128xf32> to vector<2x128xf32>
    %179 = arith.addf %177, %178 : vector<2x128xf32>
    %cst_63 = arith.constant 0.000000e+00 : f32
    %180 = vector.broadcast %cst_63 : f32 to vector<2x128xf32>
    %181 = arith.maximumf %179, %180 : vector<2x128xf32>
    %182 = vector.broadcast %2 : vector<1x128xf32> to vector<2x128xf32>
    %183 = arith.mulf %181, %182 : vector<2x128xf32>
    %184 = vector.broadcast %3 : vector<1x128xf32> to vector<2x128xf32>
    %185 = arith.addf %183, %184 : vector<2x128xf32>
    %c0_64 = arith.constant 0 : index
    %c1024 = arith.constant 1024 : index
    %186 = vector.load %arg8[%c0_64, %c1024] : memref<2x1536xf32, #tpu.memory_space<vmem>>, vector<2x128xf32>
    tpu.vector_store %arg8[%c0_64, %c1024], %185 {strides = array<i32>} : memref<2x1536xf32, #tpu.memory_space<vmem>>, vector<2x128xf32>,
    %c9 = arith.constant 9 : index
    %c0_65 = arith.constant 0 : index
    %c0_66 = arith.constant 0 : index
    %187 = vector.load %arg1[%c9, %c0_65, %c0_66] : memref<12x2x168xf32, #tpu.memory_space<vmem>>, vector<1x2x168xf32>
    %188 = vector.shape_cast %187 : vector<1x2x168xf32> to vector<2x168xf32>
    %c0_67 = arith.constant 0 : index
    %c0_68 = arith.constant 0 : index
    %189 = vector.load %arg2[%c0_67, %c0_68] : memref<168x512xf32, #tpu.memory_space<vmem>>, vector<168x512xf32>
    %cst_69 = arith.constant dense<0.000000e+00> : vector<2x512xf32>
    %190 = tpu.matmul %188, %189, %cst_69 {dimension_numbers = #tpu.dot_dimension_numbers<[1], [0], [0], [1], [0, 0, 1, 1], [], []>} : vector<2x168xf32>, vector<168x512xf32>, vector<2x512xf32> -> vector<2x512xf32>
    %191 = vector.extract_strided_slice %190 {offsets = [0, 0], sizes = [2, 128], strides = [1, 1]} : vector<2x512xf32> to vector<2x128xf32>
    %192 = vector.extract_strided_slice %190 {offsets = [0, 128], sizes = [2, 128], strides = [1, 1]} : vector<2x512xf32> to vector<2x128xf32>
    %193 = arith.maximumf %191, %192 : vector<2x128xf32>
    %194 = vector.extract_strided_slice %190 {offsets = [0, 256], sizes = [2, 128], strides = [1, 1]} : vector<2x512xf32> to vector<2x128xf32>
    %195 = vector.extract_strided_slice %190 {offsets = [0, 384], sizes = [2, 128], strides = [1, 1]} : vector<2x512xf32> to vector<2x128xf32>
    %196 = arith.maximumf %194, %195 : vector<2x128xf32>
    %197 = arith.maximumf %193, %196 : vector<2x128xf32>
    %198 = vector.broadcast %1 : vector<1x128xf32> to vector<2x128xf32>
    %199 = arith.addf %197, %198 : vector<2x128xf32>
    %cst_70 = arith.constant 0.000000e+00 : f32
    %200 = vector.broadcast %cst_70 : f32 to vector<2x128xf32>
    %201 = arith.maximumf %199, %200 : vector<2x128xf32>
    %202 = vector.broadcast %2 : vector<1x128xf32> to vector<2x128xf32>
    %203 = arith.mulf %201, %202 : vector<2x128xf32>
    %204 = vector.broadcast %3 : vector<1x128xf32> to vector<2x128xf32>
    %205 = arith.addf %203, %204 : vector<2x128xf32>
    %c0_71 = arith.constant 0 : index
    %c1152 = arith.constant 1152 : index
    %206 = vector.load %arg8[%c0_71, %c1152] : memref<2x1536xf32, #tpu.memory_space<vmem>>, vector<2x128xf32>
    tpu.vector_store %arg8[%c0_71, %c1152], %205 {strides = array<i32>} : memref<2x1536xf32, #tpu.memory_space<vmem>>, vector<2x128xf32>,
    %c10 = arith.constant 10 : index
    %c0_72 = arith.constant 0 : index
    %c0_73 = arith.constant 0 : index
    %207 = vector.load %arg1[%c10, %c0_72, %c0_73] : memref<12x2x168xf32, #tpu.memory_space<vmem>>, vector<1x2x168xf32>
    %208 = vector.shape_cast %207 : vector<1x2x168xf32> to vector<2x168xf32>
    %c0_74 = arith.constant 0 : index
    %c0_75 = arith.constant 0 : index
    %209 = vector.load %arg2[%c0_74, %c0_75] : memref<168x512xf32, #tpu.memory_space<vmem>>, vector<168x512xf32>
    %cst_76 = arith.constant dense<0.000000e+00> : vector<2x512xf32>
    %210 = tpu.matmul %208, %209, %cst_76 {dimension_numbers = #tpu.dot_dimension_numbers<[1], [0], [0], [1], [0, 0, 1, 1], [], []>} : vector<2x168xf32>, vector<168x512xf32>, vector<2x512xf32> -> vector<2x512xf32>
    %211 = vector.extract_strided_slice %210 {offsets = [0, 0], sizes = [2, 128], strides = [1, 1]} : vector<2x512xf32> to vector<2x128xf32>
    %212 = vector.extract_strided_slice %210 {offsets = [0, 128], sizes = [2, 128], strides = [1, 1]} : vector<2x512xf32> to vector<2x128xf32>
    %213 = arith.maximumf %211, %212 : vector<2x128xf32>
    %214 = vector.extract_strided_slice %210 {offsets = [0, 256], sizes = [2, 128], strides = [1, 1]} : vector<2x512xf32> to vector<2x128xf32>
    %215 = vector.extract_strided_slice %210 {offsets = [0, 384], sizes = [2, 128], strides = [1, 1]} : vector<2x512xf32> to vector<2x128xf32>
    %216 = arith.maximumf %214, %215 : vector<2x128xf32>
    %217 = arith.maximumf %213, %216 : vector<2x128xf32>
    %218 = vector.broadcast %1 : vector<1x128xf32> to vector<2x128xf32>
    %219 = arith.addf %217, %218 : vector<2x128xf32>
    %cst_77 = arith.constant 0.000000e+00 : f32
    %220 = vector.broadcast %cst_77 : f32 to vector<2x128xf32>
    %221 = arith.maximumf %219, %220 : vector<2x128xf32>
    %222 = vector.broadcast %2 : vector<1x128xf32> to vector<2x128xf32>
    %223 = arith.mulf %221, %222 : vector<2x128xf32>
    %224 = vector.broadcast %3 : vector<1x128xf32> to vector<2x128xf32>
    %225 = arith.addf %223, %224 : vector<2x128xf32>
    %c0_78 = arith.constant 0 : index
    %c1280 = arith.constant 1280 : index
    %226 = vector.load %arg8[%c0_78, %c1280] : memref<2x1536xf32, #tpu.memory_space<vmem>>, vector<2x128xf32>
    tpu.vector_store %arg8[%c0_78, %c1280], %225 {strides = array<i32>} : memref<2x1536xf32, #tpu.memory_space<vmem>>, vector<2x128xf32>,
    %c11 = arith.constant 11 : index
    %c0_79 = arith.constant 0 : index
    %c0_80 = arith.constant 0 : index
    %227 = vector.load %arg1[%c11, %c0_79, %c0_80] : memref<12x2x168xf32, #tpu.memory_space<vmem>>, vector<1x2x168xf32>
    %228 = vector.shape_cast %227 : vector<1x2x168xf32> to vector<2x168xf32>
    %c0_81 = arith.constant 0 : index
    %c0_82 = arith.constant 0 : index
    %229 = vector.load %arg2[%c0_81, %c0_82] : memref<168x512xf32, #tpu.memory_space<vmem>>, vector<168x512xf32>
    %cst_83 = arith.constant dense<0.000000e+00> : vector<2x512xf32>
    %230 = tpu.matmul %228, %229, %cst_83 {dimension_numbers = #tpu.dot_dimension_numbers<[1], [0], [0], [1], [0, 0, 1, 1], [], []>} : vector<2x168xf32>, vector<168x512xf32>, vector<2x512xf32> -> vector<2x512xf32>
    %231 = vector.extract_strided_slice %230 {offsets = [0, 0], sizes = [2, 128], strides = [1, 1]} : vector<2x512xf32> to vector<2x128xf32>
    %232 = vector.extract_strided_slice %230 {offsets = [0, 128], sizes = [2, 128], strides = [1, 1]} : vector<2x512xf32> to vector<2x128xf32>
    %233 = arith.maximumf %231, %232 : vector<2x128xf32>
    %234 = vector.extract_strided_slice %230 {offsets = [0, 256], sizes = [2, 128], strides = [1, 1]} : vector<2x512xf32> to vector<2x128xf32>
    %235 = vector.extract_strided_slice %230 {offsets = [0, 384], sizes = [2, 128], strides = [1, 1]} : vector<2x512xf32> to vector<2x128xf32>
    %236 = arith.maximumf %234, %235 : vector<2x128xf32>
    %237 = arith.maximumf %233, %236 : vector<2x128xf32>
    %238 = vector.broadcast %1 : vector<1x128xf32> to vector<2x128xf32>
    %239 = arith.addf %237, %238 : vector<2x128xf32>
    %cst_84 = arith.constant 0.000000e+00 : f32
    %240 = vector.broadcast %cst_84 : f32 to vector<2x128xf32>
    %241 = arith.maximumf %239, %240 : vector<2x128xf32>
    %242 = vector.broadcast %2 : vector<1x128xf32> to vector<2x128xf32>
    %243 = arith.mulf %241, %242 : vector<2x128xf32>
    %244 = vector.broadcast %3 : vector<1x128xf32> to vector<2x128xf32>
    %245 = arith.addf %243, %244 : vector<2x128xf32>
    %c0_85 = arith.constant 0 : index
    %c1408 = arith.constant 1408 : index
    %246 = vector.load %arg8[%c0_85, %c1408] : memref<2x1536xf32, #tpu.memory_space<vmem>>, vector<2x128xf32>
    tpu.vector_store %arg8[%c0_85, %c1408], %245 {strides = array<i32>} : memref<2x1536xf32, #tpu.memory_space<vmem>>, vector<2x128xf32>,
    %c0_86 = arith.constant 0 : index
    %c0_87 = arith.constant 0 : index
    %247 = vector.load %arg8[%c0_86, %c0_87] : memref<2x1536xf32, #tpu.memory_space<vmem>>, vector<2x768xf32>
    %c0_88 = arith.constant 0 : index
    %c0_89 = arith.constant 0 : index
    %248 = vector.load %arg3[%c0_88, %c0_89] : memref<768x512xf32, #tpu.memory_space<vmem>>, vector<768x512xf32>
    %cst_90 = arith.constant dense<0.000000e+00> : vector<2x512xf32>
    %249 = tpu.matmul %247, %248, %cst_90 {dimension_numbers = #tpu.dot_dimension_numbers<[1], [0], [0], [1], [0, 0, 1, 1], [], []>} : vector<2x768xf32>, vector<768x512xf32>, vector<2x512xf32> -> vector<2x512xf32>
    %250 = vector.extract_strided_slice %249 {offsets = [0, 0], sizes = [2, 128], strides = [1, 1]} : vector<2x512xf32> to vector<2x128xf32>
    %251 = vector.extract_strided_slice %249 {offsets = [0, 128], sizes = [2, 128], strides = [1, 1]} : vector<2x512xf32> to vector<2x128xf32>
    %252 = arith.maximumf %250, %251 : vector<2x128xf32>
    %253 = vector.extract_strided_slice %249 {offsets = [0, 256], sizes = [2, 128], strides = [1, 1]} : vector<2x512xf32> to vector<2x128xf32>
    %254 = vector.extract_strided_slice %249 {offsets = [0, 384], sizes = [2, 128], strides = [1, 1]} : vector<2x512xf32> to vector<2x128xf32>
    %255 = arith.maximumf %253, %254 : vector<2x128xf32>
    %256 = arith.maximumf %252, %255 : vector<2x128xf32>
    %257 = vector.broadcast %4 : vector<1x128xf32> to vector<2x128xf32>
    %258 = arith.addf %256, %257 : vector<2x128xf32>
    %cst_91 = arith.constant 0.000000e+00 : f32
    %259 = vector.broadcast %cst_91 : f32 to vector<2x128xf32>
    %260 = arith.maximumf %258, %259 : vector<2x128xf32>
    %c0_92 = arith.constant 0 : index
    %c0_93 = arith.constant 0 : index
    %261 = vector.load %arg9[%c0_92, %c0_93] : memref<2x512xf32, #tpu.memory_space<vmem>>, vector<2x128xf32>
    tpu.vector_store %arg9[%c0_92, %c0_93], %260 {strides = array<i32>} : memref<2x512xf32, #tpu.memory_space<vmem>>, vector<2x128xf32>,
    %c0_94 = arith.constant 0 : index
    %c256_95 = arith.constant 256 : index
    %262 = vector.load %arg8[%c0_94, %c256_95] : memref<2x1536xf32, #tpu.memory_space<vmem>>, vector<2x768xf32>
    %c0_96 = arith.constant 0 : index
    %c0_97 = arith.constant 0 : index
    %263 = vector.load %arg3[%c0_96, %c0_97] : memref<768x512xf32, #tpu.memory_space<vmem>>, vector<768x512xf32>
    %cst_98 = arith.constant dense<0.000000e+00> : vector<2x512xf32>
    %264 = tpu.matmul %262, %263, %cst_98 {dimension_numbers = #tpu.dot_dimension_numbers<[1], [0], [0], [1], [0, 0, 1, 1], [], []>} : vector<2x768xf32>, vector<768x512xf32>, vector<2x512xf32> -> vector<2x512xf32>
    %265 = vector.extract_strided_slice %264 {offsets = [0, 0], sizes = [2, 128], strides = [1, 1]} : vector<2x512xf32> to vector<2x128xf32>
    %266 = vector.extract_strided_slice %264 {offsets = [0, 128], sizes = [2, 128], strides = [1, 1]} : vector<2x512xf32> to vector<2x128xf32>
    %267 = arith.maximumf %265, %266 : vector<2x128xf32>
    %268 = vector.extract_strided_slice %264 {offsets = [0, 256], sizes = [2, 128], strides = [1, 1]} : vector<2x512xf32> to vector<2x128xf32>
    %269 = vector.extract_strided_slice %264 {offsets = [0, 384], sizes = [2, 128], strides = [1, 1]} : vector<2x512xf32> to vector<2x128xf32>
    %270 = arith.maximumf %268, %269 : vector<2x128xf32>
    %271 = arith.maximumf %267, %270 : vector<2x128xf32>
    %272 = vector.broadcast %4 : vector<1x128xf32> to vector<2x128xf32>
    %273 = arith.addf %271, %272 : vector<2x128xf32>
    %cst_99 = arith.constant 0.000000e+00 : f32
    %274 = vector.broadcast %cst_99 : f32 to vector<2x128xf32>
    %275 = arith.maximumf %273, %274 : vector<2x128xf32>
    %c0_100 = arith.constant 0 : index
    %c128_101 = arith.constant 128 : index
    %276 = vector.load %arg9[%c0_100, %c128_101] : memref<2x512xf32, #tpu.memory_space<vmem>>, vector<2x128xf32>
    tpu.vector_store %arg9[%c0_100, %c128_101], %275 {strides = array<i32>} : memref<2x512xf32, #tpu.memory_space<vmem>>, vector<2x128xf32>,
    %c0_102 = arith.constant 0 : index
    %c512_103 = arith.constant 512 : index
    %277 = vector.load %arg8[%c0_102, %c512_103] : memref<2x1536xf32, #tpu.memory_space<vmem>>, vector<2x768xf32>
    %c0_104 = arith.constant 0 : index
    %c0_105 = arith.constant 0 : index
    %278 = vector.load %arg3[%c0_104, %c0_105] : memref<768x512xf32, #tpu.memory_space<vmem>>, vector<768x512xf32>
    %cst_106 = arith.constant dense<0.000000e+00> : vector<2x512xf32>
    %279 = tpu.matmul %277, %278, %cst_106 {dimension_numbers = #tpu.dot_dimension_numbers<[1], [0], [0], [1], [0, 0, 1, 1], [], []>} : vector<2x768xf32>, vector<768x512xf32>, vector<2x512xf32> -> vector<2x512xf32>
    %280 = vector.extract_strided_slice %279 {offsets = [0, 0], sizes = [2, 128], strides = [1, 1]} : vector<2x512xf32> to vector<2x128xf32>
    %281 = vector.extract_strided_slice %279 {offsets = [0, 128], sizes = [2, 128], strides = [1, 1]} : vector<2x512xf32> to vector<2x128xf32>
    %282 = arith.maximumf %280, %281 : vector<2x128xf32>
    %283 = vector.extract_strided_slice %279 {offsets = [0, 256], sizes = [2, 128], strides = [1, 1]} : vector<2x512xf32> to vector<2x128xf32>
    %284 = vector.extract_strided_slice %279 {offsets = [0, 384], sizes = [2, 128], strides = [1, 1]} : vector<2x512xf32> to vector<2x128xf32>
    %285 = arith.maximumf %283, %284 : vector<2x128xf32>
    %286 = arith.maximumf %282, %285 : vector<2x128xf32>
    %287 = vector.broadcast %4 : vector<1x128xf32> to vector<2x128xf32>
    %288 = arith.addf %286, %287 : vector<2x128xf32>
    %cst_107 = arith.constant 0.000000e+00 : f32
    %289 = vector.broadcast %cst_107 : f32 to vector<2x128xf32>
    %290 = arith.maximumf %288, %289 : vector<2x128xf32>
    %c0_108 = arith.constant 0 : index
    %c256_109 = arith.constant 256 : index
    %291 = vector.load %arg9[%c0_108, %c256_109] : memref<2x512xf32, #tpu.memory_space<vmem>>, vector<2x128xf32>
    tpu.vector_store %arg9[%c0_108, %c256_109], %290 {strides = array<i32>} : memref<2x512xf32, #tpu.memory_space<vmem>>, vector<2x128xf32>,
    %c0_110 = arith.constant 0 : index
    %c768_111 = arith.constant 768 : index
    %292 = vector.load %arg8[%c0_110, %c768_111] : memref<2x1536xf32, #tpu.memory_space<vmem>>, vector<2x768xf32>
    %c0_112 = arith.constant 0 : index
    %c0_113 = arith.constant 0 : index
    %293 = vector.load %arg3[%c0_112, %c0_113] : memref<768x512xf32, #tpu.memory_space<vmem>>, vector<768x512xf32>
    %cst_114 = arith.constant dense<0.000000e+00> : vector<2x512xf32>
    %294 = tpu.matmul %292, %293, %cst_114 {dimension_numbers = #tpu.dot_dimension_numbers<[1], [0], [0], [1], [0, 0, 1, 1], [], []>} : vector<2x768xf32>, vector<768x512xf32>, vector<2x512xf32> -> vector<2x512xf32>
    %295 = vector.extract_strided_slice %294 {offsets = [0, 0], sizes = [2, 128], strides = [1, 1]} : vector<2x512xf32> to vector<2x128xf32>
    %296 = vector.extract_strided_slice %294 {offsets = [0, 128], sizes = [2, 128], strides = [1, 1]} : vector<2x512xf32> to vector<2x128xf32>
    %297 = arith.maximumf %295, %296 : vector<2x128xf32>
    %298 = vector.extract_strided_slice %294 {offsets = [0, 256], sizes = [2, 128], strides = [1, 1]} : vector<2x512xf32> to vector<2x128xf32>
    %299 = vector.extract_strided_slice %294 {offsets = [0, 384], sizes = [2, 128], strides = [1, 1]} : vector<2x512xf32> to vector<2x128xf32>
    %300 = arith.maximumf %298, %299 : vector<2x128xf32>
    %301 = arith.maximumf %297, %300 : vector<2x128xf32>
    %302 = vector.broadcast %4 : vector<1x128xf32> to vector<2x128xf32>
    %303 = arith.addf %301, %302 : vector<2x128xf32>
    %cst_115 = arith.constant 0.000000e+00 : f32
    %304 = vector.broadcast %cst_115 : f32 to vector<2x128xf32>
    %305 = arith.maximumf %303, %304 : vector<2x128xf32>
    %c0_116 = arith.constant 0 : index
    %c384_117 = arith.constant 384 : index
    %306 = vector.load %arg9[%c0_116, %c384_117] : memref<2x512xf32, #tpu.memory_space<vmem>>, vector<2x128xf32>
    tpu.vector_store %arg9[%c0_116, %c384_117], %305 {strides = array<i32>} : memref<2x512xf32, #tpu.memory_space<vmem>>, vector<2x128xf32>,
    %c0_118 = arith.constant 0 : index
    %c0_119 = arith.constant 0 : index
    %307 = vector.load %arg9[%c0_118, %c0_119] : memref<2x512xf32, #tpu.memory_space<vmem>>, vector<2x512xf32>
    %c0_120 = arith.constant 0 : index
    %c0_121 = arith.constant 0 : index
    %308 = vector.load %arg4[%c0_120, %c0_121] : memref<512x64xf32, #tpu.memory_space<vmem>>, vector<512x64xf32>
    %cst_122 = arith.constant dense<0.000000e+00> : vector<2x64xf32>
    %309 = tpu.matmul %307, %308, %cst_122 {dimension_numbers = #tpu.dot_dimension_numbers<[1], [0], [0], [1], [0, 0, 1, 1], [], []>} : vector<2x512xf32>, vector<512x64xf32>, vector<2x64xf32> -> vector<2x64xf32>
    %310 = vector.broadcast %5 : vector<1x64xf32> to vector<2x64xf32>
    %311 = arith.addf %309, %310 : vector<2x64xf32>
    %cst_123 = arith.constant 0.000000e+00 : f32
    %312 = vector.broadcast %cst_123 : f32 to vector<2x64xf32>
    %313 = arith.maximumf %311, %312 : vector<2x64xf32>
    %c0_124 = arith.constant 0 : index
    %c0_125 = arith.constant 0 : index
    %314 = vector.load %arg5[%c0_124, %c0_125] : memref<64x10xf32, #tpu.memory_space<vmem>>, vector<64x10xf32>
    %cst_126 = arith.constant dense<0.000000e+00> : vector<2x10xf32>
    %315 = tpu.matmul %313, %314, %cst_126 {dimension_numbers = #tpu.dot_dimension_numbers<[1], [0], [0], [1], [0, 0, 1, 1], [], []>} : vector<2x64xf32>, vector<64x10xf32>, vector<2x10xf32> -> vector<2x10xf32>
    %316 = vector.broadcast %6 : vector<1x10xf32> to vector<2x10xf32>
    %317 = arith.addf %315, %316 : vector<2x10xf32>
    %cst_127 = arith.constant dense<0xFF800000> : vector<2xf32>
    %318 = vector.multi_reduction <maximumf>, %317, %cst_127 [1] : vector<2x10xf32> to vector<2xf32>
    %319 = vector.shape_cast %318 : vector<2xf32> to vector<2x1xf32>
    %320 = vector.broadcast %319 : vector<2x1xf32> to vector<2x10xf32>
    %321 = arith.subf %317, %320 : vector<2x10xf32>
    %322 = math.exp %321 : vector<2x10xf32>
    %cst_128 = arith.constant dense<0.000000e+00> : vector<2xf32>
    %323 = vector.multi_reduction <add>, %322, %cst_128 [1] : vector<2x10xf32> to vector<2xf32>
    %324 = vector.shape_cast %323 : vector<2xf32> to vector<2x1xf32>
    %325 = math.log %324 : vector<2x1xf32>
    %326 = vector.broadcast %319 : vector<2x1xf32> to vector<2x10xf32>
    %327 = arith.subf %317, %326 : vector<2x10xf32>
    %328 = vector.broadcast %325 : vector<2x1xf32> to vector<2x10xf32>
    %329 = arith.subf %327, %328 : vector<2x10xf32>
    %c0_129 = arith.constant 0 : index
    %c0_130 = arith.constant 0 : index
    %330 = vector.load %arg7[%c0_129, %c0_130] : memref<2x10xf32, #tpu.memory_space<vmem>>, vector<2x10xf32>
    tpu.vector_store %arg7[%c0_129, %c0_130], %329 {strides = array<i32>} : memref<2x10xf32, #tpu.memory_space<vmem>>, vector<2x10xf32>,
    return
  }
  func.func @transform_0(%arg0: i32) -> (i32, i32, i32) {
    %c0_i32 = arith.constant 0 : i32
    %c0_i32_0 = arith.constant 0 : i32
    %c0_i32_1 = arith.constant 0 : i32
    return %c0_i32, %arg0, %c0_i32_0 : i32, i32, i32
  }
  func.func @transform_1(%arg0: i32) -> (i32, i32) {
    %c0_i32 = arith.constant 0 : i32
    %c0_i32_0 = arith.constant 0 : i32
    %c0_i32_1 = arith.constant 0 : i32
    return %c0_i32, %c0_i32_0 : i32, i32
  }
  func.func @transform_2(%arg0: i32) -> (i32, i32) {
    %c0_i32 = arith.constant 0 : i32
    %c0_i32_0 = arith.constant 0 : i32
    %c0_i32_1 = arith.constant 0 : i32
    return %c0_i32, %c0_i32_0 : i32, i32
  }
  func.func @transform_3(%arg0: i32) -> (i32, i32) {
    %c0_i32 = arith.constant 0 : i32
    %c0_i32_0 = arith.constant 0 : i32
    %c0_i32_1 = arith.constant 0 : i32
    return %c0_i32, %c0_i32_0 : i32, i32
  }
  func.func @transform_4(%arg0: i32) -> (i32, i32) {
    %c0_i32 = arith.constant 0 : i32
    %c0_i32_0 = arith.constant 0 : i32
    %c0_i32_1 = arith.constant 0 : i32
    return %c0_i32, %c0_i32_0 : i32, i32
  }
  func.func @transform_5(%arg0: i32) -> (i32, i32) {
    %c0_i32 = arith.constant 0 : i32
    %c0_i32_0 = arith.constant 0 : i32
    %c0_i32_1 = arith.constant 0 : i32
    return %c0_i32, %c0_i32_0 : i32, i32
  }
  func.func @transform_6(%arg0: i32) -> (i32, i32) {
    %c0_i32 = arith.constant 0 : i32
    %c0_i32_0 = arith.constant 0 : i32
    return %arg0, %c0_i32 : i32, i32
  }
}

</mosaic_0001>

<bundles_post_ra>
// kernel: net_forward.1
= control target key start
LH: loop header
LB: loop body
LE: loop exit
PB: predicated region body
PF: predicated region fallthrough
CT: control target
= control target key end

     0   :  { %11 = vsyncpa [#allocation5], 0  ;;  %s11151_s0 = inlined_call_operand.vmem [shape: f32[12,2,168], index: 0, kind: input, shape index: {}]   ;;  %s11152_s1 = inlined_call_operand.hbm [shape: f32[168,512], index: 1, kind: input, shape index: {}]   ;;  %s11153_s2 = inlined_call_operand.hbm [shape: f32[768,512], index: 2, kind: input, shape index: {}]   ;;  %s11154_s3 = inlined_call_operand.vmem [shape: f32[512,64], index: 3, kind: input, shape index: {}]   ;;  %s11155_s4 = inlined_call_operand.vmem [shape: f32[64,10], index: 4, kind: input, shape index: {}]   ;;  %s11156_s5 = inlined_call_operand.hbm [shape: f32[6,128], index: 5, kind: input, shape index: {}]   ;;  %s11157_s6 = inlined_call_operand.hbm [shape: f32[2,10], index: 6, kind: output, shape index: {}]  }
   0x1   :  { %12 = vsyncpa [#allocation8], 0 }
   0x2   :  { %13 = vsyncpa [#allocation6], 0  ;;  %s9677_s21 = smov [#allocation7]   ;;  %s9678_s23 = smov [#allocation4]  }
   0x3   :  { %s33_s22 = sshll.u32 %s9677_s21, 4  ;;  %s21_s24 = sshll.u32 %s9678_s23, 4  ;;  %s34_s22 = int_to_ptr.vmem [resolvable:$true] %s33_s22  ;;  %s9722_s24 = int_to_ptr.vmem [resolvable:$true] %s21_s24 }
   0x4   :  { %s9583_s27 = scalar_lea.hbm %s11153_s2, 49152 }
   0x5   :  { %p9584_p0 = scmp.ne.s32.totalorder %s11153_s2, %s9583_s27  ;;  %p9587_p1 = scmp.lt.u32.totalorder %s9583_s27, %s11153_s2 }
   0x7   :  { %p9589_p2 = pnand %p9587_p1, %p9584_p0 }
   0x9   :  { %9592 = shalt.err (!%p9589_p2)
}
   0xa   :  { %s9593_s8 = scalar_lea.vmem %s34_s22, 49152  ;;  %p9598_p4 = scmp.lt.s32.totalorder %s34_s22, %s34_s22 }
   0xb   :  { %p9594_p3 = scmp.ne.s32.totalorder %s34_s22, %s9593_s8  ;;  %p9599_p5 = scmp.lt.s32.totalorder %s9593_s8, %s9593_s8 }
   0xd   :  { %p9600_p6 = por %p9599_p5, %p9598_p4 }
   0xf   :  { %p9601_p7 = pnand %p9600_p6, %p9594_p3 }
  0x11   :  { %9604 = shalt.err (!%p9601_p7)
}
  0x12   :  { %s9679_s9 = smov 512   ;;  %s9680_s10 = smov 32  }
  0x13   :  { %39 = dma.hbm_to_vmem [thread:$0]  %s11153_s2, 49152, %s34_s22, [#allocation8], %s9679_s9, %s9679_s9, %s9680_s10  }
  0x14   :  { %s9605_s15 = scalar_lea.hbm %s11152_s1, 10752 }
  0x15   :  { %p9606_p8 = scmp.ne.s32.totalorder %s11152_s1, %s9605_s15  ;;  %p9609_p9 = scmp.lt.u32.totalorder %s9605_s15, %s11152_s1 }
  0x17   :  { %p9611_p10 = pnand %p9609_p9, %p9606_p8 }
  0x19   :  { %9614 = shalt.err (!%p9611_p10)
}
  0x1a   :  { %s9615_s20 = scalar_lea.vmem %s9722_s24, 10752  ;;  %p9620_p12 = scmp.lt.s32.totalorder %s9722_s24, %s9722_s24 }
  0x1b   :  { %p9616_p11 = scmp.ne.s32.totalorder %s9722_s24, %s9615_s20  ;;  %p9621_p13 = scmp.lt.s32.totalorder %s9615_s20, %s9615_s20 }
  0x1d   :  { %p9622_p0 = por %p9621_p13, %p9620_p12 }
  0x1f   :  { %p9623_p1 = pnand %p9622_p0, %p9616_p11 }
  0x21   :  { %9626 = shalt.err (!%p9623_p1)
}
  0x22   :  { %27 = dma.hbm_to_vmem [thread:$0]  %s11152_s1, 10752, %s9722_s24, [#allocation5], %s9679_s9, %s9679_s9, %s9680_s10  }
  0x23   :  { %s9681_s22 = smov [#allocation9]   ;;  %s9627_s27 = scalar_lea.hbm %s11156_s5, 128 }
  0x24   :  { %s50_s23 = sshll.u32 %s9681_s22, 4  ;;  %p9628_p2 = scmp.ne.s32.totalorder %s11156_s5, %s9627_s27  ;;  %s51_s23 = int_to_ptr.vmem [resolvable:$true] %s50_s23 }
  0x25   :  { %p9631_p3 = scmp.lt.u32.totalorder %s9627_s27, %s11156_s5 }
  0x27   :  { %p9633_p4 = pnand %p9631_p3, %p9628_p2 }
  0x29   :  { %9636 = shalt.err (!%p9633_p4)
}
  0x2a   :  { %s9637_s8 = scalar_lea.vmem %s51_s23, 128  ;;  %p9642_p6 = scmp.lt.s32.totalorder %s51_s23, %s51_s23 }
  0x2b   :  { %p9638_p5 = scmp.ne.s32.totalorder %s51_s23, %s9637_s8  ;;  %p9643_p7 = scmp.lt.s32.totalorder %s9637_s8, %s9637_s8 }
  0x2d   :  { %p9644_p8 = por %p9643_p7, %p9642_p6 }
  0x2f   :  { %p9645_p9 = pnand %p9644_p8, %p9638_p5 }
  0x31   :  { %9648 = shalt.err (!%p9645_p9)
}
  0x32   :  { %53 = dma.hbm_to_vmem [thread:$0]  %s11156_s5, 128, %s51_s23, [#allocation8]  }
  0x33   :  { %9671 = dma.done.wait [#allocation5], 10752  }
  0x34   :  { %9672 = vsyncadd [#allocation5], 4294956544 }
  0x35   :  { %9673 = dma.done.wait [#allocation8], 49280  }
  0x36   :  { %9674 = vsyncadd [#allocation8], 4294918016  ;;  %v66_v0 = vld [vmem:[#allocation4 + $0x8] sm:$0xff]  ;;  %v68_v2 = vld [vmem:[#allocation4 + $0x18] sm:$0xff]  ;;  %vm159_vm0 = vcmask 326656   ;;  %vm9684_vm1 = vmmov 0  }
  0x37   :  { %v70_v1 = vld [vmem:[#allocation4 + $0x28] sm:$0xff]  ;;  %v72_v4 = vld [vmem:[#allocation4 + $0x38] sm:$0xff]  ;;  %v65_v5 = vld [vmem:[#allocation4] sm:$0xff]  ;;  %vm6704_vm2 = vcmask 523264   ;;  %vm6778_vm3 = vcmask 74752  }
  0x38   :  { %v9765_v3 = vpack.c.bf16 %v70_v1, %v66_v0  ;;  %v69_v6 = vld [vmem:[#allocation4 + $0x20] sm:$0xff]  ;;  %v9767_v7 = vpack.c.bf16 %v72_v4, %v68_v2  ;;  %v67_v9 = vld [vmem:[#allocation4 + $0x10] sm:$0xff]  ;;  %v74_v11 = vld [vmem:[#allocation4 + $0x48] sm:$0xff] }
  0x39   :  { %v9769_v8 = vpack.c.bf16 %v69_v6, %v65_v5  ;;  %v71_v10 = vld [vmem:[#allocation4 + $0x30] sm:$0xff]  ;;  %v78_v13 = vld [vmem:[#allocation4 + $0x68] sm:$0xff]  ;;  %v76_v14 = vld [vmem:[#allocation4 + $0x58] sm:$0xff] }
  0x3a   :  { %6959 = vmatprep.subr.bf16.mxu0 %v9765_v3  ;;  %v9772_v12 = vpack.c.bf16 %v71_v10, %v67_v9  ;;  %v80_v15 = vld [vmem:[#allocation4 + $0x78] sm:$0xff]  ;;  %6999 = vmatprep.subr.bf16.mxu1 %v9767_v7  ;;  %v9776_v16 = vpack.c.bf16 %v78_v13, %v74_v11  ;;  %v73_v18 = vld [vmem:[#allocation4 + $0x40] sm:$0xff]  ;;  %v75_v20 = vld [vmem:[#allocation4 + $0x50] sm:$0xff] }
  0x3b   :  { %6961 = vmatpush1.bf16.msra.mxu0 %v9769_v8  ;;  %v9778_v17 = vpack.c.bf16 %v80_v15, %v76_v14  ;;  %v77_v19 = vld [vmem:[#allocation4 + $0x60] sm:$0xff]  ;;  %v79_v22 = vld [vmem:[#allocation4 + $0x70] sm:$0xff]  ;;  %v82_v23 = vld [vmem:[#allocation4 + $0x88] sm:$0xff] }
  0x3c   :  { %7001 = vmatpush1.bf16.msra.mxu1 %v9772_v12  ;;  %v9781_v21 = vpack.c.bf16 %v77_v19, %v73_v18  ;;  %v86_v24 = vld [vmem:[#allocation4 + $0xa8] sm:$0xff]  ;;  %6963 = vmatprep.subr.bf16.mxu0 %v9776_v16  ;;  %v9785_v25 = vpack.c.bf16 %v79_v22, %v75_v20  ;;  %v84_v27 = vld [vmem:[#allocation4 + $0x98] sm:$0xff]  ;;  %v81_v29 = vld [vmem:[#allocation4 + $0x80] sm:$0xff] }
  0x3d   :  { %7003 = vmatprep.subr.bf16.mxu1 %v9778_v17  ;;  %v9787_v26 = vpack.c.bf16 %v86_v24, %v82_v23  ;;  %v88_v28 = vld [vmem:[#allocation4 + $0xb8] sm:$0xff]  ;;  %v85_v31 = vld [vmem:[#allocation4 + $0xa0] sm:$0xff]  ;;  %v83_v32 = vld [vmem:[#allocation4 + $0x90] sm:$0xff] }
  0x3e   :  { %v9789_v30 = vpack.c.bf16 %v88_v28, %v84_v27  ;;  %v87_v33 = vld [vmem:[#allocation4 + $0xb0] sm:$0xff]  ;;  %v9792_v34 = vpack.c.bf16 %v85_v31, %v81_v29  ;;  %v90_v35 = vld [vmem:[#allocation4 + $0xc8] sm:$0xff]  ;;  %v92_v37 = vld [vmem:[#allocation4 + $0xd8] sm:$0xff] }
  0x3f   :  { %6965 = vmatpush1.bf16.msra.mxu0 %v9781_v21  ;;  %v94_v36 = vld [vmem:[#allocation4 + $0xe8] sm:$0xff]  ;;  %v9796_v38 = vpack.c.bf16 %v87_v33, %v83_v32  ;;  %v96_v40 = vld [vmem:[#allocation4 + $0xf8] sm:$0xff]  ;;  %v89_v41 = vld [vmem:[#allocation4 + $0xc0] sm:$0xff] }
  0x40   :  { %7005 = vmatpush1.bf16.msra.mxu1 %v9785_v25  ;;  %6967 = vmatprep.subr.bf16.mxu0 %v9787_v26  ;;  %v9798_v39 = vpack.c.bf16 %v94_v36, %v90_v35  ;;  %v93_v42 = vld [vmem:[#allocation4 + $0xe0] sm:$0xff]  ;;  %v9801_v43 = vpack.c.bf16 %v96_v40, %v92_v37  ;;  %v91_v44 = vld [vmem:[#allocation4 + $0xd0] sm:$0xff]  ;;  %v98_v46 = vld [vmem:[#allocation4 + $0x108] sm:$0xff] }
  0x41   :  { %7007 = vmatprep.subr.bf16.mxu1 %v9789_v30  ;;  %v95_v45 = vld [vmem:[#allocation4 + $0xf0] sm:$0xff]  ;;  %v102_v47 = vld [vmem:[#allocation4 + $0x128] sm:$0xff]  ;;  %v100_v48 = vld [vmem:[#allocation4 + $0x118] sm:$0xff]  ;;  %v9804_v50 = vpack.c.bf16 %v93_v42, %v89_v41 }
  0x42   :  { %v104_v49 = vld [vmem:[#allocation4 + $0x138] sm:$0xff]  ;;  %v9808_v51 = vpack.c.bf16 %v95_v45, %v91_v44  ;;  %v9810_v52 = vpack.c.bf16 %v102_v47, %v98_v46  ;;  %v97_v53 = vld [vmem:[#allocation4 + $0x100] sm:$0xff]  ;;  %v99_v55 = vld [vmem:[#allocation4 + $0x110] sm:$0xff] }
  0x43   :  { %6969 = vmatpush1.bf16.msra.mxu0 %v9792_v34  ;;  %v101_v54 = vld [vmem:[#allocation4 + $0x120] sm:$0xff]  ;;  %v9813_v56 = vpack.c.bf16 %v104_v49, %v100_v48  ;;  %v103_v57 = vld [vmem:[#allocation4 + $0x130] sm:$0xff]  ;;  %v106_v58 = vld [vmem:[#allocation4 + $0x148] sm:$0xff] }
  0x44   :  { %7009 = vmatpush1.bf16.msra.mxu1 %v9796_v38  ;;  %6971 = vmatprep.subr.bf16.mxu0 %v9798_v39  ;;  %v110_v59 = vld [vmem:[#allocation4 + $0x168] sm:$0xff]  ;;  %v108_v60 = vld [vmem:[#allocation4 + $0x158] sm:$0xff]  ;;  %v9816_v62 = vpack.c.bf16 %v101_v54, %v97_v53  ;;  %v9820_v63 = vpack.c.bf16 %v103_v57, %v99_v55  ;;  %v105_v1 = vld [vmem:[#allocation4 + $0x140] sm:$0xff] }
  0x45   :  { %7011 = vmatprep.subr.bf16.mxu1 %v9801_v43  ;;  %v112_v61 = vld [vmem:[#allocation4 + $0x178] sm:$0xff]  ;;  %v9822_v0 = vpack.c.bf16 %v110_v59, %v106_v58  ;;  %v109_v2 = vld [vmem:[#allocation4 + $0x160] sm:$0xff]  ;;  %v107_v4 = vld [vmem:[#allocation4 + $0x150] sm:$0xff] }
  0x46   :  { %v9825_v5 = vpack.c.bf16 %v112_v61, %v108_v60  ;;  %v111_v6 = vld [vmem:[#allocation4 + $0x170] sm:$0xff]  ;;  %v114_v9 = vld [vmem:[#allocation4 + $0x188] sm:$0xff]  ;;  %v116_v11 = vld [vmem:[#allocation4 + $0x198] sm:$0xff]  ;;  %v9828_v14 = vpack.c.bf16 %v109_v2, %v105_v1 }
  0x47   :  { %6973 = vmatpush1.bf16.msra.mxu0 %v9804_v50  ;;  %v118_v10 = vld [vmem:[#allocation4 + $0x1a8] sm:$0xff]  ;;  %v120_v13 = vld [vmem:[#allocation4 + $0x1b8] sm:$0xff]  ;;  %v9832_v15 = vpack.c.bf16 %v111_v6, %v107_v4  ;;  %v113_v19 = vld [vmem:[#allocation4 + $0x180] sm:$0xff] }
  0x48   :  { %7013 = vmatpush1.bf16.msra.mxu1 %v9808_v51  ;;  %6975 = vmatprep.subr.bf16.mxu0 %v9810_v52  ;;  %v9834_v18 = vpack.c.bf16 %v118_v10, %v114_v9  ;;  %v117_v20 = vld [vmem:[#allocation4 + $0x1a0] sm:$0xff]  ;;  %v115_v22 = vld [vmem:[#allocation4 + $0x190] sm:$0xff]  ;;  %v9837_v23 = vpack.c.bf16 %v120_v13, %v116_v11  ;;  %v122_v27 = vld [vmem:[#allocation4 + $0x1c8] sm:$0xff] }
  0x49   :  { %7015 = vmatprep.subr.bf16.mxu1 %v9813_v56  ;;  %v119_v24 = vld [vmem:[#allocation4 + $0x1b0] sm:$0xff]  ;;  %v126_v28 = vld [vmem:[#allocation4 + $0x1e8] sm:$0xff]  ;;  %v124_v29 = vld [vmem:[#allocation4 + $0x1d8] sm:$0xff]  ;;  %v9840_v32 = vpack.c.bf16 %v117_v20, %v113_v19 }
  0x4a   :  { %v128_v31 = vld [vmem:[#allocation4 + $0x1f8] sm:$0xff]  ;;  %v9844_v33 = vpack.c.bf16 %v119_v24, %v115_v22  ;;  %v9846_v35 = vpack.c.bf16 %v126_v28, %v122_v27  ;;  %v121_v36 = vld [vmem:[#allocation4 + $0x1c0] sm:$0xff]  ;;  %v123_v40 = vld [vmem:[#allocation4 + $0x1d0] sm:$0xff] }
  0x4b   :  { %6977 = vmatpush1.bf16.msra.mxu0 %v9816_v62  ;;  %v125_v37 = vld [vmem:[#allocation4 + $0x1e0] sm:$0xff]  ;;  %v9849_v41 = vpack.c.bf16 %v128_v31, %v124_v29  ;;  %v127_v42 = vld [vmem:[#allocation4 + $0x1f0] sm:$0xff]  ;;  %v130_v44 = vld [vmem:[#allocation4 + $0x208] sm:$0xff] }
  0x4c   :  { %7017 = vmatpush1.bf16.msra.mxu1 %v9820_v63  ;;  %6979 = vmatprep.subr.bf16.mxu0 %v9822_v0  ;;  %v134_v45 = vld [vmem:[#allocation4 + $0x228] sm:$0xff]  ;;  %v132_v46 = vld [vmem:[#allocation4 + $0x218] sm:$0xff]  ;;  %v6808_v48 = vld.sshfl [vmem:[%s11151_s0] sm:$0x33 pattern:$0x76325410]  ;;  %v9855_v49 = vpack.c.bf16 %v125_v37, %v121_v36  ;;  %v9859_v54 = vpack.c.bf16 %v127_v42, %v123_v40 }
  0x4d   :  { %7019 = vmatprep.subr.bf16.mxu1 %v9825_v5  ;;  %v136_v47 = vld [vmem:[#allocation4 + $0x238] sm:$0xff]  ;;  %v157_v53 = vcombine.high %v6808_v48, %v6808_v48  ;;  %v9861_v55 = vpack.c.bf16 %v134_v45, %v130_v44  ;;  %v129_v57 = vld [vmem:[#allocation4 + $0x200] sm:$0xff]  ;;  %v131_v59 = vld [vmem:[#allocation4 + $0x210] sm:$0xff] }
  0x4e   :  { %v133_v58 = vld [vmem:[#allocation4 + $0x220] sm:$0xff]  ;;  %v9864_v60 = vpack.c.bf16 %v136_v47, %v132_v46  ;;  %v135_v61 = vld [vmem:[#allocation4 + $0x230] sm:$0xff]  ;;  %v138_v1 = vld [vmem:[#allocation4 + $0x248] sm:$0xff] }
  0x4f   :  { %6981 = vmatpush1.bf16.msra.mxu0 %v9828_v14  ;;  %v142_v2 = vld [vmem:[#allocation4 + $0x268] sm:$0xff]  ;;  %6809 = vmatprep.mubr.msk.f32.mxu0 %vm159_vm0, %v157_v53  ;;  %v140_v4 = vld [vmem:[#allocation4 + $0x258] sm:$0xff]  ;;  %v9869_v9 = vpack.c.bf16 %v133_v58, %v129_v57  ;;  %v9873_v10 = vpack.c.bf16 %v135_v61, %v131_v59  ;;  %v137_v13 = vld [vmem:[#allocation4 + $0x240] sm:$0xff] }
  0x50   :  { %7021 = vmatpush1.bf16.msra.mxu1 %v9832_v15  ;;  %6983 = vmatprep.subr.bf16.mxu0 %v9834_v18  ;;  %v144_v6 = vld [vmem:[#allocation4 + $0x278] sm:$0xff]  ;;  %v9875_v11 = vpack.c.bf16 %v142_v2, %v138_v1  ;;  %v141_v19 = vld [vmem:[#allocation4 + $0x260] sm:$0xff]  ;;  %v139_v22 = vld [vmem:[#allocation4 + $0x250] sm:$0xff] }
  0x51   :  { %7023 = vmatprep.subr.bf16.mxu1 %v9837_v23  ;;  %6810 = vmatprep.mubr.msk.f32.mxu1 %vm159_vm0, %v157_v53  ;;  %v9878_v20 = vpack.c.bf16 %v144_v6, %v140_v4  ;;  %v143_v24 = vld [vmem:[#allocation4 + $0x270] sm:$0xff]  ;;  %v9881_v27 = vpack.c.bf16 %v141_v19, %v137_v13  ;;  %v9888_v29 = vld [vmem:[#allocation4 + $0x288] sm:$0xff]  ;;  %v9890_v31 = vld [vmem:[#allocation4 + $0x298] sm:$0xff] }
  0x52   :  { %v9885_v28 = vpack.c.bf16 %v143_v24, %v139_v22  ;;  %v9895_v36 = vld [vmem:[#allocation4 + $0x280] sm:$0xff]  ;;  %v9898_v37 = vld [vmem:[#allocation4 + $0x290] sm:$0xff]  ;;  %v9952_v44 = vld.sshfl [vmem:[%s11151_s0 + $0x8] sm:$0x33 pattern:$0x76325410] }
  0x53   :  { %6985 = vmatpush1.bf16.msra.mxu0 %v9840_v32  ;;  %v6812_v40 = vld.sshfl [vmem:[%s11151_s0 + $0x4] sm:$0x33 pattern:$0x76325410]  ;;  %v666_v45 = vcombine.high %v9952_v44, %v9952_v44  ;;  %v851_v57 = vld [vmem:[#allocation4 + $0xe8] sm:$0xff]  ;;  %v849_v58 = vld [vmem:[#allocation4 + $0xd8] sm:$0xff] }
  0x54   :  { %7025 = vmatpush1.bf16.msra.mxu1 %v9844_v33  ;;  %6987 = vmatprep.subr.bf16.mxu0 %v9846_v35  ;;  %v418_v42 = vcombine.high %v6812_v40, %v6812_v40  ;;  %v838_v47 = vld [vmem:[#allocation4 + $0x80] sm:$0xff]  ;;  %v853_v59 = vld [vmem:[#allocation4 + $0xf8] sm:$0xff]  ;;  %v848_v6 = vld [vmem:[#allocation4 + $0xd0] sm:$0xff] }
  0x55   :  { %7027 = vmatprep.subr.bf16.mxu1 %v9849_v41  ;;  %v846_v2 = vld [vmem:[#allocation4 + $0xc0] sm:$0xff]  ;;  %v859_v13 = vld [vmem:[#allocation4 + $0x128] sm:$0xff]  ;;  %v857_v19 = vld [vmem:[#allocation4 + $0x118] sm:$0xff] }
  0x56   :  { %v850_v4 = vld [vmem:[#allocation4 + $0xe0] sm:$0xff] }
  0x57   :  { %6989 = vmatpush1.bf16.msra.mxu0 %v9855_v49  ;;  %v10054_v22 = vpack.c.bf16 %v850_v4, %v846_v2  ;;  %v880_v2 = vld [vmem:[#allocation4 + $0x1d0] sm:$0xff] }
  0x58   :  { %7029 = vmatpush1.bf16.msra.mxu1 %v9859_v54  ;;  %6991 = vmatprep.subr.bf16.mxu0 %v9861_v55 }
  0x59   :  { %7031 = vmatprep.subr.bf16.mxu1 %v9864_v60 }
  0x5b   :  { %6993 = vmatpush1.bf16.msra.mxu0 %v9869_v9 }
  0x5c   :  { %7033 = vmatpush1.bf16.msra.mxu1 %v9873_v10  ;;  %6995 = vmatprep.subr.bf16.mxu0 %v9875_v11 }
  0x5d   :  { %7035 = vmatprep.subr.bf16.mxu1 %v9878_v20 }
  0x5f   :  { %6997 = vmatpush1.bf16.msra.mxu0 %v9881_v27 }
  0x60   :  { %7037 = vmatpush1.bf16.msra.mxu1 %v9885_v28  ;;  %202 = vmatprep.subr.mxu0 %v9888_v29 }
  0x61   :  { %273 = vmatprep.subr.mxu1 %v9890_v31 }
  0x63   :  { %203 = vmatpush1.msra.mxu0 %v9895_v36 }
  0x64   :  { %274 = vmatpush1.msra.mxu1 %v9898_v37  ;;  %227 = vmatmul.mubr.f32.vlgmr.msra.gmra.mrb[0].mxu0 %v6808_v48 }
  0x65   :  { %298 = vmatmul.mubr.f32.vlgmr.msra.gmra.mrb[0].mxu1 %v6808_v48  ;;  %7039 = vmatprep.subr.bf16.mxu0 %v9765_v3  ;;  %v842_v48 = vld [vmem:[#allocation4 + $0xa0] sm:$0xff] }
  0x66   :  { %7079 = vmatprep.subr.bf16.mxu1 %v9767_v7  ;;  %7041 = vmatpush1.bf16.msra.mxu0 %v9769_v8 }
  0x67   :  { %7081 = vmatpush1.bf16.msra.mxu1 %v9772_v12  ;;  %7043 = vmatprep.subr.bf16.mxu0 %v9776_v16 }
  0x68   :  { %7083 = vmatprep.subr.bf16.mxu1 %v9778_v17  ;;  %6813 = vmatprep.mubr.msk.f32.mxu0 %vm159_vm0, %v418_v42 }
  0x69   :  { %6814 = vmatprep.mubr.msk.f32.mxu1 %vm159_vm0, %v418_v42  ;;  %v867_v42 = vld [vmem:[#allocation4 + $0x168] sm:$0xff] }
  0x6a   :  { %7045 = vmatpush1.bf16.msra.mxu0 %v9781_v21 }
  0x6b   :  { %7085 = vmatpush1.bf16.msra.mxu1 %v9785_v25  ;;  %7047 = vmatprep.subr.bf16.mxu0 %v9787_v26 }
  0x6c   :  { %7087 = vmatprep.subr.bf16.mxu1 %v9789_v30 }
  0x6e   :  { %7049 = vmatpush1.bf16.msra.mxu0 %v9792_v34 }
  0x6f   :  { %7089 = vmatpush1.bf16.msra.mxu1 %v9796_v38  ;;  %7051 = vmatprep.subr.bf16.mxu0 %v9798_v39 }
  0x70   :  { %7091 = vmatprep.subr.bf16.mxu1 %v9801_v43 }
  0x72   :  { %7053 = vmatpush1.bf16.msra.mxu0 %v9804_v50 }
  0x73   :  { %7093 = vmatpush1.bf16.msra.mxu1 %v9808_v51  ;;  %7055 = vmatprep.subr.bf16.mxu0 %v9810_v52 }
  0x74   :  { %7095 = vmatprep.subr.bf16.mxu1 %v9813_v56 }
  0x76   :  { %7057 = vmatpush1.bf16.msra.mxu0 %v9816_v62 }
  0x77   :  { %7097 = vmatpush1.bf16.msra.mxu1 %v9820_v63  ;;  %7059 = vmatprep.subr.bf16.mxu0 %v9822_v0 }
  0x78   :  { %7099 = vmatprep.subr.bf16.mxu1 %v9825_v5 }
  0x7a   :  { %7061 = vmatpush1.bf16.msra.mxu0 %v9828_v14 }
  0x7b   :  { %7101 = vmatpush1.bf16.msra.mxu1 %v9832_v15  ;;  %7063 = vmatprep.subr.bf16.mxu0 %v9834_v18 }
  0x7c   :  { %7103 = vmatprep.subr.bf16.mxu1 %v9837_v23 }
  0x7e   :  { %7065 = vmatpush1.bf16.msra.mxu0 %v9840_v32 }
  0x7f   :  { %7105 = vmatpush1.bf16.msra.mxu1 %v9844_v33  ;;  %7067 = vmatprep.subr.bf16.mxu0 %v9846_v35 }
  0x80   :  { %7107 = vmatprep.subr.bf16.mxu1 %v9849_v41 }
  0x82   :  { %7069 = vmatpush1.bf16.msra.mxu0 %v9855_v49 }
  0x83   :  { %7109 = vmatpush1.bf16.msra.mxu1 %v9859_v54  ;;  %7071 = vmatprep.subr.bf16.mxu0 %v9861_v55 }
  0x84   :  { %7111 = vmatprep.subr.bf16.mxu1 %v9864_v60 }
  0x86   :  { %7073 = vmatpush1.bf16.msra.mxu0 %v9869_v9 }
  0x87   :  { %7113 = vmatpush1.bf16.msra.mxu1 %v9873_v10  ;;  %7075 = vmatprep.subr.bf16.mxu0 %v9875_v11 }
  0x88   :  { %7115 = vmatprep.subr.bf16.mxu1 %v9878_v20 }
  0x8a   :  { %7077 = vmatpush1.bf16.msra.mxu0 %v9881_v27 }
  0x8b   :  { %7117 = vmatpush1.bf16.msra.mxu1 %v9885_v28  ;;  %462 = vmatprep.subr.mxu0 %v9888_v29 }
  0x8c   :  { %533 = vmatprep.subr.mxu1 %v9890_v31 }
  0x8e   :  { %463 = vmatpush1.msra.mxu0 %v9895_v36 }
  0x8f   :  { %534 = vmatpush1.msra.mxu1 %v9898_v37  ;;  %487 = vmatmul.mubr.f32.vlgmr.msra.gmra.mrb[2].mxu0 %v6812_v40 }
  0x90   :  { %558 = vmatmul.mubr.f32.vlgmr.msra.gmra.mrb[2].mxu1 %v6812_v40  ;;  %7119 = vmatprep.subr.bf16.mxu0 %v9765_v3  ;;  %v823_v3 = vld [vmem:[#allocation4 + $0x8] sm:$0xff] }
  0x91   :  { %7159 = vmatprep.subr.bf16.mxu1 %v9767_v7  ;;  %7121 = vmatpush1.bf16.msra.mxu0 %v9769_v8  ;;  %v827_v7 = vld [vmem:[#allocation4 + $0x28] sm:$0xff]  ;;  %v825_v8 = vld [vmem:[#allocation4 + $0x18] sm:$0xff] }
  0x92   :  { %7161 = vmatpush1.bf16.msra.mxu1 %v9772_v12  ;;  %7123 = vmatprep.subr.bf16.mxu0 %v9776_v16  ;;  %v829_v12 = vld [vmem:[#allocation4 + $0x38] sm:$0xff]  ;;  %v822_v16 = vld [vmem:[#allocation4] sm:$0xff]  ;;  %v863_v40 = vld [vmem:[#allocation4 + $0x148] sm:$0xff] }
  0x93   :  { %7163 = vmatprep.subr.bf16.mxu1 %v9778_v17  ;;  %6817 = vmatprep.mubr.msk.f32.mxu0 %vm159_vm0, %v666_v45  ;;  %v826_v17 = vld [vmem:[#allocation4 + $0x20] sm:$0xff] }
  0x94   :  { %6818 = vmatprep.mubr.msk.f32.mxu1 %vm159_vm0, %v666_v45  ;;  %v869_v45 = vld [vmem:[#allocation4 + $0x178] sm:$0xff] }
  0x95   :  { %7125 = vmatpush1.bf16.msra.mxu0 %v9781_v21  ;;  %v824_v21 = vld [vmem:[#allocation4 + $0x10] sm:$0xff] }
  0x96   :  { %7165 = vmatpush1.bf16.msra.mxu1 %v9785_v25  ;;  %7127 = vmatprep.subr.bf16.mxu0 %v9787_v26  ;;  %v828_v25 = vld [vmem:[#allocation4 + $0x30] sm:$0xff]  ;;  %v831_v26 = vld [vmem:[#allocation4 + $0x48] sm:$0xff] }
  0x97   :  { %7167 = vmatprep.subr.bf16.mxu1 %v9789_v30  ;;  %v835_v30 = vld [vmem:[#allocation4 + $0x68] sm:$0xff] }
  0x99   :  { %7129 = vmatpush1.bf16.msra.mxu0 %v9792_v34  ;;  %v10002_v34 = vpack.c.bf16 %v827_v7, %v823_v3 }
  0x9a   :  { %7169 = vmatpush1.bf16.msra.mxu1 %v9796_v38  ;;  %7131 = vmatprep.subr.bf16.mxu0 %v9798_v39  ;;  %v833_v38 = vld [vmem:[#allocation4 + $0x58] sm:$0xff] }
  0x9b   :  { %7171 = vmatprep.subr.bf16.mxu1 %v9801_v43  ;;  %v837_v39 = vld [vmem:[#allocation4 + $0x78] sm:$0xff]  ;;  %v10007_v43 = vld.sshfl [vmem:[%s11151_s0 + $0xc] sm:$0x33 pattern:$0x76325410] }
  0x9d   :  { %7133 = vmatpush1.bf16.msra.mxu0 %v9804_v50  ;;  %v10009_v50 = vpack.c.bf16 %v829_v12, %v825_v8  ;;  %v10072_v8 = vpack.c.bf16 %v867_v42, %v863_v40  ;;  %v862_v12 = vld [vmem:[#allocation4 + $0x140] sm:$0xff]  ;;  %v888_v40 = vld [vmem:[#allocation4 + $0x210] sm:$0xff] }
  0x9e   :  { %7173 = vmatpush1.bf16.msra.mxu1 %v9808_v51  ;;  %7135 = vmatprep.subr.bf16.mxu0 %v9810_v52  ;;  %v10011_v51 = vpack.c.bf16 %v826_v17, %v822_v16  ;;  %v10014_v52 = vpack.c.bf16 %v828_v25, %v824_v21  ;;  %v866_v16 = vld [vmem:[#allocation4 + $0x160] sm:$0xff]  ;;  %v864_v17 = vld [vmem:[#allocation4 + $0x150] sm:$0xff] }
  0x9f   :  { %7175 = vmatprep.subr.bf16.mxu1 %v9813_v56  ;;  %v10016_v56 = vpack.c.bf16 %v835_v30, %v831_v26  ;;  %v868_v25 = vld [vmem:[#allocation4 + $0x170] sm:$0xff]  ;;  %v871_v26 = vld [vmem:[#allocation4 + $0x188] sm:$0xff] }
  0xa0   :  { %v875_v30 = vld [vmem:[#allocation4 + $0x1a8] sm:$0xff] }
  0xa1   :  { %7137 = vmatpush1.bf16.msra.mxu0 %v9816_v62  ;;  %v830_v62 = vld [vmem:[#allocation4 + $0x40] sm:$0xff] }
  0xa2   :  { %7177 = vmatpush1.bf16.msra.mxu1 %v9820_v63  ;;  %7139 = vmatprep.subr.bf16.mxu0 %v9822_v0  ;;  %v834_v63 = vld [vmem:[#allocation4 + $0x60] sm:$0xff]  ;;  %v832_v0 = vld [vmem:[#allocation4 + $0x50] sm:$0xff] }
  0xa3   :  { %7179 = vmatprep.subr.bf16.mxu1 %v9825_v5  ;;  %v10020_v5 = vpack.c.bf16 %v837_v39, %v833_v38  ;;  %v873_v38 = vld [vmem:[#allocation4 + $0x198] sm:$0xff] }
  0xa4   :  { %v877_v39 = vld [vmem:[#allocation4 + $0x1b8] sm:$0xff] }
  0xa5   :  { %7141 = vmatpush1.bf16.msra.mxu0 %v9828_v14  ;;  %v836_v14 = vld [vmem:[#allocation4 + $0x70] sm:$0xff] }
  0xa6   :  { %7181 = vmatpush1.bf16.msra.mxu1 %v9832_v15  ;;  %7143 = vmatprep.subr.bf16.mxu0 %v9834_v18  ;;  %v839_v15 = vld [vmem:[#allocation4 + $0x88] sm:$0xff] }
  0xa7   :  { %7183 = vmatprep.subr.bf16.mxu1 %v9837_v23  ;;  %v843_v18 = vld [vmem:[#allocation4 + $0xa8] sm:$0xff]  ;;  %v914_v23 = vcombine.high %v10007_v43, %v10007_v43 }
  0xa8   :  { %v10034_v46 = vpack.c.bf16 %v843_v18, %v839_v15  ;;  %v874_v15 = vld [vmem:[#allocation4 + $0x1a0] sm:$0xff]  ;;  %v872_v18 = vld [vmem:[#allocation4 + $0x190] sm:$0xff] }
  0xa9   :  { %7145 = vmatpush1.bf16.msra.mxu0 %v9840_v32  ;;  %v841_v32 = vld [vmem:[#allocation4 + $0x98] sm:$0xff] }
  0xaa   :  { %7185 = vmatpush1.bf16.msra.mxu1 %v9844_v33  ;;  %7147 = vmatprep.subr.bf16.mxu0 %v9846_v35  ;;  %v845_v33 = vld [vmem:[#allocation4 + $0xb8] sm:$0xff]  ;;  %v10028_v35 = vpack.c.bf16 %v834_v63, %v830_v62  ;;  %v10078_v62 = vpack.c.bf16 %v866_v16, %v862_v12  ;;  %v10082_v63 = vpack.c.bf16 %v868_v25, %v864_v17  ;;  %v899_v12 = vld [vmem:[#allocation4 + $0x268] sm:$0xff] }
  0xab   :  { %7187 = vmatprep.subr.bf16.mxu1 %v9849_v41  ;;  %v10032_v41 = vpack.c.bf16 %v836_v14, %v832_v0  ;;  %v10037_v53 = vpack.c.bf16 %v845_v33, %v841_v32  ;;  %v10084_v0 = vpack.c.bf16 %v875_v30, %v871_v26  ;;  %v870_v14 = vld [vmem:[#allocation4 + $0x180] sm:$0xff]  ;;  %v876_v32 = vld [vmem:[#allocation4 + $0x1b0] sm:$0xff]  ;;  %v879_v33 = vld [vmem:[#allocation4 + $0x1c8] sm:$0xff] }
  0xac   :  { %v897_v16 = vld [vmem:[#allocation4 + $0x258] sm:$0xff] }
  0xad   :  { %7149 = vmatpush1.bf16.msra.mxu0 %v9855_v49  ;;  %v840_v49 = vld [vmem:[#allocation4 + $0x90] sm:$0xff]  ;;  %v901_v17 = vld [vmem:[#allocation4 + $0x278] sm:$0xff] }
  0xae   :  { %7189 = vmatpush1.bf16.msra.mxu1 %v9859_v54  ;;  %7151 = vmatprep.subr.bf16.mxu0 %v9861_v55  ;;  %v844_v54 = vld [vmem:[#allocation4 + $0xb0] sm:$0xff]  ;;  %v847_v55 = vld [vmem:[#allocation4 + $0xc8] sm:$0xff] }
  0xaf   :  { %7191 = vmatprep.subr.bf16.mxu1 %v9864_v60  ;;  %v10042_v60 = vpack.c.bf16 %v842_v48, %v838_v47  ;;  %v10046_v61 = vpack.c.bf16 %v844_v54, %v840_v49  ;;  %v10048_v1 = vpack.c.bf16 %v851_v57, %v847_v55  ;;  %v883_v47 = vld [vmem:[#allocation4 + $0x1e8] sm:$0xff]  ;;  %v881_v48 = vld [vmem:[#allocation4 + $0x1d8] sm:$0xff]  ;;  %v10090_v54 = vpack.c.bf16 %v874_v15, %v870_v14  ;;  %v896_v15 = vld [vmem:[#allocation4 + $0x250] sm:$0xff] }
  0xb0   :  { %v885_v49 = vld [vmem:[#allocation4 + $0x1f8] sm:$0xff]  ;;  %v10094_v55 = vpack.c.bf16 %v876_v32, %v872_v18  ;;  %v10096_v57 = vpack.c.bf16 %v883_v47, %v879_v33  ;;  %v10123_v14 = vpack.c.bf16 %v901_v17, %v897_v16  ;;  %v900_v18 = vld [vmem:[#allocation4 + $0x270] sm:$0xff]  ;;  %v10133_v47 = vld [vmem:[#allocation4 + $0x288] sm:$0xff] }
  0xb1   :  { %7153 = vmatpush1.bf16.msra.mxu0 %v9869_v9  ;;  %v10051_v9 = vpack.c.bf16 %v853_v59, %v849_v58  ;;  %v878_v58 = vld [vmem:[#allocation4 + $0x1c0] sm:$0xff]  ;;  %v10099_v4 = vpack.c.bf16 %v885_v49, %v881_v48  ;;  %v10130_v33 = vpack.c.bf16 %v900_v18, %v896_v15  ;;  %v10135_v48 = vld [vmem:[#allocation4 + $0x298] sm:$0xff]  ;;  %v1591_v15 = vld [vmem:[#allocation4 + $0xc8] sm:$0xff] }
  0xb2   :  { %7193 = vmatpush1.bf16.msra.mxu1 %v9873_v10  ;;  %7155 = vmatprep.subr.bf16.mxu0 %v9875_v11  ;;  %v852_v10 = vld [vmem:[#allocation4 + $0xf0] sm:$0xff]  ;;  %v855_v11 = vld [vmem:[#allocation4 + $0x108] sm:$0xff]  ;;  %v882_v59 = vld [vmem:[#allocation4 + $0x1e0] sm:$0xff] }
  0xb3   :  { %7195 = vmatprep.subr.bf16.mxu1 %v9878_v20  ;;  %v861_v20 = vld [vmem:[#allocation4 + $0x138] sm:$0xff]  ;;  %v10058_v24 = vpack.c.bf16 %v852_v10, %v848_v6  ;;  %v884_v6 = vld [vmem:[#allocation4 + $0x1f0] sm:$0xff]  ;;  %v887_v10 = vld [vmem:[#allocation4 + $0x208] sm:$0xff] }
  0xb4   :  { %v10140_v49 = vld [vmem:[#allocation4 + $0x280] sm:$0xff]  ;;  %v1595_v18 = vld [vmem:[#allocation4 + $0xe8] sm:$0xff] }
  0xb5   :  { %7157 = vmatpush1.bf16.msra.mxu0 %v9881_v27  ;;  %v10060_v27 = vpack.c.bf16 %v859_v13, %v855_v11  ;;  %v891_v11 = vld [vmem:[#allocation4 + $0x228] sm:$0xff]  ;;  %v889_v13 = vld [vmem:[#allocation4 + $0x218] sm:$0xff] }
  0xb6   :  { %7197 = vmatpush1.bf16.msra.mxu1 %v9885_v28  ;;  %710 = vmatprep.subr.mxu0 %v9888_v29  ;;  %v854_v28 = vld [vmem:[#allocation4 + $0x100] sm:$0xff] }
  0xb7   :  { %781 = vmatprep.subr.mxu1 %v9890_v31  ;;  %v858_v29 = vld [vmem:[#allocation4 + $0x120] sm:$0xff]  ;;  %v856_v31 = vld [vmem:[#allocation4 + $0x110] sm:$0xff] }
  0xb8   :  { %v10066_v3 = vpack.c.bf16 %v858_v29, %v854_v28  ;;  %v10106_v28 = vpack.c.bf16 %v884_v6, %v880_v2  ;;  %v10108_v29 = vpack.c.bf16 %v891_v11, %v887_v10  ;;  %v1578_v11 = vld [vmem:[#allocation4 + $0x60] sm:$0xff] }
  0xb9   :  { %711 = vmatpush1.msra.mxu0 %v9895_v36  ;;  %v10063_v36 = vpack.c.bf16 %v861_v20, %v857_v19  ;;  %v893_v19 = vld [vmem:[#allocation4 + $0x238] sm:$0xff]  ;;  %v10102_v20 = vpack.c.bf16 %v882_v59, %v878_v58  ;;  %v10143_v58 = vld [vmem:[#allocation4 + $0x290] sm:$0xff] }
  0xba   :  { %782 = vmatpush1.msra.mxu1 %v9898_v37  ;;  %735 = vmatmul.mubr.f32.vlgmr.msra.gmra.mrb[4].mxu0 %v9952_v44  ;;  %v860_v37 = vld [vmem:[#allocation4 + $0x130] sm:$0xff]  ;;  %v10111_v42 = vpack.c.bf16 %v893_v19, %v889_v13 }
  0xbb   :  { %806 = vmatmul.mubr.f32.vlgmr.msra.gmra.mrb[4].mxu1 %v9952_v44  ;;  %7199 = vmatprep.subr.bf16.mxu0 %v10002_v34  ;;  %v865_v44 = vld [vmem:[#allocation4 + $0x158] sm:$0xff]  ;;  %v10070_v7 = vpack.c.bf16 %v860_v37, %v856_v31  ;;  %v886_v31 = vld [vmem:[#allocation4 + $0x200] sm:$0xff]  ;;  %v6824_v59 = vld.sshfl [vmem:[%s11151_s0 + $0x10] sm:$0x33 pattern:$0x76325410] }
  0xbc   :  { %7239 = vmatprep.subr.bf16.mxu1 %v10009_v50  ;;  %7201 = vmatpush1.bf16.msra.mxu0 %v10011_v51  ;;  %v10075_v21 = vpack.c.bf16 %v869_v45, %v865_v44  ;;  %v890_v37 = vld [vmem:[#allocation4 + $0x220] sm:$0xff]  ;;  %v892_v44 = vld [vmem:[#allocation4 + $0x230] sm:$0xff]  ;;  %v895_v45 = vld [vmem:[#allocation4 + $0x248] sm:$0xff]  ;;  %v1162_v2 = vcombine.high %v6824_v59, %v6824_v59 }
  0xbd   :  { %7241 = vmatpush1.bf16.msra.mxu1 %v10014_v52  ;;  %7203 = vmatprep.subr.bf16.mxu0 %v10016_v56  ;;  %v10114_v25 = vpack.c.bf16 %v890_v37, %v886_v31  ;;  %v10118_v26 = vpack.c.bf16 %v892_v44, %v888_v40  ;;  %v10120_v30 = vpack.c.bf16 %v899_v12, %v895_v45  ;;  %v1576_v13 = vld [vmem:[#allocation4 + $0x50] sm:$0xff]  ;;  %v1589_v44 = vld [vmem:[#allocation4 + $0xb8] sm:$0xff] }
  0xbe   :  { %7243 = vmatprep.subr.bf16.mxu1 %v10020_v5  ;;  %6821 = vmatprep.mubr.msk.f32.mxu0 %vm159_vm0, %v914_v23  ;;  %v1580_v19 = vld [vmem:[#allocation4 + $0x70] sm:$0xff] }
  0xbf   :  { %6822 = vmatprep.mubr.msk.f32.mxu1 %vm159_vm0, %v914_v23  ;;  %v10087_v23 = vpack.c.bf16 %v877_v39, %v873_v38  ;;  %v894_v38 = vld [vmem:[#allocation4 + $0x240] sm:$0xff]  ;;  %v10284_v12 = vpack.c.bf16 %v1580_v19, %v1576_v13  ;;  %v1608_v19 = vld [vmem:[#allocation4 + $0x150] sm:$0xff] }
  0xc0   :  { %7205 = vmatpush1.bf16.msra.mxu0 %v10028_v35  ;;  %v898_v39 = vld [vmem:[#allocation4 + $0x260] sm:$0xff] }
  0xc1   :  { %7245 = vmatpush1.bf16.msra.mxu1 %v10032_v41  ;;  %7207 = vmatprep.subr.bf16.mxu0 %v10034_v46  ;;  %v10126_v32 = vpack.c.bf16 %v898_v39, %v894_v38  ;;  %v1584_v38 = vld [vmem:[#allocation4 + $0x90] sm:$0xff]  ;;  %v1610_v13 = vld [vmem:[#allocation4 + $0x160] sm:$0xff] }
  0xc2   :  { %7247 = vmatprep.subr.bf16.mxu1 %v10037_v53 }
  0xc4   :  { %7209 = vmatpush1.bf16.msra.mxu0 %v10042_v60 }
  0xc5   :  { %7249 = vmatpush1.bf16.msra.mxu1 %v10046_v61  ;;  %7211 = vmatprep.subr.bf16.mxu0 %v10048_v1 }
  0xc6   :  { %7251 = vmatprep.subr.bf16.mxu1 %v10051_v9 }
  0xc8   :  { %7213 = vmatpush1.bf16.msra.mxu0 %v10054_v22 }
  0xc9   :  { %7253 = vmatpush1.bf16.msra.mxu1 %v10058_v24  ;;  %7215 = vmatprep.subr.bf16.mxu0 %v10060_v27 }
  0xca   :  { %7255 = vmatprep.subr.bf16.mxu1 %v10063_v36 }
  0xcc   :  { %7217 = vmatpush1.bf16.msra.mxu0 %v10066_v3 }
  0xcd   :  { %7257 = vmatpush1.bf16.msra.mxu1 %v10070_v7  ;;  %7219 = vmatprep.subr.bf16.mxu0 %v10072_v8 }
  0xce   :  { %7259 = vmatprep.subr.bf16.mxu1 %v10075_v21 }
  0xd0   :  { %7221 = vmatpush1.bf16.msra.mxu0 %v10078_v62 }
  0xd1   :  { %7261 = vmatpush1.bf16.msra.mxu1 %v10082_v63  ;;  %7223 = vmatprep.subr.bf16.mxu0 %v10084_v0 }
  0xd2   :  { %7263 = vmatprep.subr.bf16.mxu1 %v10087_v23 }
  0xd4   :  { %7225 = vmatpush1.bf16.msra.mxu0 %v10090_v54 }
  0xd5   :  { %7265 = vmatpush1.bf16.msra.mxu1 %v10094_v55  ;;  %7227 = vmatprep.subr.bf16.mxu0 %v10096_v57 }
  0xd6   :  { %7267 = vmatprep.subr.bf16.mxu1 %v10099_v4 }
  0xd8   :  { %7229 = vmatpush1.bf16.msra.mxu0 %v10102_v20 }
  0xd9   :  { %7269 = vmatpush1.bf16.msra.mxu1 %v10106_v28  ;;  %7231 = vmatprep.subr.bf16.mxu0 %v10108_v29 }
  0xda   :  { %7271 = vmatprep.subr.bf16.mxu1 %v10111_v42 }
  0xdc   :  { %7233 = vmatpush1.bf16.msra.mxu0 %v10114_v25 }
  0xdd   :  { %7273 = vmatpush1.bf16.msra.mxu1 %v10118_v26  ;;  %7235 = vmatprep.subr.bf16.mxu0 %v10120_v30 }
  0xde   :  { %7275 = vmatprep.subr.bf16.mxu1 %v10123_v14 }
  0xe0   :  { %7237 = vmatpush1.bf16.msra.mxu0 %v10126_v32 }
  0xe1   :  { %7277 = vmatpush1.bf16.msra.mxu1 %v10130_v33  ;;  %958 = vmatprep.subr.mxu0 %v10133_v47 }
  0xe2   :  { %1029 = vmatprep.subr.mxu1 %v10135_v48 }
  0xe4   :  { %959 = vmatpush1.msra.mxu0 %v10140_v49 }
  0xe5   :  { %1030 = vmatpush1.msra.mxu1 %v10143_v58  ;;  %983 = vmatmul.mubr.f32.vlgmr.msra.gmra.mrb[6].mxu0 %v10007_v43 }
  0xe6   :  { %1054 = vmatmul.mubr.f32.vlgmr.msra.gmra.mrb[6].mxu1 %v10007_v43  ;;  %7279 = vmatprep.subr.bf16.mxu0 %v10002_v34  ;;  %v10199_v43 = vld.sshfl [vmem:[%s11151_s0 + $0x14] sm:$0x33 pattern:$0x76325410] }
  0xe7   :  { %7319 = vmatprep.subr.bf16.mxu1 %v10009_v50  ;;  %7281 = vmatpush1.bf16.msra.mxu0 %v10011_v51  ;;  %v1410_v6 = vcombine.high %v10199_v43, %v10199_v43 }
  0xe8   :  { %7321 = vmatpush1.bf16.msra.mxu1 %v10014_v52  ;;  %7283 = vmatprep.subr.bf16.mxu0 %v10016_v56 }
  0xe9   :  { %7323 = vmatprep.subr.bf16.mxu1 %v10020_v5  ;;  %6825 = vmatprep.mubr.msk.f32.mxu0 %vm159_vm0, %v1162_v2 }
  0xea   :  { %6826 = vmatprep.mubr.msk.f32.mxu1 %vm159_vm0, %v1162_v2  ;;  %v10308_v2 = vpack.c.bf16 %v1595_v18, %v1591_v15  ;;  %v1620_v18 = vld [vmem:[#allocation4 + $0x1b0] sm:$0xff] }
  0xeb   :  { %7285 = vmatpush1.bf16.msra.mxu0 %v10028_v35 }
  0xec   :  { %7325 = vmatpush1.bf16.msra.mxu1 %v10032_v41  ;;  %7287 = vmatprep.subr.bf16.mxu0 %v10034_v46 }
  0xed   :  { %7327 = vmatprep.subr.bf16.mxu1 %v10037_v53 }
  0xef   :  { %7289 = vmatpush1.bf16.msra.mxu0 %v10042_v60 }
  0xf0   :  { %7329 = vmatpush1.bf16.msra.mxu1 %v10046_v61  ;;  %7291 = vmatprep.subr.bf16.mxu0 %v10048_v1 }
  0xf1   :  { %7331 = vmatprep.subr.bf16.mxu1 %v10051_v9 }
  0xf3   :  { %7293 = vmatpush1.bf16.msra.mxu0 %v10054_v22 }
  0xf4   :  { %7333 = vmatpush1.bf16.msra.mxu1 %v10058_v24  ;;  %7295 = vmatprep.subr.bf16.mxu0 %v10060_v27 }
  0xf5   :  { %7335 = vmatprep.subr.bf16.mxu1 %v10063_v36 }
  0xf7   :  { %7297 = vmatpush1.bf16.msra.mxu0 %v10066_v3 }
  0xf8   :  { %7337 = vmatpush1.bf16.msra.mxu1 %v10070_v7  ;;  %7299 = vmatprep.subr.bf16.mxu0 %v10072_v8 }
  0xf9   :  { %7339 = vmatprep.subr.bf16.mxu1 %v10075_v21 }
  0xfb   :  { %7301 = vmatpush1.bf16.msra.mxu0 %v10078_v62 }
  0xfc   :  { %7341 = vmatpush1.bf16.msra.mxu1 %v10082_v63  ;;  %7303 = vmatprep.subr.bf16.mxu0 %v10084_v0 }
  0xfd   :  { %7343 = vmatprep.subr.bf16.mxu1 %v10087_v23 }
  0xff   :  { %7305 = vmatpush1.bf16.msra.mxu0 %v10090_v54 }
 0x100   :  { %7345 = vmatpush1.bf16.msra.mxu1 %v10094_v55  ;;  %7307 = vmatprep.subr.bf16.mxu0 %v10096_v57 }
 0x101   :  { %7347 = vmatprep.subr.bf16.mxu1 %v10099_v4 }
 0x103   :  { %7309 = vmatpush1.bf16.msra.mxu0 %v10102_v20 }
 0x104   :  { %7349 = vmatpush1.bf16.msra.mxu1 %v10106_v28  ;;  %7311 = vmatprep.subr.bf16.mxu0 %v10108_v29 }
 0x105   :  { %7351 = vmatprep.subr.bf16.mxu1 %v10111_v42 }
 0x107   :  { %7313 = vmatpush1.bf16.msra.mxu0 %v10114_v25 }
 0x108   :  { %7353 = vmatpush1.bf16.msra.mxu1 %v10118_v26  ;;  %7315 = vmatprep.subr.bf16.mxu0 %v10120_v30 }
 0x109   :  { %7355 = vmatprep.subr.bf16.mxu1 %v10123_v14 }
 0x10b   :  { %7317 = vmatpush1.bf16.msra.mxu0 %v10126_v32 }
 0x10c   :  { %7357 = vmatpush1.bf16.msra.mxu1 %v10130_v33  ;;  %1206 = vmatprep.subr.mxu0 %v10133_v47 }
 0x10d   :  { %1277 = vmatprep.subr.mxu1 %v10135_v48 }
 0x10f   :  { %1207 = vmatpush1.msra.mxu0 %v10140_v49 }
 0x110   :  { %1278 = vmatpush1.msra.mxu1 %v10143_v58  ;;  %1231 = vmatmul.mubr.f32.vlgmr.msra.gmra.mrb[8].mxu0 %v6824_v59 }
 0x111   :  { %1302 = vmatmul.mubr.f32.vlgmr.msra.gmra.mrb[8].mxu1 %v6824_v59  ;;  %7359 = vmatprep.subr.bf16.mxu0 %v10002_v34  ;;  %v307_v34 = vlaneseq }
 0x112   :  { %7399 = vmatprep.subr.bf16.mxu1 %v10009_v50  ;;  %7361 = vmatpush1.bf16.msra.mxu0 %v10011_v51  ;;  %v1567_v51 = vld [vmem:[#allocation4 + $0x8] sm:$0xff] }
 0x113   :  { %7401 = vmatpush1.bf16.msra.mxu1 %v10014_v52  ;;  %7363 = vmatprep.subr.bf16.mxu0 %v10016_v56  ;;  %v10242_v50 = vshrl.u32 %v307_v34, 7  ;;  %v1571_v52 = vld [vmem:[#allocation4 + $0x28] sm:$0xff]  ;;  %v1569_v56 = vld [vmem:[#allocation4 + $0x18] sm:$0xff]  ;;  %v1592_v34 = vld [vmem:[#allocation4 + $0xd0] sm:$0xff] }
 0x114   :  { %7403 = vmatprep.subr.bf16.mxu1 %v10020_v5  ;;  %6829 = vmatprep.mubr.msk.f32.mxu0 %vm159_vm0, %v1410_v6  ;;  %v1573_v5 = vld [vmem:[#allocation4 + $0x38] sm:$0xff] }
 0x115   :  { %6830 = vmatprep.mubr.msk.f32.mxu1 %vm159_vm0, %v1410_v6  ;;  %v320_v40 = vsub.s32 2, %v10242_v50  ;;  %v1594_v6 = vld [vmem:[#allocation4 + $0xe0] sm:$0xff] }
 0x116   :  { %7365 = vmatpush1.bf16.msra.mxu0 %v10028_v35  ;;  %v1566_v35 = vld [vmem:[#allocation4] sm:$0xff] }
 0x117   :  { %7405 = vmatpush1.bf16.msra.mxu1 %v10032_v41  ;;  %7367 = vmatprep.subr.bf16.mxu0 %v10034_v46  ;;  %v1570_v41 = vld [vmem:[#allocation4 + $0x20] sm:$0xff]  ;;  %v1568_v46 = vld [vmem:[#allocation4 + $0x10] sm:$0xff] }
 0x118   :  { %7407 = vmatprep.subr.bf16.mxu1 %v10037_v53  ;;  %v1572_v53 = vld [vmem:[#allocation4 + $0x30] sm:$0xff] }
 0x11a   :  { %7369 = vmatpush1.bf16.msra.mxu0 %v10042_v60  ;;  %v63_v60 = vld [vmem:[#allocation9] sm:$0x3f] }
 0x11b   :  { %7409 = vmatpush1.bf16.msra.mxu1 %v10046_v61  ;;  %7371 = vmatprep.subr.bf16.mxu0 %v10048_v1  ;;  %v309_v61 = vsub.s32 0, %v10242_v50  ;;  %v1575_v1 = vld [vmem:[#allocation4 + $0x48] sm:$0xff] }
 0x11c   :  { %7411 = vmatprep.subr.bf16.mxu1 %v10051_v9 }
 0x11e   :  { %7373 = vmatpush1.bf16.msra.mxu0 %v10054_v22  ;;  %v1579_v22 = vld [vmem:[#allocation4 + $0x68] sm:$0xff] }
 0x11f   :  { %7413 = vmatpush1.bf16.msra.mxu1 %v10058_v24  ;;  %7375 = vmatprep.subr.bf16.mxu0 %v10060_v27  ;;  %v1577_v24 = vld [vmem:[#allocation4 + $0x58] sm:$0xff]  ;;  %v10269_v10 = vpack.c.bf16 %v1579_v22, %v1575_v1  ;;  %v1598_v1 = vld [vmem:[#allocation4 + $0x100] sm:$0xff]  ;;  %v1600_v22 = vld [vmem:[#allocation4 + $0x110] sm:$0xff] }
 0x120   :  { %7415 = vmatprep.subr.bf16.mxu1 %v10063_v36  ;;  %v1581_v27 = vld [vmem:[#allocation4 + $0x78] sm:$0xff]  ;;  %v10252_v36 = vpack.c.bf16 %v1571_v52, %v1567_v51  ;;  %v1596_v52 = vld [vmem:[#allocation4 + $0xf0] sm:$0xff] }
 0x122   :  { %7377 = vmatpush1.bf16.msra.mxu0 %v10066_v3 }
 0x123   :  { %7417 = vmatpush1.bf16.msra.mxu1 %v10070_v7  ;;  %7379 = vmatprep.subr.bf16.mxu0 %v10072_v8  ;;  %v10257_v8 = vld.sshfl [vmem:[%s11151_s0 + $0x18] sm:$0x33 pattern:$0x76325410] }
 0x124   :  { %7419 = vmatprep.subr.bf16.mxu1 %v10075_v21  ;;  %v10259_v21 = vpack.c.bf16 %v1573_v5, %v1569_v56  ;;  %v1658_v31 = vcombine.high %v10257_v8, %v10257_v8  ;;  %v1599_v56 = vld [vmem:[#allocation4 + $0x108] sm:$0xff] }
 0x125   :  { %v1603_v5 = vld [vmem:[#allocation4 + $0x128] sm:$0xff] }
 0x126   :  { %7381 = vmatpush1.bf16.msra.mxu0 %v10078_v62  ;;  %v10261_v62 = vpack.c.bf16 %v1570_v41, %v1566_v35  ;;  %v1601_v41 = vld [vmem:[#allocation4 + $0x118] sm:$0xff] }
 0x127   :  { %7421 = vmatpush1.bf16.msra.mxu1 %v10082_v63  ;;  %7383 = vmatprep.subr.bf16.mxu0 %v10084_v0  ;;  %v10263_v63 = vpack.c.bf16 %v1572_v53, %v1568_v46  ;;  %v1605_v46 = vld [vmem:[#allocation4 + $0x138] sm:$0xff] }
 0x128   :  { %7423 = vmatprep.subr.bf16.mxu1 %v10087_v23 }
 0x12a   :  { %7385 = vmatpush1.bf16.msra.mxu0 %v10090_v54  ;;  %v1574_v54 = vld [vmem:[#allocation4 + $0x40] sm:$0xff] }
 0x12b   :  { %7425 = vmatpush1.bf16.msra.mxu1 %v10094_v55  ;;  %7387 = vmatprep.subr.bf16.mxu0 %v10096_v57  ;;  %v10266_v57 = vrot.slane %v63_v60, %v309_v61  ;;  %v10282_v45 = vpack.c.bf16 %v1578_v11, %v1574_v54  ;;  %v10321_v61 = vpack.c.bf16 %v1603_v5, %v1599_v56  ;;  %v1606_v11 = vld [vmem:[#allocation4 + $0x140] sm:$0xff]  ;;  %v1624_v5 = vld [vmem:[#allocation4 + $0x1d0] sm:$0xff] }
 0x12c   :  { %7427 = vmatprep.subr.bf16.mxu1 %v10099_v4  ;;  %v315_v4 = vsub.s32 1, %v10242_v50  ;;  %v1626_v56 = vld [vmem:[#allocation4 + $0x1e0] sm:$0xff] }
 0x12e   :  { %7389 = vmatpush1.bf16.msra.mxu0 %v10102_v20  ;;  %v10273_v20 = vpack.c.bf16 %v1581_v27, %v1577_v24  ;;  %v10288_v17 = vrot.slane %v63_v60, %v315_v4  ;;  %v10324_v24 = vpack.c.bf16 %v1605_v46, %v1601_v41  ;;  %v1604_v27 = vld [vmem:[#allocation4 + $0x130] sm:$0xff]  ;;  %v1631_v46 = vld [vmem:[#allocation4 + $0x208] sm:$0xff] }
 0x12f   :  { %7429 = vmatpush1.bf16.msra.mxu1 %v10106_v28  ;;  %7391 = vmatprep.subr.bf16.mxu0 %v10108_v29  ;;  %v1583_v28 = vld [vmem:[#allocation4 + $0x88] sm:$0xff]  ;;  %v1628_v41 = vld [vmem:[#allocation4 + $0x1f0] sm:$0xff] }
 0x130   :  { %7431 = vmatprep.subr.bf16.mxu1 %v10111_v42  ;;  %v1587_v29 = vld [vmem:[#allocation4 + $0xa8] sm:$0xff]  ;;  %v1585_v42 = vld [vmem:[#allocation4 + $0x98] sm:$0xff] }
 0x131   :  { %v10294_v39 = vpack.c.bf16 %v1589_v44, %v1585_v42  ;;  %v1621_v42 = vld [vmem:[#allocation4 + $0x1b8] sm:$0xff]  ;;  %v10339_v44 = vpack.c.bf16 %v1610_v13, %v1606_v11  ;;  %v1632_v11 = vld [vmem:[#allocation4 + $0x210] sm:$0xff] }
 0x132   :  { %7393 = vmatpush1.bf16.msra.mxu0 %v10114_v25  ;;  %v10291_v25 = vpack.c.bf16 %v1587_v29, %v1583_v28  ;;  %v1612_v29 = vld [vmem:[#allocation4 + $0x170] sm:$0xff] }
 0x133   :  { %7433 = vmatpush1.bf16.msra.mxu1 %v10118_v26  ;;  %7395 = vmatprep.subr.bf16.mxu0 %v10120_v30  ;;  %v1582_v26 = vld [vmem:[#allocation4 + $0x80] sm:$0xff] }
 0x134   :  { %7435 = vmatprep.subr.bf16.mxu1 %v10123_v14  ;;  %v1586_v30 = vld [vmem:[#allocation4 + $0xa0] sm:$0xff]  ;;  %v1588_v14 = vld [vmem:[#allocation4 + $0xb0] sm:$0xff] }
 0x135   :  { %v10306_v59 = vpack.c.bf16 %v1588_v14, %v1584_v38  ;;  %v1618_v38 = vld [vmem:[#allocation4 + $0x1a0] sm:$0xff]  ;;  %v1616_v14 = vld [vmem:[#allocation4 + $0x190] sm:$0xff] }
 0x136   :  { %7397 = vmatpush1.bf16.msra.mxu0 %v10126_v32 }
 0x137   :  { %7437 = vmatpush1.bf16.msra.mxu1 %v10130_v33  ;;  %1454 = vmatprep.subr.mxu0 %v10133_v47  ;;  %v228_v9 = vpop.f32.mrb[0].mxu0  ;;  %v10297_v33 = vrot.slane %v63_v60, %v320_v40  ;;  %v1593_v47 = vld [vmem:[#allocation4 + $0xd8] sm:$0xff]  ;;  %v10319_v60 = vpack.c.bf16 %v1596_v52, %v1592_v34  ;;  %v1622_v52 = vld [vmem:[#allocation4 + $0x1c0] sm:$0xff] }
 0x138   :  { %1525 = vmatprep.subr.mxu1 %v10135_v48  ;;  %v299_v3 = vpop.f32.mrb[0].mxu1  ;;  %v230_v7 = vpop.f32.mrb[1].mxu0  ;;  %v1597_v48 = vld [vmem:[#allocation4 + $0xf8] sm:$0xff] }
 0x139   :  { %v304_v0 = vmax.f32 %v228_v9, %v230_v7  ;;  %v301_v23 = vpop.f32.mrb[1].mxu1  ;;  %v10311_v51 = vpack.c.bf16 %v1597_v48, %v1593_v47  ;;  %v1602_v9 = vld [vmem:[#allocation4 + $0x120] sm:$0xff]  ;;  %v1611_v7 = vld [vmem:[#allocation4 + $0x168] sm:$0xff]  ;;  %v1617_v40 = vld [vmem:[#allocation4 + $0x198] sm:$0xff] }
 0x13a   :  { %1455 = vmatpush1.msra.mxu0 %v10140_v49  ;;  %v305_v55 = vmax.f32 %v299_v3, %v301_v23  ;;  %v10301_v49 = vpack.c.bf16 %v1586_v30, %v1582_v26  ;;  %v1607_v3 = vld [vmem:[#allocation4 + $0x148] sm:$0xff]  ;;  %v1613_v23 = vld [vmem:[#allocation4 + $0x178] sm:$0xff]  ;;  %v10327_v54 = vpack.c.bf16 %v1602_v9, %v1598_v1  ;;  %v1614_v30 = vld [vmem:[#allocation4 + $0x180] sm:$0xff]  ;;  %v10348_v15 = vpack.c.bf16 %v1621_v42, %v1617_v40 }
 0x13b   :  { %1526 = vmatpush1.msra.mxu1 %v10143_v58  ;;  %1479 = vmatmul.mubr.f32.vlgmr.msra.gmra.mrb[10].mxu0 %v10199_v43  ;;  %v10333_v4 = vpack.c.bf16 %v1611_v7, %v1607_v3  ;;  %v1627_v47 = vld [vmem:[#allocation4 + $0x1e8] sm:$0xff]  ;;  %v1625_v48 = vld [vmem:[#allocation4 + $0x1d8] sm:$0xff]  ;;  %v10367_v3 = vpack.c.bf16 %v1628_v41, %v1624_v5  ;;  %v10401_v41 = vld [vmem:[#allocation4 + $0x280] sm:$0xff] }
 0x13c   :  { %1550 = vmatmul.mubr.f32.vlgmr.msra.gmra.mrb[10].mxu1 %v10199_v43  ;;  %7439 = vmatprep.subr.bf16.mxu0 %v10252_v36  ;;  %v306_v37 = vmax.f32 %v304_v0, %v305_v55  ;;  %v1590_v43 = vld [vmem:[#allocation4 + $0xc0] sm:$0xff]  ;;  %v1609_v0 = vld [vmem:[#allocation4 + $0x158] sm:$0xff]  ;;  %v10331_v55 = vpack.c.bf16 %v1604_v27, %v1600_v22  ;;  %v1635_v1 = vld [vmem:[#allocation4 + $0x228] sm:$0xff]  ;;  %v10363_v27 = vpack.c.bf16 %v1626_v56, %v1622_v52 }
 0x13d   :  { %7479 = vmatprep.subr.bf16.mxu1 %v10259_v21  ;;  %7441 = vmatpush1.bf16.msra.mxu0 %v10261_v62  ;;  %v10315_v53 = vpack.c.bf16 %v1594_v6, %v1590_v43  ;;  %v10336_v28 = vpack.c.bf16 %v1613_v23, %v1609_v0  ;;  %v10351_v43 = vpack.c.bf16 %v1618_v38, %v1614_v30  ;;  %v1633_v9 = vld [vmem:[#allocation4 + $0x218] sm:$0xff]  ;;  %v1630_v0 = vld [vmem:[#allocation4 + $0x200] sm:$0xff]  ;;  %v10394_v56 = vld [vmem:[#allocation4 + $0x288] sm:$0xff] }
 0x13e   :  { %7481 = vmatpush1.bf16.msra.mxu1 %v10263_v63  ;;  %v311_v16 = vadd.f32 %v10266_v57, %v306_v37  ;;  %7443 = vmatprep.subr.bf16.mxu0 %v10269_v10  ;;  %v1619_v37 = vld [vmem:[#allocation4 + $0x1a8] sm:$0xff]  ;;  %v10355_v6 = vpack.c.bf16 %v1620_v18, %v1616_v14  ;;  %v1637_v22 = vld [vmem:[#allocation4 + $0x238] sm:$0xff]  ;;  %v10369_v7 = vpack.c.bf16 %v1635_v1, %v1631_v46  ;;  %v1634_v23 = vld [vmem:[#allocation4 + $0x220] sm:$0xff] }
 0x13f   :  { %7483 = vmatprep.subr.bf16.mxu1 %v10273_v20  ;;  %6833 = vmatprep.mubr.msk.f32.mxu0 %vm159_vm0, %v1658_v31  ;;  %v10372_v13 = vpack.c.bf16 %v1637_v22, %v1633_v9  ;;  %v1645_v40 = vld [vmem:[#allocation4 + $0x278] sm:$0xff]  ;;  %v10375_v42 = vpack.c.bf16 %v1634_v23, %v1630_v0  ;;  %v1638_v14 = vld [vmem:[#allocation4 + $0x240] sm:$0xff]  ;;  %v10403_v46 = vld [vmem:[#allocation4 + $0x290] sm:$0xff] }
 0x140   :  { %v312_v32 = vmax.f32 %v311_v16, 0.0  ;;  %6834 = vmatprep.mubr.msk.f32.mxu1 %vm159_vm0, %v1658_v31  ;;  %v1615_v31 = vld [vmem:[#allocation4 + $0x188] sm:$0xff]  ;;  %v10343_v16 = vpack.c.bf16 %v1612_v29, %v1608_v19  ;;  %v1636_v19 = vld [vmem:[#allocation4 + $0x230] sm:$0xff]  ;;  %v1642_v18 = vld [vmem:[#allocation4 + $0x260] sm:$0xff] }
 0x141   :  { %7445 = vmatpush1.bf16.msra.mxu0 %v10282_v45  ;;  %v10345_v26 = vpack.c.bf16 %v1619_v37, %v1615_v31  ;;  %v1639_v29 = vld [vmem:[#allocation4 + $0x248] sm:$0xff]  ;;  %v1641_v37 = vld [vmem:[#allocation4 + $0x258] sm:$0xff]  ;;  %v10379_v30 = vpack.c.bf16 %v1636_v19, %v1632_v11 }
 0x142   :  { %v317_v58 = vmul.f32 %v10288_v17, %v312_v32  ;;  %7485 = vmatpush1.bf16.msra.mxu1 %v10284_v12  ;;  %7447 = vmatprep.subr.bf16.mxu0 %v10291_v25  ;;  %v1623_v32 = vld [vmem:[#allocation4 + $0x1c8] sm:$0xff]  ;;  %v10396_v5 = vld [vmem:[#allocation4 + $0x298] sm:$0xff] }
 0x143   :  { %7487 = vmatprep.subr.bf16.mxu1 %v10294_v39  ;;  %v10357_v34 = vpack.c.bf16 %v1627_v47, %v1623_v32  ;;  %v1643_v31 = vld [vmem:[#allocation4 + $0x268] sm:$0xff]  ;;  %v10384_v32 = vpack.c.bf16 %v1645_v40, %v1641_v37  ;;  %v1640_v47 = vld [vmem:[#allocation4 + $0x250] sm:$0xff]  ;;  %v10409_v0 = vld.sshfl [vmem:[%s11151_s0 + $0x1c] sm:$0x33 pattern:$0x76325410] }
 0x144   :  { %v322_v35 = vadd.f32 %v10297_v33, %v317_v58  ;;  %v1629_v58 = vld [vmem:[#allocation4 + $0x1f8] sm:$0xff]  ;;  %v10381_v38 = vpack.c.bf16 %v1643_v31, %v1639_v29  ;;  %v1906_v29 = vcombine.high %v10409_v0, %v10409_v0 }
 0x145   :  { %7449 = vmatpush1.bf16.msra.mxu0 %v10301_v49 }
 0x146   :  { %323 = vst [vmem:[#allocation2] sm:$0x3] %v322_v35  ;;  %7489 = vmatpush1.bf16.msra.mxu1 %v10306_v59  ;;  %7451 = vmatprep.subr.bf16.mxu0 %v10308_v2  ;;  %v10360_v35 = vpack.c.bf16 %v1629_v58, %v1625_v48  ;;  %v1644_v48 = vld [vmem:[#allocation4 + $0x270] sm:$0xff]  ;;  %v10387_v58 = vpack.c.bf16 %v1642_v18, %v1638_v14 }
 0x147   :  { %7491 = vmatprep.subr.bf16.mxu1 %v10311_v51  ;;  %v10391_v52 = vpack.c.bf16 %v1644_v48, %v1640_v47 }
 0x149   :  { %7453 = vmatpush1.bf16.msra.mxu0 %v10315_v53 }
 0x14a   :  { %7493 = vmatpush1.bf16.msra.mxu1 %v10319_v60  ;;  %7455 = vmatprep.subr.bf16.mxu0 %v10321_v61 }
 0x14b   :  { %7495 = vmatprep.subr.bf16.mxu1 %v10324_v24 }
 0x14d   :  { %7457 = vmatpush1.bf16.msra.mxu0 %v10327_v54 }
 0x14e   :  { %7497 = vmatpush1.bf16.msra.mxu1 %v10331_v55  ;;  %7459 = vmatprep.subr.bf16.mxu0 %v10333_v4 }
 0x14f   :  { %7499 = vmatprep.subr.bf16.mxu1 %v10336_v28 }
 0x151   :  { %7461 = vmatpush1.bf16.msra.mxu0 %v10339_v44 }
 0x152   :  { %7501 = vmatpush1.bf16.msra.mxu1 %v10343_v16  ;;  %7463 = vmatprep.subr.bf16.mxu0 %v10345_v26 }
 0x153   :  { %7503 = vmatprep.subr.bf16.mxu1 %v10348_v15 }
 0x155   :  { %7465 = vmatpush1.bf16.msra.mxu0 %v10351_v43 }
 0x156   :  { %7505 = vmatpush1.bf16.msra.mxu1 %v10355_v6  ;;  %7467 = vmatprep.subr.bf16.mxu0 %v10357_v34 }
 0x157   :  { %7507 = vmatprep.subr.bf16.mxu1 %v10360_v35 }
 0x159   :  { %7469 = vmatpush1.bf16.msra.mxu0 %v10363_v27 }
 0x15a   :  { %7509 = vmatpush1.bf16.msra.mxu1 %v10367_v3  ;;  %7471 = vmatprep.subr.bf16.mxu0 %v10369_v7 }
 0x15b   :  { %7511 = vmatprep.subr.bf16.mxu1 %v10372_v13 }
 0x15d   :  { %7473 = vmatpush1.bf16.msra.mxu0 %v10375_v42 }
 0x15e   :  { %7513 = vmatpush1.bf16.msra.mxu1 %v10379_v30  ;;  %7475 = vmatprep.subr.bf16.mxu0 %v10381_v38 }
 0x15f   :  { %7515 = vmatprep.subr.bf16.mxu1 %v10384_v32 }
 0x161   :  { %7477 = vmatpush1.bf16.msra.mxu0 %v10387_v58 }
 0x162   :  { %7517 = vmatpush1.bf16.msra.mxu1 %v10391_v52  ;;  %1702 = vmatprep.subr.mxu0 %v10394_v56  ;;  %v488_v1 = vpop.f32.mrb[2].mxu0 }
 0x163   :  { %1773 = vmatprep.subr.mxu1 %v10396_v5  ;;  %v559_v9 = vpop.f32.mrb[2].mxu1  ;;  %v490_v22 = vpop.f32.mrb[3].mxu0 }
 0x164   :  { %v564_v23 = vmax.f32 %v488_v1, %v490_v22  ;;  %v561_v11 = vpop.f32.mrb[3].mxu1  ;;  %v10467_v1 = vld.sshfl [vmem:[%s11151_s0 + $0x20] sm:$0x33 pattern:$0x76325410] }
 0x165   :  { %1703 = vmatpush1.msra.mxu0 %v10401_v41  ;;  %v565_v19 = vmax.f32 %v559_v9, %v561_v11  ;;  %v2154_v11 = vcombine.high %v10467_v1, %v10467_v1 }
 0x166   :  { %1774 = vmatpush1.msra.mxu1 %v10403_v46  ;;  %1727 = vmatmul.mubr.f32.vlgmr.msra.gmra.mrb[12].mxu0 %v10257_v8 }
 0x167   :  { %1798 = vmatmul.mubr.f32.vlgmr.msra.gmra.mrb[12].mxu1 %v10257_v8  ;;  %7519 = vmatprep.subr.bf16.mxu0 %v10252_v36  ;;  %v566_v31 = vmax.f32 %v564_v23, %v565_v19 }
 0x168   :  { %7559 = vmatprep.subr.bf16.mxu1 %v10259_v21  ;;  %7521 = vmatpush1.bf16.msra.mxu0 %v10261_v62 }
 0x169   :  { %7561 = vmatpush1.bf16.msra.mxu1 %v10263_v63  ;;  %v567_v37 = vadd.f32 %v566_v31, %v10266_v57  ;;  %7523 = vmatprep.subr.bf16.mxu0 %v10269_v10 }
 0x16a   :  { %7563 = vmatprep.subr.bf16.mxu1 %v10273_v20  ;;  %6837 = vmatprep.mubr.msk.f32.mxu0 %vm159_vm0, %v1906_v29 }
 0x16b   :  { %v568_v40 = vmax.f32 %v567_v37, 0.0  ;;  %6838 = vmatprep.mubr.msk.f32.mxu1 %vm159_vm0, %v1906_v29  ;;  %v2332_v37 = vld [vmem:[#allocation4 + $0xb0] sm:$0xff] }
 0x16c   :  { %7525 = vmatpush1.bf16.msra.mxu0 %v10282_v45 }
 0x16d   :  { %v569_v8 = vmul.f32 %v568_v40, %v10288_v17  ;;  %7565 = vmatpush1.bf16.msra.mxu1 %v10284_v12  ;;  %7527 = vmatprep.subr.bf16.mxu0 %v10291_v25  ;;  %v2335_v40 = vld [vmem:[#allocation4 + $0xc8] sm:$0xff] }
 0x16e   :  { %7567 = vmatprep.subr.bf16.mxu1 %v10294_v39 }
 0x16f   :  { %v570_v14 = vadd.f32 %v569_v8, %v10297_v33  ;;  %v2339_v8 = vld [vmem:[#allocation4 + $0xe8] sm:$0xff] }
 0x170   :  { %7529 = vmatpush1.bf16.msra.mxu0 %v10301_v49 }
 0x171   :  { %571 = vst [vmem:[#allocation2 + $0x2] sm:$0x3] %v570_v14  ;;  %7569 = vmatpush1.bf16.msra.mxu1 %v10306_v59  ;;  %7531 = vmatprep.subr.bf16.mxu0 %v10308_v2 }
 0x172   :  { %7571 = vmatprep.subr.bf16.mxu1 %v10311_v51 }
 0x174   :  { %7533 = vmatpush1.bf16.msra.mxu0 %v10315_v53 }
 0x175   :  { %7573 = vmatpush1.bf16.msra.mxu1 %v10319_v60  ;;  %7535 = vmatprep.subr.bf16.mxu0 %v10321_v61 }
 0x176   :  { %7575 = vmatprep.subr.bf16.mxu1 %v10324_v24 }
 0x178   :  { %7537 = vmatpush1.bf16.msra.mxu0 %v10327_v54 }
 0x179   :  { %7577 = vmatpush1.bf16.msra.mxu1 %v10331_v55  ;;  %7539 = vmatprep.subr.bf16.mxu0 %v10333_v4 }
 0x17a   :  { %7579 = vmatprep.subr.bf16.mxu1 %v10336_v28 }
 0x17c   :  { %7541 = vmatpush1.bf16.msra.mxu0 %v10339_v44 }
 0x17d   :  { %7581 = vmatpush1.bf16.msra.mxu1 %v10343_v16  ;;  %7543 = vmatprep.subr.bf16.mxu0 %v10345_v26 }
 0x17e   :  { %7583 = vmatprep.subr.bf16.mxu1 %v10348_v15 }
 0x180   :  { %7545 = vmatpush1.bf16.msra.mxu0 %v10351_v43 }
 0x181   :  { %7585 = vmatpush1.bf16.msra.mxu1 %v10355_v6  ;;  %7547 = vmatprep.subr.bf16.mxu0 %v10357_v34 }
 0x182   :  { %7587 = vmatprep.subr.bf16.mxu1 %v10360_v35 }
 0x184   :  { %7549 = vmatpush1.bf16.msra.mxu0 %v10363_v27 }
 0x185   :  { %7589 = vmatpush1.bf16.msra.mxu1 %v10367_v3  ;;  %7551 = vmatprep.subr.bf16.mxu0 %v10369_v7 }
 0x186   :  { %7591 = vmatprep.subr.bf16.mxu1 %v10372_v13 }
 0x188   :  { %7553 = vmatpush1.bf16.msra.mxu0 %v10375_v42 }
 0x189   :  { %7593 = vmatpush1.bf16.msra.mxu1 %v10379_v30  ;;  %7555 = vmatprep.subr.bf16.mxu0 %v10381_v38 }
 0x18a   :  { %7595 = vmatprep.subr.bf16.mxu1 %v10384_v32 }
 0x18c   :  { %7557 = vmatpush1.bf16.msra.mxu0 %v10387_v58 }
 0x18d   :  { %7597 = vmatpush1.bf16.msra.mxu1 %v10391_v52  ;;  %1950 = vmatprep.subr.mxu0 %v10394_v56  ;;  %v736_v18 = vpop.f32.mrb[4].mxu0 }
 0x18e   :  { %2021 = vmatprep.subr.mxu1 %v10396_v5  ;;  %v807_v47 = vpop.f32.mrb[4].mxu1  ;;  %v738_v48 = vpop.f32.mrb[5].mxu0 }
 0x18f   :  { %v812_v9 = vmax.f32 %v736_v18, %v738_v48  ;;  %v809_v22 = vpop.f32.mrb[5].mxu1  ;;  %v2337_v18 = vld [vmem:[#allocation4 + $0xd8] sm:$0xff] }
 0x190   :  { %1951 = vmatpush1.msra.mxu0 %v10401_v41  ;;  %v813_v23 = vmax.f32 %v807_v47, %v809_v22  ;;  %v2341_v47 = vld [vmem:[#allocation4 + $0xf8] sm:$0xff]  ;;  %v10570_v22 = vpack.c.bf16 %v2339_v8, %v2335_v40  ;;  %v2364_v8 = vld [vmem:[#allocation4 + $0x1b0] sm:$0xff] }
 0x191   :  { %2022 = vmatpush1.msra.mxu1 %v10403_v46  ;;  %1975 = vmatmul.mubr.f32.vlgmr.msra.gmra.mrb[14].mxu0 %v10409_v0 }
 0x192   :  { %2046 = vmatmul.mubr.f32.vlgmr.msra.gmra.mrb[14].mxu1 %v10409_v0  ;;  %7599 = vmatprep.subr.bf16.mxu0 %v10252_v36  ;;  %v814_v19 = vmax.f32 %v812_v9, %v813_v23  ;;  %v2334_v23 = vld [vmem:[#allocation4 + $0xc0] sm:$0xff] }
 0x193   :  { %7639 = vmatprep.subr.bf16.mxu1 %v10259_v21  ;;  %7601 = vmatpush1.bf16.msra.mxu0 %v10261_v62  ;;  %v2311_v62 = vld [vmem:[#allocation4 + $0x8] sm:$0xff] }
 0x194   :  { %7641 = vmatpush1.bf16.msra.mxu1 %v10263_v63  ;;  %v815_v29 = vadd.f32 %v814_v19, %v10266_v57  ;;  %7603 = vmatprep.subr.bf16.mxu0 %v10269_v10  ;;  %v2315_v63 = vld [vmem:[#allocation4 + $0x28] sm:$0xff]  ;;  %v2313_v10 = vld [vmem:[#allocation4 + $0x18] sm:$0xff]  ;;  %v2336_v19 = vld [vmem:[#allocation4 + $0xd0] sm:$0xff] }
 0x195   :  { %7643 = vmatprep.subr.bf16.mxu1 %v10273_v20  ;;  %6841 = vmatprep.mubr.msk.f32.mxu0 %vm159_vm0, %v2154_v11  ;;  %v2317_v20 = vld [vmem:[#allocation4 + $0x38] sm:$0xff] }
 0x196   :  { %v816_v31 = vmax.f32 %v815_v29, 0.0  ;;  %6842 = vmatprep.mubr.msk.f32.mxu1 %vm159_vm0, %v2154_v11  ;;  %v2338_v11 = vld [vmem:[#allocation4 + $0xe0] sm:$0xff]  ;;  %v10573_v29 = vpack.c.bf16 %v2341_v47, %v2337_v18  ;;  %v2371_v18 = vld [vmem:[#allocation4 + $0x1e8] sm:$0xff]  ;;  %v2369_v47 = vld [vmem:[#allocation4 + $0x1d8] sm:$0xff] }
 0x197   :  { %7605 = vmatpush1.bf16.msra.mxu0 %v10282_v45  ;;  %v2310_v45 = vld [vmem:[#allocation4] sm:$0xff] }
 0x198   :  { %v817_v36 = vmul.f32 %v816_v31, %v10288_v17  ;;  %7645 = vmatpush1.bf16.msra.mxu1 %v10284_v12  ;;  %7607 = vmatprep.subr.bf16.mxu0 %v10291_v25  ;;  %v2314_v12 = vld [vmem:[#allocation4 + $0x20] sm:$0xff]  ;;  %v2312_v25 = vld [vmem:[#allocation4 + $0x10] sm:$0xff] }
 0x199   :  { %7647 = vmatprep.subr.bf16.mxu1 %v10294_v39  ;;  %v2316_v39 = vld [vmem:[#allocation4 + $0x30] sm:$0xff] }
 0x19a   :  { %v818_v21 = vadd.f32 %v817_v36, %v10297_v33  ;;  %v2340_v31 = vld [vmem:[#allocation4 + $0xf0] sm:$0xff]  ;;  %v2343_v36 = vld [vmem:[#allocation4 + $0x108] sm:$0xff] }
 0x19b   :  { %7609 = vmatpush1.bf16.msra.mxu0 %v10301_v49  ;;  %v2319_v49 = vld [vmem:[#allocation4 + $0x48] sm:$0xff] }
 0x19c   :  { %819 = vst [vmem:[#allocation2 + $0x4] sm:$0x3] %v818_v21  ;;  %7649 = vmatpush1.bf16.msra.mxu1 %v10306_v59  ;;  %7611 = vmatprep.subr.bf16.mxu0 %v10308_v2  ;;  %v2323_v2 = vld [vmem:[#allocation4 + $0x68] sm:$0xff] }
 0x19d   :  { %7651 = vmatprep.subr.bf16.mxu1 %v10311_v51  ;;  %v2321_v51 = vld [vmem:[#allocation4 + $0x58] sm:$0xff]  ;;  %v2347_v21 = vld [vmem:[#allocation4 + $0x128] sm:$0xff] }
 0x19f   :  { %7613 = vmatpush1.bf16.msra.mxu0 %v10315_v53  ;;  %v2325_v53 = vld [vmem:[#allocation4 + $0x78] sm:$0xff] }
 0x1a0   :  { %7653 = vmatpush1.bf16.msra.mxu1 %v10319_v60  ;;  %7615 = vmatprep.subr.bf16.mxu0 %v10321_v61  ;;  %v10522_v60 = vpack.c.bf16 %v2315_v63, %v2311_v62  ;;  %v2345_v63 = vld [vmem:[#allocation4 + $0x118] sm:$0xff] }
 0x1a1   :  { %7655 = vmatprep.subr.bf16.mxu1 %v10324_v24 }
 0x1a3   :  { %7617 = vmatpush1.bf16.msra.mxu0 %v10327_v54  ;;  %v10527_v54 = vld.sshfl [vmem:[%s11151_s0 + $0x24] sm:$0x33 pattern:$0x76325410] }
 0x1a4   :  { %7657 = vmatpush1.bf16.msra.mxu1 %v10331_v55  ;;  %7619 = vmatprep.subr.bf16.mxu0 %v10333_v4  ;;  %v10529_v55 = vpack.c.bf16 %v2317_v20, %v2313_v10  ;;  %v10531_v4 = vpack.c.bf16 %v2314_v12, %v2310_v45  ;;  %v2349_v10 = vld [vmem:[#allocation4 + $0x138] sm:$0xff]  ;;  %v10577_v20 = vpack.c.bf16 %v2338_v11, %v2334_v23 }
 0x1a5   :  { %7659 = vmatprep.subr.bf16.mxu1 %v10336_v28  ;;  %v10581_v45 = vpack.c.bf16 %v2340_v31, %v2336_v19  ;;  %v10583_v12 = vpack.c.bf16 %v2347_v21, %v2343_v36  ;;  %v2366_v31 = vld [vmem:[#allocation4 + $0x1c0] sm:$0xff]  ;;  %v2368_v21 = vld [vmem:[#allocation4 + $0x1d0] sm:$0xff] }
 0x1a6   :  { %v2370_v36 = vld [vmem:[#allocation4 + $0x1e0] sm:$0xff] }
 0x1a7   :  { %7621 = vmatpush1.bf16.msra.mxu0 %v10339_v44 }
 0x1a8   :  { %7661 = vmatpush1.bf16.msra.mxu1 %v10343_v16  ;;  %7623 = vmatprep.subr.bf16.mxu0 %v10345_v26  ;;  %v10534_v16 = vpack.c.bf16 %v2316_v39, %v2312_v25  ;;  %v2342_v25 = vld [vmem:[#allocation4 + $0x100] sm:$0xff] }
 0x1a9   :  { %7663 = vmatprep.subr.bf16.mxu1 %v10348_v15  ;;  %v10536_v15 = vpack.c.bf16 %v2323_v2, %v2319_v49  ;;  %v2346_v39 = vld [vmem:[#allocation4 + $0x120] sm:$0xff]  ;;  %v2344_v49 = vld [vmem:[#allocation4 + $0x110] sm:$0xff] }
 0x1aa   :  { %v2348_v2 = vld [vmem:[#allocation4 + $0x130] sm:$0xff] }
 0x1ab   :  { %7625 = vmatpush1.bf16.msra.mxu0 %v10351_v43  ;;  %v2318_v43 = vld [vmem:[#allocation4 + $0x40] sm:$0xff] }
 0x1ac   :  { %7665 = vmatpush1.bf16.msra.mxu1 %v10355_v6  ;;  %7627 = vmatprep.subr.bf16.mxu0 %v10357_v34  ;;  %v2322_v6 = vld [vmem:[#allocation4 + $0x60] sm:$0xff]  ;;  %v2320_v34 = vld [vmem:[#allocation4 + $0x50] sm:$0xff] }
 0x1ad   :  { %7667 = vmatprep.subr.bf16.mxu1 %v10360_v35  ;;  %v10540_v35 = vpack.c.bf16 %v2325_v53, %v2321_v51  ;;  %v2351_v51 = vld [vmem:[#allocation4 + $0x148] sm:$0xff] }
 0x1ae   :  { %v2355_v53 = vld [vmem:[#allocation4 + $0x168] sm:$0xff] }
 0x1af   :  { %7629 = vmatpush1.bf16.msra.mxu0 %v10363_v27  ;;  %v2324_v27 = vld [vmem:[#allocation4 + $0x70] sm:$0xff] }
 0x1b0   :  { %7669 = vmatpush1.bf16.msra.mxu1 %v10367_v3  ;;  %7631 = vmatprep.subr.bf16.mxu0 %v10369_v7  ;;  %v2327_v3 = vld [vmem:[#allocation4 + $0x88] sm:$0xff] }
 0x1b1   :  { %7671 = vmatprep.subr.bf16.mxu1 %v10372_v13  ;;  %v2331_v7 = vld [vmem:[#allocation4 + $0xa8] sm:$0xff]  ;;  %v2402_v13 = vcombine.high %v10527_v54, %v10527_v54 }
 0x1b3   :  { %7633 = vmatpush1.bf16.msra.mxu0 %v10375_v42 }
 0x1b4   :  { %7673 = vmatpush1.bf16.msra.mxu1 %v10379_v30  ;;  %7635 = vmatprep.subr.bf16.mxu0 %v10381_v38  ;;  %v2329_v30 = vld [vmem:[#allocation4 + $0x98] sm:$0xff] }
 0x1b5   :  { %7675 = vmatprep.subr.bf16.mxu1 %v10384_v32  ;;  %v2333_v38 = vld [vmem:[#allocation4 + $0xb8] sm:$0xff]  ;;  %v10548_v32 = vpack.c.bf16 %v2322_v6, %v2318_v43  ;;  %v2350_v43 = vld [vmem:[#allocation4 + $0x140] sm:$0xff] }
 0x1b6   :  { %v10558_v0 = vpack.c.bf16 %v2333_v38, %v2329_v30  ;;  %v2354_v6 = vld [vmem:[#allocation4 + $0x160] sm:$0xff]  ;;  %v2365_v30 = vld [vmem:[#allocation4 + $0x1b8] sm:$0xff] }
 0x1b7   :  { %7637 = vmatpush1.bf16.msra.mxu0 %v10387_v58  ;;  %v10601_v38 = vpack.c.bf16 %v2354_v6, %v2350_v43  ;;  %v2376_v43 = vld [vmem:[#allocation4 + $0x210] sm:$0xff] }
 0x1b8   :  { %7677 = vmatpush1.bf16.msra.mxu1 %v10391_v52  ;;  %2198 = vmatprep.subr.mxu0 %v10394_v56  ;;  %v984_v59 = vpop.f32.mrb[6].mxu0  ;;  %v10553_v52 = vpack.c.bf16 %v2324_v27, %v2320_v34  ;;  %v10555_v56 = vpack.c.bf16 %v2331_v7, %v2327_v3  ;;  %v2352_v34 = vld [vmem:[#allocation4 + $0x150] sm:$0xff]  ;;  %v2359_v7 = vld [vmem:[#allocation4 + $0x188] sm:$0xff] }
 0x1b9   :  { %2269 = vmatprep.subr.mxu1 %v10396_v5  ;;  %v1055_v61 = vpop.f32.mrb[6].mxu1  ;;  %v986_v24 = vpop.f32.mrb[7].mxu0  ;;  %v2326_v5 = vld [vmem:[#allocation4 + $0x80] sm:$0xff]  ;;  %v2356_v3 = vld [vmem:[#allocation4 + $0x170] sm:$0xff] }
 0x1ba   :  { %v1060_v28 = vmax.f32 %v984_v59, %v986_v24  ;;  %v1057_v44 = vpop.f32.mrb[7].mxu1  ;;  %v10586_v59 = vpack.c.bf16 %v2349_v10, %v2345_v63  ;;  %v2357_v24 = vld [vmem:[#allocation4 + $0x178] sm:$0xff]  ;;  %v2372_v63 = vld [vmem:[#allocation4 + $0x1f0] sm:$0xff]  ;;  %v2375_v10 = vld [vmem:[#allocation4 + $0x208] sm:$0xff] }
 0x1bb   :  { %2199 = vmatpush1.msra.mxu0 %v10401_v41  ;;  %v1061_v26 = vmax.f32 %v1055_v61, %v1057_v44  ;;  %v2330_v41 = vld [vmem:[#allocation4 + $0xa0] sm:$0xff]  ;;  %v2353_v61 = vld [vmem:[#allocation4 + $0x158] sm:$0xff]  ;;  %v10593_v44 = vpack.c.bf16 %v2348_v2, %v2344_v49  ;;  %v10625_v2 = vpack.c.bf16 %v2370_v36, %v2366_v31  ;;  %v10656_v36 = vld [vmem:[#allocation4 + $0x288] sm:$0xff] }
 0x1bc   :  { %2270 = vmatpush1.msra.mxu1 %v10403_v46  ;;  %2223 = vmatmul.mubr.f32.vlgmr.msra.gmra.mrb[16].mxu0 %v10467_v1  ;;  %v2328_v46 = vld [vmem:[#allocation4 + $0x90] sm:$0xff]  ;;  %v10563_v48 = vpack.c.bf16 %v2330_v41, %v2326_v5  ;;  %v10598_v27 = vpack.c.bf16 %v2357_v24, %v2353_v61  ;;  %v2358_v41 = vld [vmem:[#allocation4 + $0x180] sm:$0xff]  ;;  %v2381_v49 = vld [vmem:[#allocation4 + $0x238] sm:$0xff] }
 0x1bd   :  { %2294 = vmatmul.mubr.f32.vlgmr.msra.gmra.mrb[16].mxu1 %v10467_v1  ;;  %7679 = vmatprep.subr.bf16.mxu0 %v10522_v60  ;;  %v1062_v42 = vmax.f32 %v1060_v28, %v1061_v26  ;;  %v10568_v9 = vpack.c.bf16 %v2332_v37, %v2328_v46  ;;  %v10589_v28 = vpack.c.bf16 %v2346_v39, %v2342_v25  ;;  %v2362_v46 = vld [vmem:[#allocation4 + $0x1a0] sm:$0xff]  ;;  %v2360_v37 = vld [vmem:[#allocation4 + $0x190] sm:$0xff]  ;;  %v2379_v25 = vld [vmem:[#allocation4 + $0x228] sm:$0xff] }
 0x1be   :  { %7719 = vmatprep.subr.bf16.mxu1 %v10529_v55  ;;  %7681 = vmatpush1.bf16.msra.mxu0 %v10531_v4  ;;  %v10595_v26 = vpack.c.bf16 %v2355_v53, %v2351_v51  ;;  %v10613_v23 = vpack.c.bf16 %v2362_v46, %v2358_v41  ;;  %v10617_v11 = vpack.c.bf16 %v2364_v8, %v2360_v37  ;;  %v2377_v39 = vld [vmem:[#allocation4 + $0x218] sm:$0xff]  ;;  %v2374_v61 = vld [vmem:[#allocation4 + $0x200] sm:$0xff] }
 0x1bf   :  { %7721 = vmatpush1.bf16.msra.mxu1 %v10534_v16  ;;  %v1063_v58 = vadd.f32 %v1062_v42, %v10266_v57  ;;  %7683 = vmatprep.subr.bf16.mxu0 %v10536_v15  ;;  %v2361_v42 = vld [vmem:[#allocation4 + $0x198] sm:$0xff]  ;;  %v10629_v51 = vpack.c.bf16 %v2372_v63, %v2368_v21  ;;  %v10631_v53 = vpack.c.bf16 %v2379_v25, %v2375_v10  ;;  %v2378_v24 = vld [vmem:[#allocation4 + $0x220] sm:$0xff]  ;;  %v10665_v10 = vld [vmem:[#allocation4 + $0x290] sm:$0xff] }
 0x1c0   :  { %7723 = vmatprep.subr.bf16.mxu1 %v10540_v35  ;;  %6845 = vmatprep.mubr.msk.f32.mxu0 %vm159_vm0, %v2402_v13  ;;  %v10610_v40 = vpack.c.bf16 %v2365_v30, %v2361_v42  ;;  %v10634_v6 = vpack.c.bf16 %v2381_v49, %v2377_v39  ;;  %v2389_v42 = vld [vmem:[#allocation4 + $0x278] sm:$0xff]  ;;  %v10637_v30 = vpack.c.bf16 %v2378_v24, %v2374_v61  ;;  %v2382_v37 = vld [vmem:[#allocation4 + $0x240] sm:$0xff]  ;;  %v10671_v61 = vld.sshfl [vmem:[%s11151_s0 + $0x28] sm:$0x33 pattern:$0x76325410] }
 0x1c1   :  { %v1064_v14 = vmax.f32 %v1063_v58, 0.0  ;;  %6846 = vmatprep.mubr.msk.f32.mxu1 %vm159_vm0, %v2402_v13  ;;  %v2363_v13 = vld [vmem:[#allocation4 + $0x1a8] sm:$0xff]  ;;  %v10605_v58 = vpack.c.bf16 %v2356_v3, %v2352_v34  ;;  %v2380_v34 = vld [vmem:[#allocation4 + $0x230] sm:$0xff]  ;;  %v2386_v8 = vld [vmem:[#allocation4 + $0x260] sm:$0xff] }
 0x1c2   :  { %7685 = vmatpush1.bf16.msra.mxu0 %v10548_v32  ;;  %v10607_v5 = vpack.c.bf16 %v2363_v13, %v2359_v7  ;;  %v2383_v3 = vld [vmem:[#allocation4 + $0x248] sm:$0xff]  ;;  %v2385_v13 = vld [vmem:[#allocation4 + $0x258] sm:$0xff]  ;;  %v10641_v41 = vpack.c.bf16 %v2380_v34, %v2376_v43  ;;  %v10663_v63 = vld [vmem:[#allocation4 + $0x280] sm:$0xff] }
 0x1c3   :  { %v1065_v1 = vmul.f32 %v1064_v14, %v10288_v17  ;;  %7725 = vmatpush1.bf16.msra.mxu1 %v10553_v52  ;;  %7687 = vmatprep.subr.bf16.mxu0 %v10555_v56  ;;  %v2367_v14 = vld [vmem:[#allocation4 + $0x1c8] sm:$0xff]  ;;  %v10658_v21 = vld [vmem:[#allocation4 + $0x298] sm:$0xff] }
 0x1c4   :  { %7727 = vmatprep.subr.bf16.mxu1 %v10558_v0  ;;  %v10619_v19 = vpack.c.bf16 %v2371_v18, %v2367_v14  ;;  %v2387_v7 = vld [vmem:[#allocation4 + $0x268] sm:$0xff]  ;;  %v10646_v14 = vpack.c.bf16 %v2389_v42, %v2385_v13  ;;  %v2384_v18 = vld [vmem:[#allocation4 + $0x250] sm:$0xff] }
 0x1c5   :  { %v1066_v62 = vadd.f32 %v1065_v1, %v10297_v33  ;;  %v2373_v1 = vld [vmem:[#allocation4 + $0x1f8] sm:$0xff]  ;;  %v10643_v46 = vpack.c.bf16 %v2387_v7, %v2383_v3  ;;  %v2650_v3 = vcombine.high %v10671_v61, %v10671_v61 }
 0x1c6   :  { %7689 = vmatpush1.bf16.msra.mxu0 %v10563_v48 }
 0x1c7   :  { %1067 = vst [vmem:[#allocation2 + $0x6] sm:$0x3] %v1066_v62  ;;  %7729 = vmatpush1.bf16.msra.mxu1 %v10568_v9  ;;  %7691 = vmatprep.subr.bf16.mxu0 %v10570_v22  ;;  %v10622_v62 = vpack.c.bf16 %v2373_v1, %v2369_v47  ;;  %v2388_v47 = vld [vmem:[#allocation4 + $0x270] sm:$0xff]  ;;  %v10649_v1 = vpack.c.bf16 %v2386_v8, %v2382_v37 }
 0x1c8   :  { %7731 = vmatprep.subr.bf16.mxu1 %v10573_v29  ;;  %v10653_v31 = vpack.c.bf16 %v2388_v47, %v2384_v18 }
 0x1ca   :  { %7693 = vmatpush1.bf16.msra.mxu0 %v10577_v20 }
 0x1cb   :  { %7733 = vmatpush1.bf16.msra.mxu1 %v10581_v45  ;;  %7695 = vmatprep.subr.bf16.mxu0 %v10583_v12 }
 0x1cc   :  { %7735 = vmatprep.subr.bf16.mxu1 %v10586_v59 }
 0x1ce   :  { %7697 = vmatpush1.bf16.msra.mxu0 %v10589_v28 }
 0x1cf   :  { %7737 = vmatpush1.bf16.msra.mxu1 %v10593_v44  ;;  %7699 = vmatprep.subr.bf16.mxu0 %v10595_v26 }
 0x1d0   :  { %7739 = vmatprep.subr.bf16.mxu1 %v10598_v27 }
 0x1d2   :  { %7701 = vmatpush1.bf16.msra.mxu0 %v10601_v38 }
 0x1d3   :  { %7741 = vmatpush1.bf16.msra.mxu1 %v10605_v58  ;;  %7703 = vmatprep.subr.bf16.mxu0 %v10607_v5 }
 0x1d4   :  { %7743 = vmatprep.subr.bf16.mxu1 %v10610_v40 }
 0x1d6   :  { %7705 = vmatpush1.bf16.msra.mxu0 %v10613_v23 }
 0x1d7   :  { %7745 = vmatpush1.bf16.msra.mxu1 %v10617_v11  ;;  %7707 = vmatprep.subr.bf16.mxu0 %v10619_v19 }
 0x1d8   :  { %7747 = vmatprep.subr.bf16.mxu1 %v10622_v62 }
 0x1da   :  { %7709 = vmatpush1.bf16.msra.mxu0 %v10625_v2 }
 0x1db   :  { %7749 = vmatpush1.bf16.msra.mxu1 %v10629_v51  ;;  %7711 = vmatprep.subr.bf16.mxu0 %v10631_v53 }
 0x1dc   :  { %7751 = vmatprep.subr.bf16.mxu1 %v10634_v6 }
 0x1de   :  { %7713 = vmatpush1.bf16.msra.mxu0 %v10637_v30 }
 0x1df   :  { %7753 = vmatpush1.bf16.msra.mxu1 %v10641_v41  ;;  %7715 = vmatprep.subr.bf16.mxu0 %v10643_v46 }
 0x1e0   :  { %7755 = vmatprep.subr.bf16.mxu1 %v10646_v14 }
 0x1e2   :  { %7717 = vmatpush1.bf16.msra.mxu0 %v10649_v1 }
 0x1e3   :  { %7757 = vmatpush1.bf16.msra.mxu1 %v10653_v31  ;;  %2446 = vmatprep.subr.mxu0 %v10656_v36  ;;  %v1232_v25 = vpop.f32.mrb[8].mxu0 }
 0x1e4   :  { %2517 = vmatprep.subr.mxu1 %v10658_v21  ;;  %v1303_v39 = vpop.f32.mrb[8].mxu1  ;;  %v1234_v49 = vpop.f32.mrb[9].mxu0 }
 0x1e5   :  { %v1308_v24 = vmax.f32 %v1232_v25, %v1234_v49  ;;  %v1305_v43 = vpop.f32.mrb[9].mxu1  ;;  %v10729_v25 = vld.sshfl [vmem:[%s11151_s0 + $0x2c] sm:$0x33 pattern:$0x76325410] }
 0x1e6   :  { %2447 = vmatpush1.msra.mxu0 %v10663_v63  ;;  %v1309_v34 = vmax.f32 %v1303_v39, %v1305_v43  ;;  %v2898_v43 = vcombine.high %v10729_v25, %v10729_v25 }
 0x1e7   :  { %2518 = vmatpush1.msra.mxu1 %v10665_v10  ;;  %2471 = vmatmul.mubr.f32.vlgmr.msra.gmra.mrb[18].mxu0 %v10527_v54 }
 0x1e8   :  { %2542 = vmatmul.mubr.f32.vlgmr.msra.gmra.mrb[18].mxu1 %v10527_v54  ;;  %7759 = vmatprep.subr.bf16.mxu0 %v10522_v60  ;;  %v1310_v7 = vmax.f32 %v1308_v24, %v1309_v34 }
 0x1e9   :  { %7799 = vmatprep.subr.bf16.mxu1 %v10529_v55  ;;  %7761 = vmatpush1.bf16.msra.mxu0 %v10531_v4 }
 0x1ea   :  { %7801 = vmatpush1.bf16.msra.mxu1 %v10534_v16  ;;  %v1311_v13 = vadd.f32 %v1310_v7, %v10266_v57  ;;  %7763 = vmatprep.subr.bf16.mxu0 %v10536_v15 }
 0x1eb   :  { %7803 = vmatprep.subr.bf16.mxu1 %v10540_v35  ;;  %6849 = vmatprep.mubr.msk.f32.mxu0 %vm159_vm0, %v2650_v3 }
 0x1ec   :  { %v1312_v42 = vmax.f32 %v1311_v13, 0.0  ;;  %6850 = vmatprep.mubr.msk.f32.mxu1 %vm159_vm0, %v2650_v3 }
 0x1ed   :  { %7765 = vmatpush1.bf16.msra.mxu0 %v10548_v32 }
 0x1ee   :  { %v1313_v54 = vmul.f32 %v1312_v42, %v10288_v17  ;;  %7805 = vmatpush1.bf16.msra.mxu1 %v10553_v52  ;;  %7767 = vmatprep.subr.bf16.mxu0 %v10555_v56  ;;  %v3070_v42 = vld [vmem:[#allocation7 + $0x80] sm:$0xff] }
 0x1ef   :  { %7807 = vmatprep.subr.bf16.mxu1 %v10558_v0 }
 0x1f0   :  { %v1314_v37 = vadd.f32 %v1313_v54, %v10297_v33  ;;  %v3074_v54 = vld [vmem:[#allocation7 + $0xa0] sm:$0xff] }
 0x1f1   :  { %7769 = vmatpush1.bf16.msra.mxu0 %v10563_v48 }
 0x1f2   :  { %1315 = vst [vmem:[#allocation2 + $0x8] sm:$0x3] %v1314_v37  ;;  %7809 = vmatpush1.bf16.msra.mxu1 %v10568_v9  ;;  %7771 = vmatprep.subr.bf16.mxu0 %v10570_v22  ;;  %v3072_v37 = vld [vmem:[#allocation7 + $0x90] sm:$0xff] }
 0x1f3   :  { %7811 = vmatprep.subr.bf16.mxu1 %v10573_v29 }
 0x1f5   :  { %7773 = vmatpush1.bf16.msra.mxu0 %v10577_v20 }
 0x1f6   :  { %7813 = vmatpush1.bf16.msra.mxu1 %v10581_v45  ;;  %7775 = vmatprep.subr.bf16.mxu0 %v10583_v12 }
 0x1f7   :  { %7815 = vmatprep.subr.bf16.mxu1 %v10586_v59 }
 0x1f9   :  { %7777 = vmatpush1.bf16.msra.mxu0 %v10589_v28 }
 0x1fa   :  { %7817 = vmatpush1.bf16.msra.mxu1 %v10593_v44  ;;  %7779 = vmatprep.subr.bf16.mxu0 %v10595_v26 }
 0x1fb   :  { %7819 = vmatprep.subr.bf16.mxu1 %v10598_v27 }
 0x1fd   :  { %7781 = vmatpush1.bf16.msra.mxu0 %v10601_v38 }
 0x1fe   :  { %7821 = vmatpush1.bf16.msra.mxu1 %v10605_v58  ;;  %7783 = vmatprep.subr.bf16.mxu0 %v10607_v5 }
 0x1ff   :  { %7823 = vmatprep.subr.bf16.mxu1 %v10610_v40 }
 0x201   :  { %7785 = vmatpush1.bf16.msra.mxu0 %v10613_v23 }
 0x202   :  { %7825 = vmatpush1.bf16.msra.mxu1 %v10617_v11  ;;  %7787 = vmatprep.subr.bf16.mxu0 %v10619_v19 }
 0x203   :  { %7827 = vmatprep.subr.bf16.mxu1 %v10622_v62 }
 0x205   :  { %7789 = vmatpush1.bf16.msra.mxu0 %v10625_v2 }
 0x206   :  { %7829 = vmatpush1.bf16.msra.mxu1 %v10629_v51  ;;  %7791 = vmatprep.subr.bf16.mxu0 %v10631_v53 }
 0x207   :  { %7831 = vmatprep.subr.bf16.mxu1 %v10634_v6 }
 0x209   :  { %7793 = vmatpush1.bf16.msra.mxu0 %v10637_v30 }
 0x20a   :  { %7833 = vmatpush1.bf16.msra.mxu1 %v10641_v41  ;;  %7795 = vmatprep.subr.bf16.mxu0 %v10643_v46 }
 0x20b   :  { %7835 = vmatprep.subr.bf16.mxu1 %v10646_v14 }
 0x20d   :  { %7797 = vmatpush1.bf16.msra.mxu0 %v10649_v1 }
 0x20e   :  { %7837 = vmatpush1.bf16.msra.mxu1 %v10653_v31  ;;  %2694 = vmatprep.subr.mxu0 %v10656_v36  ;;  %v1480_v8 = vpop.f32.mrb[10].mxu0 }
 0x20f   :  { %2765 = vmatprep.subr.mxu1 %v10658_v21  ;;  %v1551_v18 = vpop.f32.mrb[10].mxu1  ;;  %v1482_v47 = vpop.f32.mrb[11].mxu0 }
 0x210   :  { %v1556_v39 = vmax.f32 %v1480_v8, %v1482_v47  ;;  %v1553_v49 = vpop.f32.mrb[11].mxu1  ;;  %v3079_v47 = vld [vmem:[#allocation7 + $0xc8] sm:$0xff] }
 0x211   :  { %2695 = vmatpush1.msra.mxu0 %v10663_v63  ;;  %v1557_v24 = vmax.f32 %v1551_v18, %v1553_v49  ;;  %v3076_v18 = vld [vmem:[#allocation7 + $0xb0] sm:$0xff]  ;;  %v3081_v49 = vld [vmem:[#allocation7 + $0xd8] sm:$0xff] }
 0x212   :  { %2766 = vmatpush1.msra.mxu1 %v10665_v10  ;;  %2719 = vmatmul.mubr.f32.vlgmr.msra.gmra.mrb[20].mxu0 %v10671_v61 }
 0x213   :  { %2790 = vmatmul.mubr.f32.vlgmr.msra.gmra.mrb[20].mxu1 %v10671_v61  ;;  %7839 = vmatprep.subr.bf16.mxu0 %v10522_v60  ;;  %v1558_v34 = vmax.f32 %v1556_v39, %v1557_v24  ;;  %v3085_v24 = vld [vmem:[#allocation7 + $0xf8] sm:$0xff] }
 0x214   :  { %7879 = vmatprep.subr.bf16.mxu1 %v10529_v55  ;;  %7841 = vmatpush1.bf16.msra.mxu0 %v10531_v4  ;;  %v9682_v4 = vmov 1983009808  }
 0x215   :  { %7881 = vmatpush1.bf16.msra.mxu1 %v10534_v16  ;;  %v1559_v3 = vadd.f32 %v1558_v34, %v10266_v57  ;;  %7843 = vmatprep.subr.bf16.mxu0 %v10536_v15  ;;  %v3442_v16 = vunpack.c.l.s4 %v9682_v4  ;;  %v3080_v4 = vld [vmem:[#allocation7 + $0xd0] sm:$0xff] }
 0x216   :  { %7883 = vmatprep.subr.bf16.mxu1 %v10540_v35  ;;  %6853 = vmatprep.mubr.msk.f32.mxu0 %vm159_vm0, %v2898_v43  ;;  %v3055_v35 = vld [vmem:[#allocation7 + $0x8] sm:$0xff] }
 0x217   :  { %v1560_v7 = vmax.f32 %v1559_v3, 0.0  ;;  %6854 = vmatprep.mubr.msk.f32.mxu1 %vm159_vm0, %v2898_v43  ;;  %v3443_v15 = vunpack.c.0.s8 %v3442_v16  ;;  %v7928_v43 = vpack.c.bf16 %v3074_v54, %v3070_v42  ;;  %v8120_v3 = vpack.c.bf16 %v3076_v18, %v3072_v37  ;;  %v3115_v42 = vld [vmem:[#allocation7 + $0x1e8] sm:$0xff]  ;;  %v3113_v54 = vld [vmem:[#allocation7 + $0x1d8] sm:$0xff] }
 0x218   :  { %7845 = vmatpush1.bf16.msra.mxu0 %v10548_v32  ;;  %v8122_v16 = vpack.c.bf16 %v3085_v24, %v3081_v49  ;;  %v3117_v37 = vld [vmem:[#allocation7 + $0x1f8] sm:$0xff]  ;;  %v3112_v49 = vld [vmem:[#allocation7 + $0x1d0] sm:$0xff] }
 0x219   :  { %v1561_v60 = vmul.f32 %v1560_v7, %v10288_v17  ;;  %7885 = vmatpush1.bf16.msra.mxu1 %v10553_v52  ;;  %7847 = vmatprep.subr.bf16.mxu0 %v10555_v56  ;;  %v10781_v32 = vsub.s32 %v3443_v15, %v10242_v50  ;;  %v3059_v52 = vld [vmem:[#allocation7 + $0x28] sm:$0xff]  ;;  %v3057_v56 = vld [vmem:[#allocation7 + $0x18] sm:$0xff]  ;;  %v3084_v15 = vld [vmem:[#allocation7 + $0xf0] sm:$0xff]  ;;  %v8138_v24 = vpack.c.bf16 %v3117_v37, %v3113_v54 }
 0x21a   :  { %7887 = vmatprep.subr.bf16.mxu1 %v10558_v0  ;;  %v10783_v0 = vld [vmem:[#allocation2] sm:$0xff] }
 0x21b   :  { %v1562_v55 = vadd.f32 %v1561_v60, %v10297_v33  ;;  %v3078_v60 = vld [vmem:[#allocation7 + $0xc0] sm:$0xff] }
 0x21c   :  { %7849 = vmatpush1.bf16.msra.mxu0 %v10563_v48  ;;  %v3061_v48 = vld [vmem:[#allocation7 + $0x38] sm:$0xff] }
 0x21d   :  { %1563 = vst [vmem:[#allocation2 + $0xa] sm:$0x3] %v1562_v55  ;;  %7889 = vmatpush1.bf16.msra.mxu1 %v10568_v9  ;;  %7851 = vmatprep.subr.bf16.mxu0 %v10570_v22  ;;  %v3054_v9 = vld [vmem:[#allocation7] sm:$0xff] }
 0x21e   :  { %7891 = vmatprep.subr.bf16.mxu1 %v10573_v29  ;;  %v3058_v22 = vld [vmem:[#allocation7 + $0x20] sm:$0xff] }
 0x21f   :  { %v3082_v55 = vld [vmem:[#allocation7 + $0xe0] sm:$0xff] }
 0x220   :  { %7853 = vmatpush1.bf16.msra.mxu0 %v10577_v20  ;;  %v3056_v20 = vld [vmem:[#allocation7 + $0x10] sm:$0xff] }
 0x221   :  { %7893 = vmatpush1.bf16.msra.mxu1 %v10581_v45  ;;  %7855 = vmatprep.subr.bf16.mxu0 %v10583_v12  ;;  %v3060_v45 = vld [vmem:[#allocation7 + $0x30] sm:$0xff]  ;;  %v7918_v12 = vpack.c.bf16 %v3059_v52, %v3055_v35  ;;  %v3087_v35 = vld [vmem:[#allocation7 + $0x108] sm:$0xff] }
 0x222   :  { %7895 = vmatprep.subr.bf16.mxu1 %v10586_v59  ;;  %v3091_v52 = vld [vmem:[#allocation7 + $0x128] sm:$0xff] }
 0x224   :  { %7857 = vmatpush1.bf16.msra.mxu0 %v10589_v28  ;;  %v10791_v28 = vrot.slane %v10783_v0, %v10781_v32 }
 0x225   :  { %7897 = vmatpush1.bf16.msra.mxu1 %v10593_v44  ;;  %7859 = vmatprep.subr.bf16.mxu0 %v10595_v26  ;;  %v3063_v26 = vld [vmem:[#allocation7 + $0x48] sm:$0xff] }
 0x226   :  { %7899 = vmatprep.subr.bf16.mxu1 %v10598_v27  ;;  %v3067_v27 = vld [vmem:[#allocation7 + $0x68] sm:$0xff] }
 0x228   :  { %7861 = vmatpush1.bf16.msra.mxu0 %v10601_v38  ;;  %v8110_v38 = vpack.c.bf16 %v3061_v48, %v3057_v56  ;;  %v3089_v48 = vld [vmem:[#allocation7 + $0x118] sm:$0xff] }
 0x229   :  { %7901 = vmatpush1.bf16.msra.mxu1 %v10605_v58  ;;  %7863 = vmatprep.subr.bf16.mxu0 %v10607_v5  ;;  %v7920_v58 = vpack.c.bf16 %v3058_v22, %v3054_v9  ;;  %v3093_v9 = vld [vmem:[#allocation7 + $0x138] sm:$0xff]  ;;  %v7932_v22 = vpack.c.bf16 %v3082_v55, %v3078_v60 }
 0x22a   :  { %7903 = vmatprep.subr.bf16.mxu1 %v10610_v40  ;;  %v3125_v60 = vld [vmem:[#allocation7 + $0x238] sm:$0xff] }
 0x22c   :  { %7865 = vmatpush1.bf16.msra.mxu0 %v10613_v23  ;;  %v3065_v23 = vld [vmem:[#allocation7 + $0x58] sm:$0xff] }
 0x22d   :  { %7905 = vmatpush1.bf16.msra.mxu1 %v10617_v11  ;;  %7867 = vmatprep.subr.bf16.mxu0 %v10619_v19  ;;  %v3069_v11 = vld [vmem:[#allocation7 + $0x78] sm:$0xff]  ;;  %v8112_v19 = vpack.c.bf16 %v3060_v45, %v3056_v20  ;;  %v7934_v20 = vpack.c.bf16 %v3091_v52, %v3087_v35  ;;  %v3086_v45 = vld [vmem:[#allocation7 + $0x100] sm:$0xff]  ;;  %v3120_v52 = vld [vmem:[#allocation7 + $0x210] sm:$0xff] }
 0x22e   :  { %7907 = vmatprep.subr.bf16.mxu1 %v10622_v62  ;;  %v3122_v35 = vld [vmem:[#allocation7 + $0x220] sm:$0xff] }
 0x230   :  { %7869 = vmatpush1.bf16.msra.mxu0 %v10625_v2  ;;  %v3062_v2 = vld [vmem:[#allocation7 + $0x40] sm:$0xff] }
 0x231   :  { %7909 = vmatpush1.bf16.msra.mxu1 %v10629_v51  ;;  %7871 = vmatprep.subr.bf16.mxu0 %v10631_v53  ;;  %v3066_v51 = vld [vmem:[#allocation7 + $0x60] sm:$0xff]  ;;  %v3064_v53 = vld [vmem:[#allocation7 + $0x50] sm:$0xff] }
 0x232   :  { %7911 = vmatprep.subr.bf16.mxu1 %v10634_v6  ;;  %v7922_v6 = vpack.c.bf16 %v3067_v27, %v3063_v26  ;;  %v3092_v26 = vld [vmem:[#allocation7 + $0x130] sm:$0xff]  ;;  %v3095_v27 = vld [vmem:[#allocation7 + $0x148] sm:$0xff] }
 0x234   :  { %7873 = vmatpush1.bf16.msra.mxu0 %v10637_v30  ;;  %v3068_v30 = vld [vmem:[#allocation7 + $0x70] sm:$0xff] }
 0x235   :  { %7913 = vmatpush1.bf16.msra.mxu1 %v10641_v41  ;;  %7875 = vmatprep.subr.bf16.mxu0 %v10643_v46  ;;  %v3071_v41 = vld [vmem:[#allocation7 + $0x88] sm:$0xff]  ;;  %v8116_v61 = vpack.c.bf16 %v3068_v30, %v3064_v53  ;;  %v3100_v53 = vld [vmem:[#allocation7 + $0x170] sm:$0xff] }
 0x236   :  { %7915 = vmatprep.subr.bf16.mxu1 %v10646_v14  ;;  %v3075_v46 = vld [vmem:[#allocation7 + $0xa8] sm:$0xff]  ;;  %v3455_v14 = vcombine.high %v10791_v28, %v10791_v28 }
 0x237   :  { %v7926_v13 = vpack.c.bf16 %v3075_v46, %v3071_v41  ;;  %v3107_v30 = vld [vmem:[#allocation7 + $0x1a8] sm:$0xff]  ;;  %v3105_v41 = vld [vmem:[#allocation7 + $0x198] sm:$0xff] }
 0x238   :  { %7877 = vmatpush1.bf16.msra.mxu0 %v10649_v1  ;;  %v3109_v46 = vld [vmem:[#allocation7 + $0x1b8] sm:$0xff] }
 0x239   :  { %7917 = vmatpush1.bf16.msra.mxu1 %v10653_v31  ;;  %2942 = vmatprep.subr.mxu0 %v10656_v36  ;;  %v1728_v29 = vpop.f32.mrb[12].mxu0  ;;  %v8114_v31 = vpack.c.bf16 %v3069_v11, %v3065_v23  ;;  %v3073_v36 = vld [vmem:[#allocation7 + $0x98] sm:$0xff] }
 0x23a   :  { %3013 = vmatprep.subr.mxu1 %v10658_v21  ;;  %v1799_v59 = vpop.f32.mrb[12].mxu1  ;;  %v1730_v44 = vpop.f32.mrb[13].mxu0  ;;  %v3077_v21 = vld [vmem:[#allocation7 + $0xb8] sm:$0xff] }
 0x23b   :  { %v1804_v5 = vmax.f32 %v1728_v29, %v1730_v44  ;;  %v1801_v40 = vpop.f32.mrb[13].mxu1  ;;  %v8118_v8 = vpack.c.bf16 %v3077_v21, %v3073_v36  ;;  %v8124_v29 = vpack.c.bf16 %v3084_v15, %v3080_v4  ;;  %v8126_v44 = vpack.c.bf16 %v3093_v9, %v3089_v48  ;;  %v3102_v36 = vld [vmem:[#allocation7 + $0x180] sm:$0xff]  ;;  %v3124_v48 = vld [vmem:[#allocation7 + $0x230] sm:$0xff]  ;;  %v3127_v9 = vld [vmem:[#allocation7 + $0x248] sm:$0xff] }
 0x23c   :  { %2943 = vmatpush1.msra.mxu0 %v10663_v63  ;;  %v1805_v62 = vmax.f32 %v1799_v59, %v1801_v40  ;;  %v7924_v63 = vpack.c.bf16 %v3066_v51, %v3062_v2  ;;  %v3088_v59 = vld [vmem:[#allocation7 + $0x110] sm:$0xff]  ;;  %v3106_v21 = vld [vmem:[#allocation7 + $0x1a0] sm:$0xff] }
 0x23d   :  { %3014 = vmatpush1.msra.mxu1 %v10665_v10  ;;  %2967 = vmatmul.mubr.f32.vlgmr.msra.gmra.mrb[22].mxu0 %v10729_v25  ;;  %v8128_v23 = vpack.c.bf16 %v3092_v26, %v3088_v59  ;;  %v3096_v2 = vld [vmem:[#allocation7 + $0x150] sm:$0xff]  ;;  %v3118_v15 = vld [vmem:[#allocation7 + $0x200] sm:$0xff] }
 0x23e   :  { %3038 = vmatmul.mubr.f32.vlgmr.msra.gmra.mrb[22].mxu1 %v10729_v25  ;;  %7919 = vmatprep.subr.bf16.mxu0 %v7918_v12  ;;  %v1806_v1 = vmax.f32 %v1804_v5, %v1805_v62  ;;  %v3083_v25 = vld [vmem:[#allocation7 + $0xe8] sm:$0xff]  ;;  %v3090_v12 = vld [vmem:[#allocation7 + $0x120] sm:$0xff]  ;;  %v3101_v5 = vld [vmem:[#allocation7 + $0x178] sm:$0xff] }
 0x23f   :  { %8111 = vmatprep.subr.bf16.mxu1 %v8110_v38  ;;  %7921 = vmatpush1.bf16.msra.mxu0 %v7920_v58  ;;  %v7930_v7 = vpack.c.bf16 %v3083_v25, %v3079_v47  ;;  %v3099_v38 = vld [vmem:[#allocation7 + $0x168] sm:$0xff]  ;;  %v3097_v58 = vld [vmem:[#allocation7 + $0x158] sm:$0xff]  ;;  %v7936_v40 = vpack.c.bf16 %v3090_v12, %v3086_v45  ;;  %v3098_v62 = vld [vmem:[#allocation7 + $0x160] sm:$0xff]  ;;  %v7952_v45 = vpack.c.bf16 %v3122_v35, %v3118_v15 }
 0x240   :  { %3535 = vmatprep.mubr.f32.mxu0 %v3455_v14  ;;  %8113 = vmatpush1.bf16.msra.mxu1 %v8112_v19  ;;  %v1807_v10 = vadd.f32 %v1806_v1, %v10266_v57  ;;  %v7938_v11 = vpack.c.bf16 %v3099_v38, %v3095_v27  ;;  %v3094_v19 = vld [vmem:[#allocation7 + $0x140] sm:$0xff]  ;;  %v8130_v51 = vpack.c.bf16 %v3101_v5, %v3097_v58  ;;  %v3128_v27 = vld [vmem:[#allocation7 + $0x250] sm:$0xff]  ;;  %v3135_v5 = vld [vmem:[#allocation7 + $0x288] sm:$0xff] }
 0x241   :  { %3748 = vmatprep.mubr.f32.mxu1 %v3455_v14  ;;  %7923 = vmatprep.subr.bf16.mxu0 %v7922_v6  ;;  %v3103_v6 = vld [vmem:[#allocation7 + $0x188] sm:$0xff]  ;;  %v7940_v14 = vpack.c.bf16 %v3098_v62, %v3094_v19  ;;  %v8132_v1 = vpack.c.bf16 %v3100_v53, %v3096_v2  ;;  %v3110_v25 = vld [vmem:[#allocation7 + $0x1c0] sm:$0xff]  ;;  %v8144_v12 = vpack.c.bf16 %v3124_v48, %v3120_v52  ;;  %v3132_v58 = vld [vmem:[#allocation7 + $0x270] sm:$0xff] }
 0x242   :  { %v1808_v39 = vmax.f32 %v1807_v10, 0.0  ;;  %8115 = vmatprep.subr.bf16.mxu1 %v8114_v31  ;;  %v7942_v31 = vpack.c.bf16 %v3107_v30, %v3103_v6  ;;  %v8134_v10 = vpack.c.bf16 %v3109_v46, %v3105_v41  ;;  %v3130_v26 = vld [vmem:[#allocation7 + $0x260] sm:$0xff]  ;;  %v8148_v62 = vpack.c.bf16 %v3132_v58, %v3128_v27  ;;  %v3136_v6 = vld [vmem:[#allocation7 + $0x290] sm:$0xff]  ;;  %v3143_v46 = vld [vmem:[#allocation7 + $0x2c8] sm:$0xff] }
 0x243   :  { %7925 = vmatpush1.bf16.msra.mxu0 %v7924_v63  ;;  %v3104_v63 = vld [vmem:[#allocation7 + $0x190] sm:$0xff]  ;;  %v3138_v53 = vld [vmem:[#allocation7 + $0x2a0] sm:$0xff]  ;;  %v3163_v48 = vld [vmem:[#allocation7 + $0x368] sm:$0xff] }
 0x244   :  { %v1809_v34 = vmul.f32 %v1808_v39, %v10288_v17  ;;  %8117 = vmatpush1.bf16.msra.mxu1 %v8116_v61  ;;  %7927 = vmatprep.subr.bf16.mxu0 %v7926_v13  ;;  %v3108_v61 = vld [vmem:[#allocation7 + $0x1b0] sm:$0xff]  ;;  %v3111_v13 = vld [vmem:[#allocation7 + $0x1c8] sm:$0xff]  ;;  %v3114_v39 = vld [vmem:[#allocation7 + $0x1e0] sm:$0xff] }
 0x245   :  { %8119 = vmatprep.subr.bf16.mxu1 %v8118_v8  ;;  %v7944_v8 = vpack.c.bf16 %v3106_v21, %v3102_v36  ;;  %v8136_v18 = vpack.c.bf16 %v3108_v61, %v3104_v63  ;;  %v7946_v47 = vpack.c.bf16 %v3115_v42, %v3111_v13  ;;  %v7948_v55 = vpack.c.bf16 %v3114_v39, %v3110_v25  ;;  %v3140_v41 = vld [vmem:[#allocation7 + $0x2b0] sm:$0xff]  ;;  %v3142_v61 = vld [vmem:[#allocation7 + $0x2c0] sm:$0xff]  ;;  %v3155_v25 = vld [vmem:[#allocation7 + $0x328] sm:$0xff] }
 0x246   :  { %v1810_v56 = vadd.f32 %v1809_v34, %v10297_v33  ;;  %v3119_v34 = vld [vmem:[#allocation7 + $0x208] sm:$0xff]  ;;  %v8152_v21 = vpack.c.bf16 %v3140_v41, %v3136_v6  ;;  %v3146_v13 = vld [vmem:[#allocation7 + $0x2e0] sm:$0xff]  ;;  %v3144_v42 = vld [vmem:[#allocation7 + $0x2d0] sm:$0xff] }
 0x247   :  { %7929 = vmatpush1.bf16.msra.mxu0 %v7928_v43  ;;  %v3116_v43 = vld [vmem:[#allocation7 + $0x1f0] sm:$0xff]  ;;  %v3170_v6 = vld [vmem:[#allocation7 + $0x3a0] sm:$0xff] }
 0x248   :  { %1811 = vst [vmem:[#allocation2 + $0xc] sm:$0x3] %v1810_v56  ;;  %8121 = vmatpush1.bf16.msra.mxu1 %v8120_v3  ;;  %7931 = vmatprep.subr.bf16.mxu0 %v7930_v7  ;;  %v3123_v3 = vld [vmem:[#allocation7 + $0x228] sm:$0xff]  ;;  %v3121_v7 = vld [vmem:[#allocation7 + $0x218] sm:$0xff]  ;;  %v8140_v4 = vpack.c.bf16 %v3116_v43, %v3112_v49  ;;  %v3156_v52 = vld [vmem:[#allocation7 + $0x330] sm:$0xff] }
 0x249   :  { %8123 = vmatprep.subr.bf16.mxu1 %v8122_v16  ;;  %v7950_v16 = vpack.c.bf16 %v3123_v3, %v3119_v34  ;;  %v8142_v56 = vpack.c.bf16 %v3125_v60, %v3121_v7  ;;  %v3157_v43 = vld [vmem:[#allocation7 + $0x338] sm:$0xff]  ;;  %v7964_v3 = vpack.c.bf16 %v3146_v13, %v3142_v61  ;;  %v3164_v58 = vld [vmem:[#allocation7 + $0x370] sm:$0xff]  ;;  %v3174_v13 = vld [vmem:[#allocation7 + $0x3c0] sm:$0xff] }
 0x24b   :  { %7933 = vmatpush1.bf16.msra.mxu0 %v7932_v22  ;;  %v3131_v22 = vld [vmem:[#allocation7 + $0x268] sm:$0xff] }
 0x24c   :  { %8125 = vmatpush1.bf16.msra.mxu1 %v8124_v29  ;;  %7935 = vmatprep.subr.bf16.mxu0 %v7934_v20  ;;  %v3129_v29 = vld [vmem:[#allocation7 + $0x258] sm:$0xff]  ;;  %v7954_v59 = vpack.c.bf16 %v3131_v22, %v3127_v9 }
 0x24d   :  { %8127 = vmatprep.subr.bf16.mxu1 %v8126_v44  ;;  %v3133_v20 = vld [vmem:[#allocation7 + $0x278] sm:$0xff]  ;;  %v3126_v44 = vld [vmem:[#allocation7 + $0x240] sm:$0xff] }
 0x24e   :  { %v8146_v38 = vpack.c.bf16 %v3133_v20, %v3129_v29  ;;  %v7956_v19 = vpack.c.bf16 %v3130_v26, %v3126_v44  ;;  %v3161_v9 = vld [vmem:[#allocation7 + $0x358] sm:$0xff]  ;;  %v3162_v44 = vld [vmem:[#allocation7 + $0x360] sm:$0xff]  ;;  %v3160_v26 = vld [vmem:[#allocation7 + $0x350] sm:$0xff] }
 0x24f   :  { %7937 = vmatpush1.bf16.msra.mxu0 %v7936_v40  ;;  %v3139_v40 = vld [vmem:[#allocation7 + $0x2a8] sm:$0xff]  ;;  %v3165_v22 = vld [vmem:[#allocation7 + $0x378] sm:$0xff] }
 0x250   :  { %8129 = vmatpush1.bf16.msra.mxu1 %v8128_v23  ;;  %7939 = vmatprep.subr.bf16.mxu0 %v7938_v11  ;;  %v3137_v23 = vld [vmem:[#allocation7 + $0x298] sm:$0xff]  ;;  %v7958_v2 = vpack.c.bf16 %v3139_v40, %v3135_v5  ;;  %v3167_v5 = vld [vmem:[#allocation7 + $0x388] sm:$0xff] }
 0x251   :  { %8131 = vmatprep.subr.bf16.mxu1 %v8130_v51  ;;  %v3141_v11 = vld [vmem:[#allocation7 + $0x2b8] sm:$0xff]  ;;  %v3134_v51 = vld [vmem:[#allocation7 + $0x280] sm:$0xff]  ;;  %v3171_v40 = vld [vmem:[#allocation7 + $0x3a8] sm:$0xff] }
 0x252   :  { %v8150_v30 = vpack.c.bf16 %v3141_v11, %v3137_v23  ;;  %v7960_v36 = vpack.c.bf16 %v3138_v53, %v3134_v51  ;;  %v3169_v23 = vld [vmem:[#allocation7 + $0x398] sm:$0xff]  ;;  %v7974_v51 = vpack.c.bf16 %v3171_v40, %v3167_v5  ;;  %v3166_v53 = vld [vmem:[#allocation7 + $0x380] sm:$0xff] }
 0x253   :  { %7941 = vmatpush1.bf16.msra.mxu0 %v7940_v14  ;;  %v3147_v14 = vld [vmem:[#allocation7 + $0x2e8] sm:$0xff]  ;;  %v3173_v11 = vld [vmem:[#allocation7 + $0x3b8] sm:$0xff] }
 0x254   :  { %8133 = vmatpush1.bf16.msra.mxu1 %v8132_v1  ;;  %7943 = vmatprep.subr.bf16.mxu0 %v7942_v31  ;;  %v3145_v1 = vld [vmem:[#allocation7 + $0x2d8] sm:$0xff] }
 0x255   :  { %8135 = vmatprep.subr.bf16.mxu1 %v8134_v10  ;;  %v3149_v31 = vld [vmem:[#allocation7 + $0x2f8] sm:$0xff]  ;;  %v7962_v10 = vpack.c.bf16 %v3147_v14, %v3143_v46  ;;  %v8166_v46 = vpack.c.bf16 %v3173_v11, %v3169_v23  ;;  %v3172_v14 = vld [vmem:[#allocation7 + $0x3b0] sm:$0xff]  ;;  %v3198_v23 = vld [vmem:[#allocation7 + $0x480] sm:$0xff] }
 0x256   :  { %v3202_v11 = vld [vmem:[#allocation7 + $0x4a0] sm:$0xff] }
 0x257   :  { %7945 = vmatpush1.bf16.msra.mxu0 %v7944_v8  ;;  %v8154_v8 = vpack.c.bf16 %v3149_v31, %v3145_v1  ;;  %v3175_v1 = vld [vmem:[#allocation7 + $0x3c8] sm:$0xff] }
 0x258   :  { %8137 = vmatpush1.bf16.msra.mxu1 %v8136_v18  ;;  %7947 = vmatprep.subr.bf16.mxu0 %v7946_v47  ;;  %v3148_v18 = vld [vmem:[#allocation7 + $0x2f0] sm:$0xff]  ;;  %v3151_v47 = vld [vmem:[#allocation7 + $0x308] sm:$0xff] }
 0x259   :  { %8139 = vmatprep.subr.bf16.mxu1 %v8138_v24  ;;  %v3153_v24 = vld [vmem:[#allocation7 + $0x318] sm:$0xff]  ;;  %v8156_v7 = vpack.c.bf16 %v3148_v18, %v3144_v42  ;;  %v7966_v60 = vpack.c.bf16 %v3155_v25, %v3151_v47  ;;  %v3179_v31 = vld [vmem:[#allocation7 + $0x3e8] sm:$0xff]  ;;  %v3178_v42 = vld [vmem:[#allocation7 + $0x3e0] sm:$0xff] }
 0x25a   :  { %v8158_v35 = vpack.c.bf16 %v3157_v43, %v3153_v24  ;;  %v7978_v61 = vpack.c.bf16 %v3179_v31, %v3175_v1  ;;  %v3183_v18 = vld [vmem:[#allocation7 + $0x408] sm:$0xff]  ;;  %v3185_v25 = vld [vmem:[#allocation7 + $0x418] sm:$0xff]  ;;  %v7980_v24 = vpack.c.bf16 %v3178_v42, %v3174_v13  ;;  %v3210_v1 = vld [vmem:[#allocation7 + $0x4e0] sm:$0xff] }
 0x25b   :  { %7949 = vmatpush1.bf16.msra.mxu0 %v7948_v55  ;;  %v3150_v55 = vld [vmem:[#allocation7 + $0x300] sm:$0xff]  ;;  %v3187_v47 = vld [vmem:[#allocation7 + $0x428] sm:$0xff]  ;;  %v3208_v31 = vld [vmem:[#allocation7 + $0x4d0] sm:$0xff] }
 0x25c   :  { %8141 = vmatpush1.bf16.msra.mxu1 %v8140_v4  ;;  %7951 = vmatprep.subr.bf16.mxu0 %v7950_v16  ;;  %v3154_v4 = vld [vmem:[#allocation7 + $0x320] sm:$0xff]  ;;  %v3152_v16 = vld [vmem:[#allocation7 + $0x310] sm:$0xff]  ;;  %v3221_v13 = vld [vmem:[#allocation7 + $0x538] sm:$0xff] }
 0x25d   :  { %8143 = vmatprep.subr.bf16.mxu1 %v8142_v56  ;;  %v3159_v56 = vld [vmem:[#allocation7 + $0x348] sm:$0xff]  ;;  %v7968_v20 = vpack.c.bf16 %v3154_v4, %v3150_v55  ;;  %v3184_v55 = vld [vmem:[#allocation7 + $0x410] sm:$0xff] }
 0x25e   :  { %v3188_v4 = vld [vmem:[#allocation7 + $0x430] sm:$0xff] }
 0x25f   :  { %7953 = vmatpush1.bf16.msra.mxu0 %v7952_v45  ;;  %v8160_v45 = vpack.c.bf16 %v3156_v52, %v3152_v16 }
 0x260   :  { %8145 = vmatpush1.bf16.msra.mxu1 %v8144_v12  ;;  %7955 = vmatprep.subr.bf16.mxu0 %v7954_v59  ;;  %v7970_v12 = vpack.c.bf16 %v3163_v48, %v3159_v56  ;;  %v3158_v59 = vld [vmem:[#allocation7 + $0x340] sm:$0xff]  ;;  %v3197_v56 = vld [vmem:[#allocation7 + $0x478] sm:$0xff]  ;;  %v8176_v48 = vpack.c.bf16 %v3188_v4, %v3184_v55 }
 0x261   :  { %8147 = vmatprep.subr.bf16.mxu1 %v8146_v38  ;;  %v8162_v38 = vpack.c.bf16 %v3165_v22, %v3161_v9  ;;  %v3190_v9 = vld [vmem:[#allocation7 + $0x440] sm:$0xff] }
 0x262   :  { %v3194_v22 = vld [vmem:[#allocation7 + $0x460] sm:$0xff] }
 0x263   :  { %7957 = vmatpush1.bf16.msra.mxu0 %v7956_v19  ;;  %v3222_v55 = vld [vmem:[#allocation7 + $0x540] sm:$0xff] }
 0x264   :  { %8149 = vmatpush1.bf16.msra.mxu1 %v8148_v62  ;;  %7959 = vmatprep.subr.bf16.mxu0 %v7958_v2  ;;  %v1976_v63 = vpop.f32.mrb[14].mxu0  ;;  %v7972_v62 = vpack.c.bf16 %v3162_v44, %v3158_v59  ;;  %v8164_v2 = vpack.c.bf16 %v3164_v58, %v3160_v26  ;;  %v3203_v59 = vld [vmem:[#allocation7 + $0x4a8] sm:$0xff]  ;;  %v7988_v58 = vpack.c.bf16 %v3194_v22, %v3190_v9  ;;  %v3226_v4 = vld [vmem:[#allocation7 + $0x560] sm:$0xff]  ;;  %v3237_v9 = vld [vmem:[#allocation7 + $0x5b8] sm:$0xff] }
 0x265   :  { %8151 = vmatprep.subr.bf16.mxu1 %v8150_v30  ;;  %v2047_v54 = vpop.f32.mrb[14].mxu1  ;;  %v1978_v37 = vpop.f32.mrb[15].mxu0  ;;  %v3168_v30 = vld [vmem:[#allocation7 + $0x390] sm:$0xff] }
 0x266   :  { %v2052_v39 = vmax.f32 %v1976_v63, %v1978_v37  ;;  %v2049_v49 = vpop.f32.mrb[15].mxu1  ;;  %v7976_v63 = vpack.c.bf16 %v3170_v6, %v3166_v53  ;;  %v3211_v53 = vld [vmem:[#allocation7 + $0x4e8] sm:$0xff]  ;;  %v3209_v6 = vld [vmem:[#allocation7 + $0x4d8] sm:$0xff] }
 0x267   :  { %7961 = vmatpush1.bf16.msra.mxu0 %v7960_v36  ;;  %v2053_v34 = vmax.f32 %v2047_v54, %v2049_v49  ;;  %v3177_v36 = vld [vmem:[#allocation7 + $0x3d8] sm:$0xff]  ;;  %v3176_v54 = vld [vmem:[#allocation7 + $0x3d0] sm:$0xff]  ;;  %v3440_v49 = vcombine.high %v10783_v0, %v10783_v0 }
 0x268   :  { %8153 = vmatpush1.bf16.msra.mxu1 %v8152_v21  ;;  %7963 = vmatprep.subr.bf16.mxu0 %v7962_v10  ;;  %v3181_v21 = vld [vmem:[#allocation7 + $0x3f8] sm:$0xff]  ;;  %v8168_v10 = vpack.c.bf16 %v3172_v14, %v3168_v30  ;;  %v3206_v14 = vld [vmem:[#allocation7 + $0x4c0] sm:$0xff] }
 0x269   :  { %v2054_v15 = vmax.f32 %v2052_v39, %v2053_v34  ;;  %8155 = vmatprep.subr.bf16.mxu1 %v8154_v8  ;;  %v8170_v37 = vpack.c.bf16 %v3181_v21, %v3177_v36  ;;  %v3180_v8 = vld [vmem:[#allocation7 + $0x3f0] sm:$0xff]  ;;  %v3189_v39 = vld [vmem:[#allocation7 + $0x438] sm:$0xff]  ;;  %v7982_v34 = vpack.c.bf16 %v3187_v47, %v3183_v18  ;;  %v10808_v16 = vrot.slane %v3440_v49, %v10781_v32  ;;  %v3218_v18 = vld [vmem:[#allocation7 + $0x520] sm:$0xff] }
 0x26a   :  { %v8172_v43 = vpack.c.bf16 %v3180_v8, %v3176_v54  ;;  %v3193_v0 = vld [vmem:[#allocation7 + $0x458] sm:$0xff]  ;;  %v3212_v21 = vld [vmem:[#allocation7 + $0x4f0] sm:$0xff]  ;;  %v7996_v42 = vpack.c.bf16 %v3210_v1, %v3206_v14  ;;  %v3214_v8 = vld [vmem:[#allocation7 + $0x500] sm:$0xff] }
 0x26b   :  { %v2055_v29 = vadd.f32 %v2054_v15, %v10266_v57  ;;  %7965 = vmatpush1.bf16.msra.mxu0 %v7964_v3  ;;  %v3182_v3 = vld [vmem:[#allocation7 + $0x400] sm:$0xff]  ;;  %v3191_v15 = vld [vmem:[#allocation7 + $0x448] sm:$0xff]  ;;  %v3456_v44 = vcombine.high %v10808_v16, %v10808_v16  ;;  %v8178_v26 = vpack.c.bf16 %v3197_v56, %v3193_v0  ;;  %v3213_v30 = vld [vmem:[#allocation7 + $0x4f8] sm:$0xff]  ;;  %v8188_v54 = vpack.c.bf16 %v3212_v21, %v3208_v31 }
 0x26c   :  { %8157 = vmatpush1.bf16.msra.mxu1 %v8156_v7  ;;  %7967 = vmatprep.subr.bf16.mxu0 %v7966_v60  ;;  %v3186_v7 = vld [vmem:[#allocation7 + $0x420] sm:$0xff]  ;;  %v8174_v60 = vpack.c.bf16 %v3189_v39, %v3185_v25  ;;  %v8186_v36 = vpack.c.bf16 %v3213_v30, %v3209_v6  ;;  %v3216_v47 = vld [vmem:[#allocation7 + $0x510] sm:$0xff]  ;;  %v3223_v49 = vld [vmem:[#allocation7 + $0x548] sm:$0xff] }
 0x26d   :  { %v2056_v27 = vmax.f32 %v2055_v29, 0.0  ;;  %8159 = vmatprep.subr.bf16.mxu1 %v8158_v35  ;;  %v3195_v35 = vld [vmem:[#allocation7 + $0x468] sm:$0xff]  ;;  %v7984_v52 = vpack.c.bf16 %v3186_v7, %v3182_v3  ;;  %v3192_v29 = vld [vmem:[#allocation7 + $0x450] sm:$0xff]  ;;  %v8000_v3 = vpack.c.bf16 %v3218_v18, %v3214_v8  ;;  %v3250_v8 = vld [vmem:[#allocation7 + $0x620] sm:$0xff] }
 0x26e   :  { %v3220_v39 = vld [vmem:[#allocation7 + $0x530] sm:$0xff]  ;;  %v3231_v0 = vld [vmem:[#allocation7 + $0x588] sm:$0xff] }
 0x26f   :  { %v2057_v19 = vmul.f32 %v2056_v27, %v10288_v17  ;;  %7969 = vmatpush1.bf16.msra.mxu0 %v7968_v20  ;;  %v7986_v20 = vpack.c.bf16 %v3195_v35, %v3191_v15  ;;  %v3201_v27 = vld [vmem:[#allocation7 + $0x498] sm:$0xff]  ;;  %v8192_v7 = vpack.c.bf16 %v3220_v39, %v3216_v47  ;;  %v3224_v15 = vld [vmem:[#allocation7 + $0x550] sm:$0xff]  ;;  %v3235_v56 = vld [vmem:[#allocation7 + $0x5a8] sm:$0xff] }
 0x270   :  { %8161 = vmatpush1.bf16.msra.mxu1 %v8160_v45  ;;  %7971 = vmatprep.subr.bf16.mxu0 %v7970_v12  ;;  %v3196_v45 = vld [vmem:[#allocation7 + $0x470] sm:$0xff]  ;;  %v3199_v12 = vld [vmem:[#allocation7 + $0x488] sm:$0xff] }
 0x271   :  { %v2058_v41 = vadd.f32 %v2057_v19, %v10297_v33  ;;  %8163 = vmatprep.subr.bf16.mxu1 %v8162_v38  ;;  %v3205_v38 = vld [vmem:[#allocation7 + $0x4b8] sm:$0xff]  ;;  %v8180_v5 = vpack.c.bf16 %v3196_v45, %v3192_v29  ;;  %v7990_v40 = vpack.c.bf16 %v3203_v59, %v3199_v12  ;;  %v3200_v19 = vld [vmem:[#allocation7 + $0x490] sm:$0xff]  ;;  %v8004_v29 = vpack.c.bf16 %v3226_v4, %v3222_v55  ;;  %v3247_v31 = vld [vmem:[#allocation7 + $0x608] sm:$0xff] }
 0x272   :  { %v8006_v59 = vpack.c.bf16 %v3235_v56, %v3231_v0  ;;  %v3244_v1 = vld [vmem:[#allocation7 + $0x5f0] sm:$0xff]  ;;  %v3255_v39 = vld [vmem:[#allocation7 + $0x648] sm:$0xff]  ;;  %v3254_v4 = vld [vmem:[#allocation7 + $0x640] sm:$0xff] }
 0x273   :  { %2059 = vst [vmem:[#allocation2 + $0xe] sm:$0x3] %v2058_v41  ;;  %7973 = vmatpush1.bf16.msra.mxu0 %v7972_v62  ;;  %v8182_v62 = vpack.c.bf16 %v3205_v38, %v3201_v27  ;;  %v3232_v27 = vld [vmem:[#allocation7 + $0x590] sm:$0xff]  ;;  %v3263_v56 = vld [vmem:[#allocation7 + $0x688] sm:$0xff] }
 0x274   :  { %8165 = vmatpush1.bf16.msra.mxu1 %v8164_v2  ;;  %7975 = vmatprep.subr.bf16.mxu0 %v7974_v51  ;;  %v3204_v2 = vld [vmem:[#allocation7 + $0x4b0] sm:$0xff]  ;;  %v3207_v51 = vld [vmem:[#allocation7 + $0x4c8] sm:$0xff] }
 0x275   :  { %8167 = vmatprep.subr.bf16.mxu1 %v8166_v46  ;;  %v8184_v41 = vpack.c.bf16 %v3204_v2, %v3200_v19  ;;  %v7994_v46 = vpack.c.bf16 %v3211_v53, %v3207_v51  ;;  %v3245_v2 = vld [vmem:[#allocation7 + $0x5f8] sm:$0xff]  ;;  %v3248_v18 = vld [vmem:[#allocation7 + $0x610] sm:$0xff] }
 0x276   :  { %v3260_v0 = vld [vmem:[#allocation7 + $0x670] sm:$0xff] }
 0x277   :  { %7977 = vmatpush1.bf16.msra.mxu0 %v7976_v63  ;;  %v3215_v63 = vld [vmem:[#allocation7 + $0x508] sm:$0xff] }
 0x278   :  { %8169 = vmatpush1.bf16.msra.mxu1 %v8168_v10  ;;  %7979 = vmatprep.subr.bf16.mxu0 %v7978_v61  ;;  %v3219_v10 = vld [vmem:[#allocation7 + $0x528] sm:$0xff]  ;;  %v3217_v61 = vld [vmem:[#allocation7 + $0x518] sm:$0xff] }
 0x279   :  { %8171 = vmatprep.subr.bf16.mxu1 %v8170_v37  ;;  %v7998_v37 = vpack.c.bf16 %v3219_v10, %v3215_v63  ;;  %v8190_v25 = vpack.c.bf16 %v3221_v13, %v3217_v61  ;;  %v3249_v63 = vld [vmem:[#allocation7 + $0x618] sm:$0xff] }
 0x27a   :  { %v3253_v10 = vld [vmem:[#allocation7 + $0x638] sm:$0xff] }
 0x27b   :  { %7981 = vmatpush1.bf16.msra.mxu0 %v7980_v24  ;;  %v3227_v24 = vld [vmem:[#allocation7 + $0x568] sm:$0xff]  ;;  %v8206_v47 = vpack.c.bf16 %v3253_v10, %v3249_v63  ;;  %v3280_v63 = vld [vmem:[#allocation7 + $0x710] sm:$0xff] }
 0x27c   :  { %8173 = vmatpush1.bf16.msra.mxu1 %v8172_v43  ;;  %7983 = vmatprep.subr.bf16.mxu0 %v7982_v34  ;;  %v3225_v43 = vld [vmem:[#allocation7 + $0x558] sm:$0xff] }
 0x27d   :  { %8175 = vmatprep.subr.bf16.mxu1 %v8174_v60  ;;  %v3229_v34 = vld [vmem:[#allocation7 + $0x578] sm:$0xff]  ;;  %v8002_v60 = vpack.c.bf16 %v3227_v24, %v3223_v49  ;;  %v3259_v49 = vld [vmem:[#allocation7 + $0x668] sm:$0xff] }
 0x27e   :  { %3536 = vmatmul.mubr.f32.vlgmr.msra.gmra.mrb[24].mxu0 %v10791_v28  ;;  %v8194_v35 = vpack.c.bf16 %v3229_v34, %v3225_v43  ;;  %v3257_v43 = vld [vmem:[#allocation7 + $0x658] sm:$0xff]  ;;  %v8018_v55 = vpack.c.bf16 %v3259_v49, %v3255_v39  ;;  %v3290_v39 = vld [vmem:[#allocation7 + $0x760] sm:$0xff]  ;;  %v3288_v49 = vld [vmem:[#allocation7 + $0x750] sm:$0xff] }
 0x27f   :  { %3749 = vmatmul.mubr.f32.vlgmr.msra.gmra.mrb[24].mxu1 %v10791_v28  ;;  %7985 = vmatpush1.bf16.msra.mxu0 %v7984_v52  ;;  %v7992_v28 = vpack.c.bf16 %v3202_v11, %v3198_v23  ;;  %v3228_v52 = vld [vmem:[#allocation7 + $0x570] sm:$0xff]  ;;  %v3239_v23 = vld [vmem:[#allocation7 + $0x5c8] sm:$0xff]  ;;  %v3261_v34 = vld [vmem:[#allocation7 + $0x678] sm:$0xff] }
 0x280   :  { %3606 = vmatprep.mubr.f32.mxu0 %v3456_v44  ;;  %8177 = vmatpush1.bf16.msra.mxu1 %v8176_v48  ;;  %v3233_v48 = vld [vmem:[#allocation7 + $0x598] sm:$0xff]  ;;  %v8196_v45 = vpack.c.bf16 %v3228_v52, %v3224_v15  ;;  %v3243_v11 = vld [vmem:[#allocation7 + $0x5e8] sm:$0xff]  ;;  %v3258_v15 = vld [vmem:[#allocation7 + $0x660] sm:$0xff]  ;;  %v8210_v52 = vpack.c.bf16 %v3261_v34, %v3257_v43 }
 0x281   :  { %3819 = vmatprep.mubr.f32.mxu1 %v3456_v44  ;;  %7987 = vmatprep.subr.bf16.mxu0 %v7986_v20  ;;  %v3230_v44 = vld [vmem:[#allocation7 + $0x580] sm:$0xff]  ;;  %v8010_v30 = vpack.c.bf16 %v3243_v11, %v3239_v23  ;;  %v3292_v43 = vld [vmem:[#allocation7 + $0x770] sm:$0xff]  ;;  %v3295_v34 = vld [vmem:[#allocation7 + $0x788] sm:$0xff] }
 0x282   :  { %8179 = vmatprep.subr.bf16.mxu1 %v8178_v26  ;;  %v3234_v26 = vld [vmem:[#allocation7 + $0x5a0] sm:$0xff] }
 0x283   :  { %7989 = vmatpush1.bf16.msra.mxu0 %v7988_v58  ;;  %v8008_v51 = vpack.c.bf16 %v3234_v26, %v3230_v44  ;;  %v3264_v44 = vld [vmem:[#allocation7 + $0x690] sm:$0xff] }
 0x284   :  { %8181 = vmatpush1.bf16.msra.mxu1 %v8180_v5  ;;  %7991 = vmatprep.subr.bf16.mxu0 %v7990_v40  ;;  %v8198_v5 = vpack.c.bf16 %v3237_v9, %v3233_v48  ;;  %v3236_v40 = vld [vmem:[#allocation7 + $0x5b0] sm:$0xff]  ;;  %v3267_v48 = vld [vmem:[#allocation7 + $0x6a8] sm:$0xff]  ;;  %v3265_v9 = vld [vmem:[#allocation7 + $0x698] sm:$0xff] }
 0x285   :  { %8183 = vmatprep.subr.bf16.mxu1 %v8182_v62  ;;  %v3241_v62 = vld [vmem:[#allocation7 + $0x5d8] sm:$0xff]  ;;  %v8200_v6 = vpack.c.bf16 %v3236_v40, %v3232_v27  ;;  %v3268_v27 = vld [vmem:[#allocation7 + $0x6b0] sm:$0xff] }
 0x286   :  { %v8202_v14 = vpack.c.bf16 %v3245_v2, %v3241_v62  ;;  %v3277_v40 = vld [vmem:[#allocation7 + $0x6f8] sm:$0xff]  ;;  %v8216_v11 = vpack.c.bf16 %v3268_v27, %v3264_v44  ;;  %v3270_v62 = vld [vmem:[#allocation7 + $0x6c0] sm:$0xff]  ;;  %v3304_v27 = vld [vmem:[#allocation7 + $0x7d0] sm:$0xff] }
 0x287   :  { %7993 = vmatpush1.bf16.msra.mxu0 %v7992_v28  ;;  %v3238_v28 = vld [vmem:[#allocation7 + $0x5c0] sm:$0xff] }
 0x288   :  { %8185 = vmatpush1.bf16.msra.mxu1 %v8184_v41  ;;  %7995 = vmatprep.subr.bf16.mxu0 %v7994_v46  ;;  %v3242_v41 = vld [vmem:[#allocation7 + $0x5e0] sm:$0xff]  ;;  %v3240_v46 = vld [vmem:[#allocation7 + $0x5d0] sm:$0xff] }
 0x289   :  { %8187 = vmatprep.subr.bf16.mxu1 %v8186_v36  ;;  %v3251_v36 = vld [vmem:[#allocation7 + $0x628] sm:$0xff]  ;;  %v8012_v61 = vpack.c.bf16 %v3242_v41, %v3238_v28  ;;  %v3274_v2 = vld [vmem:[#allocation7 + $0x6e0] sm:$0xff]  ;;  %v3281_v41 = vld [vmem:[#allocation7 + $0x718] sm:$0xff] }
 0x28a   :  { %v3283_v28 = vld [vmem:[#allocation7 + $0x728] sm:$0xff]  ;;  %v3302_v44 = vld [vmem:[#allocation7 + $0x7c0] sm:$0xff] }
 0x28b   :  { %7997 = vmatpush1.bf16.msra.mxu0 %v7996_v42  ;;  %v8204_v42 = vpack.c.bf16 %v3244_v1, %v3240_v46  ;;  %v3285_v46 = vld [vmem:[#allocation7 + $0x738] sm:$0xff] }
 0x28c   :  { %8189 = vmatpush1.bf16.msra.mxu1 %v8188_v54  ;;  %7999 = vmatprep.subr.bf16.mxu0 %v7998_v37  ;;  %v8014_v54 = vpack.c.bf16 %v3251_v36, %v3247_v31  ;;  %v3246_v37 = vld [vmem:[#allocation7 + $0x600] sm:$0xff]  ;;  %v8222_v10 = vpack.c.bf16 %v3285_v46, %v3281_v41  ;;  %v3316_v41 = vld [vmem:[#allocation7 + $0x830] sm:$0xff] }
 0x28d   :  { %8191 = vmatprep.subr.bf16.mxu1 %v8190_v25  ;;  %v3252_v25 = vld [vmem:[#allocation7 + $0x630] sm:$0xff]  ;;  %v3278_v36 = vld [vmem:[#allocation7 + $0x700] sm:$0xff] }
 0x28f   :  { %8001 = vmatpush1.bf16.msra.mxu0 %v8000_v3  ;;  %v2224_v22 = vpop.f32.mrb[16].mxu0  ;;  %v8016_v3 = vpack.c.bf16 %v3250_v8, %v3246_v37  ;;  %v3293_v37 = vld [vmem:[#allocation7 + $0x778] sm:$0xff] }
 0x290   :  { %8193 = vmatpush1.bf16.msra.mxu1 %v8192_v7  ;;  %8003 = vmatprep.subr.bf16.mxu0 %v8002_v60  ;;  %v2295_v20 = vpop.f32.mrb[16].mxu1  ;;  %v2226_v12 = vpop.f32.mrb[17].mxu0  ;;  %v8208_v60 = vpack.c.bf16 %v3252_v25, %v3248_v18  ;;  %v3286_v25 = vld [vmem:[#allocation7 + $0x740] sm:$0xff] }
 0x291   :  { %8195 = vmatprep.subr.bf16.mxu1 %v8194_v35  ;;  %v2300_v38 = vmax.f32 %v2224_v22, %v2226_v12  ;;  %v2297_v58 = vpop.f32.mrb[17].mxu1  ;;  %v3256_v35 = vld [vmem:[#allocation7 + $0x650] sm:$0xff]  ;;  %v3269_v22 = vld [vmem:[#allocation7 + $0x6b8] sm:$0xff]  ;;  %v3262_v12 = vld [vmem:[#allocation7 + $0x680] sm:$0xff] }
 0x292   :  { %v2301_v19 = vmax.f32 %v2295_v20, %v2297_v58  ;;  %v8212_v20 = vpack.c.bf16 %v3260_v0, %v3256_v35  ;;  %v8214_v26 = vpack.c.bf16 %v3269_v22, %v3265_v9  ;;  %v3275_v58 = vld [vmem:[#allocation7 + $0x6e8] sm:$0xff]  ;;  %v3294_v35 = vld [vmem:[#allocation7 + $0x780] sm:$0xff]  ;;  %v3296_v0 = vld [vmem:[#allocation7 + $0x790] sm:$0xff] }
 0x293   :  { %8005 = vmatpush1.bf16.msra.mxu0 %v8004_v29  ;;  %v8020_v29 = vpack.c.bf16 %v3258_v15, %v3254_v4  ;;  %v8228_v4 = vpack.c.bf16 %v3292_v43, %v3288_v49  ;;  %v3303_v9 = vld [vmem:[#allocation7 + $0x7c8] sm:$0xff] }
 0x294   :  { %8197 = vmatpush1.bf16.msra.mxu1 %v8196_v45  ;;  %v2302_v53 = vmax.f32 %v2300_v38, %v2301_v19  ;;  %8007 = vmatprep.subr.bf16.mxu0 %v8006_v59  ;;  %v8022_v45 = vpack.c.bf16 %v3267_v48, %v3263_v56  ;;  %v3266_v59 = vld [vmem:[#allocation7 + $0x6a0] sm:$0xff]  ;;  %v3271_v38 = vld [vmem:[#allocation7 + $0x6c8] sm:$0xff]  ;;  %v3300_v48 = vld [vmem:[#allocation7 + $0x7b0] sm:$0xff] }
 0x295   :  { %8199 = vmatprep.subr.bf16.mxu1 %v8198_v5  ;;  %v3273_v5 = vld [vmem:[#allocation7 + $0x6d8] sm:$0xff]  ;;  %v8024_v23 = vpack.c.bf16 %v3266_v59, %v3262_v12  ;;  %v8026_v19 = vpack.c.bf16 %v3275_v58, %v3271_v38  ;;  %v3307_v22 = vld [vmem:[#allocation7 + $0x7e8] sm:$0xff]  ;;  %v8232_v12 = vpack.c.bf16 %v3300_v48, %v3296_v0  ;;  %v3308_v58 = vld [vmem:[#allocation7 + $0x7f0] sm:$0xff] }
 0x296   :  { %v2303_v21 = vadd.f32 %v2302_v53, %v10266_v57  ;;  %v8218_v53 = vpack.c.bf16 %v3277_v40, %v3273_v5  ;;  %v8042_v59 = vpack.c.bf16 %v3307_v22, %v3303_v9  ;;  %v3311_v5 = vld [vmem:[#allocation7 + $0x808] sm:$0xff]  ;;  %v3332_v48 = vld [vmem:[#allocation7 + $0x8b0] sm:$0xff] }
 0x297   :  { %8009 = vmatpush1.bf16.msra.mxu0 %v8008_v51  ;;  %v3272_v51 = vld [vmem:[#allocation7 + $0x6d0] sm:$0xff]  ;;  %v3315_v40 = vld [vmem:[#allocation7 + $0x828] sm:$0xff] }
 0x298   :  { %v2304_v13 = vmax.f32 %v2303_v21, 0.0  ;;  %8201 = vmatpush1.bf16.msra.mxu1 %v8200_v6  ;;  %8011 = vmatprep.subr.bf16.mxu0 %v8010_v30  ;;  %v3276_v6 = vld [vmem:[#allocation7 + $0x6f0] sm:$0xff]  ;;  %v3279_v30 = vld [vmem:[#allocation7 + $0x708] sm:$0xff]  ;;  %v3282_v21 = vld [vmem:[#allocation7 + $0x720] sm:$0xff] }
 0x299   :  { %8203 = vmatprep.subr.bf16.mxu1 %v8202_v14  ;;  %v8028_v14 = vpack.c.bf16 %v3274_v2, %v3270_v62  ;;  %v8220_v1 = vpack.c.bf16 %v3276_v6, %v3272_v51  ;;  %v8030_v31 = vpack.c.bf16 %v3283_v28, %v3279_v30  ;;  %v8032_v8 = vpack.c.bf16 %v3282_v21, %v3278_v36  ;;  %v3310_v51 = vld [vmem:[#allocation7 + $0x800] sm:$0xff]  ;;  %v10817_v30 = vld.sshfl [vmem:[#allocation2 + $0x8] sm:$0x33 pattern:$0x76325410]  ;;  %v3312_v28 = vld [vmem:[#allocation7 + $0x810] sm:$0xff] }
 0x29a   :  { %v2305_v24 = vmul.f32 %v2304_v13, %v10288_v17  ;;  %v3287_v13 = vld [vmem:[#allocation7 + $0x748] sm:$0xff]  ;;  %v8236_v62 = vpack.c.bf16 %v3308_v58, %v3304_v27  ;;  %v8046_v2 = vpack.c.bf16 %v3315_v40, %v3311_v5  ;;  %v3336_v27 = vld [vmem:[#allocation7 + $0x8d0] sm:$0xff] }
 0x29b   :  { %8013 = vmatpush1.bf16.msra.mxu0 %v8012_v61  ;;  %v3284_v61 = vld [vmem:[#allocation7 + $0x730] sm:$0xff]  ;;  %v3331_v49 = vld [vmem:[#allocation7 + $0x8a8] sm:$0xff] }
 0x29c   :  { %v2306_v7 = vadd.f32 %v2305_v24, %v10297_v33  ;;  %8205 = vmatpush1.bf16.msra.mxu1 %v8204_v42  ;;  %8015 = vmatprep.subr.bf16.mxu0 %v8014_v54  ;;  %v3291_v42 = vld [vmem:[#allocation7 + $0x768] sm:$0xff]  ;;  %v3289_v54 = vld [vmem:[#allocation7 + $0x758] sm:$0xff]  ;;  %v8224_v18 = vpack.c.bf16 %v3284_v61, %v3280_v63  ;;  %v3340_v5 = vld [vmem:[#allocation7 + $0x8f0] sm:$0xff] }
 0x29d   :  { %8207 = vmatprep.subr.bf16.mxu1 %v8206_v47  ;;  %v8034_v47 = vpack.c.bf16 %v3291_v42, %v3287_v13  ;;  %v8226_v24 = vpack.c.bf16 %v3293_v37, %v3289_v54  ;;  %v3321_v63 = vld [vmem:[#allocation7 + $0x858] sm:$0xff]  ;;  %v8240_v42 = vpack.c.bf16 %v3316_v41, %v3312_v28  ;;  %v3318_v54 = vld [vmem:[#allocation7 + $0x840] sm:$0xff]  ;;  %v3335_v9 = vld [vmem:[#allocation7 + $0x8c8] sm:$0xff] }
 0x29e   :  { %2307 = vst [vmem:[#allocation2 + $0x10] sm:$0x3] %v2306_v7  ;;  %v3297_v7 = vld [vmem:[#allocation7 + $0x798] sm:$0xff]  ;;  %v3322_v37 = vld [vmem:[#allocation7 + $0x860] sm:$0xff]  ;;  %v3339_v22 = vld [vmem:[#allocation7 + $0x8e8] sm:$0xff] }
 0x29f   :  { %8017 = vmatpush1.bf16.msra.mxu0 %v8016_v3  ;;  %v3299_v3 = vld [vmem:[#allocation7 + $0x7a8] sm:$0xff]  ;;  %v3346_v28 = vld [vmem:[#allocation7 + $0x920] sm:$0xff]  ;;  %v3344_v41 = vld [vmem:[#allocation7 + $0x910] sm:$0xff] }
 0x2a0   :  { %8209 = vmatpush1.bf16.msra.mxu1 %v8208_v60  ;;  %8019 = vmatprep.subr.bf16.mxu0 %v8018_v55  ;;  %v3301_v60 = vld [vmem:[#allocation7 + $0x7b8] sm:$0xff]  ;;  %v8036_v55 = vpack.c.bf16 %v3290_v39, %v3286_v25  ;;  %v8038_v15 = vpack.c.bf16 %v3299_v3, %v3295_v34  ;;  %v3324_v25 = vld [vmem:[#allocation7 + $0x870] sm:$0xff]  ;;  %v3327_v39 = vld [vmem:[#allocation7 + $0x888] sm:$0xff] }
 0x2a1   :  { %8211 = vmatprep.subr.bf16.mxu1 %v8210_v52  ;;  %v3298_v52 = vld [vmem:[#allocation7 + $0x7a0] sm:$0xff]  ;;  %v8230_v56 = vpack.c.bf16 %v3301_v60, %v3297_v7  ;;  %v3329_v34 = vld [vmem:[#allocation7 + $0x898] sm:$0xff]  ;;  %v8052_v60 = vpack.c.bf16 %v3322_v37, %v3318_v54  ;;  %v3343_v40 = vld [vmem:[#allocation7 + $0x908] sm:$0xff] }
 0x2a2   :  { %v3333_v3 = vld [vmem:[#allocation7 + $0x8b8] sm:$0xff]  ;;  %v3352_v54 = vld [vmem:[#allocation7 + $0x950] sm:$0xff] }
 0x2a3   :  { %8021 = vmatpush1.bf16.msra.mxu0 %v8020_v29  ;;  %v3305_v29 = vld [vmem:[#allocation7 + $0x7d8] sm:$0xff] }
 0x2a4   :  { %8213 = vmatpush1.bf16.msra.mxu1 %v8212_v20  ;;  %8023 = vmatprep.subr.bf16.mxu0 %v8022_v45  ;;  %v3309_v20 = vld [vmem:[#allocation7 + $0x7f8] sm:$0xff]  ;;  %v8040_v45 = vpack.c.bf16 %v3298_v52, %v3294_v35  ;;  %v3330_v35 = vld [vmem:[#allocation7 + $0x8a0] sm:$0xff]  ;;  %v3328_v52 = vld [vmem:[#allocation7 + $0x890] sm:$0xff] }
 0x2a5   :  { %8215 = vmatprep.subr.bf16.mxu1 %v8214_v26  ;;  %v3306_v26 = vld [vmem:[#allocation7 + $0x7e0] sm:$0xff]  ;;  %v8234_v38 = vpack.c.bf16 %v3309_v20, %v3305_v29  ;;  %v3337_v29 = vld [vmem:[#allocation7 + $0x8d8] sm:$0xff] }
 0x2a7   :  { %8025 = vmatpush1.bf16.msra.mxu0 %v8024_v23  ;;  %v3313_v23 = vld [vmem:[#allocation7 + $0x818] sm:$0xff] }
 0x2a8   :  { %8217 = vmatpush1.bf16.msra.mxu1 %v8216_v11  ;;  %8027 = vmatprep.subr.bf16.mxu0 %v8026_v19  ;;  %v3317_v11 = vld [vmem:[#allocation7 + $0x838] sm:$0xff]  ;;  %v8044_v19 = vpack.c.bf16 %v3306_v26, %v3302_v44  ;;  %v3334_v44 = vld [vmem:[#allocation7 + $0x8c0] sm:$0xff] }
 0x2a9   :  { %8219 = vmatprep.subr.bf16.mxu1 %v8218_v53  ;;  %v3314_v53 = vld [vmem:[#allocation7 + $0x820] sm:$0xff]  ;;  %v8238_v6 = vpack.c.bf16 %v3317_v11, %v3313_v23  ;;  %v3347_v23 = vld [vmem:[#allocation7 + $0x928] sm:$0xff]  ;;  %v3345_v11 = vld [vmem:[#allocation7 + $0x918] sm:$0xff] }
 0x2aa   :  { %v8048_v21 = vpack.c.bf16 %v3314_v53, %v3310_v51  ;;  %v3338_v26 = vld [vmem:[#allocation7 + $0x8e0] sm:$0xff]  ;;  %v8252_v51 = vpack.c.bf16 %v3340_v5, %v3336_v27  ;;  %v8062_v53 = vpack.c.bf16 %v3347_v23, %v3343_v40  ;;  %v3376_v40 = vld [vmem:[#allocation7 + $0xa10] sm:$0xff] }
 0x2ab   :  { %8029 = vmatpush1.bf16.msra.mxu0 %v8028_v14  ;;  %v3319_v14 = vld [vmem:[#allocation7 + $0x848] sm:$0xff]  ;;  %v3378_v5 = vld [vmem:[#allocation7 + $0xa20] sm:$0xff] }
 0x2ac   :  { %8221 = vmatpush1.bf16.msra.mxu1 %v8220_v1  ;;  %8031 = vmatprep.subr.bf16.mxu0 %v8030_v31  ;;  %v3323_v1 = vld [vmem:[#allocation7 + $0x868] sm:$0xff] }
 0x2ad   :  { %8223 = vmatprep.subr.bf16.mxu1 %v8222_v10  ;;  %v3325_v10 = vld [vmem:[#allocation7 + $0x878] sm:$0xff] }
 0x2ae   :  { %v8242_v43 = vpack.c.bf16 %v3325_v10, %v3321_v63 }
 0x2af   :  { %8033 = vmatpush1.bf16.msra.mxu0 %v8032_v8  ;;  %v3320_v8 = vld [vmem:[#allocation7 + $0x850] sm:$0xff] }
 0x2b0   :  { %8225 = vmatpush1.bf16.msra.mxu1 %v8224_v18  ;;  %8035 = vmatprep.subr.bf16.mxu0 %v8034_v47  ;;  %v8050_v47 = vpack.c.bf16 %v3323_v1, %v3319_v14  ;;  %v3348_v14 = vld [vmem:[#allocation7 + $0x930] sm:$0xff]  ;;  %v3351_v1 = vld [vmem:[#allocation7 + $0x948] sm:$0xff] }
 0x2b1   :  { %8227 = vmatprep.subr.bf16.mxu1 %v8226_v24  ;;  %v3464_v24 = vcombine.high %v10817_v30, %v10817_v30  ;;  %v8256_v10 = vpack.c.bf16 %v3348_v14, %v3344_v41  ;;  %v3382_v41 = vld [vmem:[#allocation7 + $0xa40] sm:$0xff]  ;;  %v3384_v14 = vld [vmem:[#allocation7 + $0xa50] sm:$0xff] }
 0x2b3   :  { %8037 = vmatpush1.bf16.msra.mxu0 %v8036_v55  ;;  %v8244_v55 = vpack.c.bf16 %v3324_v25, %v3320_v8  ;;  %v3356_v8 = vld [vmem:[#allocation7 + $0x970] sm:$0xff]  ;;  %v3361_v25 = vld [vmem:[#allocation7 + $0x998] sm:$0xff] }
 0x2b4   :  { %8229 = vmatpush1.bf16.msra.mxu1 %v8228_v4  ;;  %8039 = vmatprep.subr.bf16.mxu0 %v8038_v15  ;;  %v8054_v4 = vpack.c.bf16 %v3331_v49, %v3327_v39  ;;  %v3326_v15 = vld [vmem:[#allocation7 + $0x880] sm:$0xff]  ;;  %v3365_v39 = vld [vmem:[#allocation7 + $0x9b8] sm:$0xff] }
 0x2b5   :  { %8231 = vmatprep.subr.bf16.mxu1 %v8230_v56  ;;  %v8246_v56 = vpack.c.bf16 %v3333_v3, %v3329_v34  ;;  %v3358_v34 = vld [vmem:[#allocation7 + $0x980] sm:$0xff] }
 0x2b6   :  { %v3362_v3 = vld [vmem:[#allocation7 + $0x9a0] sm:$0xff] }
 0x2b7   :  { %8041 = vmatpush1.bf16.msra.mxu0 %v8040_v45  ;;  %v8056_v45 = vpack.c.bf16 %v3330_v35, %v3326_v15  ;;  %v3371_v15 = vld [vmem:[#allocation7 + $0x9e8] sm:$0xff]  ;;  %v3369_v35 = vld [vmem:[#allocation7 + $0x9d8] sm:$0xff] }
 0x2b8   :  { %8233 = vmatpush1.bf16.msra.mxu1 %v8232_v12  ;;  %8043 = vmatprep.subr.bf16.mxu0 %v8042_v59  ;;  %v8248_v12 = vpack.c.bf16 %v3332_v48, %v3328_v52  ;;  %v8058_v59 = vpack.c.bf16 %v3339_v22, %v3335_v9  ;;  %v3373_v52 = vld [vmem:[#allocation7 + $0x9f8] sm:$0xff]  ;;  %v3366_v9 = vld [vmem:[#allocation7 + $0x9c0] sm:$0xff] }
 0x2b9   :  { %8235 = vmatprep.subr.bf16.mxu1 %v8234_v38  ;;  %v3370_v22 = vld [vmem:[#allocation7 + $0x9e0] sm:$0xff] }
 0x2ba   :  { %v2472_v46 = vpop.f32.mrb[18].mxu0 }
 0x2bb   :  { %8045 = vmatpush1.bf16.msra.mxu0 %v8044_v19  ;;  %v2543_v31 = vpop.f32.mrb[18].mxu1  ;;  %v2474_v36 = vpop.f32.mrb[19].mxu0  ;;  %v3349_v19 = vld [vmem:[#allocation7 + $0x938] sm:$0xff] }
 0x2bc   :  { %8237 = vmatpush1.bf16.msra.mxu1 %v8236_v62  ;;  %v2548_v61 = vmax.f32 %v2472_v46, %v2474_v36  ;;  %v2545_v13 = vpop.f32.mrb[19].mxu1  ;;  %8047 = vmatprep.subr.bf16.mxu0 %v8046_v2  ;;  %v8060_v2 = vpack.c.bf16 %v3338_v26, %v3334_v44  ;;  %v8254_v46 = vpack.c.bf16 %v3349_v19, %v3345_v11  ;;  %v3353_v36 = vld [vmem:[#allocation7 + $0x958] sm:$0xff]  ;;  %v3380_v11 = vld [vmem:[#allocation7 + $0xa30] sm:$0xff]  ;;  %v3383_v19 = vld [vmem:[#allocation7 + $0xa48] sm:$0xff] }
 0x2bd   :  { %v2549_v18 = vmax.f32 %v2543_v31, %v2545_v13  ;;  %8239 = vmatprep.subr.bf16.mxu1 %v8238_v6  ;;  %v3342_v6 = vld [vmem:[#allocation7 + $0x900] sm:$0xff]  ;;  %v3355_v31 = vld [vmem:[#allocation7 + $0x968] sm:$0xff]  ;;  %v3381_v44 = vld [vmem:[#allocation7 + $0xa38] sm:$0xff]  ;;  %v8076_v26 = vpack.c.bf16 %v3370_v22, %v3366_v9 }
 0x2be   :  { %3607 = vmatmul.mubr.f32.vlgmr.msra.gmra.mrb[24].mxu0 %v10808_v16  ;;  %v8064_v63 = vpack.c.bf16 %v3346_v28, %v3342_v6  ;;  %v3350_v13 = vld [vmem:[#allocation7 + $0x940] sm:$0xff]  ;;  %v8272_v6 = vpack.c.bf16 %v3380_v11, %v3376_v40  ;;  %v3409_v9 = vld [vmem:[#allocation7 + $0xb18] sm:$0xff]  ;;  %v3419_v40 = vld [vmem:[#allocation7 + $0xb68] sm:$0xff] }
 0x2bf   :  { %v2550_v7 = vmax.f32 %v2548_v61, %v2549_v18  ;;  %3820 = vmatmul.mubr.f32.vlgmr.msra.gmra.mrb[24].mxu1 %v10808_v16  ;;  %8049 = vmatpush1.bf16.msra.mxu0 %v8048_v21  ;;  %v3341_v16 = vld [vmem:[#allocation7 + $0x8f8] sm:$0xff]  ;;  %v8066_v61 = vpack.c.bf16 %v3355_v31, %v3351_v1  ;;  %v3359_v18 = vld [vmem:[#allocation7 + $0x988] sm:$0xff]  ;;  %v3388_v31 = vld [vmem:[#allocation7 + $0xa70] sm:$0xff] }
 0x2c0   :  { %3677 = vmatprep.mubr.f32.mxu0 %v3464_v24  ;;  %8241 = vmatpush1.bf16.msra.mxu1 %v8240_v42  ;;  %v8250_v58 = vpack.c.bf16 %v3341_v16, %v3337_v29  ;;  %v3357_v21 = vld [vmem:[#allocation7 + $0x978] sm:$0xff]  ;;  %v3354_v42 = vld [vmem:[#allocation7 + $0x960] sm:$0xff]  ;;  %v3368_v29 = vld [vmem:[#allocation7 + $0x9d0] sm:$0xff]  ;;  %v8266_v16 = vpack.c.bf16 %v3373_v52, %v3369_v35 }
 0x2c1   :  { %v2551_v0 = vadd.f32 %v2550_v7, %v10266_v57  ;;  %3890 = vmatprep.mubr.f32.mxu1 %v3464_v24  ;;  %8051 = vmatprep.subr.bf16.mxu0 %v8050_v47  ;;  %v8258_v37 = vpack.c.bf16 %v3357_v21, %v3353_v36  ;;  %v3363_v47 = vld [vmem:[#allocation7 + $0x9a8] sm:$0xff]  ;;  %v8068_v49 = vpack.c.bf16 %v3354_v42, %v3350_v13  ;;  %v3360_v7 = vld [vmem:[#allocation7 + $0x990] sm:$0xff]  ;;  %v3413_v22 = vld [vmem:[#allocation7 + $0xb38] sm:$0xff] }
 0x2c2   :  { %8243 = vmatprep.subr.bf16.mxu1 %v8242_v43  ;;  %v8260_v24 = vpack.c.bf16 %v3356_v8, %v3352_v54  ;;  %v8070_v43 = vpack.c.bf16 %v3363_v47, %v3359_v18  ;;  %v3391_v36 = vld [vmem:[#allocation7 + $0xa88] sm:$0xff]  ;;  %v8276_v13 = vpack.c.bf16 %v3388_v31, %v3384_v14  ;;  %v3390_v54 = vld [vmem:[#allocation7 + $0xa80] sm:$0xff]  ;;  %v3392_v8 = vld [vmem:[#allocation7 + $0xa90] sm:$0xff] }
 0x2c3   :  { %v2552_v20 = vmax.f32 %v2551_v0, 0.0  ;;  %8053 = vmatpush1.bf16.msra.mxu0 %v8052_v60  ;;  %v8262_v60 = vpack.c.bf16 %v3365_v39, %v3361_v25  ;;  %v8072_v0 = vpack.c.bf16 %v3362_v3, %v3358_v34  ;;  %v3395_v21 = vld [vmem:[#allocation7 + $0xaa8] sm:$0xff]  ;;  %v3396_v47 = vld [vmem:[#allocation7 + $0xab0] sm:$0xff]  ;;  %v3417_v11 = vld [vmem:[#allocation7 + $0xb58] sm:$0xff] }
 0x2c4   :  { %8245 = vmatpush1.bf16.msra.mxu1 %v8244_v55  ;;  %8055 = vmatprep.subr.bf16.mxu0 %v8054_v4  ;;  %v3364_v55 = vld [vmem:[#allocation7 + $0x9b0] sm:$0xff]  ;;  %v3367_v4 = vld [vmem:[#allocation7 + $0x9c8] sm:$0xff]  ;;  %v8086_v42 = vpack.c.bf16 %v3395_v21, %v3391_v36  ;;  %v8280_v34 = vpack.c.bf16 %v3396_v47, %v3392_v8  ;;  %v3425_v21 = vld [vmem:[#allocation7 + $0xb98] sm:$0xff] }
 0x2c5   :  { %v2553_v38 = vmul.f32 %v2552_v20, %v10288_v17  ;;  %8247 = vmatprep.subr.bf16.mxu1 %v8246_v56  ;;  %v8264_v56 = vpack.c.bf16 %v3364_v55, %v3360_v7  ;;  %v8074_v48 = vpack.c.bf16 %v3371_v15, %v3367_v4  ;;  %v3372_v20 = vld [vmem:[#allocation7 + $0x9f0] sm:$0xff]  ;;  %v3399_v25 = vld [vmem:[#allocation7 + $0xac8] sm:$0xff]  ;;  %v3398_v7 = vld [vmem:[#allocation7 + $0xac0] sm:$0xff] }
 0x2c6   :  { %v8268_v27 = vpack.c.bf16 %v3372_v20, %v3368_v29  ;;  %v3403_v39 = vld [vmem:[#allocation7 + $0xae8] sm:$0xff]  ;;  %v3400_v55 = vld [vmem:[#allocation7 + $0xad0] sm:$0xff] }
 0x2c7   :  { %v2554_v62 = vadd.f32 %v2553_v38, %v10297_v33  ;;  %8057 = vmatpush1.bf16.msra.mxu0 %v8056_v45  ;;  %v3375_v45 = vld [vmem:[#allocation7 + $0xa08] sm:$0xff]  ;;  %v8090_v3 = vpack.c.bf16 %v3403_v39, %v3399_v25  ;;  %v3404_v35 = vld [vmem:[#allocation7 + $0xaf0] sm:$0xff] }
 0x2c8   :  { %8249 = vmatpush1.bf16.msra.mxu1 %v8248_v12  ;;  %8059 = vmatprep.subr.bf16.mxu0 %v8058_v59  ;;  %v3379_v12 = vld [vmem:[#allocation7 + $0xa28] sm:$0xff]  ;;  %v3377_v59 = vld [vmem:[#allocation7 + $0xa18] sm:$0xff]  ;;  %v3420_v14 = vld [vmem:[#allocation7 + $0xb70] sm:$0xff] }
 0x2c9   :  { %2555 = vst [vmem:[#allocation2 + $0x12] sm:$0x3] %v2554_v62  ;;  %8251 = vmatprep.subr.bf16.mxu1 %v8250_v58  ;;  %v8078_v38 = vpack.c.bf16 %v3379_v12, %v3375_v45  ;;  %v3374_v58 = vld [vmem:[#allocation7 + $0xa00] sm:$0xff]  ;;  %v8270_v23 = vpack.c.bf16 %v3381_v44, %v3377_v59  ;;  %v3387_v62 = vld [vmem:[#allocation7 + $0xa68] sm:$0xff]  ;;  %v8284_v12 = vpack.c.bf16 %v3404_v35, %v3400_v55  ;;  %v3424_v8 = vld [vmem:[#allocation7 + $0xb90] sm:$0xff] }
 0x2ca   :  { %v8082_v28 = vpack.c.bf16 %v3387_v62, %v3383_v19  ;;  %v3407_v52 = vld [vmem:[#allocation7 + $0xb08] sm:$0xff]  ;;  %v3406_v44 = vld [vmem:[#allocation7 + $0xb00] sm:$0xff]  ;;  %v3421_v19 = vld [vmem:[#allocation7 + $0xb78] sm:$0xff] }
 0x2cb   :  { %8061 = vmatpush1.bf16.msra.mxu0 %v8060_v2  ;;  %v3385_v2 = vld [vmem:[#allocation7 + $0xa58] sm:$0xff]  ;;  %v3427_v31 = vld [vmem:[#allocation7 + $0xba8] sm:$0xff]  ;;  %v3428_v47 = vld [vmem:[#allocation7 + $0xbb0] sm:$0xff] }
 0x2cc   :  { %8253 = vmatpush1.bf16.msra.mxu1 %v8252_v51  ;;  %8063 = vmatprep.subr.bf16.mxu0 %v8062_v53  ;;  %v3389_v51 = vld [vmem:[#allocation7 + $0xa78] sm:$0xff]  ;;  %v8080_v53 = vpack.c.bf16 %v3378_v5, %v3374_v58  ;;  %v3412_v58 = vld [vmem:[#allocation7 + $0xb30] sm:$0xff]  ;;  %v3415_v5 = vld [vmem:[#allocation7 + $0xb48] sm:$0xff] }
 0x2cd   :  { %8255 = vmatprep.subr.bf16.mxu1 %v8254_v46  ;;  %v3386_v46 = vld [vmem:[#allocation7 + $0xa60] sm:$0xff]  ;;  %v8274_v1 = vpack.c.bf16 %v3389_v51, %v3385_v2  ;;  %v3431_v25 = vld [vmem:[#allocation7 + $0xbc8] sm:$0xff]  ;;  %v3436_v35 = vld [vmem:[#allocation7 + $0xbf0] sm:$0xff] }
 0x2ce   :  { %v3435_v39 = vld [vmem:[#allocation7 + $0xbe8] sm:$0xff]  ;;  %v3434_v55 = vld [vmem:[#allocation7 + $0xbe0] sm:$0xff] }
 0x2cf   :  { %8065 = vmatpush1.bf16.msra.mxu0 %v8064_v63  ;;  %v3393_v63 = vld [vmem:[#allocation7 + $0xa98] sm:$0xff] }
 0x2d0   :  { %8257 = vmatpush1.bf16.msra.mxu1 %v8256_v10  ;;  %8067 = vmatprep.subr.bf16.mxu0 %v8066_v61  ;;  %v3397_v10 = vld [vmem:[#allocation7 + $0xab8] sm:$0xff]  ;;  %v8084_v61 = vpack.c.bf16 %v3386_v46, %v3382_v41  ;;  %v3416_v41 = vld [vmem:[#allocation7 + $0xb50] sm:$0xff]  ;;  %v8290_v46 = vpack.c.bf16 %v3421_v19, %v3417_v11  ;;  %v3917_v11 = vld [vmem:[#allocation7 + $0x40] sm:$0xff] }
 0x2d1   :  { %8259 = vmatprep.subr.bf16.mxu1 %v8258_v37  ;;  %v3394_v37 = vld [vmem:[#allocation7 + $0xaa0] sm:$0xff]  ;;  %v8278_v18 = vpack.c.bf16 %v3397_v10, %v3393_v63  ;;  %v3429_v63 = vld [vmem:[#allocation7 + $0xbb8] sm:$0xff] }
 0x2d2   :  { %v3921_v19 = vld [vmem:[#allocation7 + $0x60] sm:$0xff] }
 0x2d3   :  { %8069 = vmatpush1.bf16.msra.mxu0 %v8068_v49  ;;  %v3401_v49 = vld [vmem:[#allocation7 + $0xad8] sm:$0xff] }
 0x2d4   :  { %8261 = vmatpush1.bf16.msra.mxu1 %v8260_v24  ;;  %8071 = vmatprep.subr.bf16.mxu0 %v8070_v43  ;;  %v3405_v24 = vld [vmem:[#allocation7 + $0xaf8] sm:$0xff]  ;;  %v8088_v43 = vpack.c.bf16 %v3394_v37, %v3390_v54  ;;  %v3422_v54 = vld [vmem:[#allocation7 + $0xb80] sm:$0xff] }
 0x2d5   :  { %8263 = vmatprep.subr.bf16.mxu1 %v8262_v60  ;;  %v3402_v60 = vld [vmem:[#allocation7 + $0xae0] sm:$0xff]  ;;  %v8282_v15 = vpack.c.bf16 %v3405_v24, %v3401_v49  ;;  %v3433_v24 = vld [vmem:[#allocation7 + $0xbd8] sm:$0xff] }
 0x2d6   :  { %v8092_v20 = vpack.c.bf16 %v3402_v60, %v3398_v7  ;;  %v3426_v37 = vld [vmem:[#allocation7 + $0xba0] sm:$0xff]  ;;  %v8106_v7 = vpack.c.bf16 %v3435_v39, %v3431_v25 }
 0x2d7   :  { %8073 = vmatpush1.bf16.msra.mxu0 %v8072_v0  ;;  %v3411_v0 = vld [vmem:[#allocation7 + $0xb28] sm:$0xff]  ;;  %v3430_v60 = vld [vmem:[#allocation7 + $0xbc0] sm:$0xff] }
 0x2d8   :  { %8265 = vmatpush1.bf16.msra.mxu1 %v8264_v56  ;;  %8075 = vmatprep.subr.bf16.mxu0 %v8074_v48  ;;  %v8094_v59 = vpack.c.bf16 %v3411_v0, %v3407_v52  ;;  %v3910_v52 = vld [vmem:[#allocation7 + $0x8] sm:$0xff]  ;;  %v3933_v25 = vld [vmem:[#allocation7 + $0xc0] sm:$0xff] }
 0x2d9   :  { %8267 = vmatprep.subr.bf16.mxu1 %v8266_v16  ;;  %v3914_v0 = vld [vmem:[#allocation7 + $0x28] sm:$0xff]  ;;  %v3937_v39 = vld [vmem:[#allocation7 + $0xe0] sm:$0xff] }
 0x2db   :  { %8077 = vmatpush1.bf16.msra.mxu0 %v8076_v26  ;;  %v3410_v26 = vld [vmem:[#allocation7 + $0xb20] sm:$0xff] }
 0x2dc   :  { %8269 = vmatpush1.bf16.msra.mxu1 %v8268_v27  ;;  %8079 = vmatprep.subr.bf16.mxu0 %v8078_v38  ;;  %v3408_v27 = vld [vmem:[#allocation7 + $0xb10] sm:$0xff]  ;;  %v8286_v38 = vpack.c.bf16 %v3413_v22, %v3409_v9  ;;  %v8096_v62 = vpack.c.bf16 %v3410_v26, %v3406_v44  ;;  %v8108_v9 = vpack.c.bf16 %v3434_v55, %v3430_v60  ;;  %v10829_v22 = vld [vmem:[#allocation2 + $0x4] sm:$0xff]  ;;  %v3948_v60 = vld [vmem:[#allocation7 + $0x138] sm:$0xff] }
 0x2dd   :  { %8271 = vmatprep.subr.bf16.mxu1 %v8270_v23  ;;  %v8288_v51 = vpack.c.bf16 %v3412_v58, %v3408_v27  ;;  %v3915_v44 = vld [vmem:[#allocation7 + $0x30] sm:$0xff]  ;;  %v10833_v26 = vrot.slane %v10829_v22, %v10781_v32  ;;  %v3918_v27 = vld [vmem:[#allocation7 + $0x48] sm:$0xff]  ;;  %v8316_v55 = vpack.c.bf16 %v3937_v39, %v3933_v25 }
 0x2df   :  { %8081 = vmatpush1.bf16.msra.mxu0 %v8080_v53  ;;  %v8098_v53 = vpack.c.bf16 %v3419_v40, %v3415_v5  ;;  %v3920_v5 = vld [vmem:[#allocation7 + $0x58] sm:$0xff] }
 0x2e0   :  { %8273 = vmatpush1.bf16.msra.mxu1 %v8272_v6  ;;  %8083 = vmatprep.subr.bf16.mxu0 %v8082_v28  ;;  %v3414_v6 = vld [vmem:[#allocation7 + $0xb40] sm:$0xff]  ;;  %v3924_v40 = vld [vmem:[#allocation7 + $0x78] sm:$0xff] }
 0x2e1   :  { %8275 = vmatprep.subr.bf16.mxu1 %v8274_v1  ;;  %v3418_v28 = vld [vmem:[#allocation7 + $0xb60] sm:$0xff]  ;;  %v3423_v1 = vld [vmem:[#allocation7 + $0xb88] sm:$0xff] }
 0x2e2   :  { %v8100_v10 = vpack.c.bf16 %v3418_v28, %v3414_v6  ;;  %v3930_v6 = vld [vmem:[#allocation7 + $0xa8] sm:$0xff]  ;;  %v4310_v28 = vcombine.high %v10833_v26, %v10833_v26 }
 0x2e3   :  { %8085 = vmatpush1.bf16.msra.mxu0 %v8084_v61 }
 0x2e4   :  { %8277 = vmatpush1.bf16.msra.mxu1 %v8276_v13  ;;  %8087 = vmatprep.subr.bf16.mxu0 %v8086_v42  ;;  %v8292_v13 = vpack.c.bf16 %v3420_v14, %v3416_v41  ;;  %v8102_v42 = vpack.c.bf16 %v3427_v31, %v3423_v1  ;;  %v8498_v41 = vpack.c.bf16 %v3924_v40, %v3920_v5  ;;  %v3932_v14 = vld [vmem:[#allocation7 + $0xb8] sm:$0xff]  ;;  %v3955_v5 = vld [vmem:[#allocation7 + $0x170] sm:$0xff]  ;;  %v3958_v40 = vld [vmem:[#allocation7 + $0x188] sm:$0xff] }
 0x2e5   :  { %8279 = vmatprep.subr.bf16.mxu1 %v8278_v18  ;;  %v2720_v4 = vpop.f32.mrb[20].mxu0  ;;  %v8294_v18 = vpack.c.bf16 %v3429_v63, %v3425_v21  ;;  %v8308_v1 = vpack.c.bf16 %v3921_v19, %v3917_v11  ;;  %v3925_v21 = vld [vmem:[#allocation7 + $0x80] sm:$0xff]  ;;  %v3960_v11 = vld [vmem:[#allocation7 + $0x198] sm:$0xff] }
 0x2e6   :  { %v2791_v56 = vpop.f32.mrb[20].mxu1  ;;  %v2722_v48 = vpop.f32.mrb[21].mxu0  ;;  %v3929_v63 = vld [vmem:[#allocation7 + $0xa0] sm:$0xff]  ;;  %v3964_v19 = vld [vmem:[#allocation7 + $0x1b8] sm:$0xff] }
 0x2e7   :  { %8089 = vmatpush1.bf16.msra.mxu0 %v8088_v43  ;;  %v2796_v29 = vmax.f32 %v2720_v4, %v2722_v48  ;;  %v2793_v16 = vpop.f32.mrb[21].mxu1  ;;  %v3437_v43 = vld [vmem:[#allocation7 + $0xbf8] sm:$0xff]  ;;  %v3432_v4 = vld [vmem:[#allocation7 + $0xbd0] sm:$0xff] }
 0x2e8   :  { %8281 = vmatpush1.bf16.msra.mxu1 %v8280_v34  ;;  %v2797_v45 = vmax.f32 %v2791_v56, %v2793_v16  ;;  %8091 = vmatprep.subr.bf16.mxu0 %v8090_v3  ;;  %v8104_v34 = vpack.c.bf16 %v3426_v37, %v3422_v54  ;;  %v8296_v3 = vpack.c.bf16 %v3428_v47, %v3424_v8  ;;  %v3912_v56 = vld [vmem:[#allocation7 + $0x18] sm:$0xff]  ;;  %v3938_v54 = vld [vmem:[#allocation7 + $0xe8] sm:$0xff] }
 0x2e9   :  { %8283 = vmatprep.subr.bf16.mxu1 %v8282_v15  ;;  %v8298_v15 = vpack.c.bf16 %v3437_v43, %v3433_v24  ;;  %v3916_v48 = vld [vmem:[#allocation7 + $0x38] sm:$0xff]  ;;  %v8302_v16 = vpack.c.bf16 %v3914_v0, %v3910_v52  ;;  %v3939_v43 = vld [vmem:[#allocation7 + $0xf0] sm:$0xff]  ;;  %v3945_v52 = vld [vmem:[#allocation7 + $0x120] sm:$0xff] }
 0x2ea   :  { %v2798_v23 = vmax.f32 %v2796_v29, %v2797_v45  ;;  %v8300_v29 = vpack.c.bf16 %v3436_v35, %v3432_v4  ;;  %v3913_v45 = vld [vmem:[#allocation7 + $0x20] sm:$0xff]  ;;  %v3936_v37 = vld [vmem:[#allocation7 + $0xd8] sm:$0xff]  ;;  %v3943_v0 = vld [vmem:[#allocation7 + $0x110] sm:$0xff] }
 0x2eb   :  { %8093 = vmatpush1.bf16.msra.mxu0 %v8092_v20  ;;  %v3909_v20 = vld [vmem:[#allocation7] sm:$0xff]  ;;  %v3940_v8 = vld [vmem:[#allocation7 + $0xf8] sm:$0xff] }
 0x2ec   :  { %v2799_v2 = vadd.f32 %v2798_v23, %v10266_v57  ;;  %8285 = vmatpush1.bf16.msra.mxu1 %v8284_v12  ;;  %8095 = vmatprep.subr.bf16.mxu0 %v8094_v59  ;;  %v8494_v12 = vpack.c.bf16 %v3916_v48, %v3912_v56  ;;  %v3911_v59 = vld [vmem:[#allocation7 + $0x10] sm:$0xff]  ;;  %v8304_v58 = vpack.c.bf16 %v3913_v45, %v3909_v20  ;;  %v3941_v35 = vld [vmem:[#allocation7 + $0x100] sm:$0xff]  ;;  %v3956_v20 = vld [vmem:[#allocation7 + $0x178] sm:$0xff] }
 0x2ed   :  { %8287 = vmatprep.subr.bf16.mxu1 %v8286_v38  ;;  %v3922_v38 = vld [vmem:[#allocation7 + $0x68] sm:$0xff]  ;;  %v8496_v23 = vpack.c.bf16 %v3915_v44, %v3911_v59  ;;  %v8506_v24 = vpack.c.bf16 %v3940_v8, %v3936_v37  ;;  %v3947_v48 = vld [vmem:[#allocation7 + $0x130] sm:$0xff]  ;;  %v8320_v45 = vpack.c.bf16 %v3945_v52, %v3941_v35  ;;  %v3949_v44 = vld [vmem:[#allocation7 + $0x140] sm:$0xff] }
 0x2ee   :  { %v2800_v36 = vmax.f32 %v2799_v2, 0.0  ;;  %v8306_v2 = vpack.c.bf16 %v3922_v38, %v3918_v27  ;;  %v3953_v27 = vld [vmem:[#allocation7 + $0x160] sm:$0xff]  ;;  %v3951_v38 = vld [vmem:[#allocation7 + $0x150] sm:$0xff] }
 0x2ef   :  { %8097 = vmatpush1.bf16.msra.mxu0 %v8096_v62  ;;  %v3919_v62 = vld [vmem:[#allocation7 + $0x50] sm:$0xff]  ;;  %v3977_v35 = vld [vmem:[#allocation7 + $0x220] sm:$0xff] }
 0x2f0   :  { %v2801_v61 = vmul.f32 %v2800_v36, %v10288_v17  ;;  %8289 = vmatpush1.bf16.msra.mxu1 %v8288_v51  ;;  %8099 = vmatprep.subr.bf16.mxu0 %v8098_v53  ;;  %v3923_v51 = vld [vmem:[#allocation7 + $0x70] sm:$0xff]  ;;  %v3926_v53 = vld [vmem:[#allocation7 + $0x88] sm:$0xff] }
 0x2f1   :  { %8291 = vmatprep.subr.bf16.mxu1 %v8290_v46  ;;  %v3928_v46 = vld [vmem:[#allocation7 + $0x98] sm:$0xff]  ;;  %v8500_v31 = vpack.c.bf16 %v3923_v51, %v3919_v62  ;;  %v8310_v36 = vpack.c.bf16 %v3930_v6, %v3926_v53  ;;  %v8324_v62 = vpack.c.bf16 %v3953_v27, %v3949_v44  ;;  %v8516_v51 = vpack.c.bf16 %v3955_v5, %v3951_v38  ;;  %v3957_v6 = vld [vmem:[#allocation7 + $0x180] sm:$0xff]  ;;  %v3975_v52 = vld [vmem:[#allocation7 + $0x210] sm:$0xff] }
 0x2f2   :  { %v2802_v49 = vadd.f32 %v2801_v61, %v10297_v33  ;;  %v8502_v61 = vpack.c.bf16 %v3932_v14, %v3928_v46  ;;  %v3981_v44 = vld [vmem:[#allocation7 + $0x240] sm:$0xff]  ;;  %v3983_v38 = vld [vmem:[#allocation7 + $0x250] sm:$0xff] }
 0x2f3   :  { %8101 = vmatpush1.bf16.msra.mxu0 %v8100_v10  ;;  %v3927_v10 = vld [vmem:[#allocation7 + $0x90] sm:$0xff]  ;;  %v3985_v27 = vld [vmem:[#allocation7 + $0x260] sm:$0xff] }
 0x2f4   :  { %2803 = vst [vmem:[#allocation2 + $0x14] sm:$0x3] %v2802_v49  ;;  %8293 = vmatpush1.bf16.msra.mxu1 %v8292_v13  ;;  %8103 = vmatprep.subr.bf16.mxu0 %v8102_v42  ;;  %v3931_v13 = vld [vmem:[#allocation7 + $0xb0] sm:$0xff]  ;;  %v3934_v42 = vld [vmem:[#allocation7 + $0xc8] sm:$0xff] }
 0x2f5   :  { %8295 = vmatprep.subr.bf16.mxu1 %v8294_v18  ;;  %v8504_v18 = vpack.c.bf16 %v3931_v13, %v3927_v10  ;;  %v8314_v47 = vpack.c.bf16 %v3938_v54, %v3934_v42  ;;  %v3935_v49 = vld [vmem:[#allocation7 + $0xd0] sm:$0xff]  ;;  %v3972_v13 = vld [vmem:[#allocation7 + $0x1f8] sm:$0xff] }
 0x2f6   :  { %v8508_v4 = vpack.c.bf16 %v3939_v43, %v3935_v49  ;;  %v3971_v49 = vld [vmem:[#allocation7 + $0x1f0] sm:$0xff]  ;;  %v3978_v43 = vld [vmem:[#allocation7 + $0x228] sm:$0xff] }
 0x2f7   :  { %8105 = vmatpush1.bf16.msra.mxu0 %v8104_v34  ;;  %v3942_v34 = vld [vmem:[#allocation7 + $0x108] sm:$0xff] }
 0x2f8   :  { %8297 = vmatpush1.bf16.msra.mxu1 %v8296_v3  ;;  %8107 = vmatprep.subr.bf16.mxu0 %v8106_v7  ;;  %v3946_v3 = vld [vmem:[#allocation7 + $0x128] sm:$0xff]  ;;  %v3944_v7 = vld [vmem:[#allocation7 + $0x118] sm:$0xff] }
 0x2f9   :  { %8299 = vmatprep.subr.bf16.mxu1 %v8298_v15  ;;  %v8318_v15 = vpack.c.bf16 %v3946_v3, %v3942_v34  ;;  %v8510_v56 = vpack.c.bf16 %v3948_v60, %v3944_v7  ;;  %v3976_v34 = vld [vmem:[#allocation7 + $0x218] sm:$0xff] }
 0x2fa   :  { %v3980_v3 = vld [vmem:[#allocation7 + $0x238] sm:$0xff] }
 0x2fb   :  { %8109 = vmatpush1.bf16.msra.mxu0 %v8108_v9  ;;  %v3950_v9 = vld [vmem:[#allocation7 + $0x148] sm:$0xff] }
 0x2fc   :  { %8301 = vmatpush1.bf16.msra.mxu1 %v8300_v29  ;;  %8303 = vmatprep.subr.bf16.mxu0 %v8302_v16  ;;  %v3954_v29 = vld [vmem:[#allocation7 + $0x168] sm:$0xff]  ;;  %v3952_v16 = vld [vmem:[#allocation7 + $0x158] sm:$0xff] }
 0x2fd   :  { %8495 = vmatprep.subr.bf16.mxu1 %v8494_v12  ;;  %v8512_v12 = vpack.c.bf16 %v3947_v48, %v3943_v0  ;;  %v8322_v59 = vpack.c.bf16 %v3954_v29, %v3950_v9  ;;  %v3979_v48 = vld [vmem:[#allocation7 + $0x230] sm:$0xff]  ;;  %v3982_v9 = vld [vmem:[#allocation7 + $0x248] sm:$0xff] }
 0x2fe   :  { %3678 = vmatmul.mubr.f32.vlgmr.msra.gmra.mrb[24].mxu0 %v10817_v30  ;;  %v3986_v29 = vld [vmem:[#allocation7 + $0x268] sm:$0xff] }
 0x2ff   :  { %3891 = vmatmul.mubr.f32.vlgmr.msra.gmra.mrb[24].mxu1 %v10817_v30  ;;  %8305 = vmatpush1.bf16.msra.mxu0 %v8304_v58  ;;  %v8312_v30 = vpack.c.bf16 %v3929_v63, %v3925_v21  ;;  %v8514_v58 = vpack.c.bf16 %v3956_v20, %v3952_v16  ;;  %v3970_v21 = vld [vmem:[#allocation7 + $0x1e8] sm:$0xff]  ;;  %v3984_v16 = vld [vmem:[#allocation7 + $0x258] sm:$0xff] }
 0x300   :  { %4390 = vmatprep.mubr.f32.mxu0 %v4310_v28  ;;  %8497 = vmatpush1.bf16.msra.mxu1 %v8496_v23  ;;  %v3962_v23 = vld [vmem:[#allocation7 + $0x1a8] sm:$0xff]  ;;  %v3988_v20 = vld [vmem:[#allocation7 + $0x278] sm:$0xff] }
 0x301   :  { %4603 = vmatprep.mubr.f32.mxu1 %v4310_v28  ;;  %8307 = vmatprep.subr.bf16.mxu0 %v8306_v2  ;;  %v8326_v53 = vpack.c.bf16 %v3962_v23, %v3958_v40  ;;  %v3961_v28 = vld [vmem:[#allocation7 + $0x1a0] sm:$0xff]  ;;  %v8530_v5 = vpack.c.bf16 %v3988_v20, %v3984_v16  ;;  %v3987_v40 = vld [vmem:[#allocation7 + $0x270] sm:$0xff]  ;;  %v3990_v23 = vld [vmem:[#allocation7 + $0x288] sm:$0xff] }
 0x302   :  { %8499 = vmatprep.subr.bf16.mxu1 %v8498_v41  ;;  %v3959_v41 = vld [vmem:[#allocation7 + $0x190] sm:$0xff]  ;;  %v8328_v54 = vpack.c.bf16 %v3961_v28, %v3957_v6  ;;  %v3993_v6 = vld [vmem:[#allocation7 + $0x2a0] sm:$0xff]  ;;  %v4022_v16 = vld [vmem:[#allocation7 + $0x388] sm:$0xff] }
 0x303   :  { %8309 = vmatpush1.bf16.msra.mxu0 %v8308_v1  ;;  %v8518_v1 = vpack.c.bf16 %v3964_v19, %v3960_v11  ;;  %v3994_v11 = vld [vmem:[#allocation7 + $0x2a8] sm:$0xff]  ;;  %v3992_v19 = vld [vmem:[#allocation7 + $0x298] sm:$0xff]  ;;  %v3991_v28 = vld [vmem:[#allocation7 + $0x290] sm:$0xff] }
 0x304   :  { %8501 = vmatpush1.bf16.msra.mxu1 %v8500_v31  ;;  %8311 = vmatprep.subr.bf16.mxu0 %v8310_v36  ;;  %v3963_v31 = vld [vmem:[#allocation7 + $0x1b0] sm:$0xff]  ;;  %v3966_v36 = vld [vmem:[#allocation7 + $0x1c8] sm:$0xff] }
 0x305   :  { %8503 = vmatprep.subr.bf16.mxu1 %v8502_v61  ;;  %v3968_v61 = vld [vmem:[#allocation7 + $0x1d8] sm:$0xff]  ;;  %v8520_v37 = vpack.c.bf16 %v3963_v31, %v3959_v41  ;;  %v8330_v8 = vpack.c.bf16 %v3970_v21, %v3966_v36  ;;  %v4026_v20 = vld [vmem:[#allocation7 + $0x3a8] sm:$0xff] }
 0x306   :  { %v8522_v39 = vpack.c.bf16 %v3972_v13, %v3968_v61  ;;  %v4004_v31 = vld [vmem:[#allocation7 + $0x2f8] sm:$0xff]  ;;  %v4001_v61 = vld [vmem:[#allocation7 + $0x2e0] sm:$0xff]  ;;  %v3999_v13 = vld [vmem:[#allocation7 + $0x2d0] sm:$0xff] }
 0x307   :  { %8313 = vmatpush1.bf16.msra.mxu0 %v8312_v30  ;;  %v3965_v30 = vld [vmem:[#allocation7 + $0x1c0] sm:$0xff] }
 0x308   :  { %8505 = vmatpush1.bf16.msra.mxu1 %v8504_v18  ;;  %8315 = vmatprep.subr.bf16.mxu0 %v8314_v47  ;;  %v3969_v18 = vld [vmem:[#allocation7 + $0x1e0] sm:$0xff]  ;;  %v3967_v47 = vld [vmem:[#allocation7 + $0x1d0] sm:$0xff] }
 0x309   :  { %8507 = vmatprep.subr.bf16.mxu1 %v8506_v24  ;;  %v3974_v24 = vld [vmem:[#allocation7 + $0x208] sm:$0xff]  ;;  %v8332_v60 = vpack.c.bf16 %v3969_v18, %v3965_v30  ;;  %v4008_v30 = vld [vmem:[#allocation7 + $0x318] sm:$0xff] }
 0x30a   :  { %v4012_v18 = vld [vmem:[#allocation7 + $0x338] sm:$0xff] }
 0x30b   :  { %8317 = vmatpush1.bf16.msra.mxu0 %v8316_v55  ;;  %v8524_v55 = vpack.c.bf16 %v3971_v49, %v3967_v47  ;;  %v4005_v49 = vld [vmem:[#allocation7 + $0x300] sm:$0xff] }
 0x30c   :  { %8509 = vmatpush1.bf16.msra.mxu1 %v8508_v4  ;;  %8319 = vmatprep.subr.bf16.mxu0 %v8318_v15  ;;  %v8334_v4 = vpack.c.bf16 %v3978_v43, %v3974_v24  ;;  %v3973_v15 = vld [vmem:[#allocation7 + $0x200] sm:$0xff]  ;;  %v4007_v43 = vld [vmem:[#allocation7 + $0x310] sm:$0xff] }
 0x30d   :  { %8511 = vmatprep.subr.bf16.mxu1 %v8510_v56  ;;  %v8526_v56 = vpack.c.bf16 %v3980_v3, %v3976_v34  ;;  %v4009_v24 = vld [vmem:[#allocation7 + $0x320] sm:$0xff]  ;;  %v8542_v34 = vpack.c.bf16 %v4012_v18, %v4008_v30  ;;  %v4011_v3 = vld [vmem:[#allocation7 + $0x330] sm:$0xff]  ;;  %v4046_v30 = vld [vmem:[#allocation7 + $0x448] sm:$0xff] }
 0x30e   :  { %v4050_v18 = vld [vmem:[#allocation7 + $0x468] sm:$0xff] }
 0x30f   :  { %8321 = vmatpush1.bf16.msra.mxu0 %v8320_v45 }
 0x310   :  { %8513 = vmatpush1.bf16.msra.mxu1 %v8512_v12  ;;  %v2968_v2 = vpop.f32.mrb[22].mxu0  ;;  %8323 = vmatprep.subr.bf16.mxu0 %v8322_v59  ;;  %v8528_v12 = vpack.c.bf16 %v3979_v48, %v3975_v52  ;;  %v8338_v59 = vpack.c.bf16 %v3986_v29, %v3982_v9  ;;  %v4015_v48 = vld [vmem:[#allocation7 + $0x350] sm:$0xff] }
 0x311   :  { %v3039_v46 = vpop.f32.mrb[22].mxu1  ;;  %v2970_v14 = vpop.f32.mrb[23].mxu0  ;;  %8515 = vmatprep.subr.bf16.mxu1 %v8514_v58  ;;  %v4019_v29 = vld [vmem:[#allocation7 + $0x370] sm:$0xff] }
 0x312   :  { %v3044_v63 = vmax.f32 %v2968_v2, %v2970_v14  ;;  %v3041_v10 = vpop.f32.mrb[23].mxu1  ;;  %v8532_v2 = vpack.c.bf16 %v3987_v40, %v3983_v38  ;;  %v4002_v14 = vld [vmem:[#allocation7 + $0x2e8] sm:$0xff]  ;;  %v4025_v38 = vld [vmem:[#allocation7 + $0x3a0] sm:$0xff]  ;;  %v4027_v40 = vld [vmem:[#allocation7 + $0x3b0] sm:$0xff] }
 0x313   :  { %v3045_v42 = vmax.f32 %v3039_v46, %v3041_v10  ;;  %8325 = vmatpush1.bf16.msra.mxu0 %v8324_v62  ;;  %v3996_v62 = vld [vmem:[#allocation7 + $0x2b8] sm:$0xff]  ;;  %v3998_v46 = vld [vmem:[#allocation7 + $0x2c8] sm:$0xff]  ;;  %v3997_v10 = vld [vmem:[#allocation7 + $0x2c0] sm:$0xff] }
 0x314   :  { %8517 = vmatpush1.bf16.msra.mxu1 %v8516_v51  ;;  %8327 = vmatprep.subr.bf16.mxu0 %v8326_v53  ;;  %v8342_v51 = vpack.c.bf16 %v3994_v11, %v3990_v23  ;;  %v3989_v53 = vld [vmem:[#allocation7 + $0x280] sm:$0xff]  ;;  %v8534_v41 = vpack.c.bf16 %v3996_v62, %v3992_v19  ;;  %v8348_v47 = vpack.c.bf16 %v4001_v61, %v3997_v10  ;;  %v4030_v23 = vld [vmem:[#allocation7 + $0x3c8] sm:$0xff]  ;;  %v4032_v19 = vld [vmem:[#allocation7 + $0x3d8] sm:$0xff] }
 0x315   :  { %v3046_v25 = vmax.f32 %v3044_v63, %v3045_v42  ;;  %8519 = vmatprep.subr.bf16.mxu1 %v8518_v1  ;;  %v4000_v1 = vld [vmem:[#allocation7 + $0x2d8] sm:$0xff]  ;;  %v8344_v36 = vpack.c.bf16 %v3993_v6, %v3989_v53  ;;  %v8346_v63 = vpack.c.bf16 %v4002_v14, %v3998_v46  ;;  %v4034_v11 = vld [vmem:[#allocation7 + $0x3e8] sm:$0xff]  ;;  %v4029_v53 = vld [vmem:[#allocation7 + $0x3c0] sm:$0xff] }
 0x316   :  { %v8538_v42 = vpack.c.bf16 %v4004_v31, %v4000_v1  ;;  %v4036_v62 = vld [vmem:[#allocation7 + $0x3f8] sm:$0xff]  ;;  %v4033_v6 = vld [vmem:[#allocation7 + $0x3e0] sm:$0xff]  ;;  %v4038_v46 = vld [vmem:[#allocation7 + $0x408] sm:$0xff] }
 0x317   :  { %v3047_v7 = vadd.f32 %v3046_v25, %v10266_v57  ;;  %8329 = vmatpush1.bf16.msra.mxu0 %v8328_v54  ;;  %v8336_v57 = vpack.c.bf16 %v3977_v35, %v3973_v15  ;;  %v4003_v54 = vld [vmem:[#allocation7 + $0x2f0] sm:$0xff]  ;;  %v8352_v15 = vpack.c.bf16 %v4009_v24, %v4005_v49  ;;  %v8544_v35 = vpack.c.bf16 %v4011_v3, %v4007_v43  ;;  %v4042_v14 = vld [vmem:[#allocation7 + $0x428] sm:$0xff]  ;;  %v4040_v1 = vld [vmem:[#allocation7 + $0x418] sm:$0xff] }
 0x318   :  { %8521 = vmatpush1.bf16.msra.mxu1 %v8520_v37  ;;  %8331 = vmatprep.subr.bf16.mxu0 %v8330_v8  ;;  %v4006_v37 = vld [vmem:[#allocation7 + $0x308] sm:$0xff]  ;;  %v8540_v25 = vpack.c.bf16 %v4003_v54, %v3999_v13  ;;  %v4044_v31 = vld [vmem:[#allocation7 + $0x438] sm:$0xff]  ;;  %v8366_v10 = vpack.c.bf16 %v4042_v14, %v4038_v46  ;;  %v4037_v61 = vld [vmem:[#allocation7 + $0x400] sm:$0xff] }
 0x319   :  { %v3048_v0 = vmax.f32 %v3047_v7, 0.0  ;;  %8523 = vmatprep.subr.bf16.mxu1 %v8522_v39  ;;  %v4010_v8 = vld [vmem:[#allocation7 + $0x328] sm:$0xff]  ;;  %v4041_v13 = vld [vmem:[#allocation7 + $0x420] sm:$0xff]  ;;  %v4039_v54 = vld [vmem:[#allocation7 + $0x410] sm:$0xff] }
 0x31a   :  { %v8350_v39 = vpack.c.bf16 %v4010_v8, %v4006_v37  ;;  %v4014_v7 = vld [vmem:[#allocation7 + $0x348] sm:$0xff]  ;;  %v4043_v37 = vld [vmem:[#allocation7 + $0x430] sm:$0xff]  ;;  %v4045_v49 = vld [vmem:[#allocation7 + $0x440] sm:$0xff] }
 0x31b   :  { %v3049_v45 = vmul.f32 %v3048_v0, %v10288_v17  ;;  %8333 = vmatpush1.bf16.msra.mxu0 %v8332_v60  ;;  %v8340_v17 = vpack.c.bf16 %v3985_v27, %v3981_v44  ;;  %v4018_v60 = vld [vmem:[#allocation7 + $0x368] sm:$0xff]  ;;  %v4013_v0 = vld [vmem:[#allocation7 + $0x340] sm:$0xff]  ;;  %v8358_v44 = vpack.c.bf16 %v4026_v20, %v4022_v16  ;;  %v4047_v43 = vld [vmem:[#allocation7 + $0x450] sm:$0xff] }
 0x31c   :  { %8525 = vmatpush1.bf16.msra.mxu1 %v8524_v55  ;;  %8335 = vmatprep.subr.bf16.mxu0 %v8334_v4  ;;  %v4016_v55 = vld [vmem:[#allocation7 + $0x358] sm:$0xff]  ;;  %v8354_v52 = vpack.c.bf16 %v4018_v60, %v4014_v7  ;;  %v4021_v27 = vld [vmem:[#allocation7 + $0x380] sm:$0xff]  ;;  %v4051_v3 = vld [vmem:[#allocation7 + $0x470] sm:$0xff] }
 0x31d   :  { %v3050_v58 = vadd.f32 %v3049_v45, %v10297_v33  ;;  %8527 = vmatprep.subr.bf16.mxu1 %v8526_v56  ;;  %v3995_v33 = vld [vmem:[#allocation7 + $0x2b0] sm:$0xff]  ;;  %v4020_v4 = vld [vmem:[#allocation7 + $0x378] sm:$0xff]  ;;  %v4017_v56 = vld [vmem:[#allocation7 + $0x360] sm:$0xff] }
 0x31e   :  { %v8536_v21 = vpack.c.bf16 %v3995_v33, %v3991_v28  ;;  %v8546_v9 = vpack.c.bf16 %v4020_v4, %v4016_v55  ;;  %v4024_v45 = vld [vmem:[#allocation7 + $0x398] sm:$0xff]  ;;  %v4031_v28 = vld [vmem:[#allocation7 + $0x3d0] sm:$0xff]  ;;  %v4049_v24 = vld [vmem:[#allocation7 + $0x460] sm:$0xff] }
 0x31f   :  { %3051 = vst [vmem:[#allocation2 + $0x16] sm:$0x3] %v3050_v58  ;;  %8337 = vmatpush1.bf16.msra.mxu0 %v8336_v57  ;;  %v4028_v57 = vld [vmem:[#allocation7 + $0x3b8] sm:$0xff]  ;;  %v4023_v58 = vld [vmem:[#allocation7 + $0x390] sm:$0xff]  ;;  %v4054_v7 = vld [vmem:[#allocation7 + $0x488] sm:$0xff] }
 0x320   :  { %8529 = vmatpush1.bf16.msra.mxu1 %v8528_v12  ;;  %8339 = vmatprep.subr.bf16.mxu0 %v8338_v59  ;;  %v8356_v12 = vpack.c.bf16 %v4017_v56, %v4013_v0  ;;  %v8548_v59 = vpack.c.bf16 %v4019_v29, %v4015_v48  ;;  %v4035_v33 = vld [vmem:[#allocation7 + $0x3f0] sm:$0xff]  ;;  %v4058_v60 = vld [vmem:[#allocation7 + $0x4a8] sm:$0xff]  ;;  %v8564_v0 = vpack.c.bf16 %v4051_v3, %v4047_v43  ;;  %v4053_v48 = vld [vmem:[#allocation7 + $0x480] sm:$0xff] }
 0x321   :  { %8531 = vmatprep.subr.bf16.mxu1 %v8530_v5  ;;  %v8550_v5 = vpack.c.bf16 %v4028_v57, %v4024_v45  ;;  %v8374_v56 = vpack.c.bf16 %v4058_v60, %v4054_v7  ;;  %v4055_v29 = vld [vmem:[#allocation7 + $0x490] sm:$0xff]  ;;  %v4062_v45 = vld [vmem:[#allocation7 + $0x4c8] sm:$0xff]  ;;  %v4089_v43 = vld [vmem:[#allocation7 + $0x5a0] sm:$0xff] }
 0x322   :  { %v4059_v20 = vld [vmem:[#allocation7 + $0x4b0] sm:$0xff]  ;;  %v4066_v57 = vld [vmem:[#allocation7 + $0x4e8] sm:$0xff] }
 0x323   :  { %8341 = vmatpush1.bf16.msra.mxu0 %v8340_v17  ;;  %v8360_v17 = vpack.c.bf16 %v4025_v38, %v4021_v27  ;;  %v8378_v27 = vpack.c.bf16 %v4066_v57, %v4062_v45  ;;  %v4061_v38 = vld [vmem:[#allocation7 + $0x4c0] sm:$0xff]  ;;  %v4075_v46 = vld [vmem:[#allocation7 + $0x530] sm:$0xff]  ;;  %v4078_v14 = vld [vmem:[#allocation7 + $0x548] sm:$0xff] }
 0x324   :  { %8533 = vmatpush1.bf16.msra.mxu1 %v8532_v2  ;;  %8343 = vmatprep.subr.bf16.mxu0 %v8342_v51  ;;  %v8552_v2 = vpack.c.bf16 %v4027_v40, %v4023_v58  ;;  %v8362_v51 = vpack.c.bf16 %v4034_v11, %v4030_v23  ;;  %v4065_v58 = vld [vmem:[#allocation7 + $0x4e0] sm:$0xff]  ;;  %v4067_v23 = vld [vmem:[#allocation7 + $0x4f0] sm:$0xff]  ;;  %v4070_v11 = vld [vmem:[#allocation7 + $0x508] sm:$0xff] }
 0x325   :  { %8535 = vmatprep.subr.bf16.mxu1 %v8534_v41  ;;  %v8554_v41 = vpack.c.bf16 %v4036_v62, %v4032_v19  ;;  %v4074_v19 = vld [vmem:[#allocation7 + $0x528] sm:$0xff]  ;;  %v4072_v62 = vld [vmem:[#allocation7 + $0x518] sm:$0xff]  ;;  %v4091_v7 = vld [vmem:[#allocation7 + $0x5b0] sm:$0xff] }
 0x326   :  { %v4094_v60 = vld [vmem:[#allocation7 + $0x5c8] sm:$0xff]  ;;  %v4104_v57 = vld [vmem:[#allocation7 + $0x618] sm:$0xff] }
 0x327   :  { %8345 = vmatpush1.bf16.msra.mxu0 %v8344_v36  ;;  %v4295_v36 = vcombine.high %v10829_v22, %v10829_v22  ;;  %v4048_v22 = vld [vmem:[#allocation7 + $0x458] sm:$0xff]  ;;  %v4106_v45 = vld [vmem:[#allocation7 + $0x628] sm:$0xff] }
 0x328   :  { %8537 = vmatpush1.bf16.msra.mxu1 %v8536_v21  ;;  %8347 = vmatprep.subr.bf16.mxu0 %v8346_v63  ;;  %v8364_v21 = vpack.c.bf16 %v4033_v6, %v4029_v53  ;;  %v8556_v63 = vpack.c.bf16 %v4035_v33, %v4031_v28  ;;  %v8382_v53 = vpack.c.bf16 %v4074_v19, %v4070_v11  ;;  %v4069_v6 = vld [vmem:[#allocation7 + $0x500] sm:$0xff]  ;;  %v4114_v11 = vld [vmem:[#allocation7 + $0x668] sm:$0xff]  ;;  %v4112_v19 = vld [vmem:[#allocation7 + $0x658] sm:$0xff] }
 0x329   :  { %8539 = vmatprep.subr.bf16.mxu1 %v8538_v42  ;;  %v8558_v42 = vpack.c.bf16 %v4044_v31, %v4040_v1  ;;  %v10845_v8 = vrot.slane %v4295_v36, %v10781_v32  ;;  %v4073_v28 = vld [vmem:[#allocation7 + $0x520] sm:$0xff]  ;;  %v4082_v1 = vld [vmem:[#allocation7 + $0x568] sm:$0xff]  ;;  %v4080_v31 = vld [vmem:[#allocation7 + $0x558] sm:$0xff] }
 0x32a   :  { %v4084_v36 = vld [vmem:[#allocation7 + $0x578] sm:$0xff] }
 0x32b   :  { %8349 = vmatpush1.bf16.msra.mxu0 %v8348_v47  ;;  %v8368_v47 = vpack.c.bf16 %v4041_v13, %v4037_v61  ;;  %v4311_v55 = vcombine.high %v10845_v8, %v10845_v8  ;;  %v4077_v61 = vld [vmem:[#allocation7 + $0x540] sm:$0xff] }
 0x32c   :  { %8541 = vmatpush1.bf16.msra.mxu1 %v8540_v25  ;;  %8351 = vmatprep.subr.bf16.mxu0 %v8350_v39  ;;  %v4052_v25 = vld [vmem:[#allocation7 + $0x478] sm:$0xff]  ;;  %v8560_v39 = vpack.c.bf16 %v4043_v37, %v4039_v54  ;;  %v4081_v13 = vld [vmem:[#allocation7 + $0x560] sm:$0xff]  ;;  %v8578_v54 = vpack.c.bf16 %v4084_v36, %v4080_v31  ;;  %v4083_v37 = vld [vmem:[#allocation7 + $0x570] sm:$0xff] }
 0x32d   :  { %8543 = vmatprep.subr.bf16.mxu1 %v8542_v34  ;;  %v8370_v34 = vpack.c.bf16 %v4050_v18, %v4046_v30  ;;  %v8562_v4 = vpack.c.bf16 %v4052_v25, %v4048_v22  ;;  %v4086_v30 = vld [vmem:[#allocation7 + $0x588] sm:$0xff]  ;;  %v4092_v22 = vld [vmem:[#allocation7 + $0x5b8] sm:$0xff]  ;;  %v8388_v25 = vpack.c.bf16 %v4081_v13, %v4077_v61  ;;  %v4121_v61 = vld [vmem:[#allocation7 + $0x6a0] sm:$0xff] }
 0x32e   :  { %v4090_v18 = vld [vmem:[#allocation7 + $0x5a8] sm:$0xff]  ;;  %v4124_v31 = vld [vmem:[#allocation7 + $0x6b8] sm:$0xff]  ;;  %v4119_v13 = vld [vmem:[#allocation7 + $0x690] sm:$0xff] }
 0x32f   :  { %8353 = vmatpush1.bf16.msra.mxu0 %v8352_v15  ;;  %v4056_v15 = vld [vmem:[#allocation7 + $0x498] sm:$0xff] }
 0x330   :  { %8545 = vmatpush1.bf16.msra.mxu1 %v8544_v35  ;;  %8355 = vmatprep.subr.bf16.mxu0 %v8354_v52  ;;  %v4060_v35 = vld [vmem:[#allocation7 + $0x4b8] sm:$0xff]  ;;  %v8372_v52 = vpack.c.bf16 %v4049_v24, %v4045_v49  ;;  %v8390_v49 = vpack.c.bf16 %v4090_v18, %v4086_v30  ;;  %v4085_v24 = vld [vmem:[#allocation7 + $0x580] sm:$0xff]  ;;  %v4130_v30 = vld [vmem:[#allocation7 + $0x6e8] sm:$0xff] }
 0x331   :  { %8547 = vmatprep.subr.bf16.mxu1 %v8546_v9  ;;  %v4057_v9 = vld [vmem:[#allocation7 + $0x4a0] sm:$0xff]  ;;  %v8566_v16 = vpack.c.bf16 %v4060_v35, %v4056_v15  ;;  %v4100_v15 = vld [vmem:[#allocation7 + $0x5f8] sm:$0xff]  ;;  %v8392_v35 = vpack.c.bf16 %v4089_v43, %v4085_v24  ;;  %v4127_v43 = vld [vmem:[#allocation7 + $0x6d0] sm:$0xff] }
 0x332   :  { %v4128_v18 = vld [vmem:[#allocation7 + $0x6d8] sm:$0xff]  ;;  %v4129_v24 = vld [vmem:[#allocation7 + $0x6e0] sm:$0xff] }
 0x333   :  { %8357 = vmatpush1.bf16.msra.mxu0 %v8356_v12  ;;  %v4064_v12 = vld [vmem:[#allocation7 + $0x4d8] sm:$0xff] }
 0x334   :  { %8549 = vmatpush1.bf16.msra.mxu1 %v8548_v59  ;;  %8359 = vmatprep.subr.bf16.mxu0 %v8358_v44  ;;  %v4068_v59 = vld [vmem:[#allocation7 + $0x4f8] sm:$0xff]  ;;  %v8568_v44 = vpack.c.bf16 %v4059_v20, %v4055_v29  ;;  %v4102_v20 = vld [vmem:[#allocation7 + $0x608] sm:$0xff] }
 0x335   :  { %8551 = vmatprep.subr.bf16.mxu1 %v8550_v5  ;;  %v4063_v5 = vld [vmem:[#allocation7 + $0x4d0] sm:$0xff]  ;;  %v8570_v40 = vpack.c.bf16 %v4068_v59, %v4064_v12  ;;  %v4108_v12 = vld [vmem:[#allocation7 + $0x638] sm:$0xff] }
 0x337   :  { %8361 = vmatpush1.bf16.msra.mxu0 %v8360_v17  ;;  %v4076_v17 = vld [vmem:[#allocation7 + $0x538] sm:$0xff] }
 0x338   :  { %8553 = vmatpush1.bf16.msra.mxu1 %v8552_v2  ;;  %8363 = vmatprep.subr.bf16.mxu0 %v8362_v51  ;;  %v8380_v2 = vpack.c.bf16 %v4065_v58, %v4061_v38  ;;  %v8572_v51 = vpack.c.bf16 %v4067_v23, %v4063_v5  ;;  %v8574_v33 = vpack.c.bf16 %v4076_v17, %v4072_v62  ;;  %v4105_v38 = vld [vmem:[#allocation7 + $0x620] sm:$0xff]  ;;  %v4103_v58 = vld [vmem:[#allocation7 + $0x610] sm:$0xff]  ;;  %v4110_v23 = vld [vmem:[#allocation7 + $0x648] sm:$0xff] }
 0x339   :  { %8555 = vmatprep.subr.bf16.mxu1 %v8554_v41  ;;  %v4071_v41 = vld [vmem:[#allocation7 + $0x510] sm:$0xff]  ;;  %v8590_v5 = vpack.c.bf16 %v4108_v12, %v4104_v57  ;;  %v4116_v62 = vld [vmem:[#allocation7 + $0x678] sm:$0xff] }
 0x33a   :  { %v4148_v57 = vld [vmem:[#allocation7 + $0x778] sm:$0xff] }
 0x33b   :  { %8365 = vmatpush1.bf16.msra.mxu0 %v8364_v21  ;;  %v8384_v21 = vpack.c.bf16 %v4073_v28, %v4069_v6  ;;  %v4113_v6 = vld [vmem:[#allocation7 + $0x660] sm:$0xff]  ;;  %v4111_v28 = vld [vmem:[#allocation7 + $0x650] sm:$0xff] }
 0x33c   :  { %8557 = vmatpush1.bf16.msra.mxu1 %v8556_v63  ;;  %8367 = vmatprep.subr.bf16.mxu0 %v8366_v10  ;;  %v8576_v63 = vpack.c.bf16 %v4075_v46, %v4071_v41  ;;  %v8386_v10 = vpack.c.bf16 %v4082_v1, %v4078_v14  ;;  %v8594_v41 = vpack.c.bf16 %v4116_v62, %v4112_v19  ;;  %v4118_v46 = vld [vmem:[#allocation7 + $0x688] sm:$0xff]  ;;  %v4120_v1 = vld [vmem:[#allocation7 + $0x698] sm:$0xff] }
 0x33d   :  { %8559 = vmatprep.subr.bf16.mxu1 %v8558_v42  ;;  %v4079_v42 = vld [vmem:[#allocation7 + $0x550] sm:$0xff]  ;;  %v4122_v14 = vld [vmem:[#allocation7 + $0x6a8] sm:$0xff]  ;;  %v4156_v19 = vld [vmem:[#allocation7 + $0x7b8] sm:$0xff] }
 0x33e   :  { %4391 = vmatmul.mubr.f32.vlgmr.msra.gmra.mrb[26].mxu0 %v10833_v26 }
 0x33f   :  { %4604 = vmatmul.mubr.f32.vlgmr.msra.gmra.mrb[26].mxu1 %v10833_v26  ;;  %8369 = vmatpush1.bf16.msra.mxu0 %v8368_v47  ;;  %v8376_v26 = vpack.c.bf16 %v4057_v9, %v4053_v48  ;;  %v4088_v47 = vld [vmem:[#allocation7 + $0x598] sm:$0xff]  ;;  %v4097_v48 = vld [vmem:[#allocation7 + $0x5e0] sm:$0xff]  ;;  %v4095_v9 = vld [vmem:[#allocation7 + $0x5d0] sm:$0xff] }
 0x340   :  { %4461 = vmatprep.mubr.f32.mxu0 %v4311_v55  ;;  %8561 = vmatpush1.bf16.msra.mxu1 %v8560_v39  ;;  %v8580_v39 = vpack.c.bf16 %v4083_v37, %v4079_v42  ;;  %v8582_v3 = vpack.c.bf16 %v4092_v22, %v4088_v47  ;;  %v8598_v42 = vpack.c.bf16 %v4124_v31, %v4120_v1  ;;  %v4126_v37 = vld [vmem:[#allocation7 + $0x6c8] sm:$0xff]  ;;  %v4132_v47 = vld [vmem:[#allocation7 + $0x6f8] sm:$0xff] }
 0x341   :  { %4674 = vmatprep.mubr.f32.mxu1 %v4311_v55  ;;  %8371 = vmatprep.subr.bf16.mxu0 %v8370_v34  ;;  %v4087_v34 = vld [vmem:[#allocation7 + $0x590] sm:$0xff]  ;;  %v4098_v55 = vld [vmem:[#allocation7 + $0x5e8] sm:$0xff]  ;;  %v4164_v1 = vld [vmem:[#allocation7 + $0x7f8] sm:$0xff] }
 0x342   :  { %8563 = vmatprep.subr.bf16.mxu1 %v8562_v4  ;;  %v4096_v4 = vld [vmem:[#allocation7 + $0x5d8] sm:$0xff] }
 0x343   :  { %8373 = vmatpush1.bf16.msra.mxu0 %v8372_v52  ;;  %v8584_v52 = vpack.c.bf16 %v4091_v7, %v4087_v34  ;;  %v8586_v29 = vpack.c.bf16 %v4100_v15, %v4096_v4  ;;  %v8602_v34 = vpack.c.bf16 %v4132_v47, %v4128_v18  ;;  %v4134_v7 = vld [vmem:[#allocation7 + $0x708] sm:$0xff]  ;;  %v4140_v4 = vld [vmem:[#allocation7 + $0x738] sm:$0xff] }
 0x344   :  { %8565 = vmatpush1.bf16.msra.mxu1 %v8564_v0  ;;  %8375 = vmatprep.subr.bf16.mxu0 %v8374_v56  ;;  %v8394_v0 = vpack.c.bf16 %v4098_v55, %v4094_v60  ;;  %v4093_v56 = vld [vmem:[#allocation7 + $0x5c0] sm:$0xff]  ;;  %v4138_v60 = vld [vmem:[#allocation7 + $0x728] sm:$0xff]  ;;  %v4136_v55 = vld [vmem:[#allocation7 + $0x718] sm:$0xff] }
 0x345   :  { %8567 = vmatprep.subr.bf16.mxu1 %v8566_v16  ;;  %v4099_v16 = vld [vmem:[#allocation7 + $0x5f0] sm:$0xff]  ;;  %v8396_v59 = vpack.c.bf16 %v4097_v48, %v4093_v56  ;;  %v4137_v56 = vld [vmem:[#allocation7 + $0x720] sm:$0xff]  ;;  %v4172_v18 = vld [vmem:[#allocation7 + $0x838] sm:$0xff] }
 0x346   :  { %v4135_v48 = vld [vmem:[#allocation7 + $0x710] sm:$0xff] }
 0x347   :  { %8377 = vmatpush1.bf16.msra.mxu0 %v8376_v26  ;;  %v8588_v26 = vpack.c.bf16 %v4099_v16, %v4095_v9  ;;  %v8606_v9 = vpack.c.bf16 %v4140_v4, %v4136_v55  ;;  %v4142_v16 = vld [vmem:[#allocation7 + $0x748] sm:$0xff]  ;;  %v4176_v4 = vld [vmem:[#allocation7 + $0x858] sm:$0xff] }
 0x348   :  { %8569 = vmatpush1.bf16.msra.mxu1 %v8568_v44  ;;  %8379 = vmatprep.subr.bf16.mxu0 %v8378_v27  ;;  %v8398_v44 = vpack.c.bf16 %v4106_v45, %v4102_v20  ;;  %v4101_v27 = vld [vmem:[#allocation7 + $0x600] sm:$0xff]  ;;  %v4146_v20 = vld [vmem:[#allocation7 + $0x768] sm:$0xff]  ;;  %v4144_v45 = vld [vmem:[#allocation7 + $0x758] sm:$0xff] }
 0x349   :  { %8571 = vmatprep.subr.bf16.mxu1 %v8570_v40  ;;  %v4107_v40 = vld [vmem:[#allocation7 + $0x630] sm:$0xff]  ;;  %v8400_v17 = vpack.c.bf16 %v4105_v38, %v4101_v27  ;;  %v4145_v27 = vld [vmem:[#allocation7 + $0x760] sm:$0xff]  ;;  %v10851_v55 = vld.sshfl [vmem:[#allocation2 + $0xc] sm:$0x33 pattern:$0x76325410] }
 0x34a   :  { %v4143_v38 = vld [vmem:[#allocation7 + $0x750] sm:$0xff] }
 0x34b   :  { %8381 = vmatpush1.bf16.msra.mxu0 %v8380_v2  ;;  %v8592_v2 = vpack.c.bf16 %v4107_v40, %v4103_v58  ;;  %v8610_v58 = vpack.c.bf16 %v4148_v57, %v4144_v45  ;;  %v4150_v40 = vld [vmem:[#allocation7 + $0x788] sm:$0xff]  ;;  %v4184_v57 = vld [vmem:[#allocation7 + $0x898] sm:$0xff] }
 0x34c   :  { %8573 = vmatpush1.bf16.msra.mxu1 %v8572_v51  ;;  %8383 = vmatprep.subr.bf16.mxu0 %v8382_v53  ;;  %v8402_v51 = vpack.c.bf16 %v4114_v11, %v4110_v23  ;;  %v4109_v53 = vld [vmem:[#allocation7 + $0x640] sm:$0xff]  ;;  %v4154_v23 = vld [vmem:[#allocation7 + $0x7a8] sm:$0xff]  ;;  %v4152_v11 = vld [vmem:[#allocation7 + $0x798] sm:$0xff] }
 0x34d   :  { %8575 = vmatprep.subr.bf16.mxu1 %v8574_v33  ;;  %v4115_v33 = vld [vmem:[#allocation7 + $0x670] sm:$0xff]  ;;  %v8404_v36 = vpack.c.bf16 %v4113_v6, %v4109_v53  ;;  %v4153_v53 = vld [vmem:[#allocation7 + $0x7a0] sm:$0xff] }
 0x34e   :  { %v4151_v6 = vld [vmem:[#allocation7 + $0x790] sm:$0xff] }
 0x34f   :  { %8385 = vmatpush1.bf16.msra.mxu0 %v8384_v21  ;;  %v8596_v21 = vpack.c.bf16 %v4115_v33, %v4111_v28  ;;  %v8614_v28 = vpack.c.bf16 %v4156_v19, %v4152_v11  ;;  %v4158_v33 = vld [vmem:[#allocation7 + $0x7c8] sm:$0xff]  ;;  %v4192_v19 = vld [vmem:[#allocation7 + $0x8d8] sm:$0xff] }
 0x350   :  { %8577 = vmatpush1.bf16.msra.mxu1 %v8576_v63  ;;  %8387 = vmatprep.subr.bf16.mxu0 %v8386_v10  ;;  %v8406_v63 = vpack.c.bf16 %v4122_v14, %v4118_v46  ;;  %v4117_v10 = vld [vmem:[#allocation7 + $0x680] sm:$0xff]  ;;  %v4162_v46 = vld [vmem:[#allocation7 + $0x7e8] sm:$0xff]  ;;  %v4160_v14 = vld [vmem:[#allocation7 + $0x7d8] sm:$0xff] }
 0x351   :  { %8579 = vmatprep.subr.bf16.mxu1 %v8578_v54  ;;  %v4123_v54 = vld [vmem:[#allocation7 + $0x6b0] sm:$0xff]  ;;  %v8408_v22 = vpack.c.bf16 %v4121_v61, %v4117_v10  ;;  %v4161_v10 = vld [vmem:[#allocation7 + $0x7e0] sm:$0xff]  ;;  %v4194_v11 = vld [vmem:[#allocation7 + $0x8e8] sm:$0xff] }
 0x352   :  { %v4159_v61 = vld [vmem:[#allocation7 + $0x7d0] sm:$0xff] }
 0x353   :  { %8389 = vmatpush1.bf16.msra.mxu0 %v8388_v25  ;;  %v8600_v25 = vpack.c.bf16 %v4123_v54, %v4119_v13  ;;  %v8618_v13 = vpack.c.bf16 %v4164_v1, %v4160_v14  ;;  %v4166_v54 = vld [vmem:[#allocation7 + $0x808] sm:$0xff]  ;;  %v4200_v14 = vld [vmem:[#allocation7 + $0x918] sm:$0xff] }
 0x354   :  { %8581 = vmatpush1.bf16.msra.mxu1 %v8580_v39  ;;  %8391 = vmatprep.subr.bf16.mxu0 %v8390_v49  ;;  %v8410_v39 = vpack.c.bf16 %v4130_v30, %v4126_v37  ;;  %v4125_v49 = vld [vmem:[#allocation7 + $0x6c0] sm:$0xff]  ;;  %v4170_v37 = vld [vmem:[#allocation7 + $0x828] sm:$0xff]  ;;  %v4168_v30 = vld [vmem:[#allocation7 + $0x818] sm:$0xff] }
 0x355   :  { %8583 = vmatprep.subr.bf16.mxu1 %v8582_v3  ;;  %v4131_v3 = vld [vmem:[#allocation7 + $0x6f0] sm:$0xff]  ;;  %v8412_v15 = vpack.c.bf16 %v4129_v24, %v4125_v49  ;;  %v4169_v49 = vld [vmem:[#allocation7 + $0x820] sm:$0xff]  ;;  %v8622_v24 = vpack.c.bf16 %v4172_v18, %v4168_v30  ;;  %v4204_v1 = vld [vmem:[#allocation7 + $0x938] sm:$0xff] }
 0x356   :  { %v4208_v30 = vld [vmem:[#allocation7 + $0x958] sm:$0xff] }
 0x357   :  { %8393 = vmatpush1.bf16.msra.mxu0 %v8392_v35  ;;  %v8604_v35 = vpack.c.bf16 %v4131_v3, %v4127_v43  ;;  %v4167_v43 = vld [vmem:[#allocation7 + $0x810] sm:$0xff]  ;;  %v4174_v3 = vld [vmem:[#allocation7 + $0x848] sm:$0xff]  ;;  %v4212_v18 = vld [vmem:[#allocation7 + $0x978] sm:$0xff] }
 0x358   :  { %8585 = vmatpush1.bf16.msra.mxu1 %v8584_v52  ;;  %8395 = vmatprep.subr.bf16.mxu0 %v8394_v0  ;;  %v8414_v52 = vpack.c.bf16 %v4138_v60, %v4134_v7  ;;  %v4133_v0 = vld [vmem:[#allocation7 + $0x700] sm:$0xff]  ;;  %v4178_v7 = vld [vmem:[#allocation7 + $0x868] sm:$0xff] }
 0x359   :  { %8587 = vmatprep.subr.bf16.mxu1 %v8586_v29  ;;  %v4139_v29 = vld [vmem:[#allocation7 + $0x730] sm:$0xff]  ;;  %v8416_v12 = vpack.c.bf16 %v4137_v56, %v4133_v0  ;;  %v4177_v0 = vld [vmem:[#allocation7 + $0x860] sm:$0xff] }
 0x35a   :  { %v4175_v56 = vld [vmem:[#allocation7 + $0x850] sm:$0xff] }
 0x35b   :  { %8397 = vmatpush1.bf16.msra.mxu0 %v8396_v59  ;;  %v8608_v59 = vpack.c.bf16 %v4139_v29, %v4135_v48  ;;  %v8434_v48 = vpack.c.bf16 %v4178_v7, %v4174_v3  ;;  %v4182_v29 = vld [vmem:[#allocation7 + $0x888] sm:$0xff] }
 0x35c   :  { %8589 = vmatpush1.bf16.msra.mxu1 %v8588_v26  ;;  %8399 = vmatprep.subr.bf16.mxu0 %v8398_v44  ;;  %v8418_v26 = vpack.c.bf16 %v4146_v20, %v4142_v16  ;;  %v4141_v44 = vld [vmem:[#allocation7 + $0x740] sm:$0xff]  ;;  %v4186_v16 = vld [vmem:[#allocation7 + $0x8a8] sm:$0xff]  ;;  %v4319_v20 = vcombine.high %v10851_v55, %v10851_v55 }
 0x35d   :  { %8591 = vmatprep.subr.bf16.mxu1 %v8590_v5  ;;  %v4147_v5 = vld [vmem:[#allocation7 + $0x770] sm:$0xff]  ;;  %v8420_v62 = vpack.c.bf16 %v4145_v27, %v4141_v44  ;;  %v8438_v44 = vpack.c.bf16 %v4186_v16, %v4182_v29  ;;  %v4181_v27 = vld [vmem:[#allocation7 + $0x880] sm:$0xff]  ;;  %v4214_v3 = vld [vmem:[#allocation7 + $0x988] sm:$0xff] }
 0x35e   :  { %v4218_v7 = vld [vmem:[#allocation7 + $0x9a8] sm:$0xff]  ;;  %v4219_v29 = vld [vmem:[#allocation7 + $0x9b0] sm:$0xff] }
 0x35f   :  { %8401 = vmatpush1.bf16.msra.mxu0 %v8400_v17  ;;  %v8612_v17 = vpack.c.bf16 %v4147_v5, %v4143_v38  ;;  %v4185_v38 = vld [vmem:[#allocation7 + $0x8a0] sm:$0xff]  ;;  %v4222_v16 = vld [vmem:[#allocation7 + $0x9c8] sm:$0xff] }
 0x360   :  { %8593 = vmatpush1.bf16.msra.mxu1 %v8592_v2  ;;  %8403 = vmatprep.subr.bf16.mxu0 %v8402_v51  ;;  %v8422_v2 = vpack.c.bf16 %v4154_v23, %v4150_v40  ;;  %v4149_v51 = vld [vmem:[#allocation7 + $0x780] sm:$0xff]  ;;  %v4187_v40 = vld [vmem:[#allocation7 + $0x8b0] sm:$0xff]  ;;  %v4190_v23 = vld [vmem:[#allocation7 + $0x8c8] sm:$0xff] }
 0x361   :  { %8595 = vmatprep.subr.bf16.mxu1 %v8594_v41  ;;  %v4155_v41 = vld [vmem:[#allocation7 + $0x7b0] sm:$0xff]  ;;  %v8424_v31 = vpack.c.bf16 %v4153_v53, %v4149_v51  ;;  %v4189_v51 = vld [vmem:[#allocation7 + $0x8c0] sm:$0xff] }
 0x362   :  { %v4193_v53 = vld [vmem:[#allocation7 + $0x8e0] sm:$0xff] }
 0x363   :  { %8405 = vmatpush1.bf16.msra.mxu0 %v8404_v36  ;;  %v8616_v36 = vpack.c.bf16 %v4155_v41, %v4151_v6  ;;  %v4191_v6 = vld [vmem:[#allocation7 + $0x8d0] sm:$0xff] }
 0x364   :  { %8597 = vmatpush1.bf16.msra.mxu1 %v8596_v21  ;;  %8407 = vmatprep.subr.bf16.mxu0 %v8406_v63  ;;  %v8426_v21 = vpack.c.bf16 %v4162_v46, %v4158_v33  ;;  %v4157_v63 = vld [vmem:[#allocation7 + $0x7c0] sm:$0xff]  ;;  %v4195_v41 = vld [vmem:[#allocation7 + $0x8f0] sm:$0xff]  ;;  %v4198_v33 = vld [vmem:[#allocation7 + $0x908] sm:$0xff] }
 0x365   :  { %8599 = vmatprep.subr.bf16.mxu1 %v8598_v42  ;;  %v4163_v42 = vld [vmem:[#allocation7 + $0x7f0] sm:$0xff]  ;;  %v8428_v47 = vpack.c.bf16 %v4161_v10, %v4157_v63  ;;  %v4202_v46 = vld [vmem:[#allocation7 + $0x928] sm:$0xff]  ;;  %v4197_v63 = vld [vmem:[#allocation7 + $0x900] sm:$0xff] }
 0x366   :  { %v4201_v10 = vld [vmem:[#allocation7 + $0x920] sm:$0xff] }
 0x367   :  { %8409 = vmatpush1.bf16.msra.mxu0 %v8408_v22  ;;  %v8620_v22 = vpack.c.bf16 %v4163_v42, %v4159_v61  ;;  %v4199_v61 = vld [vmem:[#allocation7 + $0x910] sm:$0xff] }
 0x368   :  { %8601 = vmatpush1.bf16.msra.mxu1 %v8600_v25  ;;  %8411 = vmatprep.subr.bf16.mxu0 %v8410_v39  ;;  %v8430_v25 = vpack.c.bf16 %v4170_v37, %v4166_v54  ;;  %v4165_v39 = vld [vmem:[#allocation7 + $0x800] sm:$0xff]  ;;  %v4203_v42 = vld [vmem:[#allocation7 + $0x930] sm:$0xff]  ;;  %v4206_v54 = vld [vmem:[#allocation7 + $0x948] sm:$0xff] }
 0x369   :  { %8603 = vmatprep.subr.bf16.mxu1 %v8602_v34  ;;  %v4171_v34 = vld [vmem:[#allocation7 + $0x830] sm:$0xff]  ;;  %v8432_v60 = vpack.c.bf16 %v4169_v49, %v4165_v39  ;;  %v4210_v37 = vld [vmem:[#allocation7 + $0x968] sm:$0xff]  ;;  %v4205_v39 = vld [vmem:[#allocation7 + $0x940] sm:$0xff] }
 0x36a   :  { %v4209_v49 = vld [vmem:[#allocation7 + $0x960] sm:$0xff] }
 0x36b   :  { %8413 = vmatpush1.bf16.msra.mxu0 %v8412_v15  ;;  %v4180_v15 = vld [vmem:[#allocation7 + $0x878] sm:$0xff] }
 0x36c   :  { %8605 = vmatpush1.bf16.msra.mxu1 %v8604_v35  ;;  %8415 = vmatprep.subr.bf16.mxu0 %v8414_v52  ;;  %v8624_v35 = vpack.c.bf16 %v4171_v34, %v4167_v43  ;;  %v4173_v52 = vld [vmem:[#allocation7 + $0x840] sm:$0xff]  ;;  %v8626_v45 = vpack.c.bf16 %v4180_v15, %v4176_v4  ;;  %v8642_v43 = vpack.c.bf16 %v4212_v18, %v4208_v30  ;;  %v4211_v34 = vld [vmem:[#allocation7 + $0x970] sm:$0xff]  ;;  %v4220_v4 = vld [vmem:[#allocation7 + $0x9b8] sm:$0xff] }
 0x36d   :  { %8607 = vmatprep.subr.bf16.mxu1 %v8606_v9  ;;  %v4179_v9 = vld [vmem:[#allocation7 + $0x870] sm:$0xff]  ;;  %v8452_v15 = vpack.c.bf16 %v4209_v49, %v4205_v39  ;;  %v4252_v30 = vld [vmem:[#allocation7 + $0xab8] sm:$0xff]  ;;  %v4249_v39 = vld [vmem:[#allocation7 + $0xaa0] sm:$0xff] }
 0x36e   :  { %v4247_v49 = vld [vmem:[#allocation7 + $0xa90] sm:$0xff] }
 0x36f   :  { %8417 = vmatpush1.bf16.msra.mxu0 %v8416_v12  ;;  %v4188_v12 = vld [vmem:[#allocation7 + $0x8b8] sm:$0xff] }
 0x370   :  { %8609 = vmatpush1.bf16.msra.mxu1 %v8608_v59  ;;  %8419 = vmatprep.subr.bf16.mxu0 %v8418_v26  ;;  %v8436_v59 = vpack.c.bf16 %v4177_v0, %v4173_v52  ;;  %v8628_v26 = vpack.c.bf16 %v4179_v9, %v4175_v56  ;;  %v8630_v5 = vpack.c.bf16 %v4188_v12, %v4184_v57  ;;  %v4213_v0 = vld [vmem:[#allocation7 + $0x980] sm:$0xff]  ;;  %v4228_v57 = vld [vmem:[#allocation7 + $0x9f8] sm:$0xff] }
 0x371   :  { %8611 = vmatprep.subr.bf16.mxu1 %v8610_v58  ;;  %v4183_v58 = vld [vmem:[#allocation7 + $0x890] sm:$0xff]  ;;  %v8454_v52 = vpack.c.bf16 %v4218_v7, %v4214_v3  ;;  %v4217_v56 = vld [vmem:[#allocation7 + $0x9a0] sm:$0xff]  ;;  %v4258_v3 = vld [vmem:[#allocation7 + $0xae8] sm:$0xff] }
 0x372   :  { %v8456_v12 = vpack.c.bf16 %v4217_v56, %v4213_v0  ;;  %v4256_v7 = vld [vmem:[#allocation7 + $0xad8] sm:$0xff]  ;;  %v4257_v0 = vld [vmem:[#allocation7 + $0xae0] sm:$0xff]  ;;  %v4255_v56 = vld [vmem:[#allocation7 + $0xad0] sm:$0xff] }
 0x373   :  { %8421 = vmatpush1.bf16.msra.mxu0 %v8420_v62  ;;  %v4196_v62 = vld [vmem:[#allocation7 + $0x8f8] sm:$0xff] }
 0x374   :  { %8613 = vmatpush1.bf16.msra.mxu1 %v8612_v17  ;;  %8423 = vmatprep.subr.bf16.mxu0 %v8422_v2  ;;  %v8632_v17 = vpack.c.bf16 %v4187_v40, %v4183_v58  ;;  %v8442_v2 = vpack.c.bf16 %v4194_v11, %v4190_v23  ;;  %v4230_v40 = vld [vmem:[#allocation7 + $0xa08] sm:$0xff]  ;;  %v4232_v11 = vld [vmem:[#allocation7 + $0xa18] sm:$0xff] }
 0x375   :  { %8615 = vmatprep.subr.bf16.mxu1 %v8614_v28  ;;  %v8634_v28 = vpack.c.bf16 %v4196_v62, %v4192_v19  ;;  %v4234_v23 = vld [vmem:[#allocation7 + $0xa28] sm:$0xff]  ;;  %v4236_v19 = vld [vmem:[#allocation7 + $0xa38] sm:$0xff] }
 0x377   :  { %8425 = vmatpush1.bf16.msra.mxu0 %v8424_v31  ;;  %v8444_v31 = vpack.c.bf16 %v4193_v53, %v4189_v51  ;;  %v4233_v51 = vld [vmem:[#allocation7 + $0xa20] sm:$0xff]  ;;  %v4231_v53 = vld [vmem:[#allocation7 + $0xa10] sm:$0xff] }
 0x378   :  { %8617 = vmatpush1.bf16.msra.mxu1 %v8616_v36  ;;  %8427 = vmatprep.subr.bf16.mxu0 %v8426_v21  ;;  %v8636_v36 = vpack.c.bf16 %v4195_v41, %v4191_v6  ;;  %v8446_v21 = vpack.c.bf16 %v4202_v46, %v4198_v33  ;;  %v8654_v6 = vpack.c.bf16 %v4236_v19, %v4232_v11  ;;  %v4238_v41 = vld [vmem:[#allocation7 + $0xa48] sm:$0xff]  ;;  %v4240_v46 = vld [vmem:[#allocation7 + $0xa58] sm:$0xff] }
 0x379   :  { %8619 = vmatprep.subr.bf16.mxu1 %v8618_v13  ;;  %v8638_v13 = vpack.c.bf16 %v4204_v1, %v4200_v14  ;;  %v4242_v33 = vld [vmem:[#allocation7 + $0xa68] sm:$0xff]  ;;  %v4244_v14 = vld [vmem:[#allocation7 + $0xa78] sm:$0xff] }
 0x37a   :  { %v4276_v11 = vld [vmem:[#allocation7 + $0xb78] sm:$0xff] }
 0x37b   :  { %8429 = vmatpush1.bf16.msra.mxu0 %v8428_v47  ;;  %v8448_v47 = vpack.c.bf16 %v4201_v10, %v4197_v63  ;;  %v4241_v63 = vld [vmem:[#allocation7 + $0xa60] sm:$0xff]  ;;  %v4239_v10 = vld [vmem:[#allocation7 + $0xa50] sm:$0xff] }
 0x37c   :  { %8621 = vmatpush1.bf16.msra.mxu1 %v8620_v22  ;;  %8431 = vmatprep.subr.bf16.mxu0 %v8430_v25  ;;  %v8640_v22 = vpack.c.bf16 %v4203_v42, %v4199_v61  ;;  %v8450_v25 = vpack.c.bf16 %v4210_v37, %v4206_v54  ;;  %v8658_v61 = vpack.c.bf16 %v4244_v14, %v4240_v46  ;;  %v4246_v42 = vld [vmem:[#allocation7 + $0xa88] sm:$0xff]  ;;  %v4248_v37 = vld [vmem:[#allocation7 + $0xa98] sm:$0xff] }
 0x37d   :  { %8623 = vmatprep.subr.bf16.mxu1 %v8622_v24  ;;  %v4207_v24 = vld [vmem:[#allocation7 + $0x950] sm:$0xff]  ;;  %v4250_v54 = vld [vmem:[#allocation7 + $0xaa8] sm:$0xff]  ;;  %v4284_v46 = vld [vmem:[#allocation7 + $0xbb8] sm:$0xff] }
 0x37e   :  { %4462 = vmatmul.mubr.f32.vlgmr.msra.gmra.mrb[26].mxu0 %v10845_v8 }
 0x37f   :  { %4675 = vmatmul.mubr.f32.vlgmr.msra.gmra.mrb[26].mxu1 %v10845_v8  ;;  %8433 = vmatpush1.bf16.msra.mxu0 %v8432_v60  ;;  %v8440_v8 = vpack.c.bf16 %v4185_v38, %v4181_v27  ;;  %v4216_v60 = vld [vmem:[#allocation7 + $0x998] sm:$0xff]  ;;  %v4225_v27 = vld [vmem:[#allocation7 + $0x9e0] sm:$0xff]  ;;  %v4223_v38 = vld [vmem:[#allocation7 + $0x9d0] sm:$0xff] }
 0x380   :  { %4532 = vmatprep.mubr.f32.mxu0 %v4319_v20  ;;  %8625 = vmatpush1.bf16.msra.mxu1 %v8624_v35  ;;  %v8644_v35 = vpack.c.bf16 %v4211_v34, %v4207_v24  ;;  %v8646_v9 = vpack.c.bf16 %v4220_v4, %v4216_v60  ;;  %v8662_v24 = vpack.c.bf16 %v4252_v30, %v4248_v37  ;;  %v4254_v34 = vld [vmem:[#allocation7 + $0xac8] sm:$0xff]  ;;  %v4260_v60 = vld [vmem:[#allocation7 + $0xaf8] sm:$0xff] }
 0x381   :  { %4745 = vmatprep.mubr.f32.mxu1 %v4319_v20  ;;  %8435 = vmatprep.subr.bf16.mxu0 %v8434_v48  ;;  %v4215_v48 = vld [vmem:[#allocation7 + $0x990] sm:$0xff]  ;;  %v4226_v20 = vld [vmem:[#allocation7 + $0x9e8] sm:$0xff]  ;;  %v4292_v37 = vld [vmem:[#allocation7 + $0xbf8] sm:$0xff] }
 0x382   :  { %8627 = vmatprep.subr.bf16.mxu1 %v8626_v45  ;;  %v4224_v45 = vld [vmem:[#allocation7 + $0x9d8] sm:$0xff] }
 0x383   :  { %8437 = vmatpush1.bf16.msra.mxu0 %v8436_v59  ;;  %v8648_v59 = vpack.c.bf16 %v4219_v29, %v4215_v48  ;;  %v8650_v58 = vpack.c.bf16 %v4228_v57, %v4224_v45  ;;  %v8666_v48 = vpack.c.bf16 %v4260_v60, %v4256_v7  ;;  %v4262_v29 = vld [vmem:[#allocation7 + $0xb08] sm:$0xff]  ;;  %v4268_v45 = vld [vmem:[#allocation7 + $0xb38] sm:$0xff] }
 0x384   :  { %8629 = vmatpush1.bf16.msra.mxu1 %v8628_v26  ;;  %8439 = vmatprep.subr.bf16.mxu0 %v8438_v44  ;;  %v8458_v26 = vpack.c.bf16 %v4226_v20, %v4222_v16  ;;  %v4221_v44 = vld [vmem:[#allocation7 + $0x9c0] sm:$0xff]  ;;  %v4266_v16 = vld [vmem:[#allocation7 + $0xb28] sm:$0xff]  ;;  %v4264_v20 = vld [vmem:[#allocation7 + $0xb18] sm:$0xff] }
 0x385   :  { %8631 = vmatprep.subr.bf16.mxu1 %v8630_v5  ;;  %v4227_v5 = vld [vmem:[#allocation7 + $0x9f0] sm:$0xff]  ;;  %v8460_v62 = vpack.c.bf16 %v4225_v27, %v4221_v44  ;;  %v4265_v44 = vld [vmem:[#allocation7 + $0xb20] sm:$0xff]  ;;  %v4767_v7 = vld [vmem:[#allocation7 + $0x38] sm:$0xff] }
 0x386   :  { %v4263_v27 = vld [vmem:[#allocation7 + $0xb10] sm:$0xff] }
 0x387   :  { %8441 = vmatpush1.bf16.msra.mxu0 %v8440_v8  ;;  %v8652_v8 = vpack.c.bf16 %v4227_v5, %v4223_v38  ;;  %v8670_v38 = vpack.c.bf16 %v4268_v45, %v4264_v20  ;;  %v4270_v5 = vld [vmem:[#allocation7 + $0xb48] sm:$0xff] }
 0x388   :  { %8633 = vmatpush1.bf16.msra.mxu1 %v8632_v17  ;;  %8443 = vmatprep.subr.bf16.mxu0 %v8442_v2  ;;  %v8462_v17 = vpack.c.bf16 %v4234_v23, %v4230_v40  ;;  %v4229_v2 = vld [vmem:[#allocation7 + $0xa00] sm:$0xff]  ;;  %v4274_v40 = vld [vmem:[#allocation7 + $0xb68] sm:$0xff]  ;;  %v4272_v23 = vld [vmem:[#allocation7 + $0xb58] sm:$0xff] }
 0x389   :  { %8635 = vmatprep.subr.bf16.mxu1 %v8634_v28  ;;  %v4235_v28 = vld [vmem:[#allocation7 + $0xa30] sm:$0xff]  ;;  %v8464_v1 = vpack.c.bf16 %v4233_v51, %v4229_v2  ;;  %v4273_v2 = vld [vmem:[#allocation7 + $0xb60] sm:$0xff]  ;;  %v4773_v20 = vld [vmem:[#allocation7 + $0x68] sm:$0xff] }
 0x38a   :  { %v4271_v51 = vld [vmem:[#allocation7 + $0xb50] sm:$0xff] }
 0x38b   :  { %8445 = vmatpush1.bf16.msra.mxu0 %v8444_v31  ;;  %v8656_v31 = vpack.c.bf16 %v4235_v28, %v4231_v53  ;;  %v8674_v53 = vpack.c.bf16 %v4276_v11, %v4272_v23  ;;  %v4278_v28 = vld [vmem:[#allocation7 + $0xb88] sm:$0xff] }
 0x38c   :  { %8637 = vmatpush1.bf16.msra.mxu1 %v8636_v36  ;;  %8447 = vmatprep.subr.bf16.mxu0 %v8446_v21  ;;  %v8466_v36 = vpack.c.bf16 %v4242_v33, %v4238_v41  ;;  %v4237_v21 = vld [vmem:[#allocation7 + $0xa40] sm:$0xff]  ;;  %v4282_v41 = vld [vmem:[#allocation7 + $0xba8] sm:$0xff]  ;;  %v4280_v33 = vld [vmem:[#allocation7 + $0xb98] sm:$0xff] }
 0x38d   :  { %8639 = vmatprep.subr.bf16.mxu1 %v8638_v13  ;;  %v4243_v13 = vld [vmem:[#allocation7 + $0xa70] sm:$0xff]  ;;  %v8468_v18 = vpack.c.bf16 %v4241_v63, %v4237_v21  ;;  %v4281_v21 = vld [vmem:[#allocation7 + $0xba0] sm:$0xff] }
 0x38e   :  { %v4279_v63 = vld [vmem:[#allocation7 + $0xb90] sm:$0xff] }
 0x38f   :  { %8449 = vmatpush1.bf16.msra.mxu0 %v8448_v47  ;;  %v8660_v47 = vpack.c.bf16 %v4243_v13, %v4239_v10  ;;  %v8678_v10 = vpack.c.bf16 %v4284_v46, %v4280_v33  ;;  %v4286_v13 = vld [vmem:[#allocation7 + $0xbc8] sm:$0xff] }
 0x390   :  { %8641 = vmatpush1.bf16.msra.mxu1 %v8640_v22  ;;  %8451 = vmatprep.subr.bf16.mxu0 %v8450_v25  ;;  %v8470_v22 = vpack.c.bf16 %v4250_v54, %v4246_v42  ;;  %v4245_v25 = vld [vmem:[#allocation7 + $0xa80] sm:$0xff]  ;;  %v4290_v42 = vld [vmem:[#allocation7 + $0xbe8] sm:$0xff]  ;;  %v4288_v54 = vld [vmem:[#allocation7 + $0xbd8] sm:$0xff] }
 0x391   :  { %8643 = vmatprep.subr.bf16.mxu1 %v8642_v43  ;;  %v4251_v43 = vld [vmem:[#allocation7 + $0xab0] sm:$0xff]  ;;  %v8472_v4 = vpack.c.bf16 %v4249_v39, %v4245_v25  ;;  %v4289_v25 = vld [vmem:[#allocation7 + $0xbe0] sm:$0xff]  ;;  %v4785_v33 = vld [vmem:[#allocation7 + $0xc8] sm:$0xff] }
 0x392   :  { %v4287_v39 = vld [vmem:[#allocation7 + $0xbd0] sm:$0xff]  ;;  %v4789_v46 = vld [vmem:[#allocation7 + $0xe8] sm:$0xff] }
 0x393   :  { %8453 = vmatpush1.bf16.msra.mxu0 %v8452_v15  ;;  %v8664_v15 = vpack.c.bf16 %v4251_v43, %v4247_v49  ;;  %v8682_v49 = vpack.c.bf16 %v4292_v37, %v4288_v54  ;;  %v4761_v43 = vld [vmem:[#allocation7 + $0x8] sm:$0xff]  ;;  %v4795_v37 = vld [vmem:[#allocation7 + $0x118] sm:$0xff] }
 0x394   :  { %8645 = vmatpush1.bf16.msra.mxu1 %v8644_v35  ;;  %8455 = vmatprep.subr.bf16.mxu0 %v8454_v52  ;;  %v8474_v35 = vpack.c.bf16 %v4258_v3, %v4254_v34  ;;  %v4253_v52 = vld [vmem:[#allocation7 + $0xac0] sm:$0xff]  ;;  %v4765_v34 = vld [vmem:[#allocation7 + $0x28] sm:$0xff]  ;;  %v4763_v3 = vld [vmem:[#allocation7 + $0x18] sm:$0xff] }
 0x395   :  { %8647 = vmatprep.subr.bf16.mxu1 %v8646_v9  ;;  %v4259_v9 = vld [vmem:[#allocation7 + $0xaf0] sm:$0xff]  ;;  %v8476_v57 = vpack.c.bf16 %v4257_v0, %v4253_v52  ;;  %v4760_v52 = vld [vmem:[#allocation7] sm:$0xff]  ;;  %v4797_v54 = vld [vmem:[#allocation7 + $0x128] sm:$0xff] }
 0x396   :  { %v4764_v0 = vld [vmem:[#allocation7 + $0x20] sm:$0xff] }
 0x397   :  { %8457 = vmatpush1.bf16.msra.mxu0 %v8456_v12  ;;  %v8668_v12 = vpack.c.bf16 %v4259_v9, %v4255_v56  ;;  %v8878_v56 = vpack.c.bf16 %v4767_v7, %v4763_v3  ;;  %v4766_v9 = vld [vmem:[#allocation7 + $0x30] sm:$0xff]  ;;  %v8688_v45 = vpack.c.bf16 %v4764_v0, %v4760_v52  ;;  %v4805_v3 = vld [vmem:[#allocation7 + $0x168] sm:$0xff]  ;;  %v4803_v7 = vld [vmem:[#allocation7 + $0x158] sm:$0xff] }
 0x398   :  { %8649 = vmatpush1.bf16.msra.mxu1 %v8648_v59  ;;  %8459 = vmatprep.subr.bf16.mxu0 %v8458_v26  ;;  %v8478_v59 = vpack.c.bf16 %v4266_v16, %v4262_v29  ;;  %v4261_v26 = vld [vmem:[#allocation7 + $0xb00] sm:$0xff]  ;;  %v4769_v16 = vld [vmem:[#allocation7 + $0x48] sm:$0xff] }
 0x399   :  { %8651 = vmatprep.subr.bf16.mxu1 %v8650_v58  ;;  %v4267_v58 = vld [vmem:[#allocation7 + $0xb30] sm:$0xff]  ;;  %v8480_v19 = vpack.c.bf16 %v4265_v44, %v4261_v26  ;;  %v4768_v26 = vld [vmem:[#allocation7 + $0x40] sm:$0xff] }
 0x39a   :  { %v4772_v44 = vld [vmem:[#allocation7 + $0x60] sm:$0xff] }
 0x39b   :  { %8461 = vmatpush1.bf16.msra.mxu0 %v8460_v62  ;;  %v8672_v62 = vpack.c.bf16 %v4267_v58, %v4263_v27  ;;  %v4770_v27 = vld [vmem:[#allocation7 + $0x50] sm:$0xff]  ;;  %v4800_v0 = vld [vmem:[#allocation7 + $0x140] sm:$0xff] }
 0x39c   :  { %8653 = vmatpush1.bf16.msra.mxu1 %v8652_v8  ;;  %8463 = vmatprep.subr.bf16.mxu0 %v8462_v17  ;;  %v8482_v8 = vpack.c.bf16 %v4274_v40, %v4270_v5  ;;  %v4269_v17 = vld [vmem:[#allocation7 + $0xb40] sm:$0xff]  ;;  %v4774_v58 = vld [vmem:[#allocation7 + $0x70] sm:$0xff]  ;;  %v4777_v5 = vld [vmem:[#allocation7 + $0x88] sm:$0xff] }
 0x39d   :  { %8655 = vmatprep.subr.bf16.mxu1 %v8654_v6  ;;  %v4275_v6 = vld [vmem:[#allocation7 + $0xb70] sm:$0xff]  ;;  %v8484_v14 = vpack.c.bf16 %v4273_v2, %v4269_v17  ;;  %v4781_v40 = vld [vmem:[#allocation7 + $0xa8] sm:$0xff]  ;;  %v8884_v17 = vpack.c.bf16 %v4774_v58, %v4770_v27  ;;  %v4812_v58 = vld [vmem:[#allocation7 + $0x1a0] sm:$0xff] }
 0x39e   :  { %v8694_v2 = vpack.c.bf16 %v4781_v40, %v4777_v5  ;;  %v4810_v5 = vld [vmem:[#allocation7 + $0x190] sm:$0xff] }
 0x39f   :  { %8465 = vmatpush1.bf16.msra.mxu0 %v8464_v1  ;;  %v8676_v1 = vpack.c.bf16 %v4275_v6, %v4271_v51  ;;  %v4776_v51 = vld [vmem:[#allocation7 + $0x80] sm:$0xff]  ;;  %v4778_v6 = vld [vmem:[#allocation7 + $0x90] sm:$0xff] }
 0x3a0   :  { %8657 = vmatpush1.bf16.msra.mxu1 %v8656_v31  ;;  %8467 = vmatprep.subr.bf16.mxu0 %v8466_v36  ;;  %v8486_v31 = vpack.c.bf16 %v4282_v41, %v4278_v28  ;;  %v4277_v36 = vld [vmem:[#allocation7 + $0xb80] sm:$0xff]  ;;  %v4782_v41 = vld [vmem:[#allocation7 + $0xb0] sm:$0xff] }
 0x3a1   :  { %8659 = vmatprep.subr.bf16.mxu1 %v8658_v61  ;;  %v4283_v61 = vld [vmem:[#allocation7 + $0xbb0] sm:$0xff]  ;;  %v8488_v30 = vpack.c.bf16 %v4281_v21, %v4277_v36  ;;  %v8698_v36 = vpack.c.bf16 %v4789_v46, %v4785_v33  ;;  %v4784_v21 = vld [vmem:[#allocation7 + $0xc0] sm:$0xff] }
 0x3a3   :  { %8469 = vmatpush1.bf16.msra.mxu0 %v8468_v18  ;;  %v8680_v18 = vpack.c.bf16 %v4283_v61, %v4279_v63  ;;  %v4788_v63 = vld [vmem:[#allocation7 + $0xe0] sm:$0xff] }
 0x3a4   :  { %8661 = vmatpush1.bf16.msra.mxu1 %v8660_v47  ;;  %8471 = vmatprep.subr.bf16.mxu0 %v8470_v22  ;;  %v8490_v47 = vpack.c.bf16 %v4290_v42, %v4286_v13  ;;  %v4285_v22 = vld [vmem:[#allocation7 + $0xbc0] sm:$0xff]  ;;  %v4790_v13 = vld [vmem:[#allocation7 + $0xf0] sm:$0xff]  ;;  %v4793_v42 = vld [vmem:[#allocation7 + $0x108] sm:$0xff] }
 0x3a5   :  { %8663 = vmatprep.subr.bf16.mxu1 %v8662_v24  ;;  %v4291_v24 = vld [vmem:[#allocation7 + $0xbf0] sm:$0xff]  ;;  %v8492_v60 = vpack.c.bf16 %v4289_v25, %v4285_v22  ;;  %v8702_v22 = vpack.c.bf16 %v4797_v54, %v4793_v42  ;;  %v4792_v25 = vld [vmem:[#allocation7 + $0x100] sm:$0xff]  ;;  %v4827_v42 = vld [vmem:[#allocation7 + $0x218] sm:$0xff] }
 0x3a6   :  { %v4831_v54 = vld [vmem:[#allocation7 + $0x238] sm:$0xff] }
 0x3a7   :  { %8473 = vmatpush1.bf16.msra.mxu0 %v8472_v4  ;;  %v10857_v4 = vld [vmem:[#allocation2 + $0x8] sm:$0xff] }
 0x3a8   :  { %8665 = vmatpush1.bf16.msra.mxu1 %v8664_v15  ;;  %8475 = vmatprep.subr.bf16.mxu0 %v8474_v35  ;;  %v8684_v15 = vpack.c.bf16 %v4291_v24, %v4287_v39  ;;  %v8686_v35 = vpack.c.bf16 %v4765_v34, %v4761_v43  ;;  %v10861_v29 = vrot.slane %v10857_v4, %v10781_v32  ;;  %v4796_v39 = vld [vmem:[#allocation7 + $0x120] sm:$0xff]  ;;  %v4798_v43 = vld [vmem:[#allocation7 + $0x130] sm:$0xff]  ;;  %v4801_v34 = vld [vmem:[#allocation7 + $0x148] sm:$0xff] }
 0x3a9   :  { %8667 = vmatprep.subr.bf16.mxu1 %v8666_v48  ;;  %v4762_v48 = vld [vmem:[#allocation7 + $0x10] sm:$0xff]  ;;  %v8706_v52 = vpack.c.bf16 %v4805_v3, %v4801_v34  ;;  %v4837_v34 = vld [vmem:[#allocation7 + $0x268] sm:$0xff] }
 0x3aa   :  { %v5161_v23 = vcombine.high %v10861_v29, %v10861_v29 }
 0x3ab   :  { %8477 = vmatpush1.bf16.msra.mxu0 %v8476_v57  ;;  %v4771_v57 = vld [vmem:[#allocation7 + $0x58] sm:$0xff] }
 0x3ac   :  { %8669 = vmatpush1.bf16.msra.mxu1 %v8668_v12  ;;  %8479 = vmatprep.subr.bf16.mxu0 %v8478_v59  ;;  %v4775_v12 = vld [vmem:[#allocation7 + $0x78] sm:$0xff]  ;;  %v8880_v59 = vpack.c.bf16 %v4766_v9, %v4762_v48  ;;  %v4802_v48 = vld [vmem:[#allocation7 + $0x150] sm:$0xff] }
 0x3ad   :  { %8671 = vmatprep.subr.bf16.mxu1 %v8670_v38  ;;  %v8690_v38 = vpack.c.bf16 %v4773_v20, %v4769_v16  ;;  %v8882_v11 = vpack.c.bf16 %v4775_v12, %v4771_v57  ;;  %v4806_v16 = vld [vmem:[#allocation7 + $0x170] sm:$0xff]  ;;  %v4809_v20 = vld [vmem:[#allocation7 + $0x188] sm:$0xff]  ;;  %v4811_v57 = vld [vmem:[#allocation7 + $0x198] sm:$0xff] }
 0x3ae   :  { %v4815_v12 = vld [vmem:[#allocation7 + $0x1b8] sm:$0xff] }
 0x3af   :  { %8481 = vmatpush1.bf16.msra.mxu0 %v8480_v19  ;;  %v4779_v19 = vld [vmem:[#allocation7 + $0x98] sm:$0xff] }
 0x3b0   :  { %8673 = vmatpush1.bf16.msra.mxu1 %v8672_v62  ;;  %8483 = vmatprep.subr.bf16.mxu0 %v8482_v8  ;;  %v4783_v62 = vld [vmem:[#allocation7 + $0xb8] sm:$0xff]  ;;  %v8692_v8 = vpack.c.bf16 %v4772_v44, %v4768_v26  ;;  %v8900_v44 = vpack.c.bf16 %v4806_v16, %v4802_v48  ;;  %v4834_v48 = vld [vmem:[#allocation7 + $0x250] sm:$0xff] }
 0x3b1   :  { %8675 = vmatprep.subr.bf16.mxu1 %v8674_v53  ;;  %v4780_v53 = vld [vmem:[#allocation7 + $0xa0] sm:$0xff]  ;;  %v8886_v28 = vpack.c.bf16 %v4783_v62, %v4779_v19  ;;  %v4817_v19 = vld [vmem:[#allocation7 + $0x1c8] sm:$0xff]  ;;  %v4838_v16 = vld [vmem:[#allocation7 + $0x270] sm:$0xff] }
 0x3b2   :  { %v4821_v62 = vld [vmem:[#allocation7 + $0x1e8] sm:$0xff] }
 0x3b3   :  { %8485 = vmatpush1.bf16.msra.mxu0 %v8484_v14  ;;  %v4787_v14 = vld [vmem:[#allocation7 + $0xd8] sm:$0xff] }
 0x3b4   :  { %8677 = vmatpush1.bf16.msra.mxu1 %v8676_v1  ;;  %8487 = vmatprep.subr.bf16.mxu0 %v8486_v31  ;;  %v4791_v1 = vld [vmem:[#allocation7 + $0xf8] sm:$0xff]  ;;  %v8888_v31 = vpack.c.bf16 %v4782_v41, %v4778_v6 }
 0x3b5   :  { %8679 = vmatprep.subr.bf16.mxu1 %v8678_v10  ;;  %v4786_v10 = vld [vmem:[#allocation7 + $0xd0] sm:$0xff]  ;;  %v8890_v61 = vpack.c.bf16 %v4791_v1, %v4787_v14  ;;  %v8714_v1 = vpack.c.bf16 %v4821_v62, %v4817_v19  ;;  %v4851_v19 = vld [vmem:[#allocation7 + $0x2d8] sm:$0xff] }
 0x3b6   :  { %v4855_v62 = vld [vmem:[#allocation7 + $0x2f8] sm:$0xff] }
 0x3b7   :  { %8489 = vmatpush1.bf16.msra.mxu0 %v8488_v30  ;;  %v4799_v30 = vld [vmem:[#allocation7 + $0x138] sm:$0xff] }
 0x3b8   :  { %8681 = vmatpush1.bf16.msra.mxu1 %v8680_v18  ;;  %8491 = vmatprep.subr.bf16.mxu0 %v8490_v47  ;;  %v8700_v18 = vpack.c.bf16 %v4788_v63, %v4784_v21  ;;  %v8892_v47 = vpack.c.bf16 %v4790_v13, %v4786_v10  ;;  %v8894_v24 = vpack.c.bf16 %v4799_v30, %v4795_v37  ;;  %v4822_v63 = vld [vmem:[#allocation7 + $0x1f0] sm:$0xff]  ;;  %v4825_v10 = vld [vmem:[#allocation7 + $0x208] sm:$0xff] }
 0x3b9   :  { %8683 = vmatprep.subr.bf16.mxu1 %v8682_v49  ;;  %v4794_v49 = vld [vmem:[#allocation7 + $0x110] sm:$0xff] }
 0x3bb   :  { %8493 = vmatpush1.bf16.msra.mxu0 %v8492_v60  ;;  %v4807_v60 = vld [vmem:[#allocation7 + $0x178] sm:$0xff] }
 0x3bc   :  { %8685 = vmatpush1.bf16.msra.mxu1 %v8684_v15  ;;  %8687 = vmatprep.subr.bf16.mxu0 %v8686_v35  ;;  %v8704_v15 = vpack.c.bf16 %v4796_v39, %v4792_v25  ;;  %v8896_v35 = vpack.c.bf16 %v4798_v43, %v4794_v49  ;;  %v8898_v9 = vpack.c.bf16 %v4807_v60, %v4803_v7  ;;  %v4828_v25 = vld [vmem:[#allocation7 + $0x220] sm:$0xff]  ;;  %v4826_v39 = vld [vmem:[#allocation7 + $0x210] sm:$0xff]  ;;  %v4833_v43 = vld [vmem:[#allocation7 + $0x248] sm:$0xff] }
 0x3bd   :  { %8879 = vmatprep.subr.bf16.mxu1 %v8878_v56  ;;  %v4804_v56 = vld [vmem:[#allocation7 + $0x160] sm:$0xff]  ;;  %v8910_v49 = vpack.c.bf16 %v4831_v54, %v4827_v42  ;;  %v4835_v7 = vld [vmem:[#allocation7 + $0x258] sm:$0xff]  ;;  %v4862_v42 = vld [vmem:[#allocation7 + $0x330] sm:$0xff] }
 0x3be   :  { %4533 = vmatmul.mubr.f32.vlgmr.msra.gmra.mrb[26].mxu0 %v10851_v55  ;;  %v8708_v26 = vpack.c.bf16 %v4804_v56, %v4800_v0  ;;  %v4839_v60 = vld [vmem:[#allocation7 + $0x278] sm:$0xff]  ;;  %v4832_v0 = vld [vmem:[#allocation7 + $0x240] sm:$0xff]  ;;  %v4865_v54 = vld [vmem:[#allocation7 + $0x348] sm:$0xff] }
 0x3bf   :  { %4746 = vmatmul.mubr.f32.vlgmr.msra.gmra.mrb[26].mxu1 %v10851_v55  ;;  %8689 = vmatpush1.bf16.msra.mxu0 %v8688_v45  ;;  %v8696_v55 = vpack.c.bf16 %v4780_v53, %v4776_v51  ;;  %v4813_v45 = vld [vmem:[#allocation7 + $0x1a8] sm:$0xff]  ;;  %v4823_v51 = vld [vmem:[#allocation7 + $0x1f8] sm:$0xff]  ;;  %v4836_v56 = vld [vmem:[#allocation7 + $0x260] sm:$0xff] }
 0x3c0   :  { %5241 = vmatprep.mubr.f32.mxu0 %v5161_v23  ;;  %8881 = vmatpush1.bf16.msra.mxu1 %v8880_v59  ;;  %v3902_v59 = vsub.s32 3, %v10242_v50  ;;  %v8710_v27 = vpack.c.bf16 %v4813_v45, %v4809_v20  ;;  %v4841_v20 = vld [vmem:[#allocation7 + $0x288] sm:$0xff] }
 0x3c1   :  { %5454 = vmatprep.mubr.f32.mxu1 %v5161_v23  ;;  %8691 = vmatprep.subr.bf16.mxu0 %v8690_v38  ;;  %v4808_v38 = vld [vmem:[#allocation7 + $0x180] sm:$0xff]  ;;  %v8902_v23 = vpack.c.bf16 %v4815_v12, %v4811_v57  ;;  %v4845_v45 = vld [vmem:[#allocation7 + $0x2a8] sm:$0xff]  ;;  %v4843_v57 = vld [vmem:[#allocation7 + $0x298] sm:$0xff] }
 0x3c2   :  { %8883 = vmatprep.subr.bf16.mxu1 %v8882_v11  ;;  %v4814_v11 = vld [vmem:[#allocation7 + $0x1b0] sm:$0xff]  ;;  %v8712_v33 = vpack.c.bf16 %v4812_v58, %v4808_v38  ;;  %v4847_v12 = vld [vmem:[#allocation7 + $0x2b8] sm:$0xff]  ;;  %v4844_v38 = vld [vmem:[#allocation7 + $0x2a0] sm:$0xff] }
 0x3c3   :  { %8693 = vmatpush1.bf16.msra.mxu0 %v8692_v8  ;;  %v8904_v14 = vpack.c.bf16 %v4814_v11, %v4810_v5  ;;  %v4842_v58 = vld [vmem:[#allocation7 + $0x290] sm:$0xff]  ;;  %v8918_v5 = vpack.c.bf16 %v4847_v12, %v4843_v57  ;;  %v4853_v11 = vld [vmem:[#allocation7 + $0x2e8] sm:$0xff]  ;;  %v4883_v12 = vld [vmem:[#allocation7 + $0x3d8] sm:$0xff] }
 0x3c4   :  { %8885 = vmatpush1.bf16.msra.mxu1 %v8884_v17  ;;  %8695 = vmatprep.subr.bf16.mxu0 %v8694_v2  ;;  %v4819_v2 = vld [vmem:[#allocation7 + $0x1d8] sm:$0xff]  ;;  %v4885_v57 = vld [vmem:[#allocation7 + $0x3e8] sm:$0xff] }
 0x3c5   :  { %8887 = vmatprep.subr.bf16.mxu1 %v8886_v28  ;;  %v9581_v28 = vld [vmem:[#allocation9] sm:$0x3f]  ;;  %v8906_v21 = vpack.c.bf16 %v4823_v51, %v4819_v2 }
 0x3c6   :  { %v10868_v41 = vrot.slane %v9581_v28, %v3902_v59  ;;  %v8724_v59 = vpack.c.bf16 %v4836_v56, %v4832_v0  ;;  %v4848_v51 = vld [vmem:[#allocation7 + $0x2c0] sm:$0xff]  ;;  %v8922_v28 = vpack.c.bf16 %v4855_v62, %v4851_v19  ;;  %v4893_v19 = vld [vmem:[#allocation7 + $0x428] sm:$0xff]  ;;  %v4891_v62 = vld [vmem:[#allocation7 + $0x418] sm:$0xff] }
 0x3c7   :  { %8697 = vmatpush1.bf16.msra.mxu0 %v8696_v55  ;;  %v4816_v55 = vld [vmem:[#allocation7 + $0x1c0] sm:$0xff] }
 0x3c8   :  { %8889 = vmatpush1.bf16.msra.mxu1 %v8888_v31  ;;  %8699 = vmatprep.subr.bf16.mxu0 %v8698_v36  ;;  %v4820_v31 = vld [vmem:[#allocation7 + $0x1e0] sm:$0xff]  ;;  %v4818_v36 = vld [vmem:[#allocation7 + $0x1d0] sm:$0xff] }
 0x3c9   :  { %8891 = vmatprep.subr.bf16.mxu1 %v8890_v61  ;;  %v4829_v61 = vld [vmem:[#allocation7 + $0x228] sm:$0xff]  ;;  %v8716_v37 = vpack.c.bf16 %v4820_v31, %v4816_v55  ;;  %v4863_v55 = vld [vmem:[#allocation7 + $0x338] sm:$0xff]  ;;  %v4872_v56 = vld [vmem:[#allocation7 + $0x380] sm:$0xff] }
 0x3cb   :  { %8701 = vmatpush1.bf16.msra.mxu0 %v8700_v18  ;;  %v8908_v18 = vpack.c.bf16 %v4822_v63, %v4818_v36  ;;  %v4856_v63 = vld [vmem:[#allocation7 + $0x300] sm:$0xff] }
 0x3cc   :  { %8893 = vmatpush1.bf16.msra.mxu1 %v8892_v47  ;;  %8703 = vmatprep.subr.bf16.mxu0 %v8702_v22  ;;  %v8718_v47 = vpack.c.bf16 %v4829_v61, %v4825_v10  ;;  %v4824_v22 = vld [vmem:[#allocation7 + $0x200] sm:$0xff]  ;;  %v4858_v61 = vld [vmem:[#allocation7 + $0x310] sm:$0xff] }
 0x3cd   :  { %8895 = vmatprep.subr.bf16.mxu1 %v8894_v24  ;;  %v4830_v24 = vld [vmem:[#allocation7 + $0x230] sm:$0xff]  ;;  %v4860_v10 = vld [vmem:[#allocation7 + $0x320] sm:$0xff] }
 0x3cf   :  { %8705 = vmatpush1.bf16.msra.mxu0 %v8704_v15  ;;  %v8720_v15 = vpack.c.bf16 %v4828_v25, %v4824_v22  ;;  %v8928_v22 = vpack.c.bf16 %v4862_v42, %v4858_v61  ;;  %v4900_v61 = vld [vmem:[#allocation7 + $0x460] sm:$0xff] }
 0x3d0   :  { %8897 = vmatpush1.bf16.msra.mxu1 %v8896_v35  ;;  %8707 = vmatprep.subr.bf16.mxu0 %v8706_v52  ;;  %v8912_v35 = vpack.c.bf16 %v4830_v24, %v4826_v39  ;;  %v8722_v52 = vpack.c.bf16 %v4837_v34, %v4833_v43  ;;  %v4864_v39 = vld [vmem:[#allocation7 + $0x340] sm:$0xff]  ;;  %v4866_v24 = vld [vmem:[#allocation7 + $0x350] sm:$0xff] }
 0x3d1   :  { %v3679_v40 = vpop.f32.mrb[24].mxu0  ;;  %8899 = vmatprep.subr.bf16.mxu1 %v8898_v9  ;;  %v8914_v9 = vpack.c.bf16 %v4839_v60, %v4835_v7  ;;  %v4870_v34 = vld [vmem:[#allocation7 + $0x370] sm:$0xff]  ;;  %v4877_v7 = vld [vmem:[#allocation7 + $0x3a8] sm:$0xff]  ;;  %v4875_v60 = vld [vmem:[#allocation7 + $0x398] sm:$0xff] }
 0x3d2   :  { %v3892_v8 = vpop.f32.mrb[24].mxu1  ;;  %v3681_v17 = vpop.f32.mrb[25].mxu0 }
 0x3d3   :  { %v3897_v53 = vmax.f32 %v3679_v40, %v3681_v17  ;;  %v3894_v6 = vpop.f32.mrb[25].mxu1  ;;  %8709 = vmatpush1.bf16.msra.mxu0 %v8708_v26  ;;  %v8916_v26 = vpack.c.bf16 %v4838_v16, %v4834_v48  ;;  %v4846_v40 = vld [vmem:[#allocation7 + $0x2b0] sm:$0xff]  ;;  %v4876_v48 = vld [vmem:[#allocation7 + $0x3a0] sm:$0xff] }
 0x3d4   :  { %v3898_v46 = vmax.f32 %v3892_v8, %v3894_v6  ;;  %8901 = vmatpush1.bf16.msra.mxu1 %v8900_v44  ;;  %8711 = vmatprep.subr.bf16.mxu0 %v8710_v27  ;;  %v8726_v44 = vpack.c.bf16 %v4845_v45, %v4841_v20  ;;  %v4840_v27 = vld [vmem:[#allocation7 + $0x280] sm:$0xff]  ;;  %v8920_v17 = vpack.c.bf16 %v4846_v40, %v4842_v58  ;;  %v4850_v6 = vld [vmem:[#allocation7 + $0x2d0] sm:$0xff]  ;;  %v4881_v45 = vld [vmem:[#allocation7 + $0x3c8] sm:$0xff] }
 0x3d5   :  { %8903 = vmatprep.subr.bf16.mxu1 %v8902_v23  ;;  %v4849_v23 = vld [vmem:[#allocation7 + $0x2c8] sm:$0xff]  ;;  %v8728_v8 = vpack.c.bf16 %v4844_v38, %v4840_v27  ;;  %v4878_v20 = vld [vmem:[#allocation7 + $0x3b0] sm:$0xff]  ;;  %v8746_v27 = vpack.c.bf16 %v4885_v57, %v4881_v45  ;;  %v4880_v38 = vld [vmem:[#allocation7 + $0x3c0] sm:$0xff] }
 0x3d6   :  { %v3899_v13 = vmax.f32 %v3897_v53, %v3898_v46  ;;  %v8730_v2 = vpack.c.bf16 %v4853_v11, %v4849_v23  ;;  %v4852_v53 = vld [vmem:[#allocation7 + $0x2e0] sm:$0xff]  ;;  %v4857_v46 = vld [vmem:[#allocation7 + $0x308] sm:$0xff]  ;;  %v4886_v23 = vld [vmem:[#allocation7 + $0x3f0] sm:$0xff] }
 0x3d7   :  { %8713 = vmatpush1.bf16.msra.mxu0 %v8712_v33  ;;  %v4854_v33 = vld [vmem:[#allocation7 + $0x2f0] sm:$0xff]  ;;  %v8732_v31 = vpack.c.bf16 %v4852_v53, %v4848_v51  ;;  %v4884_v58 = vld [vmem:[#allocation7 + $0x3e0] sm:$0xff]  ;;  %v4889_v11 = vld [vmem:[#allocation7 + $0x408] sm:$0xff] }
 0x3d8   :  { %v3904_v30 = vadd.f32 %v10868_v41, %v3899_v13  ;;  %8905 = vmatpush1.bf16.msra.mxu1 %v8904_v14  ;;  %8715 = vmatprep.subr.bf16.mxu0 %v8714_v1  ;;  %v4861_v14 = vld [vmem:[#allocation7 + $0x328] sm:$0xff]  ;;  %v4859_v1 = vld [vmem:[#allocation7 + $0x318] sm:$0xff]  ;;  %v8924_v36 = vpack.c.bf16 %v4854_v33, %v4850_v6  ;;  %v8750_v53 = vpack.c.bf16 %v4893_v19, %v4889_v11  ;;  %v4888_v6 = vld [vmem:[#allocation7 + $0x400] sm:$0xff] }
 0x3d9   :  { %8907 = vmatprep.subr.bf16.mxu1 %v8906_v21  ;;  %v8734_v21 = vpack.c.bf16 %v4861_v14, %v4857_v46  ;;  %v8926_v13 = vpack.c.bf16 %v4863_v55, %v4859_v1  ;;  %v4890_v46 = vld [vmem:[#allocation7 + $0x410] sm:$0xff]  ;;  %v4897_v55 = vld [vmem:[#allocation7 + $0x448] sm:$0xff] }
 0x3da   :  { %v3905_v3 = vmax.f32 %v3904_v30, 0.0  ;;  %v4867_v30 = vld [vmem:[#allocation7 + $0x358] sm:$0xff]  ;;  %v4894_v14 = vld [vmem:[#allocation7 + $0x430] sm:$0xff] }
 0x3db   :  { %8717 = vmatpush1.bf16.msra.mxu0 %v8716_v37  ;;  %v4869_v37 = vld [vmem:[#allocation7 + $0x368] sm:$0xff]  ;;  %v4918_v57 = vld [vmem:[#allocation7 + $0x4f0] sm:$0xff] }
 0x3dc   :  { %3906 = vst [vmem:[#allocation3] sm:$0x3] %v3905_v3  ;;  %8909 = vmatpush1.bf16.msra.mxu1 %v8908_v18  ;;  %8719 = vmatprep.subr.bf16.mxu0 %v8718_v47  ;;  %v4871_v18 = vld [vmem:[#allocation7 + $0x378] sm:$0xff]  ;;  %v8736_v47 = vpack.c.bf16 %v4860_v10, %v4856_v63  ;;  %v8738_v25 = vpack.c.bf16 %v4869_v37, %v4865_v54  ;;  %v4873_v3 = vld [vmem:[#allocation7 + $0x388] sm:$0xff]  ;;  %v4896_v10 = vld [vmem:[#allocation7 + $0x440] sm:$0xff] }
 0x3dd   :  { %8911 = vmatprep.subr.bf16.mxu1 %v8910_v49  ;;  %v4868_v49 = vld [vmem:[#allocation7 + $0x360] sm:$0xff]  ;;  %v8930_v43 = vpack.c.bf16 %v4871_v18, %v4867_v30  ;;  %v8742_v0 = vpack.c.bf16 %v4877_v7, %v4873_v3  ;;  %v8944_v63 = vpack.c.bf16 %v4894_v14, %v4890_v46  ;;  %v4902_v54 = vld [vmem:[#allocation7 + $0x470] sm:$0xff]  ;;  %v4905_v37 = vld [vmem:[#allocation7 + $0x488] sm:$0xff] }
 0x3de   :  { %v4909_v30 = vld [vmem:[#allocation7 + $0x4a8] sm:$0xff]  ;;  %v4906_v3 = vld [vmem:[#allocation7 + $0x490] sm:$0xff] }
 0x3df   :  { %8721 = vmatpush1.bf16.msra.mxu0 %v8720_v15  ;;  %v4879_v15 = vld [vmem:[#allocation7 + $0x3b8] sm:$0xff]  ;;  %v4926_v19 = vld [vmem:[#allocation7 + $0x530] sm:$0xff] }
 0x3e0   :  { %8913 = vmatpush1.bf16.msra.mxu1 %v8912_v35  ;;  %8723 = vmatprep.subr.bf16.mxu0 %v8722_v52  ;;  %v8740_v35 = vpack.c.bf16 %v4868_v49, %v4864_v39  ;;  %v8932_v52 = vpack.c.bf16 %v4870_v34, %v4866_v24  ;;  %v8934_v16 = vpack.c.bf16 %v4879_v15, %v4875_v60  ;;  %v4908_v34 = vld [vmem:[#allocation7 + $0x4a0] sm:$0xff]  ;;  %v4910_v60 = vld [vmem:[#allocation7 + $0x4b0] sm:$0xff]  ;;  %v4913_v15 = vld [vmem:[#allocation7 + $0x4c8] sm:$0xff] }
 0x3e1   :  { %8915 = vmatprep.subr.bf16.mxu1 %v8914_v9  ;;  %v4874_v9 = vld [vmem:[#allocation7 + $0x390] sm:$0xff]  ;;  %v8756_v39 = vpack.c.bf16 %v4900_v61, %v4896_v10  ;;  %v8758_v24 = vpack.c.bf16 %v4909_v30, %v4905_v37 }
 0x3e2   :  { %v4930_v46 = vld [vmem:[#allocation7 + $0x550] sm:$0xff] }
 0x3e3   :  { %8725 = vmatpush1.bf16.msra.mxu0 %v8724_v59  ;;  %v4887_v59 = vld [vmem:[#allocation7 + $0x3f8] sm:$0xff]  ;;  %v4942_v30 = vld [vmem:[#allocation7 + $0x5b0] sm:$0xff] }
 0x3e4   :  { %8917 = vmatpush1.bf16.msra.mxu1 %v8916_v26  ;;  %8727 = vmatprep.subr.bf16.mxu0 %v8726_v44  ;;  %v8744_v26 = vpack.c.bf16 %v4876_v48, %v4872_v56  ;;  %v8936_v44 = vpack.c.bf16 %v4878_v20, %v4874_v9  ;;  %v8938_v40 = vpack.c.bf16 %v4887_v59, %v4883_v12  ;;  %v4912_v9 = vld [vmem:[#allocation7 + $0x4c0] sm:$0xff]  ;;  %v4914_v20 = vld [vmem:[#allocation7 + $0x4d0] sm:$0xff]  ;;  %v4921_v12 = vld [vmem:[#allocation7 + $0x508] sm:$0xff] }
 0x3e5   :  { %8919 = vmatprep.subr.bf16.mxu1 %v8918_v5  ;;  %v4882_v5 = vld [vmem:[#allocation7 + $0x3d0] sm:$0xff]  ;;  %v8952_v56 = vpack.c.bf16 %v4910_v60, %v4906_v3  ;;  %v4925_v59 = vld [vmem:[#allocation7 + $0x528] sm:$0xff] }
 0x3e6   :  { %v8940_v51 = vpack.c.bf16 %v4886_v23, %v4882_v5  ;;  %v4920_v5 = vld [vmem:[#allocation7 + $0x500] sm:$0xff]  ;;  %v4922_v23 = vld [vmem:[#allocation7 + $0x510] sm:$0xff] }
 0x3e7   :  { %8729 = vmatpush1.bf16.msra.mxu0 %v8728_v8  ;;  %v4895_v8 = vld [vmem:[#allocation7 + $0x438] sm:$0xff]  ;;  %v4946_v3 = vld [vmem:[#allocation7 + $0x5d0] sm:$0xff] }
 0x3e8   :  { %8921 = vmatpush1.bf16.msra.mxu1 %v8920_v17  ;;  %8731 = vmatprep.subr.bf16.mxu0 %v8730_v2  ;;  %v5146_v17 = vcombine.high %v10857_v4, %v10857_v4  ;;  %v8748_v2 = vpack.c.bf16 %v4884_v58, %v4880_v38  ;;  %v8942_v33 = vpack.c.bf16 %v4895_v8, %v4891_v62  ;;  %v4899_v4 = vld [vmem:[#allocation7 + $0x458] sm:$0xff]  ;;  %v4929_v62 = vld [vmem:[#allocation7 + $0x548] sm:$0xff]  ;;  %v4950_v60 = vld [vmem:[#allocation7 + $0x5f0] sm:$0xff] }
 0x3e9   :  { %8923 = vmatprep.subr.bf16.mxu1 %v8922_v28  ;;  %v4892_v28 = vld [vmem:[#allocation7 + $0x420] sm:$0xff]  ;;  %v8956_v38 = vpack.c.bf16 %v4918_v57, %v4914_v20  ;;  %v8766_v58 = vpack.c.bf16 %v4925_v59, %v4921_v12  ;;  %v4933_v8 = vld [vmem:[#allocation7 + $0x568] sm:$0xff]  ;;  %v4954_v20 = vld [vmem:[#allocation7 + $0x610] sm:$0xff] }
 0x3ea   :  { %v10874_v1 = vrot.slane %v5146_v17, %v10781_v32  ;;  %v4931_v17 = vld [vmem:[#allocation7 + $0x558] sm:$0xff]  ;;  %v4958_v57 = vld [vmem:[#allocation7 + $0x630] sm:$0xff]  ;;  %v4961_v12 = vld [vmem:[#allocation7 + $0x648] sm:$0xff] }
 0x3eb   :  { %8733 = vmatpush1.bf16.msra.mxu0 %v8732_v31  ;;  %v4901_v31 = vld [vmem:[#allocation7 + $0x468] sm:$0xff] }
 0x3ec   :  { %8925 = vmatpush1.bf16.msra.mxu1 %v8924_v36  ;;  %8735 = vmatprep.subr.bf16.mxu0 %v8734_v21  ;;  %v8752_v36 = vpack.c.bf16 %v4892_v28, %v4888_v6  ;;  %v4903_v21 = vld [vmem:[#allocation7 + $0x478] sm:$0xff]  ;;  %v8754_v42 = vpack.c.bf16 %v4901_v31, %v4897_v55  ;;  %v5162_v18 = vcombine.high %v10874_v1, %v10874_v1  ;;  %v4928_v28 = vld [vmem:[#allocation7 + $0x540] sm:$0xff]  ;;  %v4934_v55 = vld [vmem:[#allocation7 + $0x570] sm:$0xff] }
 0x3ed   :  { %8927 = vmatprep.subr.bf16.mxu1 %v8926_v13  ;;  %v4898_v13 = vld [vmem:[#allocation7 + $0x450] sm:$0xff]  ;;  %v8770_v6 = vpack.c.bf16 %v4933_v8, %v4929_v62  ;;  %v4937_v31 = vld [vmem:[#allocation7 + $0x588] sm:$0xff]  ;;  %v8964_v10 = vpack.c.bf16 %v4934_v55, %v4930_v46 }
 0x3ee   :  { %v8948_v49 = vpack.c.bf16 %v4902_v54, %v4898_v13  ;;  %v4936_v13 = vld [vmem:[#allocation7 + $0x580] sm:$0xff]  ;;  %v4938_v54 = vld [vmem:[#allocation7 + $0x590] sm:$0xff]  ;;  %v4965_v59 = vld [vmem:[#allocation7 + $0x668] sm:$0xff] }
 0x3ef   :  { %8737 = vmatpush1.bf16.msra.mxu0 %v8736_v47  ;;  %v8946_v47 = vpack.c.bf16 %v4903_v21, %v4899_v4  ;;  %v4939_v4 = vld [vmem:[#allocation7 + $0x598] sm:$0xff]  ;;  %v4969_v62 = vld [vmem:[#allocation7 + $0x688] sm:$0xff]  ;;  %v4970_v46 = vld [vmem:[#allocation7 + $0x690] sm:$0xff] }
 0x3f0   :  { %8929 = vmatpush1.bf16.msra.mxu1 %v8928_v22  ;;  %8739 = vmatprep.subr.bf16.mxu0 %v8738_v25  ;;  %v4907_v22 = vld [vmem:[#allocation7 + $0x498] sm:$0xff]  ;;  %v4973_v8 = vld [vmem:[#allocation7 + $0x6a8] sm:$0xff]  ;;  %v4974_v55 = vld [vmem:[#allocation7 + $0x6b0] sm:$0xff] }
 0x3f1   :  { %8931 = vmatprep.subr.bf16.mxu1 %v8930_v43  ;;  %v4911_v25 = vld [vmem:[#allocation7 + $0x4b8] sm:$0xff]  ;;  %v4904_v43 = vld [vmem:[#allocation7 + $0x480] sm:$0xff] }
 0x3f2   :  { %v8950_v7 = vpack.c.bf16 %v4911_v25, %v4907_v22  ;;  %v4943_v21 = vld [vmem:[#allocation7 + $0x5b8] sm:$0xff] }
 0x3f3   :  { %8741 = vmatpush1.bf16.msra.mxu0 %v8740_v35  ;;  %v4917_v35 = vld [vmem:[#allocation7 + $0x4e8] sm:$0xff]  ;;  %v8966_v37 = vpack.c.bf16 %v4943_v21, %v4939_v4  ;;  %v4947_v22 = vld [vmem:[#allocation7 + $0x5d8] sm:$0xff] }
 0x3f4   :  { %8933 = vmatpush1.bf16.msra.mxu1 %v8932_v52  ;;  %8743 = vmatprep.subr.bf16.mxu0 %v8742_v0  ;;  %v4915_v52 = vld [vmem:[#allocation7 + $0x4d8] sm:$0xff]  ;;  %v8762_v48 = vpack.c.bf16 %v4917_v35, %v4913_v15  ;;  %v4953_v15 = vld [vmem:[#allocation7 + $0x608] sm:$0xff] }
 0x3f5   :  { %8935 = vmatprep.subr.bf16.mxu1 %v8934_v16  ;;  %v4919_v0 = vld [vmem:[#allocation7 + $0x4f8] sm:$0xff]  ;;  %v4916_v16 = vld [vmem:[#allocation7 + $0x4e0] sm:$0xff]  ;;  %v4957_v35 = vld [vmem:[#allocation7 + $0x628] sm:$0xff] }
 0x3f6   :  { %v8954_v45 = vpack.c.bf16 %v4919_v0, %v4915_v52  ;;  %v4951_v25 = vld [vmem:[#allocation7 + $0x5f8] sm:$0xff] }
 0x3f7   :  { %8745 = vmatpush1.bf16.msra.mxu0 %v8744_v26  ;;  %v4923_v26 = vld [vmem:[#allocation7 + $0x518] sm:$0xff] }
 0x3f8   :  { %8937 = vmatpush1.bf16.msra.mxu1 %v8936_v44  ;;  %8747 = vmatprep.subr.bf16.mxu0 %v8746_v27  ;;  %v4927_v44 = vld [vmem:[#allocation7 + $0x538] sm:$0xff]  ;;  %v8764_v27 = vpack.c.bf16 %v4916_v16, %v4912_v9  ;;  %v4952_v9 = vld [vmem:[#allocation7 + $0x600] sm:$0xff] }
 0x3f9   :  { %8939 = vmatprep.subr.bf16.mxu1 %v8938_v40  ;;  %v4924_v40 = vld [vmem:[#allocation7 + $0x520] sm:$0xff]  ;;  %v8958_v11 = vpack.c.bf16 %v4927_v44, %v4923_v26  ;;  %v4955_v52 = vld [vmem:[#allocation7 + $0x618] sm:$0xff] }
 0x3fa   :  { %v4959_v0 = vld [vmem:[#allocation7 + $0x638] sm:$0xff]  ;;  %v4956_v16 = vld [vmem:[#allocation7 + $0x620] sm:$0xff] }
 0x3fb   :  { %8749 = vmatpush1.bf16.msra.mxu0 %v8748_v2  ;;  %v4935_v2 = vld [vmem:[#allocation7 + $0x578] sm:$0xff] }
 0x3fc   :  { %8941 = vmatpush1.bf16.msra.mxu1 %v8940_v51  ;;  %8751 = vmatprep.subr.bf16.mxu0 %v8750_v53  ;;  %v8768_v51 = vpack.c.bf16 %v4924_v40, %v4920_v5  ;;  %v8960_v53 = vpack.c.bf16 %v4926_v19, %v4922_v23  ;;  %v8962_v14 = vpack.c.bf16 %v4935_v2, %v4931_v17  ;;  %v4963_v26 = vld [vmem:[#allocation7 + $0x658] sm:$0xff]  ;;  %v4960_v5 = vld [vmem:[#allocation7 + $0x640] sm:$0xff]  ;;  %v4962_v23 = vld [vmem:[#allocation7 + $0x650] sm:$0xff] }
 0x3fd   :  { %8943 = vmatprep.subr.bf16.mxu1 %v8942_v33  ;;  %v4932_v33 = vld [vmem:[#allocation7 + $0x560] sm:$0xff]  ;;  %v4967_v44 = vld [vmem:[#allocation7 + $0x678] sm:$0xff]  ;;  %v4966_v19 = vld [vmem:[#allocation7 + $0x670] sm:$0xff] }
 0x3fe   :  { %5242 = vmatmul.mubr.f32.vlgmr.msra.gmra.mrb[28].mxu0 %v10861_v29  ;;  %v4964_v40 = vld [vmem:[#allocation7 + $0x660] sm:$0xff]  ;;  %v4971_v17 = vld [vmem:[#allocation7 + $0x698] sm:$0xff] }
 0x3ff   :  { %5455 = vmatmul.mubr.f32.vlgmr.msra.gmra.mrb[28].mxu1 %v10861_v29  ;;  %8753 = vmatpush1.bf16.msra.mxu0 %v8752_v36  ;;  %v8760_v29 = vpack.c.bf16 %v4908_v34, %v4904_v43  ;;  %v4941_v36 = vld [vmem:[#allocation7 + $0x5a8] sm:$0xff]  ;;  %v4944_v43 = vld [vmem:[#allocation7 + $0x5c0] sm:$0xff]  ;;  %v4975_v2 = vld [vmem:[#allocation7 + $0x6b8] sm:$0xff] }
 0x400   :  { %5312 = vmatprep.mubr.f32.mxu0 %v5162_v18  ;;  %8945 = vmatpush1.bf16.msra.mxu1 %v8944_v63  ;;  %v8772_v63 = vpack.c.bf16 %v4932_v33, %v4928_v28  ;;  %v8774_v61 = vpack.c.bf16 %v4941_v36, %v4937_v31  ;;  %v4948_v34 = vld [vmem:[#allocation7 + $0x5e0] sm:$0xff]  ;;  %v4977_v31 = vld [vmem:[#allocation7 + $0x6c8] sm:$0xff]  ;;  %v4979_v4 = vld [vmem:[#allocation7 + $0x6d8] sm:$0xff] }
 0x401   :  { %5525 = vmatprep.mubr.f32.mxu1 %v5162_v18  ;;  %8755 = vmatprep.subr.bf16.mxu0 %v8754_v42  ;;  %v4940_v42 = vld [vmem:[#allocation7 + $0x5a0] sm:$0xff]  ;;  %v4945_v18 = vld [vmem:[#allocation7 + $0x5c8] sm:$0xff]  ;;  %v4983_v21 = vld [vmem:[#allocation7 + $0x6f8] sm:$0xff] }
 0x402   :  { %8947 = vmatprep.subr.bf16.mxu1 %v8946_v47  ;;  %v4949_v47 = vld [vmem:[#allocation7 + $0x5e8] sm:$0xff]  ;;  %v4968_v28 = vld [vmem:[#allocation7 + $0x680] sm:$0xff] }
 0x403   :  { %8757 = vmatpush1.bf16.msra.mxu0 %v8756_v39  ;;  %v8776_v39 = vpack.c.bf16 %v4940_v42, %v4936_v13  ;;  %v4972_v33 = vld [vmem:[#allocation7 + $0x6a0] sm:$0xff]  ;;  %v4981_v36 = vld [vmem:[#allocation7 + $0x6e8] sm:$0xff] }
 0x404   :  { %8949 = vmatpush1.bf16.msra.mxu1 %v8948_v49  ;;  %8759 = vmatprep.subr.bf16.mxu0 %v8758_v24  ;;  %v8968_v49 = vpack.c.bf16 %v4942_v30, %v4938_v54  ;;  %v8778_v24 = vpack.c.bf16 %v4949_v47, %v4945_v18  ;;  %v4976_v13 = vld [vmem:[#allocation7 + $0x6c0] sm:$0xff]  ;;  %v4978_v54 = vld [vmem:[#allocation7 + $0x6d0] sm:$0xff]  ;;  %v4985_v18 = vld [vmem:[#allocation7 + $0x708] sm:$0xff] }
 0x405   :  { %8951 = vmatprep.subr.bf16.mxu1 %v8950_v7  ;;  %v8970_v7 = vpack.c.bf16 %v4951_v25, %v4947_v22  ;;  %v4980_v42 = vld [vmem:[#allocation7 + $0x6e0] sm:$0xff]  ;;  %v4982_v30 = vld [vmem:[#allocation7 + $0x6f0] sm:$0xff]  ;;  %v4989_v47 = vld [vmem:[#allocation7 + $0x728] sm:$0xff] }
 0x406   :  { %v4987_v22 = vld [vmem:[#allocation7 + $0x718] sm:$0xff] }
 0x407   :  { %8761 = vmatpush1.bf16.msra.mxu0 %v8760_v29  ;;  %v8780_v29 = vpack.c.bf16 %v4948_v34, %v4944_v43  ;;  %v4991_v25 = vld [vmem:[#allocation7 + $0x738] sm:$0xff]  ;;  %v4984_v43 = vld [vmem:[#allocation7 + $0x700] sm:$0xff] }
 0x408   :  { %8953 = vmatpush1.bf16.msra.mxu1 %v8952_v56  ;;  %8763 = vmatprep.subr.bf16.mxu0 %v8762_v48  ;;  %v8972_v56 = vpack.c.bf16 %v4950_v60, %v4946_v3  ;;  %v8782_v48 = vpack.c.bf16 %v4957_v35, %v4953_v15  ;;  %v4988_v34 = vld [vmem:[#allocation7 + $0x720] sm:$0xff]  ;;  %v4986_v3 = vld [vmem:[#allocation7 + $0x710] sm:$0xff]  ;;  %v4993_v15 = vld [vmem:[#allocation7 + $0x748] sm:$0xff] }
 0x409   :  { %8955 = vmatprep.subr.bf16.mxu1 %v8954_v45  ;;  %v8974_v45 = vpack.c.bf16 %v4959_v0, %v4955_v52  ;;  %v4990_v60 = vld [vmem:[#allocation7 + $0x730] sm:$0xff]  ;;  %v4997_v35 = vld [vmem:[#allocation7 + $0x768] sm:$0xff]  ;;  %v4995_v52 = vld [vmem:[#allocation7 + $0x758] sm:$0xff] }
 0x40a   :  { %v4999_v0 = vld [vmem:[#allocation7 + $0x778] sm:$0xff] }
 0x40b   :  { %8765 = vmatpush1.bf16.msra.mxu0 %v8764_v27  ;;  %v8784_v27 = vpack.c.bf16 %v4956_v16, %v4952_v9  ;;  %v4992_v9 = vld [vmem:[#allocation7 + $0x740] sm:$0xff] }
 0x40c   :  { %8957 = vmatpush1.bf16.msra.mxu1 %v8956_v38  ;;  %8767 = vmatprep.subr.bf16.mxu0 %v8766_v58  ;;  %v8976_v38 = vpack.c.bf16 %v4958_v57, %v4954_v20  ;;  %v8786_v58 = vpack.c.bf16 %v4965_v59, %v4961_v12  ;;  %v4996_v16 = vld [vmem:[#allocation7 + $0x760] sm:$0xff]  ;;  %v4994_v20 = vld [vmem:[#allocation7 + $0x750] sm:$0xff]  ;;  %v5001_v12 = vld [vmem:[#allocation7 + $0x788] sm:$0xff] }
 0x40d   :  { %8959 = vmatprep.subr.bf16.mxu1 %v8958_v11  ;;  %v8978_v11 = vpack.c.bf16 %v4967_v44, %v4963_v26  ;;  %v4998_v57 = vld [vmem:[#allocation7 + $0x770] sm:$0xff]  ;;  %v5005_v59 = vld [vmem:[#allocation7 + $0x7a8] sm:$0xff]  ;;  %v5003_v26 = vld [vmem:[#allocation7 + $0x798] sm:$0xff] }
 0x40e   :  { %v5007_v44 = vld [vmem:[#allocation7 + $0x7b8] sm:$0xff] }
 0x40f   :  { %8769 = vmatpush1.bf16.msra.mxu0 %v8768_v51  ;;  %v8788_v51 = vpack.c.bf16 %v4964_v40, %v4960_v5  ;;  %v5000_v5 = vld [vmem:[#allocation7 + $0x780] sm:$0xff] }
 0x410   :  { %8961 = vmatpush1.bf16.msra.mxu1 %v8960_v53  ;;  %8771 = vmatprep.subr.bf16.mxu0 %v8770_v6  ;;  %v8980_v53 = vpack.c.bf16 %v4966_v19, %v4962_v23  ;;  %v8790_v6 = vpack.c.bf16 %v4973_v8, %v4969_v62  ;;  %v5004_v40 = vld [vmem:[#allocation7 + $0x7a0] sm:$0xff]  ;;  %v5002_v23 = vld [vmem:[#allocation7 + $0x790] sm:$0xff]  ;;  %v5009_v62 = vld [vmem:[#allocation7 + $0x7c8] sm:$0xff] }
 0x411   :  { %8963 = vmatprep.subr.bf16.mxu1 %v8962_v14  ;;  %v8982_v14 = vpack.c.bf16 %v4975_v2, %v4971_v17  ;;  %v5006_v19 = vld [vmem:[#allocation7 + $0x7b0] sm:$0xff]  ;;  %v5013_v8 = vld [vmem:[#allocation7 + $0x7e8] sm:$0xff]  ;;  %v5011_v17 = vld [vmem:[#allocation7 + $0x7d8] sm:$0xff] }
 0x412   :  { %v5015_v2 = vld [vmem:[#allocation7 + $0x7f8] sm:$0xff] }
 0x413   :  { %8773 = vmatpush1.bf16.msra.mxu0 %v8772_v63  ;;  %v8792_v63 = vpack.c.bf16 %v4972_v33, %v4968_v28  ;;  %v5008_v28 = vld [vmem:[#allocation7 + $0x7c0] sm:$0xff] }
 0x414   :  { %8965 = vmatpush1.bf16.msra.mxu1 %v8964_v10  ;;  %8775 = vmatprep.subr.bf16.mxu0 %v8774_v61  ;;  %v8984_v10 = vpack.c.bf16 %v4974_v55, %v4970_v46  ;;  %v8794_v61 = vpack.c.bf16 %v4981_v36, %v4977_v31  ;;  %v5012_v33 = vld [vmem:[#allocation7 + $0x7e0] sm:$0xff]  ;;  %v5010_v46 = vld [vmem:[#allocation7 + $0x7d0] sm:$0xff]  ;;  %v5017_v31 = vld [vmem:[#allocation7 + $0x808] sm:$0xff] }
 0x415   :  { %8967 = vmatprep.subr.bf16.mxu1 %v8966_v37  ;;  %v8986_v37 = vpack.c.bf16 %v4983_v21, %v4979_v4  ;;  %v5014_v55 = vld [vmem:[#allocation7 + $0x7f0] sm:$0xff]  ;;  %v5021_v36 = vld [vmem:[#allocation7 + $0x828] sm:$0xff]  ;;  %v5019_v4 = vld [vmem:[#allocation7 + $0x818] sm:$0xff] }
 0x416   :  { %v5023_v21 = vld [vmem:[#allocation7 + $0x838] sm:$0xff] }
 0x417   :  { %8777 = vmatpush1.bf16.msra.mxu0 %v8776_v39  ;;  %v8796_v39 = vpack.c.bf16 %v4980_v42, %v4976_v13  ;;  %v5016_v13 = vld [vmem:[#allocation7 + $0x800] sm:$0xff] }
 0x418   :  { %8969 = vmatpush1.bf16.msra.mxu1 %v8968_v49  ;;  %8779 = vmatprep.subr.bf16.mxu0 %v8778_v24  ;;  %v8988_v49 = vpack.c.bf16 %v4982_v30, %v4978_v54  ;;  %v8798_v24 = vpack.c.bf16 %v4989_v47, %v4985_v18  ;;  %v5020_v42 = vld [vmem:[#allocation7 + $0x820] sm:$0xff]  ;;  %v9006_v54 = vpack.c.bf16 %v5023_v21, %v5019_v4  ;;  %v5022_v30 = vld [vmem:[#allocation7 + $0x830] sm:$0xff]  ;;  %v5025_v18 = vld [vmem:[#allocation7 + $0x848] sm:$0xff] }
 0x419   :  { %8971 = vmatprep.subr.bf16.mxu1 %v8970_v7  ;;  %v8990_v7 = vpack.c.bf16 %v4991_v25, %v4987_v22  ;;  %v5029_v47 = vld [vmem:[#allocation7 + $0x868] sm:$0xff]  ;;  %v8816_v22 = vpack.c.bf16 %v5020_v42, %v5016_v13  ;;  %v10880_v25 = vld.sshfl [vmem:[#allocation2 + $0x10] sm:$0x33 pattern:$0x76325410]  ;;  %v5059_v21 = vld [vmem:[#allocation7 + $0x958] sm:$0xff] }
 0x41a   :  { %v5061_v4 = vld [vmem:[#allocation7 + $0x968] sm:$0xff]  ;;  %v5056_v42 = vld [vmem:[#allocation7 + $0x940] sm:$0xff] }
 0x41b   :  { %8781 = vmatpush1.bf16.msra.mxu0 %v8780_v29  ;;  %v8800_v29 = vpack.c.bf16 %v4988_v34, %v4984_v43  ;;  %v5024_v43 = vld [vmem:[#allocation7 + $0x840] sm:$0xff] }
 0x41c   :  { %8973 = vmatpush1.bf16.msra.mxu1 %v8972_v56  ;;  %8783 = vmatprep.subr.bf16.mxu0 %v8782_v48  ;;  %v8992_v56 = vpack.c.bf16 %v4990_v60, %v4986_v3  ;;  %v8802_v48 = vpack.c.bf16 %v4997_v35, %v4993_v15  ;;  %v5028_v34 = vld [vmem:[#allocation7 + $0x860] sm:$0xff]  ;;  %v5026_v3 = vld [vmem:[#allocation7 + $0x850] sm:$0xff]  ;;  %v5033_v15 = vld [vmem:[#allocation7 + $0x888] sm:$0xff] }
 0x41d   :  { %8975 = vmatprep.subr.bf16.mxu1 %v8974_v45  ;;  %v8994_v45 = vpack.c.bf16 %v4999_v0, %v4995_v52  ;;  %v5030_v60 = vld [vmem:[#allocation7 + $0x870] sm:$0xff]  ;;  %v5037_v35 = vld [vmem:[#allocation7 + $0x8a8] sm:$0xff]  ;;  %v5170_v52 = vcombine.high %v10880_v25, %v10880_v25 }
 0x41f   :  { %8785 = vmatpush1.bf16.msra.mxu0 %v8784_v27  ;;  %v8804_v27 = vpack.c.bf16 %v4996_v16, %v4992_v9  ;;  %v9012_v9 = vpack.c.bf16 %v5030_v60, %v5026_v3  ;;  %v8822_v16 = vpack.c.bf16 %v5037_v35, %v5033_v15  ;;  %v5064_v3 = vld [vmem:[#allocation7 + $0x980] sm:$0xff]  ;;  %v5066_v60 = vld [vmem:[#allocation7 + $0x990] sm:$0xff] }
 0x420   :  { %8977 = vmatpush1.bf16.msra.mxu1 %v8976_v38  ;;  %8787 = vmatprep.subr.bf16.mxu0 %v8786_v58  ;;  %v8996_v38 = vpack.c.bf16 %v4998_v57, %v4994_v20  ;;  %v8806_v58 = vpack.c.bf16 %v5005_v59, %v5001_v12  ;;  %v5032_v20 = vld [vmem:[#allocation7 + $0x880] sm:$0xff]  ;;  %v5034_v57 = vld [vmem:[#allocation7 + $0x890] sm:$0xff] }
 0x421   :  { %8979 = vmatprep.subr.bf16.mxu1 %v8978_v11  ;;  %v8998_v11 = vpack.c.bf16 %v5007_v44, %v5003_v26  ;;  %v5038_v59 = vld [vmem:[#allocation7 + $0x8b0] sm:$0xff]  ;;  %v5041_v26 = vld [vmem:[#allocation7 + $0x8c8] sm:$0xff] }
 0x422   :  { %v5045_v44 = vld [vmem:[#allocation7 + $0x8e8] sm:$0xff]  ;;  %v5070_v35 = vld [vmem:[#allocation7 + $0x9b0] sm:$0xff] }
 0x423   :  { %8789 = vmatpush1.bf16.msra.mxu0 %v8788_v51  ;;  %v8808_v51 = vpack.c.bf16 %v5004_v40, %v5000_v5  ;;  %v8826_v5 = vpack.c.bf16 %v5045_v44, %v5041_v26  ;;  %v5040_v40 = vld [vmem:[#allocation7 + $0x8c0] sm:$0xff]  ;;  %v5081_v26 = vld [vmem:[#allocation7 + $0xa08] sm:$0xff] }
 0x424   :  { %8981 = vmatpush1.bf16.msra.mxu1 %v8980_v53  ;;  %8791 = vmatprep.subr.bf16.mxu0 %v8790_v6  ;;  %v9000_v53 = vpack.c.bf16 %v5006_v19, %v5002_v23  ;;  %v8810_v6 = vpack.c.bf16 %v5013_v8, %v5009_v62  ;;  %v5044_v23 = vld [vmem:[#allocation7 + $0x8e0] sm:$0xff]  ;;  %v5046_v62 = vld [vmem:[#allocation7 + $0x8f0] sm:$0xff]  ;;  %v5049_v8 = vld [vmem:[#allocation7 + $0x908] sm:$0xff] }
 0x425   :  { %8983 = vmatprep.subr.bf16.mxu1 %v8982_v14  ;;  %v9002_v14 = vpack.c.bf16 %v5015_v2, %v5011_v17  ;;  %v5053_v17 = vld [vmem:[#allocation7 + $0x928] sm:$0xff]  ;;  %v5051_v2 = vld [vmem:[#allocation7 + $0x918] sm:$0xff] }
 0x426   :  { %v5085_v44 = vld [vmem:[#allocation7 + $0xa28] sm:$0xff] }
 0x427   :  { %8793 = vmatpush1.bf16.msra.mxu0 %v8792_v63  ;;  %v8812_v63 = vpack.c.bf16 %v5012_v33, %v5008_v28  ;;  %v8830_v28 = vpack.c.bf16 %v5053_v17, %v5049_v8  ;;  %v5048_v33 = vld [vmem:[#allocation7 + $0x900] sm:$0xff]  ;;  %v5089_v8 = vld [vmem:[#allocation7 + $0xa48] sm:$0xff] }
 0x428   :  { %8985 = vmatpush1.bf16.msra.mxu1 %v8984_v10  ;;  %8795 = vmatprep.subr.bf16.mxu0 %v8794_v61  ;;  %v9004_v10 = vpack.c.bf16 %v5014_v55, %v5010_v46  ;;  %v8814_v61 = vpack.c.bf16 %v5021_v36, %v5017_v31  ;;  %v5052_v46 = vld [vmem:[#allocation7 + $0x920] sm:$0xff]  ;;  %v5054_v31 = vld [vmem:[#allocation7 + $0x930] sm:$0xff]  ;;  %v5057_v36 = vld [vmem:[#allocation7 + $0x948] sm:$0xff] }
 0x429   :  { %8987 = vmatprep.subr.bf16.mxu1 %v8986_v37  ;;  %v5018_v37 = vld [vmem:[#allocation7 + $0x810] sm:$0xff]  ;;  %v8834_v13 = vpack.c.bf16 %v5061_v4, %v5057_v36  ;;  %v5093_v17 = vld [vmem:[#allocation7 + $0xa68] sm:$0xff] }
 0x42a   :  { %v5097_v36 = vld [vmem:[#allocation7 + $0xa88] sm:$0xff] }
 0x42b   :  { %8797 = vmatpush1.bf16.msra.mxu0 %v8796_v39  ;;  %v5027_v39 = vld [vmem:[#allocation7 + $0x858] sm:$0xff]  ;;  %v5101_v4 = vld [vmem:[#allocation7 + $0xaa8] sm:$0xff] }
 0x42c   :  { %8989 = vmatpush1.bf16.msra.mxu1 %v8988_v49  ;;  %8799 = vmatprep.subr.bf16.mxu0 %v8798_v24  ;;  %v5031_v49 = vld [vmem:[#allocation7 + $0x878] sm:$0xff]  ;;  %v9008_v24 = vpack.c.bf16 %v5022_v30, %v5018_v37  ;;  %v5058_v37 = vld [vmem:[#allocation7 + $0x950] sm:$0xff] }
 0x42d   :  { %8991 = vmatprep.subr.bf16.mxu1 %v8990_v7  ;;  %v8818_v7 = vpack.c.bf16 %v5029_v47, %v5025_v18  ;;  %v9010_v0 = vpack.c.bf16 %v5031_v49, %v5027_v39  ;;  %v5062_v18 = vld [vmem:[#allocation7 + $0x970] sm:$0xff]  ;;  %v5065_v47 = vld [vmem:[#allocation7 + $0x988] sm:$0xff]  ;;  %v5067_v39 = vld [vmem:[#allocation7 + $0x998] sm:$0xff] }
 0x42e   :  { %v5071_v49 = vld [vmem:[#allocation7 + $0x9b8] sm:$0xff] }
 0x42f   :  { %8801 = vmatpush1.bf16.msra.mxu0 %v8800_v29  ;;  %v5035_v29 = vld [vmem:[#allocation7 + $0x898] sm:$0xff]  ;;  %v9030_v15 = vpack.c.bf16 %v5071_v49, %v5067_v39 }
 0x430   :  { %8993 = vmatpush1.bf16.msra.mxu1 %v8992_v56  ;;  %8803 = vmatprep.subr.bf16.mxu0 %v8802_v48  ;;  %v5039_v56 = vld [vmem:[#allocation7 + $0x8b8] sm:$0xff]  ;;  %v8820_v48 = vpack.c.bf16 %v5028_v34, %v5024_v43  ;;  %v9028_v43 = vpack.c.bf16 %v5062_v18, %v5058_v37  ;;  %v5098_v37 = vld [vmem:[#allocation7 + $0xa90] sm:$0xff] }
 0x431   :  { %8995 = vmatprep.subr.bf16.mxu1 %v8994_v45  ;;  %v5036_v45 = vld [vmem:[#allocation7 + $0x8a0] sm:$0xff]  ;;  %v9014_v12 = vpack.c.bf16 %v5039_v56, %v5035_v29  ;;  %v5075_v29 = vld [vmem:[#allocation7 + $0x9d8] sm:$0xff]  ;;  %v5102_v18 = vld [vmem:[#allocation7 + $0xab0] sm:$0xff] }
 0x432   :  { %v5079_v56 = vld [vmem:[#allocation7 + $0x9f8] sm:$0xff] }
 0x433   :  { %8805 = vmatpush1.bf16.msra.mxu0 %v8804_v27  ;;  %v5043_v27 = vld [vmem:[#allocation7 + $0x8d8] sm:$0xff] }
 0x434   :  { %8997 = vmatpush1.bf16.msra.mxu1 %v8996_v38  ;;  %8807 = vmatprep.subr.bf16.mxu0 %v8806_v58  ;;  %v5047_v38 = vld [vmem:[#allocation7 + $0x8f8] sm:$0xff]  ;;  %v9016_v58 = vpack.c.bf16 %v5038_v59, %v5034_v57  ;;  %v5074_v57 = vld [vmem:[#allocation7 + $0x9d0] sm:$0xff] }
 0x435   :  { %8999 = vmatprep.subr.bf16.mxu1 %v8998_v11  ;;  %v5042_v11 = vld [vmem:[#allocation7 + $0x8d0] sm:$0xff]  ;;  %v9018_v19 = vpack.c.bf16 %v5047_v38, %v5043_v27  ;;  %v5083_v27 = vld [vmem:[#allocation7 + $0xa18] sm:$0xff] }
 0x436   :  { %v5078_v59 = vld [vmem:[#allocation7 + $0x9f0] sm:$0xff]  ;;  %v5087_v38 = vld [vmem:[#allocation7 + $0xa38] sm:$0xff] }
 0x437   :  { %8809 = vmatpush1.bf16.msra.mxu0 %v8808_v51  ;;  %v5055_v51 = vld [vmem:[#allocation7 + $0x938] sm:$0xff] }
 0x438   :  { %9001 = vmatpush1.bf16.msra.mxu1 %v9000_v53  ;;  %8811 = vmatprep.subr.bf16.mxu0 %v8810_v6  ;;  %v8828_v53 = vpack.c.bf16 %v5044_v23, %v5040_v40  ;;  %v9020_v6 = vpack.c.bf16 %v5046_v62, %v5042_v11  ;;  %v9022_v55 = vpack.c.bf16 %v5055_v51, %v5051_v2  ;;  %v5080_v40 = vld [vmem:[#allocation7 + $0xa00] sm:$0xff]  ;;  %v5082_v11 = vld [vmem:[#allocation7 + $0xa10] sm:$0xff]  ;;  %v5091_v2 = vld [vmem:[#allocation7 + $0xa58] sm:$0xff] }
 0x439   :  { %9003 = vmatprep.subr.bf16.mxu1 %v9002_v14  ;;  %v5050_v14 = vld [vmem:[#allocation7 + $0x910] sm:$0xff]  ;;  %v5084_v23 = vld [vmem:[#allocation7 + $0xa20] sm:$0xff]  ;;  %v5095_v51 = vld [vmem:[#allocation7 + $0xa78] sm:$0xff] }
 0x43a   :  { %v5086_v62 = vld [vmem:[#allocation7 + $0xa30] sm:$0xff]  ;;  %v5107_v39 = vld [vmem:[#allocation7 + $0xad8] sm:$0xff] }
 0x43b   :  { %8813 = vmatpush1.bf16.msra.mxu0 %v8812_v63  ;;  %v5063_v63 = vld [vmem:[#allocation7 + $0x978] sm:$0xff] }
 0x43c   :  { %9005 = vmatpush1.bf16.msra.mxu1 %v9004_v10  ;;  %8815 = vmatprep.subr.bf16.mxu0 %v8814_v61  ;;  %v8832_v10 = vpack.c.bf16 %v5052_v46, %v5048_v33  ;;  %v9024_v61 = vpack.c.bf16 %v5054_v31, %v5050_v14  ;;  %v9026_v30 = vpack.c.bf16 %v5063_v63, %v5059_v21  ;;  %v5088_v33 = vld [vmem:[#allocation7 + $0xa40] sm:$0xff]  ;;  %v5090_v14 = vld [vmem:[#allocation7 + $0xa50] sm:$0xff]  ;;  %v5099_v21 = vld [vmem:[#allocation7 + $0xa98] sm:$0xff] }
 0x43d   :  { %9007 = vmatprep.subr.bf16.mxu1 %v9006_v54  ;;  %v5060_v54 = vld [vmem:[#allocation7 + $0x960] sm:$0xff]  ;;  %v5094_v31 = vld [vmem:[#allocation7 + $0xa70] sm:$0xff]  ;;  %v5103_v63 = vld [vmem:[#allocation7 + $0xab8] sm:$0xff] }
 0x43e   :  { %5313 = vmatmul.mubr.f32.vlgmr.msra.gmra.mrb[28].mxu0 %v10874_v1  ;;  %v5092_v46 = vld [vmem:[#allocation7 + $0xa60] sm:$0xff]  ;;  %v5111_v49 = vld [vmem:[#allocation7 + $0xaf8] sm:$0xff] }
 0x43f   :  { %5526 = vmatmul.mubr.f32.vlgmr.msra.gmra.mrb[28].mxu1 %v10874_v1  ;;  %8817 = vmatpush1.bf16.msra.mxu0 %v8816_v22  ;;  %v8824_v1 = vpack.c.bf16 %v5036_v45, %v5032_v20  ;;  %v5069_v22 = vld [vmem:[#allocation7 + $0x9a8] sm:$0xff]  ;;  %v5072_v20 = vld [vmem:[#allocation7 + $0x9c0] sm:$0xff] }
 0x440   :  { %5383 = vmatprep.mubr.f32.mxu0 %v5170_v52  ;;  %9009 = vmatpush1.bf16.msra.mxu1 %v9008_v24  ;;  %v8836_v24 = vpack.c.bf16 %v5060_v54, %v5056_v42  ;;  %v8838_v34 = vpack.c.bf16 %v5069_v22, %v5065_v47  ;;  %v5076_v45 = vld [vmem:[#allocation7 + $0x9e0] sm:$0xff]  ;;  %v5105_v47 = vld [vmem:[#allocation7 + $0xac8] sm:$0xff] }
 0x441   :  { %5596 = vmatprep.mubr.f32.mxu1 %v5170_v52  ;;  %8819 = vmatprep.subr.bf16.mxu0 %v8818_v7  ;;  %v5068_v7 = vld [vmem:[#allocation7 + $0x9a0] sm:$0xff]  ;;  %v5073_v52 = vld [vmem:[#allocation7 + $0x9c8] sm:$0xff] }
 0x442   :  { %9011 = vmatprep.subr.bf16.mxu1 %v9010_v0  ;;  %v5077_v0 = vld [vmem:[#allocation7 + $0x9e8] sm:$0xff]  ;;  %v5096_v42 = vld [vmem:[#allocation7 + $0xa80] sm:$0xff] }
 0x443   :  { %8821 = vmatpush1.bf16.msra.mxu0 %v8820_v48  ;;  %v8840_v48 = vpack.c.bf16 %v5068_v7, %v5064_v3  ;;  %v5100_v54 = vld [vmem:[#allocation7 + $0xaa0] sm:$0xff]  ;;  %v5109_v22 = vld [vmem:[#allocation7 + $0xae8] sm:$0xff] }
 0x444   :  { %9013 = vmatpush1.bf16.msra.mxu1 %v9012_v9  ;;  %8823 = vmatprep.subr.bf16.mxu0 %v8822_v16  ;;  %v9032_v9 = vpack.c.bf16 %v5070_v35, %v5066_v60  ;;  %v8842_v16 = vpack.c.bf16 %v5077_v0, %v5073_v52  ;;  %v5104_v3 = vld [vmem:[#allocation7 + $0xac0] sm:$0xff]  ;;  %v5106_v60 = vld [vmem:[#allocation7 + $0xad0] sm:$0xff]  ;;  %v5113_v52 = vld [vmem:[#allocation7 + $0xb08] sm:$0xff] }
 0x445   :  { %9015 = vmatprep.subr.bf16.mxu1 %v9014_v12  ;;  %v9034_v12 = vpack.c.bf16 %v5079_v56, %v5075_v29  ;;  %v5108_v7 = vld [vmem:[#allocation7 + $0xae0] sm:$0xff]  ;;  %v5110_v35 = vld [vmem:[#allocation7 + $0xaf0] sm:$0xff]  ;;  %v5117_v0 = vld [vmem:[#allocation7 + $0xb28] sm:$0xff] }
 0x446   :  { %v5115_v29 = vld [vmem:[#allocation7 + $0xb18] sm:$0xff] }
 0x447   :  { %8825 = vmatpush1.bf16.msra.mxu0 %v8824_v1  ;;  %v8844_v1 = vpack.c.bf16 %v5076_v45, %v5072_v20  ;;  %v5119_v56 = vld [vmem:[#allocation7 + $0xb38] sm:$0xff]  ;;  %v5112_v20 = vld [vmem:[#allocation7 + $0xb00] sm:$0xff] }
 0x448   :  { %9017 = vmatpush1.bf16.msra.mxu1 %v9016_v58  ;;  %8827 = vmatprep.subr.bf16.mxu0 %v8826_v5  ;;  %v9036_v58 = vpack.c.bf16 %v5078_v59, %v5074_v57  ;;  %v8846_v5 = vpack.c.bf16 %v5085_v44, %v5081_v26  ;;  %v5116_v45 = vld [vmem:[#allocation7 + $0xb20] sm:$0xff]  ;;  %v5114_v57 = vld [vmem:[#allocation7 + $0xb10] sm:$0xff]  ;;  %v5121_v26 = vld [vmem:[#allocation7 + $0xb48] sm:$0xff] }
 0x449   :  { %9019 = vmatprep.subr.bf16.mxu1 %v9018_v19  ;;  %v9038_v19 = vpack.c.bf16 %v5087_v38, %v5083_v27  ;;  %v5118_v59 = vld [vmem:[#allocation7 + $0xb30] sm:$0xff]  ;;  %v5125_v44 = vld [vmem:[#allocation7 + $0xb68] sm:$0xff]  ;;  %v5123_v27 = vld [vmem:[#allocation7 + $0xb58] sm:$0xff] }
 0x44a   :  { %v5127_v38 = vld [vmem:[#allocation7 + $0xb78] sm:$0xff] }
 0x44b   :  { %8829 = vmatpush1.bf16.msra.mxu0 %v8828_v53  ;;  %v8848_v53 = vpack.c.bf16 %v5084_v23, %v5080_v40  ;;  %v5120_v40 = vld [vmem:[#allocation7 + $0xb40] sm:$0xff] }
 0x44c   :  { %9021 = vmatpush1.bf16.msra.mxu1 %v9020_v6  ;;  %8831 = vmatprep.subr.bf16.mxu0 %v8830_v28  ;;  %v9040_v6 = vpack.c.bf16 %v5086_v62, %v5082_v11  ;;  %v8850_v28 = vpack.c.bf16 %v5093_v17, %v5089_v8  ;;  %v5124_v23 = vld [vmem:[#allocation7 + $0xb60] sm:$0xff]  ;;  %v5122_v11 = vld [vmem:[#allocation7 + $0xb50] sm:$0xff]  ;;  %v5129_v8 = vld [vmem:[#allocation7 + $0xb88] sm:$0xff] }
 0x44d   :  { %9023 = vmatprep.subr.bf16.mxu1 %v9022_v55  ;;  %v9042_v55 = vpack.c.bf16 %v5095_v51, %v5091_v2  ;;  %v5126_v62 = vld [vmem:[#allocation7 + $0xb70] sm:$0xff]  ;;  %v5133_v17 = vld [vmem:[#allocation7 + $0xba8] sm:$0xff]  ;;  %v5131_v2 = vld [vmem:[#allocation7 + $0xb98] sm:$0xff] }
 0x44e   :  { %v5135_v51 = vld [vmem:[#allocation7 + $0xbb8] sm:$0xff] }
 0x44f   :  { %8833 = vmatpush1.bf16.msra.mxu0 %v8832_v10  ;;  %v8852_v10 = vpack.c.bf16 %v5092_v46, %v5088_v33  ;;  %v5128_v33 = vld [vmem:[#allocation7 + $0xb80] sm:$0xff] }
 0x450   :  { %9025 = vmatpush1.bf16.msra.mxu1 %v9024_v61  ;;  %8835 = vmatprep.subr.bf16.mxu0 %v8834_v13  ;;  %v9044_v61 = vpack.c.bf16 %v5094_v31, %v5090_v14  ;;  %v8854_v13 = vpack.c.bf16 %v5101_v4, %v5097_v36  ;;  %v5132_v46 = vld [vmem:[#allocation7 + $0xba0] sm:$0xff]  ;;  %v5130_v14 = vld [vmem:[#allocation7 + $0xb90] sm:$0xff]  ;;  %v5137_v36 = vld [vmem:[#allocation7 + $0xbc8] sm:$0xff] }
 0x451   :  { %9027 = vmatprep.subr.bf16.mxu1 %v9026_v30  ;;  %v9046_v30 = vpack.c.bf16 %v5103_v63, %v5099_v21  ;;  %v5134_v31 = vld [vmem:[#allocation7 + $0xbb0] sm:$0xff]  ;;  %v5141_v4 = vld [vmem:[#allocation7 + $0xbe8] sm:$0xff]  ;;  %v5139_v21 = vld [vmem:[#allocation7 + $0xbd8] sm:$0xff] }
 0x452   :  { %v5143_v63 = vld [vmem:[#allocation7 + $0xbf8] sm:$0xff] }
 0x453   :  { %8837 = vmatpush1.bf16.msra.mxu0 %v8836_v24  ;;  %v8856_v24 = vpack.c.bf16 %v5100_v54, %v5096_v42  ;;  %v5136_v42 = vld [vmem:[#allocation7 + $0xbc0] sm:$0xff] }
 0x454   :  { %9029 = vmatpush1.bf16.msra.mxu1 %v9028_v43  ;;  %8839 = vmatprep.subr.bf16.mxu0 %v8838_v34  ;;  %v9048_v43 = vpack.c.bf16 %v5102_v18, %v5098_v37  ;;  %v8858_v34 = vpack.c.bf16 %v5109_v22, %v5105_v47  ;;  %v5140_v54 = vld [vmem:[#allocation7 + $0xbe0] sm:$0xff]  ;;  %v5138_v37 = vld [vmem:[#allocation7 + $0xbd0] sm:$0xff]  ;;  %v5612_v47 = vld [vmem:[#allocation7 + $0x8] sm:$0xff] }
 0x455   :  { %9031 = vmatprep.subr.bf16.mxu1 %v9030_v15  ;;  %v9050_v15 = vpack.c.bf16 %v5111_v49, %v5107_v39  ;;  %v5142_v18 = vld [vmem:[#allocation7 + $0xbf0] sm:$0xff]  ;;  %v5616_v22 = vld [vmem:[#allocation7 + $0x28] sm:$0xff]  ;;  %v5614_v39 = vld [vmem:[#allocation7 + $0x18] sm:$0xff] }
 0x456   :  { %v5618_v49 = vld [vmem:[#allocation7 + $0x38] sm:$0xff] }
 0x457   :  { %8841 = vmatpush1.bf16.msra.mxu0 %v8840_v48  ;;  %v8860_v48 = vpack.c.bf16 %v5108_v7, %v5104_v3  ;;  %v9070_v3 = vpack.c.bf16 %v5616_v22, %v5612_v47  ;;  %v5611_v7 = vld [vmem:[#allocation7] sm:$0xff]  ;;  %v5649_v22 = vld [vmem:[#allocation7 + $0x130] sm:$0xff] }
 0x458   :  { %9033 = vmatpush1.bf16.msra.mxu1 %v9032_v9  ;;  %8843 = vmatprep.subr.bf16.mxu0 %v8842_v16  ;;  %v9052_v9 = vpack.c.bf16 %v5110_v35, %v5106_v60  ;;  %v8862_v16 = vpack.c.bf16 %v5117_v0, %v5113_v52  ;;  %v5615_v60 = vld [vmem:[#allocation7 + $0x20] sm:$0xff]  ;;  %v5613_v35 = vld [vmem:[#allocation7 + $0x10] sm:$0xff] }
 0x459   :  { %9035 = vmatprep.subr.bf16.mxu1 %v9034_v12  ;;  %v9054_v12 = vpack.c.bf16 %v5119_v56, %v5115_v29  ;;  %v5617_v52 = vld [vmem:[#allocation7 + $0x30] sm:$0xff]  ;;  %v5620_v29 = vld [vmem:[#allocation7 + $0x48] sm:$0xff] }
 0x45a   :  { %v5624_v56 = vld [vmem:[#allocation7 + $0x68] sm:$0xff] }
 0x45b   :  { %8845 = vmatpush1.bf16.msra.mxu0 %v8844_v1  ;;  %v8864_v1 = vpack.c.bf16 %v5116_v45, %v5112_v20  ;;  %v9264_v20 = vpack.c.bf16 %v5617_v52, %v5613_v35  ;;  %v5619_v45 = vld [vmem:[#allocation7 + $0x40] sm:$0xff]  ;;  %v5653_v52 = vld [vmem:[#allocation7 + $0x150] sm:$0xff] }
 0x45c   :  { %9037 = vmatpush1.bf16.msra.mxu1 %v9036_v58  ;;  %8847 = vmatprep.subr.bf16.mxu0 %v8846_v5  ;;  %v9056_v58 = vpack.c.bf16 %v5118_v59, %v5114_v57  ;;  %v8866_v5 = vpack.c.bf16 %v5125_v44, %v5121_v26  ;;  %v5623_v57 = vld [vmem:[#allocation7 + $0x60] sm:$0xff]  ;;  %v9074_v59 = vpack.c.bf16 %v5624_v56, %v5620_v29  ;;  %v5625_v26 = vld [vmem:[#allocation7 + $0x70] sm:$0xff]  ;;  %v5628_v44 = vld [vmem:[#allocation7 + $0x88] sm:$0xff] }
 0x45d   :  { %9039 = vmatprep.subr.bf16.mxu1 %v9038_v19  ;;  %v9058_v19 = vpack.c.bf16 %v5127_v38, %v5123_v27  ;;  %v5632_v27 = vld [vmem:[#allocation7 + $0xa8] sm:$0xff]  ;;  %v5655_v35 = vld [vmem:[#allocation7 + $0x160] sm:$0xff]  ;;  %v5657_v56 = vld [vmem:[#allocation7 + $0x170] sm:$0xff] }
 0x45f   :  { %8849 = vmatpush1.bf16.msra.mxu0 %v8848_v53  ;;  %v8868_v53 = vpack.c.bf16 %v5124_v23, %v5120_v40  ;;  %v9076_v40 = vpack.c.bf16 %v5623_v57, %v5619_v45  ;;  %v9284_v57 = vpack.c.bf16 %v5657_v56, %v5653_v52  ;;  %v5689_v52 = vld [vmem:[#allocation7 + $0x270] sm:$0xff]  ;;  %v5696_v56 = vld [vmem:[#allocation7 + $0x2a8] sm:$0xff] }
 0x460   :  { %9041 = vmatpush1.bf16.msra.mxu1 %v9040_v6  ;;  %8851 = vmatprep.subr.bf16.mxu0 %v8850_v28  ;;  %v9060_v6 = vpack.c.bf16 %v5126_v62, %v5122_v11  ;;  %v8870_v28 = vpack.c.bf16 %v5133_v17, %v5129_v8  ;;  %v9078_v11 = vpack.c.bf16 %v5632_v27, %v5628_v44  ;;  %v5631_v62 = vld [vmem:[#allocation7 + $0xa0] sm:$0xff]  ;;  %v5629_v8 = vld [vmem:[#allocation7 + $0x90] sm:$0xff] }
 0x461   :  { %9043 = vmatprep.subr.bf16.mxu1 %v9042_v55  ;;  %v9062_v55 = vpack.c.bf16 %v5135_v51, %v5131_v2  ;;  %v5633_v2 = vld [vmem:[#allocation7 + $0xb0] sm:$0xff]  ;;  %v5636_v51 = vld [vmem:[#allocation7 + $0xc8] sm:$0xff] }
 0x462   :  { %v5661_v44 = vld [vmem:[#allocation7 + $0x190] sm:$0xff] }
 0x463   :  { %8853 = vmatpush1.bf16.msra.mxu0 %v8852_v10  ;;  %v8872_v10 = vpack.c.bf16 %v5132_v46, %v5128_v33  ;;  %v9272_v33 = vpack.c.bf16 %v5633_v2, %v5629_v8 }
 0x464   :  { %9045 = vmatpush1.bf16.msra.mxu1 %v9044_v61  ;;  %8855 = vmatprep.subr.bf16.mxu0 %v8854_v13  ;;  %v9064_v61 = vpack.c.bf16 %v5134_v31, %v5130_v14  ;;  %v8874_v13 = vpack.c.bf16 %v5141_v4, %v5137_v36  ;;  %v5635_v14 = vld [vmem:[#allocation7 + $0xc0] sm:$0xff]  ;;  %v5637_v31 = vld [vmem:[#allocation7 + $0xd0] sm:$0xff] }
 0x465   :  { %9047 = vmatprep.subr.bf16.mxu1 %v9046_v30  ;;  %v9066_v30 = vpack.c.bf16 %v5143_v63, %v5139_v21  ;;  %v5641_v4 = vld [vmem:[#allocation7 + $0xf0] sm:$0xff]  ;;  %v5644_v21 = vld [vmem:[#allocation7 + $0x108] sm:$0xff] }
 0x466   :  { %v5648_v63 = vld [vmem:[#allocation7 + $0x128] sm:$0xff] }
 0x467   :  { %8857 = vmatpush1.bf16.msra.mxu0 %v8856_v24  ;;  %v8876_v24 = vpack.c.bf16 %v5140_v54, %v5136_v42  ;;  %v9276_v42 = vpack.c.bf16 %v5641_v4, %v5637_v31  ;;  %v9086_v54 = vpack.c.bf16 %v5648_v63, %v5644_v21  ;;  %v5682_v4 = vld [vmem:[#allocation7 + $0x238] sm:$0xff] }
 0x468   :  { %9049 = vmatpush1.bf16.msra.mxu1 %v9048_v43  ;;  %8859 = vmatprep.subr.bf16.mxu0 %v8858_v34  ;;  %v10886_v43 = vld [vmem:[#allocation2 + $0xc] sm:$0xff]  ;;  %v9068_v34 = vpack.c.bf16 %v5142_v18, %v5138_v37  ;;  %v5643_v37 = vld [vmem:[#allocation7 + $0x100] sm:$0xff] }
 0x469   :  { %9051 = vmatprep.subr.bf16.mxu1 %v9050_v15  ;;  %v9262_v15 = vpack.c.bf16 %v5618_v49, %v5614_v39  ;;  %v10890_v0 = vrot.slane %v10886_v43, %v10781_v32  ;;  %v5645_v18 = vld [vmem:[#allocation7 + $0x110] sm:$0xff]  ;;  %v5652_v39 = vld [vmem:[#allocation7 + $0x148] sm:$0xff] }
 0x46a   :  { %v5656_v49 = vld [vmem:[#allocation7 + $0x168] sm:$0xff] }
 0x46b   :  { %8861 = vmatpush1.bf16.msra.mxu0 %v8860_v48  ;;  %v9072_v48 = vpack.c.bf16 %v5615_v60, %v5611_v7  ;;  %v6012_v38 = vcombine.high %v10890_v0, %v10890_v0  ;;  %v9280_v7 = vpack.c.bf16 %v5649_v22, %v5645_v18  ;;  %v9090_v60 = vpack.c.bf16 %v5656_v49, %v5652_v39  ;;  %v5684_v18 = vld [vmem:[#allocation7 + $0x248] sm:$0xff]  ;;  %v5686_v39 = vld [vmem:[#allocation7 + $0x258] sm:$0xff] }
 0x46c   :  { %9053 = vmatpush1.bf16.msra.mxu1 %v9052_v9  ;;  %8863 = vmatprep.subr.bf16.mxu0 %v8862_v16  ;;  %v5622_v9 = vld [vmem:[#allocation7 + $0x58] sm:$0xff] }
 0x46d   :  { %9055 = vmatprep.subr.bf16.mxu1 %v9054_v12  ;;  %v5626_v16 = vld [vmem:[#allocation7 + $0x78] sm:$0xff]  ;;  %v5621_v12 = vld [vmem:[#allocation7 + $0x50] sm:$0xff] }
 0x46e   :  { %v9268_v23 = vpack.c.bf16 %v5625_v26, %v5621_v12  ;;  %v5663_v26 = vld [vmem:[#allocation7 + $0x1a0] sm:$0xff]  ;;  %v5690_v49 = vld [vmem:[#allocation7 + $0x278] sm:$0xff] }
 0x46f   :  { %8865 = vmatpush1.bf16.msra.mxu0 %v8864_v1  ;;  %v9266_v1 = vpack.c.bf16 %v5626_v16, %v5622_v9  ;;  %v5664_v9 = vld [vmem:[#allocation7 + $0x1a8] sm:$0xff]  ;;  %v5662_v16 = vld [vmem:[#allocation7 + $0x198] sm:$0xff] }
 0x470   :  { %9057 = vmatpush1.bf16.msra.mxu1 %v9056_v58  ;;  %8867 = vmatprep.subr.bf16.mxu0 %v8866_v5  ;;  %v5630_v58 = vld [vmem:[#allocation7 + $0x98] sm:$0xff] }
 0x471   :  { %9059 = vmatprep.subr.bf16.mxu1 %v9058_v19  ;;  %v5634_v5 = vld [vmem:[#allocation7 + $0xb8] sm:$0xff]  ;;  %v5627_v19 = vld [vmem:[#allocation7 + $0x80] sm:$0xff] }
 0x472   :  { %v9270_v17 = vpack.c.bf16 %v5634_v5, %v5630_v58  ;;  %v5668_v58 = vld [vmem:[#allocation7 + $0x1c8] sm:$0xff] }
 0x473   :  { %8869 = vmatpush1.bf16.msra.mxu0 %v8868_v53  ;;  %v5640_v53 = vld [vmem:[#allocation7 + $0xe8] sm:$0xff] }
 0x474   :  { %9061 = vmatpush1.bf16.msra.mxu1 %v9060_v6  ;;  %8871 = vmatprep.subr.bf16.mxu0 %v8870_v28  ;;  %v5638_v6 = vld [vmem:[#allocation7 + $0xd8] sm:$0xff]  ;;  %v9082_v46 = vpack.c.bf16 %v5640_v53, %v5636_v51  ;;  %v5672_v5 = vld [vmem:[#allocation7 + $0x1e8] sm:$0xff] }
 0x475   :  { %9063 = vmatprep.subr.bf16.mxu1 %v9062_v55  ;;  %v5642_v28 = vld [vmem:[#allocation7 + $0xf8] sm:$0xff]  ;;  %v5639_v55 = vld [vmem:[#allocation7 + $0xe0] sm:$0xff]  ;;  %v9098_v53 = vpack.c.bf16 %v5672_v5, %v5668_v58 }
 0x476   :  { %v9274_v36 = vpack.c.bf16 %v5642_v28, %v5638_v6  ;;  %v5667_v6 = vld [vmem:[#allocation7 + $0x1c0] sm:$0xff]  ;;  %v5706_v58 = vld [vmem:[#allocation7 + $0x2f8] sm:$0xff] }
 0x477   :  { %8873 = vmatpush1.bf16.msra.mxu0 %v8872_v10  ;;  %v5646_v10 = vld [vmem:[#allocation7 + $0x118] sm:$0xff]  ;;  %v5671_v28 = vld [vmem:[#allocation7 + $0x1e0] sm:$0xff] }
 0x478   :  { %9065 = vmatpush1.bf16.msra.mxu1 %v9064_v61  ;;  %8875 = vmatprep.subr.bf16.mxu0 %v8874_v13  ;;  %v5650_v61 = vld [vmem:[#allocation7 + $0x138] sm:$0xff]  ;;  %v9084_v13 = vpack.c.bf16 %v5639_v55, %v5635_v14  ;;  %v5676_v14 = vld [vmem:[#allocation7 + $0x208] sm:$0xff]  ;;  %v9100_v21 = vpack.c.bf16 %v5671_v28, %v5667_v6 }
 0x479   :  { %9067 = vmatprep.subr.bf16.mxu1 %v9066_v30  ;;  %v5647_v30 = vld [vmem:[#allocation7 + $0x120] sm:$0xff]  ;;  %v9278_v47 = vpack.c.bf16 %v5650_v61, %v5646_v10  ;;  %v5680_v55 = vld [vmem:[#allocation7 + $0x228] sm:$0xff]  ;;  %v5714_v6 = vld [vmem:[#allocation7 + $0x338] sm:$0xff] }
 0x47a   :  { %v9102_v61 = vpack.c.bf16 %v5680_v55, %v5676_v14  ;;  %v5711_v14 = vld [vmem:[#allocation7 + $0x320] sm:$0xff]  ;;  %v5709_v55 = vld [vmem:[#allocation7 + $0x310] sm:$0xff] }
 0x47b   :  { %8877 = vmatpush1.bf16.msra.mxu0 %v8876_v24  ;;  %v5654_v24 = vld [vmem:[#allocation7 + $0x158] sm:$0xff] }
 0x47c   :  { %9069 = vmatpush1.bf16.msra.mxu1 %v9068_v34  ;;  %9071 = vmatprep.subr.bf16.mxu0 %v9070_v3  ;;  %v5658_v34 = vld [vmem:[#allocation7 + $0x178] sm:$0xff]  ;;  %v9088_v3 = vpack.c.bf16 %v5647_v30, %v5643_v37  ;;  %v5681_v30 = vld [vmem:[#allocation7 + $0x230] sm:$0xff] }
 0x47d   :  { %9263 = vmatprep.subr.bf16.mxu1 %v9262_v15  ;;  %v5651_v15 = vld [vmem:[#allocation7 + $0x140] sm:$0xff]  ;;  %v9282_v29 = vpack.c.bf16 %v5658_v34, %v5654_v24 }
 0x47e   :  { %5384 = vmatmul.mubr.f32.vlgmr.msra.gmra.mrb[28].mxu0 %v10880_v25  ;;  %v9092_v45 = vpack.c.bf16 %v5655_v35, %v5651_v15  ;;  %v5685_v15 = vld [vmem:[#allocation7 + $0x250] sm:$0xff]  ;;  %v9298_v35 = vpack.c.bf16 %v5690_v49, %v5686_v39  ;;  %v5728_v39 = vld [vmem:[#allocation7 + $0x3a8] sm:$0xff]  ;;  %v5726_v49 = vld [vmem:[#allocation7 + $0x398] sm:$0xff] }
 0x47f   :  { %5597 = vmatmul.mubr.f32.vlgmr.msra.gmra.mrb[28].mxu1 %v10880_v25  ;;  %9073 = vmatpush1.bf16.msra.mxu0 %v9072_v48  ;;  %v9080_v25 = vpack.c.bf16 %v5631_v62, %v5627_v19  ;;  %v5660_v48 = vld [vmem:[#allocation7 + $0x188] sm:$0xff]  ;;  %v5674_v19 = vld [vmem:[#allocation7 + $0x1f8] sm:$0xff] }
 0x480   :  { %6092 = vmatprep.mubr.f32.mxu0 %v6012_v38  ;;  %9265 = vmatpush1.bf16.msra.mxu1 %v9264_v20  ;;  %v5666_v20 = vld [vmem:[#allocation7 + $0x1b8] sm:$0xff]  ;;  %v9094_v12 = vpack.c.bf16 %v5664_v9, %v5660_v48 }
 0x481   :  { %6305 = vmatprep.mubr.f32.mxu1 %v6012_v38  ;;  %9075 = vmatprep.subr.bf16.mxu0 %v9074_v59  ;;  %v5659_v59 = vld [vmem:[#allocation7 + $0x180] sm:$0xff]  ;;  %v9286_v38 = vpack.c.bf16 %v5666_v20, %v5662_v16  ;;  %v5694_v48 = vld [vmem:[#allocation7 + $0x298] sm:$0xff]  ;;  %v9300_v20 = vpack.c.bf16 %v5689_v52, %v5685_v15 }
 0x482   :  { %9267 = vmatprep.subr.bf16.mxu1 %v9266_v1  ;;  %v5665_v1 = vld [vmem:[#allocation7 + $0x1b0] sm:$0xff]  ;;  %v5698_v9 = vld [vmem:[#allocation7 + $0x2b8] sm:$0xff]  ;;  %v5727_v15 = vld [vmem:[#allocation7 + $0x3a0] sm:$0xff] }
 0x483   :  { %9077 = vmatpush1.bf16.msra.mxu0 %v9076_v40  ;;  %v9288_v51 = vpack.c.bf16 %v5665_v1, %v5661_v44  ;;  %v5697_v44 = vld [vmem:[#allocation7 + $0x2b0] sm:$0xff]  ;;  %v5702_v1 = vld [vmem:[#allocation7 + $0x2d8] sm:$0xff] }
 0x484   :  { %9269 = vmatpush1.bf16.msra.mxu1 %v9268_v23  ;;  %9079 = vmatprep.subr.bf16.mxu0 %v9078_v11  ;;  %v5670_v11 = vld [vmem:[#allocation7 + $0x1d8] sm:$0xff] }
 0x485   :  { %9271 = vmatprep.subr.bf16.mxu1 %v9270_v17  ;;  %v9096_v17 = vpack.c.bf16 %v5663_v26, %v5659_v59  ;;  %v5693_v59 = vld [vmem:[#allocation7 + $0x290] sm:$0xff]  ;;  %v9302_v26 = vpack.c.bf16 %v5698_v9, %v5694_v48  ;;  %v5736_v48 = vld [vmem:[#allocation7 + $0x3e8] sm:$0xff]  ;;  %v5734_v9 = vld [vmem:[#allocation7 + $0x3d8] sm:$0xff] }
 0x487   :  { %9081 = vmatpush1.bf16.msra.mxu0 %v9080_v25  ;;  %v5669_v25 = vld [vmem:[#allocation7 + $0x1d0] sm:$0xff] }
 0x488   :  { %9273 = vmatpush1.bf16.msra.mxu1 %v9272_v33  ;;  %9083 = vmatprep.subr.bf16.mxu0 %v9082_v46  ;;  %v9290_v33 = vpack.c.bf16 %v5674_v19, %v5670_v11  ;;  %v5673_v46 = vld [vmem:[#allocation7 + $0x1f0] sm:$0xff]  ;;  %v5699_v11 = vld [vmem:[#allocation7 + $0x2c0] sm:$0xff] }
 0x489   :  { %9275 = vmatprep.subr.bf16.mxu1 %v9274_v36  ;;  %v5678_v36 = vld [vmem:[#allocation7 + $0x218] sm:$0xff]  ;;  %v9292_v10 = vpack.c.bf16 %v5673_v46, %v5669_v25  ;;  %v5703_v19 = vld [vmem:[#allocation7 + $0x2e0] sm:$0xff] }
 0x48a   :  { %v9294_v37 = vpack.c.bf16 %v5682_v4, %v5678_v36  ;;  %v9116_v28 = vpack.c.bf16 %v5703_v19, %v5699_v11  ;;  %v5707_v46 = vld [vmem:[#allocation7 + $0x300] sm:$0xff]  ;;  %v5713_v36 = vld [vmem:[#allocation7 + $0x330] sm:$0xff]  ;;  %v5716_v4 = vld [vmem:[#allocation7 + $0x348] sm:$0xff] }
 0x48b   :  { %9085 = vmatpush1.bf16.msra.mxu0 %v9084_v13  ;;  %v5675_v13 = vld [vmem:[#allocation7 + $0x200] sm:$0xff] }
 0x48c   :  { %9277 = vmatpush1.bf16.msra.mxu1 %v9276_v42  ;;  %9087 = vmatprep.subr.bf16.mxu0 %v9086_v54  ;;  %v5679_v42 = vld [vmem:[#allocation7 + $0x220] sm:$0xff]  ;;  %v5677_v54 = vld [vmem:[#allocation7 + $0x210] sm:$0xff] }
 0x48d   :  { %9279 = vmatprep.subr.bf16.mxu1 %v9278_v47  ;;  %v5688_v47 = vld [vmem:[#allocation7 + $0x268] sm:$0xff]  ;;  %v9104_v24 = vpack.c.bf16 %v5679_v42, %v5675_v13  ;;  %v9296_v34 = vpack.c.bf16 %v5681_v30, %v5677_v54  ;;  %v9312_v13 = vpack.c.bf16 %v5713_v36, %v5709_v55  ;;  %v5715_v54 = vld [vmem:[#allocation7 + $0x340] sm:$0xff]  ;;  %v5717_v30 = vld [vmem:[#allocation7 + $0x350] sm:$0xff] }
 0x48e   :  { %v5751_v55 = vld [vmem:[#allocation7 + $0x460] sm:$0xff] }
 0x48f   :  { %9089 = vmatpush1.bf16.msra.mxu0 %v9088_v3  ;;  %v9106_v3 = vpack.c.bf16 %v5688_v47, %v5684_v18  ;;  %v5721_v47 = vld [vmem:[#allocation7 + $0x370] sm:$0xff] }
 0x490   :  { %9281 = vmatpush1.bf16.msra.mxu1 %v9280_v7  ;;  %9091 = vmatprep.subr.bf16.mxu0 %v9090_v60  ;;  %v5683_v7 = vld [vmem:[#allocation7 + $0x240] sm:$0xff] }
 0x491   :  { %v4534_v27 = vpop.f32.mrb[26].mxu0  ;;  %9283 = vmatprep.subr.bf16.mxu1 %v9282_v29  ;;  %v5687_v60 = vld [vmem:[#allocation7 + $0x260] sm:$0xff]  ;;  %v5692_v29 = vld [vmem:[#allocation7 + $0x288] sm:$0xff] }
 0x492   :  { %v4747_v40 = vpop.f32.mrb[26].mxu1  ;;  %v4536_v23 = vpop.f32.mrb[27].mxu0  ;;  %v9108_v16 = vpack.c.bf16 %v5687_v60, %v5683_v7  ;;  %v5723_v60 = vld [vmem:[#allocation7 + $0x380] sm:$0xff] }
 0x493   :  { %v4752_v62 = vmax.f32 %v4534_v27, %v4536_v23  ;;  %v4749_v8 = vpop.f32.mrb[27].mxu1  ;;  %9093 = vmatpush1.bf16.msra.mxu0 %v9092_v45  ;;  %v9110_v45 = vpack.c.bf16 %v5696_v56, %v5692_v29  ;;  %v5700_v27 = vld [vmem:[#allocation7 + $0x2c8] sm:$0xff]  ;;  %v5729_v29 = vld [vmem:[#allocation7 + $0x3b0] sm:$0xff] }
 0x494   :  { %v4753_v2 = vmax.f32 %v4747_v40, %v4749_v8  ;;  %9285 = vmatpush1.bf16.msra.mxu1 %v9284_v57  ;;  %9095 = vmatprep.subr.bf16.mxu0 %v9094_v12  ;;  %v5691_v57 = vld [vmem:[#allocation7 + $0x280] sm:$0xff]  ;;  %v9304_v40 = vpack.c.bf16 %v5697_v44, %v5693_v59  ;;  %v9306_v8 = vpack.c.bf16 %v5706_v58, %v5702_v1  ;;  %v5732_v56 = vld [vmem:[#allocation7 + $0x3c8] sm:$0xff]  ;;  %v5742_v58 = vld [vmem:[#allocation7 + $0x418] sm:$0xff] }
 0x495   :  { %9287 = vmatprep.subr.bf16.mxu1 %v9286_v38  ;;  %v5695_v12 = vld [vmem:[#allocation7 + $0x2a0] sm:$0xff]  ;;  %v5704_v38 = vld [vmem:[#allocation7 + $0x2e8] sm:$0xff] }
 0x496   :  { %v4754_v31 = vmax.f32 %v4752_v62, %v4753_v2  ;;  %v9112_v5 = vpack.c.bf16 %v5695_v12, %v5691_v57  ;;  %v9114_v23 = vpack.c.bf16 %v5704_v38, %v5700_v27  ;;  %v5701_v62 = vld [vmem:[#allocation7 + $0x2d0] sm:$0xff]  ;;  %v5708_v2 = vld [vmem:[#allocation7 + $0x308] sm:$0xff]  ;;  %v9130_v57 = vpack.c.bf16 %v5736_v48, %v5732_v56  ;;  %v5731_v12 = vld [vmem:[#allocation7 + $0x3c0] sm:$0xff] }
 0x497   :  { %9097 = vmatpush1.bf16.msra.mxu0 %v9096_v17  ;;  %v5705_v17 = vld [vmem:[#allocation7 + $0x2f0] sm:$0xff]  ;;  %v5735_v59 = vld [vmem:[#allocation7 + $0x3e0] sm:$0xff]  ;;  %v5740_v38 = vld [vmem:[#allocation7 + $0x408] sm:$0xff] }
 0x498   :  { %v4755_v63 = vadd.f32 %v4754_v31, %v10868_v41  ;;  %9289 = vmatpush1.bf16.msra.mxu1 %v9288_v51  ;;  %9099 = vmatprep.subr.bf16.mxu0 %v9098_v53  ;;  %v5712_v51 = vld [vmem:[#allocation7 + $0x328] sm:$0xff]  ;;  %v5710_v53 = vld [vmem:[#allocation7 + $0x318] sm:$0xff]  ;;  %v9308_v25 = vpack.c.bf16 %v5705_v17, %v5701_v62  ;;  %v5737_v27 = vld [vmem:[#allocation7 + $0x3f0] sm:$0xff] }
 0x499   :  { %9291 = vmatprep.subr.bf16.mxu1 %v9290_v33  ;;  %v9118_v33 = vpack.c.bf16 %v5712_v51, %v5708_v2  ;;  %v9310_v31 = vpack.c.bf16 %v5714_v6, %v5710_v53  ;;  %v5744_v1 = vld [vmem:[#allocation7 + $0x428] sm:$0xff]  ;;  %v5739_v62 = vld [vmem:[#allocation7 + $0x400] sm:$0xff]  ;;  %v5741_v2 = vld [vmem:[#allocation7 + $0x410] sm:$0xff] }
 0x49a   :  { %v4756_v22 = vmax.f32 %v4755_v63, 0.0  ;;  %v5718_v63 = vld [vmem:[#allocation7 + $0x358] sm:$0xff]  ;;  %v9134_v19 = vpack.c.bf16 %v5744_v1, %v5740_v38  ;;  %v5745_v51 = vld [vmem:[#allocation7 + $0x430] sm:$0xff]  ;;  %v5748_v6 = vld [vmem:[#allocation7 + $0x448] sm:$0xff] }
 0x49b   :  { %9101 = vmatpush1.bf16.msra.mxu0 %v9100_v21  ;;  %v5720_v21 = vld [vmem:[#allocation7 + $0x368] sm:$0xff]  ;;  %v5769_v48 = vld [vmem:[#allocation7 + $0x4f0] sm:$0xff] }
 0x49c   :  { %4757 = vst [vmem:[#allocation3 + $0x2] sm:$0x3] %v4756_v22  ;;  %9293 = vmatpush1.bf16.msra.mxu1 %v9292_v10  ;;  %9103 = vmatprep.subr.bf16.mxu0 %v9102_v61  ;;  %v5722_v10 = vld [vmem:[#allocation7 + $0x378] sm:$0xff]  ;;  %v9120_v61 = vpack.c.bf16 %v5711_v14, %v5707_v46  ;;  %v9122_v42 = vpack.c.bf16 %v5720_v21, %v5716_v4  ;;  %v5724_v22 = vld [vmem:[#allocation7 + $0x388] sm:$0xff]  ;;  %v5747_v14 = vld [vmem:[#allocation7 + $0x440] sm:$0xff] }
 0x49d   :  { %9295 = vmatprep.subr.bf16.mxu1 %v9294_v37  ;;  %v5719_v37 = vld [vmem:[#allocation7 + $0x360] sm:$0xff]  ;;  %v9314_v18 = vpack.c.bf16 %v5722_v10, %v5718_v63  ;;  %v9126_v7 = vpack.c.bf16 %v5728_v39, %v5724_v22  ;;  %v9328_v46 = vpack.c.bf16 %v5745_v51, %v5741_v2  ;;  %v5753_v4 = vld [vmem:[#allocation7 + $0x470] sm:$0xff]  ;;  %v5756_v21 = vld [vmem:[#allocation7 + $0x488] sm:$0xff] }
 0x49e   :  { %v5760_v63 = vld [vmem:[#allocation7 + $0x4a8] sm:$0xff]  ;;  %v5757_v22 = vld [vmem:[#allocation7 + $0x490] sm:$0xff] }
 0x49f   :  { %9105 = vmatpush1.bf16.msra.mxu0 %v9104_v24  ;;  %v5730_v24 = vld [vmem:[#allocation7 + $0x3b8] sm:$0xff]  ;;  %v5777_v1 = vld [vmem:[#allocation7 + $0x530] sm:$0xff] }
 0x4a0   :  { %9297 = vmatpush1.bf16.msra.mxu1 %v9296_v34  ;;  %9107 = vmatprep.subr.bf16.mxu0 %v9106_v3  ;;  %v9124_v34 = vpack.c.bf16 %v5719_v37, %v5715_v54  ;;  %v9316_v3 = vpack.c.bf16 %v5721_v47, %v5717_v30  ;;  %v9318_v52 = vpack.c.bf16 %v5730_v24, %v5726_v49  ;;  %v5759_v47 = vld [vmem:[#allocation7 + $0x4a0] sm:$0xff]  ;;  %v5761_v49 = vld [vmem:[#allocation7 + $0x4b0] sm:$0xff]  ;;  %v5764_v24 = vld [vmem:[#allocation7 + $0x4c8] sm:$0xff] }
 0x4a1   :  { %9299 = vmatprep.subr.bf16.mxu1 %v9298_v35  ;;  %v5725_v35 = vld [vmem:[#allocation7 + $0x390] sm:$0xff]  ;;  %v9140_v54 = vpack.c.bf16 %v5751_v55, %v5747_v14  ;;  %v9142_v30 = vpack.c.bf16 %v5760_v63, %v5756_v21 }
 0x4a2   :  { %v5781_v2 = vld [vmem:[#allocation7 + $0x550] sm:$0xff] }
 0x4a3   :  { %9109 = vmatpush1.bf16.msra.mxu0 %v9108_v16  ;;  %v5738_v16 = vld [vmem:[#allocation7 + $0x3f8] sm:$0xff]  ;;  %v5793_v63 = vld [vmem:[#allocation7 + $0x5b0] sm:$0xff] }
 0x4a4   :  { %9301 = vmatpush1.bf16.msra.mxu1 %v9300_v20  ;;  %9111 = vmatprep.subr.bf16.mxu0 %v9110_v45  ;;  %v9128_v20 = vpack.c.bf16 %v5727_v15, %v5723_v60  ;;  %v9320_v45 = vpack.c.bf16 %v5729_v29, %v5725_v35  ;;  %v9322_v44 = vpack.c.bf16 %v5738_v16, %v5734_v9  ;;  %v5763_v35 = vld [vmem:[#allocation7 + $0x4c0] sm:$0xff]  ;;  %v5765_v29 = vld [vmem:[#allocation7 + $0x4d0] sm:$0xff]  ;;  %v5772_v9 = vld [vmem:[#allocation7 + $0x508] sm:$0xff] }
 0x4a5   :  { %9303 = vmatprep.subr.bf16.mxu1 %v9302_v26  ;;  %v5733_v26 = vld [vmem:[#allocation7 + $0x3d0] sm:$0xff]  ;;  %v9336_v60 = vpack.c.bf16 %v5761_v49, %v5757_v22  ;;  %v5776_v16 = vld [vmem:[#allocation7 + $0x528] sm:$0xff] }
 0x4a6   :  { %v9324_v11 = vpack.c.bf16 %v5737_v27, %v5733_v26  ;;  %v5771_v26 = vld [vmem:[#allocation7 + $0x500] sm:$0xff]  ;;  %v5773_v27 = vld [vmem:[#allocation7 + $0x510] sm:$0xff] }
 0x4a7   :  { %9113 = vmatpush1.bf16.msra.mxu0 %v9112_v5  ;;  %v5746_v5 = vld [vmem:[#allocation7 + $0x438] sm:$0xff]  ;;  %v5797_v22 = vld [vmem:[#allocation7 + $0x5d0] sm:$0xff] }
 0x4a8   :  { %9305 = vmatpush1.bf16.msra.mxu1 %v9304_v40  ;;  %9115 = vmatprep.subr.bf16.mxu0 %v9114_v23  ;;  %v5997_v40 = vcombine.high %v10886_v43, %v10886_v43  ;;  %v9132_v23 = vpack.c.bf16 %v5735_v59, %v5731_v12  ;;  %v9326_v17 = vpack.c.bf16 %v5746_v5, %v5742_v58  ;;  %v5750_v43 = vld [vmem:[#allocation7 + $0x458] sm:$0xff]  ;;  %v5780_v58 = vld [vmem:[#allocation7 + $0x548] sm:$0xff]  ;;  %v5801_v49 = vld [vmem:[#allocation7 + $0x5f0] sm:$0xff] }
 0x4a9   :  { %9307 = vmatprep.subr.bf16.mxu1 %v9306_v8  ;;  %v5743_v8 = vld [vmem:[#allocation7 + $0x420] sm:$0xff]  ;;  %v9340_v12 = vpack.c.bf16 %v5769_v48, %v5765_v29  ;;  %v9150_v59 = vpack.c.bf16 %v5776_v16, %v5772_v9  ;;  %v5784_v5 = vld [vmem:[#allocation7 + $0x568] sm:$0xff]  ;;  %v5805_v29 = vld [vmem:[#allocation7 + $0x610] sm:$0xff] }
 0x4aa   :  { %v10900_v53 = vrot.slane %v5997_v40, %v10781_v32  ;;  %v5782_v40 = vld [vmem:[#allocation7 + $0x558] sm:$0xff]  ;;  %v5809_v48 = vld [vmem:[#allocation7 + $0x630] sm:$0xff]  ;;  %v5812_v9 = vld [vmem:[#allocation7 + $0x648] sm:$0xff] }
 0x4ab   :  { %9117 = vmatpush1.bf16.msra.mxu0 %v9116_v28  ;;  %v5752_v28 = vld [vmem:[#allocation7 + $0x468] sm:$0xff] }
 0x4ac   :  { %9309 = vmatpush1.bf16.msra.mxu1 %v9308_v25  ;;  %9119 = vmatprep.subr.bf16.mxu0 %v9118_v33  ;;  %v9136_v25 = vpack.c.bf16 %v5743_v8, %v5739_v62  ;;  %v5754_v33 = vld [vmem:[#allocation7 + $0x478] sm:$0xff]  ;;  %v9138_v36 = vpack.c.bf16 %v5752_v28, %v5748_v6  ;;  %v6013_v10 = vcombine.high %v10900_v53, %v10900_v53  ;;  %v5779_v8 = vld [vmem:[#allocation7 + $0x540] sm:$0xff]  ;;  %v5785_v6 = vld [vmem:[#allocation7 + $0x570] sm:$0xff] }
 0x4ad   :  { %9311 = vmatprep.subr.bf16.mxu1 %v9310_v31  ;;  %v5749_v31 = vld [vmem:[#allocation7 + $0x450] sm:$0xff]  ;;  %v9154_v62 = vpack.c.bf16 %v5784_v5, %v5780_v58  ;;  %v5788_v28 = vld [vmem:[#allocation7 + $0x588] sm:$0xff]  ;;  %v9348_v14 = vpack.c.bf16 %v5785_v6, %v5781_v2 }
 0x4ae   :  { %v9332_v37 = vpack.c.bf16 %v5753_v4, %v5749_v31  ;;  %v5787_v31 = vld [vmem:[#allocation7 + $0x580] sm:$0xff]  ;;  %v5789_v4 = vld [vmem:[#allocation7 + $0x590] sm:$0xff]  ;;  %v5816_v16 = vld [vmem:[#allocation7 + $0x668] sm:$0xff] }
 0x4af   :  { %9121 = vmatpush1.bf16.msra.mxu0 %v9120_v61  ;;  %v9330_v61 = vpack.c.bf16 %v5754_v33, %v5750_v43  ;;  %v5790_v43 = vld [vmem:[#allocation7 + $0x598] sm:$0xff]  ;;  %v5820_v58 = vld [vmem:[#allocation7 + $0x688] sm:$0xff]  ;;  %v5821_v2 = vld [vmem:[#allocation7 + $0x690] sm:$0xff] }
 0x4b0   :  { %9313 = vmatpush1.bf16.msra.mxu1 %v9312_v13  ;;  %9123 = vmatprep.subr.bf16.mxu0 %v9122_v42  ;;  %v5758_v13 = vld [vmem:[#allocation7 + $0x498] sm:$0xff]  ;;  %v5824_v5 = vld [vmem:[#allocation7 + $0x6a8] sm:$0xff]  ;;  %v5825_v6 = vld [vmem:[#allocation7 + $0x6b0] sm:$0xff] }
 0x4b1   :  { %9315 = vmatprep.subr.bf16.mxu1 %v9314_v18  ;;  %v5762_v42 = vld [vmem:[#allocation7 + $0x4b8] sm:$0xff]  ;;  %v5755_v18 = vld [vmem:[#allocation7 + $0x480] sm:$0xff] }
 0x4b2   :  { %v9334_v39 = vpack.c.bf16 %v5762_v42, %v5758_v13  ;;  %v5794_v33 = vld [vmem:[#allocation7 + $0x5b8] sm:$0xff] }
 0x4b3   :  { %9125 = vmatpush1.bf16.msra.mxu0 %v9124_v34  ;;  %v5768_v34 = vld [vmem:[#allocation7 + $0x4e8] sm:$0xff]  ;;  %v9350_v21 = vpack.c.bf16 %v5794_v33, %v5790_v43  ;;  %v5798_v13 = vld [vmem:[#allocation7 + $0x5d8] sm:$0xff] }
 0x4b4   :  { %9317 = vmatpush1.bf16.msra.mxu1 %v9316_v3  ;;  %9127 = vmatprep.subr.bf16.mxu0 %v9126_v7  ;;  %v5766_v3 = vld [vmem:[#allocation7 + $0x4d8] sm:$0xff]  ;;  %v9146_v15 = vpack.c.bf16 %v5768_v34, %v5764_v24  ;;  %v5804_v24 = vld [vmem:[#allocation7 + $0x608] sm:$0xff] }
 0x4b5   :  { %9319 = vmatprep.subr.bf16.mxu1 %v9318_v52  ;;  %v5770_v7 = vld [vmem:[#allocation7 + $0x4f8] sm:$0xff]  ;;  %v5767_v52 = vld [vmem:[#allocation7 + $0x4e0] sm:$0xff]  ;;  %v5808_v34 = vld [vmem:[#allocation7 + $0x628] sm:$0xff] }
 0x4b6   :  { %v9338_v56 = vpack.c.bf16 %v5770_v7, %v5766_v3  ;;  %v5802_v42 = vld [vmem:[#allocation7 + $0x5f8] sm:$0xff] }
 0x4b7   :  { %9129 = vmatpush1.bf16.msra.mxu0 %v9128_v20  ;;  %v5774_v20 = vld [vmem:[#allocation7 + $0x518] sm:$0xff] }
 0x4b8   :  { %9321 = vmatpush1.bf16.msra.mxu1 %v9320_v45  ;;  %9131 = vmatprep.subr.bf16.mxu0 %v9130_v57  ;;  %v5778_v45 = vld [vmem:[#allocation7 + $0x538] sm:$0xff]  ;;  %v9148_v57 = vpack.c.bf16 %v5767_v52, %v5763_v35  ;;  %v5803_v35 = vld [vmem:[#allocation7 + $0x600] sm:$0xff] }
 0x4b9   :  { %9323 = vmatprep.subr.bf16.mxu1 %v9322_v44  ;;  %v5775_v44 = vld [vmem:[#allocation7 + $0x520] sm:$0xff]  ;;  %v9342_v38 = vpack.c.bf16 %v5778_v45, %v5774_v20  ;;  %v5806_v3 = vld [vmem:[#allocation7 + $0x618] sm:$0xff] }
 0x4ba   :  { %v5810_v7 = vld [vmem:[#allocation7 + $0x638] sm:$0xff]  ;;  %v5807_v52 = vld [vmem:[#allocation7 + $0x620] sm:$0xff] }
 0x4bb   :  { %9133 = vmatpush1.bf16.msra.mxu0 %v9132_v23  ;;  %v5786_v23 = vld [vmem:[#allocation7 + $0x578] sm:$0xff] }
 0x4bc   :  { %9325 = vmatpush1.bf16.msra.mxu1 %v9324_v11  ;;  %9135 = vmatprep.subr.bf16.mxu0 %v9134_v19  ;;  %v9152_v11 = vpack.c.bf16 %v5775_v44, %v5771_v26  ;;  %v9344_v19 = vpack.c.bf16 %v5777_v1, %v5773_v27  ;;  %v9346_v51 = vpack.c.bf16 %v5786_v23, %v5782_v40  ;;  %v5814_v20 = vld [vmem:[#allocation7 + $0x658] sm:$0xff]  ;;  %v5811_v26 = vld [vmem:[#allocation7 + $0x640] sm:$0xff]  ;;  %v5813_v27 = vld [vmem:[#allocation7 + $0x650] sm:$0xff] }
 0x4bd   :  { %9327 = vmatprep.subr.bf16.mxu1 %v9326_v17  ;;  %v5783_v17 = vld [vmem:[#allocation7 + $0x560] sm:$0xff]  ;;  %v5818_v45 = vld [vmem:[#allocation7 + $0x678] sm:$0xff]  ;;  %v5817_v1 = vld [vmem:[#allocation7 + $0x670] sm:$0xff] }
 0x4be   :  { %6093 = vmatmul.mubr.f32.vlgmr.msra.gmra.mrb[30].mxu0 %v10890_v0  ;;  %v5815_v44 = vld [vmem:[#allocation7 + $0x660] sm:$0xff]  ;;  %v5822_v40 = vld [vmem:[#allocation7 + $0x698] sm:$0xff] }
 0x4bf   :  { %6306 = vmatmul.mubr.f32.vlgmr.msra.gmra.mrb[30].mxu1 %v10890_v0  ;;  %9137 = vmatpush1.bf16.msra.mxu0 %v9136_v25  ;;  %v9144_v0 = vpack.c.bf16 %v5759_v47, %v5755_v18  ;;  %v5792_v25 = vld [vmem:[#allocation7 + $0x5a8] sm:$0xff]  ;;  %v5795_v18 = vld [vmem:[#allocation7 + $0x5c0] sm:$0xff]  ;;  %v5826_v23 = vld [vmem:[#allocation7 + $0x6b8] sm:$0xff] }
 0x4c0   :  { %6163 = vmatprep.mubr.f32.mxu0 %v6013_v10  ;;  %9329 = vmatpush1.bf16.msra.mxu1 %v9328_v46  ;;  %v9156_v46 = vpack.c.bf16 %v5783_v17, %v5779_v8  ;;  %v9158_v55 = vpack.c.bf16 %v5792_v25, %v5788_v28  ;;  %v5799_v47 = vld [vmem:[#allocation7 + $0x5e0] sm:$0xff]  ;;  %v5828_v28 = vld [vmem:[#allocation7 + $0x6c8] sm:$0xff]  ;;  %v5830_v43 = vld [vmem:[#allocation7 + $0x6d8] sm:$0xff] }
 0x4c1   :  { %6376 = vmatprep.mubr.f32.mxu1 %v6013_v10  ;;  %9139 = vmatprep.subr.bf16.mxu0 %v9138_v36  ;;  %v5791_v36 = vld [vmem:[#allocation7 + $0x5a0] sm:$0xff]  ;;  %v5796_v10 = vld [vmem:[#allocation7 + $0x5c8] sm:$0xff]  ;;  %v5834_v33 = vld [vmem:[#allocation7 + $0x6f8] sm:$0xff] }
 0x4c2   :  { %9331 = vmatprep.subr.bf16.mxu1 %v9330_v61  ;;  %v5800_v61 = vld [vmem:[#allocation7 + $0x5e8] sm:$0xff]  ;;  %v5819_v8 = vld [vmem:[#allocation7 + $0x680] sm:$0xff] }
 0x4c3   :  { %9141 = vmatpush1.bf16.msra.mxu0 %v9140_v54  ;;  %v9160_v54 = vpack.c.bf16 %v5791_v36, %v5787_v31  ;;  %v5823_v17 = vld [vmem:[#allocation7 + $0x6a0] sm:$0xff]  ;;  %v5832_v25 = vld [vmem:[#allocation7 + $0x6e8] sm:$0xff] }
 0x4c4   :  { %9333 = vmatpush1.bf16.msra.mxu1 %v9332_v37  ;;  %9143 = vmatprep.subr.bf16.mxu0 %v9142_v30  ;;  %v9352_v37 = vpack.c.bf16 %v5793_v63, %v5789_v4  ;;  %v9162_v30 = vpack.c.bf16 %v5800_v61, %v5796_v10  ;;  %v5827_v31 = vld [vmem:[#allocation7 + $0x6c0] sm:$0xff]  ;;  %v5829_v4 = vld [vmem:[#allocation7 + $0x6d0] sm:$0xff]  ;;  %v5836_v10 = vld [vmem:[#allocation7 + $0x708] sm:$0xff] }
 0x4c5   :  { %9335 = vmatprep.subr.bf16.mxu1 %v9334_v39  ;;  %v9354_v39 = vpack.c.bf16 %v5802_v42, %v5798_v13  ;;  %v5831_v36 = vld [vmem:[#allocation7 + $0x6e0] sm:$0xff]  ;;  %v5833_v63 = vld [vmem:[#allocation7 + $0x6f0] sm:$0xff]  ;;  %v5840_v61 = vld [vmem:[#allocation7 + $0x728] sm:$0xff] }
 0x4c6   :  { %v5838_v13 = vld [vmem:[#allocation7 + $0x718] sm:$0xff] }
 0x4c7   :  { %9145 = vmatpush1.bf16.msra.mxu0 %v9144_v0  ;;  %v9164_v0 = vpack.c.bf16 %v5799_v47, %v5795_v18  ;;  %v5842_v42 = vld [vmem:[#allocation7 + $0x738] sm:$0xff]  ;;  %v5835_v18 = vld [vmem:[#allocation7 + $0x700] sm:$0xff] }
 0x4c8   :  { %9337 = vmatpush1.bf16.msra.mxu1 %v9336_v60  ;;  %9147 = vmatprep.subr.bf16.mxu0 %v9146_v15  ;;  %v9356_v60 = vpack.c.bf16 %v5801_v49, %v5797_v22  ;;  %v9166_v15 = vpack.c.bf16 %v5808_v34, %v5804_v24  ;;  %v5839_v47 = vld [vmem:[#allocation7 + $0x720] sm:$0xff]  ;;  %v5837_v22 = vld [vmem:[#allocation7 + $0x710] sm:$0xff]  ;;  %v5844_v24 = vld [vmem:[#allocation7 + $0x748] sm:$0xff] }
 0x4c9   :  { %9339 = vmatprep.subr.bf16.mxu1 %v9338_v56  ;;  %v9358_v56 = vpack.c.bf16 %v5810_v7, %v5806_v3  ;;  %v5841_v49 = vld [vmem:[#allocation7 + $0x730] sm:$0xff]  ;;  %v5848_v34 = vld [vmem:[#allocation7 + $0x768] sm:$0xff]  ;;  %v5846_v3 = vld [vmem:[#allocation7 + $0x758] sm:$0xff] }
 0x4ca   :  { %v5850_v7 = vld [vmem:[#allocation7 + $0x778] sm:$0xff] }
 0x4cb   :  { %9149 = vmatpush1.bf16.msra.mxu0 %v9148_v57  ;;  %v9168_v57 = vpack.c.bf16 %v5807_v52, %v5803_v35  ;;  %v5843_v35 = vld [vmem:[#allocation7 + $0x740] sm:$0xff] }
 0x4cc   :  { %9341 = vmatpush1.bf16.msra.mxu1 %v9340_v12  ;;  %9151 = vmatprep.subr.bf16.mxu0 %v9150_v59  ;;  %v9360_v12 = vpack.c.bf16 %v5809_v48, %v5805_v29  ;;  %v9170_v59 = vpack.c.bf16 %v5816_v16, %v5812_v9  ;;  %v5847_v52 = vld [vmem:[#allocation7 + $0x760] sm:$0xff]  ;;  %v5845_v29 = vld [vmem:[#allocation7 + $0x750] sm:$0xff]  ;;  %v5852_v9 = vld [vmem:[#allocation7 + $0x788] sm:$0xff] }
 0x4cd   :  { %9343 = vmatprep.subr.bf16.mxu1 %v9342_v38  ;;  %v9362_v38 = vpack.c.bf16 %v5818_v45, %v5814_v20  ;;  %v5849_v48 = vld [vmem:[#allocation7 + $0x770] sm:$0xff]  ;;  %v5856_v16 = vld [vmem:[#allocation7 + $0x7a8] sm:$0xff]  ;;  %v5854_v20 = vld [vmem:[#allocation7 + $0x798] sm:$0xff] }
 0x4ce   :  { %v5858_v45 = vld [vmem:[#allocation7 + $0x7b8] sm:$0xff] }
 0x4cf   :  { %9153 = vmatpush1.bf16.msra.mxu0 %v9152_v11  ;;  %v9172_v11 = vpack.c.bf16 %v5815_v44, %v5811_v26  ;;  %v5851_v26 = vld [vmem:[#allocation7 + $0x780] sm:$0xff] }
 0x4d0   :  { %9345 = vmatpush1.bf16.msra.mxu1 %v9344_v19  ;;  %9155 = vmatprep.subr.bf16.mxu0 %v9154_v62  ;;  %v9364_v19 = vpack.c.bf16 %v5817_v1, %v5813_v27  ;;  %v9174_v62 = vpack.c.bf16 %v5824_v5, %v5820_v58  ;;  %v5855_v44 = vld [vmem:[#allocation7 + $0x7a0] sm:$0xff]  ;;  %v5853_v27 = vld [vmem:[#allocation7 + $0x790] sm:$0xff]  ;;  %v5860_v58 = vld [vmem:[#allocation7 + $0x7c8] sm:$0xff] }
 0x4d1   :  { %9347 = vmatprep.subr.bf16.mxu1 %v9346_v51  ;;  %v9366_v51 = vpack.c.bf16 %v5826_v23, %v5822_v40  ;;  %v5857_v1 = vld [vmem:[#allocation7 + $0x7b0] sm:$0xff]  ;;  %v5864_v5 = vld [vmem:[#allocation7 + $0x7e8] sm:$0xff]  ;;  %v5862_v40 = vld [vmem:[#allocation7 + $0x7d8] sm:$0xff] }
 0x4d2   :  { %v5866_v23 = vld [vmem:[#allocation7 + $0x7f8] sm:$0xff] }
 0x4d3   :  { %9157 = vmatpush1.bf16.msra.mxu0 %v9156_v46  ;;  %v9176_v46 = vpack.c.bf16 %v5823_v17, %v5819_v8  ;;  %v5859_v8 = vld [vmem:[#allocation7 + $0x7c0] sm:$0xff] }
 0x4d4   :  { %9349 = vmatpush1.bf16.msra.mxu1 %v9348_v14  ;;  %9159 = vmatprep.subr.bf16.mxu0 %v9158_v55  ;;  %v9368_v14 = vpack.c.bf16 %v5825_v6, %v5821_v2  ;;  %v9178_v55 = vpack.c.bf16 %v5832_v25, %v5828_v28  ;;  %v5863_v17 = vld [vmem:[#allocation7 + $0x7e0] sm:$0xff]  ;;  %v5861_v2 = vld [vmem:[#allocation7 + $0x7d0] sm:$0xff]  ;;  %v5868_v28 = vld [vmem:[#allocation7 + $0x808] sm:$0xff] }
 0x4d5   :  { %9351 = vmatprep.subr.bf16.mxu1 %v9350_v21  ;;  %v9370_v21 = vpack.c.bf16 %v5834_v33, %v5830_v43  ;;  %v5865_v6 = vld [vmem:[#allocation7 + $0x7f0] sm:$0xff]  ;;  %v5872_v25 = vld [vmem:[#allocation7 + $0x828] sm:$0xff]  ;;  %v5870_v43 = vld [vmem:[#allocation7 + $0x818] sm:$0xff] }
 0x4d6   :  { %v5874_v33 = vld [vmem:[#allocation7 + $0x838] sm:$0xff] }
 0x4d7   :  { %9161 = vmatpush1.bf16.msra.mxu0 %v9160_v54  ;;  %v9180_v54 = vpack.c.bf16 %v5831_v36, %v5827_v31  ;;  %v5867_v31 = vld [vmem:[#allocation7 + $0x800] sm:$0xff] }
 0x4d8   :  { %9353 = vmatpush1.bf16.msra.mxu1 %v9352_v37  ;;  %9163 = vmatprep.subr.bf16.mxu0 %v9162_v30  ;;  %v9372_v37 = vpack.c.bf16 %v5833_v63, %v5829_v4  ;;  %v9182_v30 = vpack.c.bf16 %v5840_v61, %v5836_v10  ;;  %v5871_v36 = vld [vmem:[#allocation7 + $0x820] sm:$0xff]  ;;  %v9390_v4 = vpack.c.bf16 %v5874_v33, %v5870_v43  ;;  %v5873_v63 = vld [vmem:[#allocation7 + $0x830] sm:$0xff]  ;;  %v5876_v10 = vld [vmem:[#allocation7 + $0x848] sm:$0xff] }
 0x4d9   :  { %9355 = vmatprep.subr.bf16.mxu1 %v9354_v39  ;;  %v9374_v39 = vpack.c.bf16 %v5842_v42, %v5838_v13  ;;  %v5880_v61 = vld [vmem:[#allocation7 + $0x868] sm:$0xff]  ;;  %v9200_v13 = vpack.c.bf16 %v5871_v36, %v5867_v31  ;;  %v10906_v42 = vld.sshfl [vmem:[#allocation2 + $0x14] sm:$0x33 pattern:$0x76325410]  ;;  %v5910_v33 = vld [vmem:[#allocation7 + $0x958] sm:$0xff] }
 0x4da   :  { %v5912_v43 = vld [vmem:[#allocation7 + $0x968] sm:$0xff]  ;;  %v5907_v36 = vld [vmem:[#allocation7 + $0x940] sm:$0xff] }
 0x4db   :  { %9165 = vmatpush1.bf16.msra.mxu0 %v9164_v0  ;;  %v9184_v0 = vpack.c.bf16 %v5839_v47, %v5835_v18  ;;  %v5875_v18 = vld [vmem:[#allocation7 + $0x840] sm:$0xff] }
 0x4dc   :  { %9357 = vmatpush1.bf16.msra.mxu1 %v9356_v60  ;;  %9167 = vmatprep.subr.bf16.mxu0 %v9166_v15  ;;  %v9376_v60 = vpack.c.bf16 %v5841_v49, %v5837_v22  ;;  %v9186_v15 = vpack.c.bf16 %v5848_v34, %v5844_v24  ;;  %v5879_v47 = vld [vmem:[#allocation7 + $0x860] sm:$0xff]  ;;  %v5877_v22 = vld [vmem:[#allocation7 + $0x850] sm:$0xff]  ;;  %v5884_v24 = vld [vmem:[#allocation7 + $0x888] sm:$0xff] }
 0x4dd   :  { %9359 = vmatprep.subr.bf16.mxu1 %v9358_v56  ;;  %v9378_v56 = vpack.c.bf16 %v5850_v7, %v5846_v3  ;;  %v5881_v49 = vld [vmem:[#allocation7 + $0x870] sm:$0xff]  ;;  %v5888_v34 = vld [vmem:[#allocation7 + $0x8a8] sm:$0xff]  ;;  %v6021_v3 = vcombine.high %v10906_v42, %v10906_v42 }
 0x4df   :  { %9169 = vmatpush1.bf16.msra.mxu0 %v9168_v57  ;;  %v9188_v57 = vpack.c.bf16 %v5847_v52, %v5843_v35  ;;  %v9396_v35 = vpack.c.bf16 %v5881_v49, %v5877_v22  ;;  %v9206_v52 = vpack.c.bf16 %v5888_v34, %v5884_v24  ;;  %v5915_v22 = vld [vmem:[#allocation7 + $0x980] sm:$0xff]  ;;  %v5917_v49 = vld [vmem:[#allocation7 + $0x990] sm:$0xff] }
 0x4e0   :  { %9361 = vmatpush1.bf16.msra.mxu1 %v9360_v12  ;;  %9171 = vmatprep.subr.bf16.mxu0 %v9170_v59  ;;  %v9380_v12 = vpack.c.bf16 %v5849_v48, %v5845_v29  ;;  %v9190_v59 = vpack.c.bf16 %v5856_v16, %v5852_v9  ;;  %v5883_v29 = vld [vmem:[#allocation7 + $0x880] sm:$0xff]  ;;  %v5885_v48 = vld [vmem:[#allocation7 + $0x890] sm:$0xff] }
 0x4e1   :  { %9363 = vmatprep.subr.bf16.mxu1 %v9362_v38  ;;  %v9382_v38 = vpack.c.bf16 %v5858_v45, %v5854_v20  ;;  %v5889_v16 = vld [vmem:[#allocation7 + $0x8b0] sm:$0xff]  ;;  %v5892_v20 = vld [vmem:[#allocation7 + $0x8c8] sm:$0xff] }
 0x4e2   :  { %v5896_v45 = vld [vmem:[#allocation7 + $0x8e8] sm:$0xff]  ;;  %v5921_v34 = vld [vmem:[#allocation7 + $0x9b0] sm:$0xff] }
 0x4e3   :  { %9173 = vmatpush1.bf16.msra.mxu0 %v9172_v11  ;;  %v9192_v11 = vpack.c.bf16 %v5855_v44, %v5851_v26  ;;  %v9210_v26 = vpack.c.bf16 %v5896_v45, %v5892_v20  ;;  %v5891_v44 = vld [vmem:[#allocation7 + $0x8c0] sm:$0xff]  ;;  %v5932_v20 = vld [vmem:[#allocation7 + $0xa08] sm:$0xff] }
 0x4e4   :  { %9365 = vmatpush1.bf16.msra.mxu1 %v9364_v19  ;;  %9175 = vmatprep.subr.bf16.mxu0 %v9174_v62  ;;  %v9384_v19 = vpack.c.bf16 %v5857_v1, %v5853_v27  ;;  %v9194_v62 = vpack.c.bf16 %v5864_v5, %v5860_v58  ;;  %v5895_v27 = vld [vmem:[#allocation7 + $0x8e0] sm:$0xff]  ;;  %v5897_v58 = vld [vmem:[#allocation7 + $0x8f0] sm:$0xff]  ;;  %v5900_v5 = vld [vmem:[#allocation7 + $0x908] sm:$0xff] }
 0x4e5   :  { %9367 = vmatprep.subr.bf16.mxu1 %v9366_v51  ;;  %v9386_v51 = vpack.c.bf16 %v5866_v23, %v5862_v40  ;;  %v5904_v40 = vld [vmem:[#allocation7 + $0x928] sm:$0xff]  ;;  %v5902_v23 = vld [vmem:[#allocation7 + $0x918] sm:$0xff] }
 0x4e6   :  { %v5936_v45 = vld [vmem:[#allocation7 + $0xa28] sm:$0xff] }
 0x4e7   :  { %9177 = vmatpush1.bf16.msra.mxu0 %v9176_v46  ;;  %v9196_v46 = vpack.c.bf16 %v5863_v17, %v5859_v8  ;;  %v9214_v8 = vpack.c.bf16 %v5904_v40, %v5900_v5  ;;  %v5899_v17 = vld [vmem:[#allocation7 + $0x900] sm:$0xff]  ;;  %v5940_v5 = vld [vmem:[#allocation7 + $0xa48] sm:$0xff] }
 0x4e8   :  { %9369 = vmatpush1.bf16.msra.mxu1 %v9368_v14  ;;  %9179 = vmatprep.subr.bf16.mxu0 %v9178_v55  ;;  %v9388_v14 = vpack.c.bf16 %v5865_v6, %v5861_v2  ;;  %v9198_v55 = vpack.c.bf16 %v5872_v25, %v5868_v28  ;;  %v5903_v2 = vld [vmem:[#allocation7 + $0x920] sm:$0xff]  ;;  %v5905_v28 = vld [vmem:[#allocation7 + $0x930] sm:$0xff]  ;;  %v5908_v25 = vld [vmem:[#allocation7 + $0x948] sm:$0xff] }
 0x4e9   :  { %9371 = vmatprep.subr.bf16.mxu1 %v9370_v21  ;;  %v5869_v21 = vld [vmem:[#allocation7 + $0x810] sm:$0xff]  ;;  %v9218_v31 = vpack.c.bf16 %v5912_v43, %v5908_v25  ;;  %v5944_v40 = vld [vmem:[#allocation7 + $0xa68] sm:$0xff] }
 0x4ea   :  { %v5948_v25 = vld [vmem:[#allocation7 + $0xa88] sm:$0xff] }
 0x4eb   :  { %9181 = vmatpush1.bf16.msra.mxu0 %v9180_v54  ;;  %v5878_v54 = vld [vmem:[#allocation7 + $0x858] sm:$0xff]  ;;  %v5952_v43 = vld [vmem:[#allocation7 + $0xaa8] sm:$0xff] }
 0x4ec   :  { %9373 = vmatpush1.bf16.msra.mxu1 %v9372_v37  ;;  %9183 = vmatprep.subr.bf16.mxu0 %v9182_v30  ;;  %v5882_v37 = vld [vmem:[#allocation7 + $0x878] sm:$0xff]  ;;  %v9392_v30 = vpack.c.bf16 %v5873_v63, %v5869_v21  ;;  %v5909_v21 = vld [vmem:[#allocation7 + $0x950] sm:$0xff] }
 0x4ed   :  { %9375 = vmatprep.subr.bf16.mxu1 %v9374_v39  ;;  %v9202_v39 = vpack.c.bf16 %v5880_v61, %v5876_v10  ;;  %v9394_v7 = vpack.c.bf16 %v5882_v37, %v5878_v54  ;;  %v5913_v10 = vld [vmem:[#allocation7 + $0x970] sm:$0xff]  ;;  %v5916_v61 = vld [vmem:[#allocation7 + $0x988] sm:$0xff]  ;;  %v5918_v54 = vld [vmem:[#allocation7 + $0x998] sm:$0xff] }
 0x4ee   :  { %v5922_v37 = vld [vmem:[#allocation7 + $0x9b8] sm:$0xff] }
 0x4ef   :  { %9185 = vmatpush1.bf16.msra.mxu0 %v9184_v0  ;;  %v5886_v0 = vld [vmem:[#allocation7 + $0x898] sm:$0xff]  ;;  %v9414_v24 = vpack.c.bf16 %v5922_v37, %v5918_v54 }
 0x4f0   :  { %9377 = vmatpush1.bf16.msra.mxu1 %v9376_v60  ;;  %9187 = vmatprep.subr.bf16.mxu0 %v9186_v15  ;;  %v5890_v60 = vld [vmem:[#allocation7 + $0x8b8] sm:$0xff]  ;;  %v9204_v15 = vpack.c.bf16 %v5879_v47, %v5875_v18  ;;  %v9412_v18 = vpack.c.bf16 %v5913_v10, %v5909_v21  ;;  %v5949_v21 = vld [vmem:[#allocation7 + $0xa90] sm:$0xff] }
 0x4f1   :  { %9379 = vmatprep.subr.bf16.mxu1 %v9378_v56  ;;  %v5887_v56 = vld [vmem:[#allocation7 + $0x8a0] sm:$0xff]  ;;  %v9398_v9 = vpack.c.bf16 %v5890_v60, %v5886_v0  ;;  %v5926_v0 = vld [vmem:[#allocation7 + $0x9d8] sm:$0xff]  ;;  %v5953_v10 = vld [vmem:[#allocation7 + $0xab0] sm:$0xff] }
 0x4f2   :  { %v5930_v60 = vld [vmem:[#allocation7 + $0x9f8] sm:$0xff] }
 0x4f3   :  { %9189 = vmatpush1.bf16.msra.mxu0 %v9188_v57  ;;  %v5894_v57 = vld [vmem:[#allocation7 + $0x8d8] sm:$0xff] }
 0x4f4   :  { %9381 = vmatpush1.bf16.msra.mxu1 %v9380_v12  ;;  %9191 = vmatprep.subr.bf16.mxu0 %v9190_v59  ;;  %v5898_v12 = vld [vmem:[#allocation7 + $0x8f8] sm:$0xff]  ;;  %v9400_v59 = vpack.c.bf16 %v5889_v16, %v5885_v48  ;;  %v5925_v48 = vld [vmem:[#allocation7 + $0x9d0] sm:$0xff] }
 0x4f5   :  { %9383 = vmatprep.subr.bf16.mxu1 %v9382_v38  ;;  %v5893_v38 = vld [vmem:[#allocation7 + $0x8d0] sm:$0xff]  ;;  %v9402_v1 = vpack.c.bf16 %v5898_v12, %v5894_v57  ;;  %v5934_v57 = vld [vmem:[#allocation7 + $0xa18] sm:$0xff] }
 0x4f6   :  { %v5929_v16 = vld [vmem:[#allocation7 + $0x9f0] sm:$0xff]  ;;  %v5938_v12 = vld [vmem:[#allocation7 + $0xa38] sm:$0xff] }
 0x4f7   :  { %9193 = vmatpush1.bf16.msra.mxu0 %v9192_v11  ;;  %v5906_v11 = vld [vmem:[#allocation7 + $0x938] sm:$0xff] }
 0x4f8   :  { %9385 = vmatpush1.bf16.msra.mxu1 %v9384_v19  ;;  %9195 = vmatprep.subr.bf16.mxu0 %v9194_v62  ;;  %v9212_v19 = vpack.c.bf16 %v5895_v27, %v5891_v44  ;;  %v9404_v62 = vpack.c.bf16 %v5897_v58, %v5893_v38  ;;  %v9406_v6 = vpack.c.bf16 %v5906_v11, %v5902_v23  ;;  %v5931_v44 = vld [vmem:[#allocation7 + $0xa00] sm:$0xff]  ;;  %v5933_v38 = vld [vmem:[#allocation7 + $0xa10] sm:$0xff]  ;;  %v5942_v23 = vld [vmem:[#allocation7 + $0xa58] sm:$0xff] }
 0x4f9   :  { %9387 = vmatprep.subr.bf16.mxu1 %v9386_v51  ;;  %v5901_v51 = vld [vmem:[#allocation7 + $0x910] sm:$0xff]  ;;  %v5935_v27 = vld [vmem:[#allocation7 + $0xa20] sm:$0xff]  ;;  %v5946_v11 = vld [vmem:[#allocation7 + $0xa78] sm:$0xff] }
 0x4fa   :  { %v5937_v58 = vld [vmem:[#allocation7 + $0xa30] sm:$0xff]  ;;  %v5958_v54 = vld [vmem:[#allocation7 + $0xad8] sm:$0xff] }
 0x4fb   :  { %9197 = vmatpush1.bf16.msra.mxu0 %v9196_v46  ;;  %v5914_v46 = vld [vmem:[#allocation7 + $0x978] sm:$0xff] }
 0x4fc   :  { %9389 = vmatpush1.bf16.msra.mxu1 %v9388_v14  ;;  %9199 = vmatprep.subr.bf16.mxu0 %v9198_v55  ;;  %v9216_v14 = vpack.c.bf16 %v5903_v2, %v5899_v17  ;;  %v9408_v55 = vpack.c.bf16 %v5905_v28, %v5901_v51  ;;  %v9410_v63 = vpack.c.bf16 %v5914_v46, %v5910_v33  ;;  %v5939_v17 = vld [vmem:[#allocation7 + $0xa40] sm:$0xff]  ;;  %v5941_v51 = vld [vmem:[#allocation7 + $0xa50] sm:$0xff]  ;;  %v5950_v33 = vld [vmem:[#allocation7 + $0xa98] sm:$0xff] }
 0x4fd   :  { %9391 = vmatprep.subr.bf16.mxu1 %v9390_v4  ;;  %v5911_v4 = vld [vmem:[#allocation7 + $0x960] sm:$0xff]  ;;  %v5945_v28 = vld [vmem:[#allocation7 + $0xa70] sm:$0xff]  ;;  %v5954_v46 = vld [vmem:[#allocation7 + $0xab8] sm:$0xff] }
 0x4fe   :  { %6164 = vmatmul.mubr.f32.vlgmr.msra.gmra.mrb[30].mxu0 %v10900_v53  ;;  %v5943_v2 = vld [vmem:[#allocation7 + $0xa60] sm:$0xff]  ;;  %v5962_v37 = vld [vmem:[#allocation7 + $0xaf8] sm:$0xff] }
 0x4ff   :  { %6377 = vmatmul.mubr.f32.vlgmr.msra.gmra.mrb[30].mxu1 %v10900_v53  ;;  %9201 = vmatpush1.bf16.msra.mxu0 %v9200_v13  ;;  %v9208_v53 = vpack.c.bf16 %v5887_v56, %v5883_v29  ;;  %v5920_v13 = vld [vmem:[#allocation7 + $0x9a8] sm:$0xff]  ;;  %v5923_v29 = vld [vmem:[#allocation7 + $0x9c0] sm:$0xff] }
 0x500   :  { %6234 = vmatprep.mubr.f32.mxu0 %v6021_v3  ;;  %9393 = vmatpush1.bf16.msra.mxu1 %v9392_v30  ;;  %v9220_v30 = vpack.c.bf16 %v5911_v4, %v5907_v36  ;;  %v9222_v47 = vpack.c.bf16 %v5920_v13, %v5916_v61  ;;  %v5927_v56 = vld [vmem:[#allocation7 + $0x9e0] sm:$0xff]  ;;  %v5956_v61 = vld [vmem:[#allocation7 + $0xac8] sm:$0xff] }
 0x501   :  { %6447 = vmatprep.mubr.f32.mxu1 %v6021_v3  ;;  %9203 = vmatprep.subr.bf16.mxu0 %v9202_v39  ;;  %v5919_v39 = vld [vmem:[#allocation7 + $0x9a0] sm:$0xff]  ;;  %v5924_v3 = vld [vmem:[#allocation7 + $0x9c8] sm:$0xff] }
 0x502   :  { %9395 = vmatprep.subr.bf16.mxu1 %v9394_v7  ;;  %v5928_v7 = vld [vmem:[#allocation7 + $0x9e8] sm:$0xff]  ;;  %v5947_v36 = vld [vmem:[#allocation7 + $0xa80] sm:$0xff] }
 0x503   :  { %9205 = vmatpush1.bf16.msra.mxu0 %v9204_v15  ;;  %v9224_v15 = vpack.c.bf16 %v5919_v39, %v5915_v22  ;;  %v5951_v4 = vld [vmem:[#allocation7 + $0xaa0] sm:$0xff]  ;;  %v5960_v13 = vld [vmem:[#allocation7 + $0xae8] sm:$0xff] }
 0x504   :  { %9397 = vmatpush1.bf16.msra.mxu1 %v9396_v35  ;;  %9207 = vmatprep.subr.bf16.mxu0 %v9206_v52  ;;  %v9416_v35 = vpack.c.bf16 %v5921_v34, %v5917_v49  ;;  %v9226_v52 = vpack.c.bf16 %v5928_v7, %v5924_v3  ;;  %v5955_v22 = vld [vmem:[#allocation7 + $0xac0] sm:$0xff]  ;;  %v5957_v49 = vld [vmem:[#allocation7 + $0xad0] sm:$0xff]  ;;  %v5964_v3 = vld [vmem:[#allocation7 + $0xb08] sm:$0xff] }
 0x505   :  { %9399 = vmatprep.subr.bf16.mxu1 %v9398_v9  ;;  %v9418_v9 = vpack.c.bf16 %v5930_v60, %v5926_v0  ;;  %v5959_v39 = vld [vmem:[#allocation7 + $0xae0] sm:$0xff]  ;;  %v5961_v34 = vld [vmem:[#allocation7 + $0xaf0] sm:$0xff]  ;;  %v5968_v7 = vld [vmem:[#allocation7 + $0xb28] sm:$0xff] }
 0x506   :  { %v5966_v0 = vld [vmem:[#allocation7 + $0xb18] sm:$0xff] }
 0x507   :  { %9209 = vmatpush1.bf16.msra.mxu0 %v9208_v53  ;;  %v9228_v53 = vpack.c.bf16 %v5927_v56, %v5923_v29  ;;  %v5970_v60 = vld [vmem:[#allocation7 + $0xb38] sm:$0xff]  ;;  %v5963_v29 = vld [vmem:[#allocation7 + $0xb00] sm:$0xff] }
 0x508   :  { %9401 = vmatpush1.bf16.msra.mxu1 %v9400_v59  ;;  %9211 = vmatprep.subr.bf16.mxu0 %v9210_v26  ;;  %v9420_v59 = vpack.c.bf16 %v5929_v16, %v5925_v48  ;;  %v9230_v26 = vpack.c.bf16 %v5936_v45, %v5932_v20  ;;  %v5967_v56 = vld [vmem:[#allocation7 + $0xb20] sm:$0xff]  ;;  %v5965_v48 = vld [vmem:[#allocation7 + $0xb10] sm:$0xff]  ;;  %v5972_v20 = vld [vmem:[#allocation7 + $0xb48] sm:$0xff] }
 0x509   :  { %9403 = vmatprep.subr.bf16.mxu1 %v9402_v1  ;;  %v9422_v1 = vpack.c.bf16 %v5938_v12, %v5934_v57  ;;  %v5969_v16 = vld [vmem:[#allocation7 + $0xb30] sm:$0xff]  ;;  %v5976_v45 = vld [vmem:[#allocation7 + $0xb68] sm:$0xff]  ;;  %v5974_v57 = vld [vmem:[#allocation7 + $0xb58] sm:$0xff] }
 0x50a   :  { %v5978_v12 = vld [vmem:[#allocation7 + $0xb78] sm:$0xff] }
 0x50b   :  { %9213 = vmatpush1.bf16.msra.mxu0 %v9212_v19  ;;  %v9232_v19 = vpack.c.bf16 %v5935_v27, %v5931_v44  ;;  %v5971_v44 = vld [vmem:[#allocation7 + $0xb40] sm:$0xff] }
 0x50c   :  { %9405 = vmatpush1.bf16.msra.mxu1 %v9404_v62  ;;  %9215 = vmatprep.subr.bf16.mxu0 %v9214_v8  ;;  %v9424_v62 = vpack.c.bf16 %v5937_v58, %v5933_v38  ;;  %v9234_v8 = vpack.c.bf16 %v5944_v40, %v5940_v5  ;;  %v5975_v27 = vld [vmem:[#allocation7 + $0xb60] sm:$0xff]  ;;  %v5973_v38 = vld [vmem:[#allocation7 + $0xb50] sm:$0xff]  ;;  %v5980_v5 = vld [vmem:[#allocation7 + $0xb88] sm:$0xff] }
 0x50d   :  { %9407 = vmatprep.subr.bf16.mxu1 %v9406_v6  ;;  %v9426_v6 = vpack.c.bf16 %v5946_v11, %v5942_v23  ;;  %v5977_v58 = vld [vmem:[#allocation7 + $0xb70] sm:$0xff]  ;;  %v5984_v40 = vld [vmem:[#allocation7 + $0xba8] sm:$0xff]  ;;  %v5982_v23 = vld [vmem:[#allocation7 + $0xb98] sm:$0xff] }
 0x50e   :  { %v5986_v11 = vld [vmem:[#allocation7 + $0xbb8] sm:$0xff] }
 0x50f   :  { %9217 = vmatpush1.bf16.msra.mxu0 %v9216_v14  ;;  %v9236_v14 = vpack.c.bf16 %v5943_v2, %v5939_v17  ;;  %v5979_v17 = vld [vmem:[#allocation7 + $0xb80] sm:$0xff] }
 0x510   :  { %9409 = vmatpush1.bf16.msra.mxu1 %v9408_v55  ;;  %9219 = vmatprep.subr.bf16.mxu0 %v9218_v31  ;;  %v9428_v55 = vpack.c.bf16 %v5945_v28, %v5941_v51  ;;  %v9238_v31 = vpack.c.bf16 %v5952_v43, %v5948_v25  ;;  %v5983_v2 = vld [vmem:[#allocation7 + $0xba0] sm:$0xff]  ;;  %v5981_v51 = vld [vmem:[#allocation7 + $0xb90] sm:$0xff]  ;;  %v5988_v25 = vld [vmem:[#allocation7 + $0xbc8] sm:$0xff] }
 0x511   :  { %9411 = vmatprep.subr.bf16.mxu1 %v9410_v63  ;;  %v9430_v63 = vpack.c.bf16 %v5954_v46, %v5950_v33  ;;  %v5985_v28 = vld [vmem:[#allocation7 + $0xbb0] sm:$0xff]  ;;  %v5992_v43 = vld [vmem:[#allocation7 + $0xbe8] sm:$0xff]  ;;  %v5990_v33 = vld [vmem:[#allocation7 + $0xbd8] sm:$0xff] }
 0x512   :  { %v5994_v46 = vld [vmem:[#allocation7 + $0xbf8] sm:$0xff] }
 0x513   :  { %9221 = vmatpush1.bf16.msra.mxu0 %v9220_v30  ;;  %v9240_v30 = vpack.c.bf16 %v5951_v4, %v5947_v36  ;;  %v5987_v36 = vld [vmem:[#allocation7 + $0xbc0] sm:$0xff] }
 0x514   :  { %9413 = vmatpush1.bf16.msra.mxu1 %v9412_v18  ;;  %9223 = vmatprep.subr.bf16.mxu0 %v9222_v47  ;;  %v9432_v18 = vpack.c.bf16 %v5953_v10, %v5949_v21  ;;  %v9242_v47 = vpack.c.bf16 %v5960_v13, %v5956_v61  ;;  %v5991_v4 = vld [vmem:[#allocation7 + $0xbe0] sm:$0xff]  ;;  %v5989_v21 = vld [vmem:[#allocation7 + $0xbd0] sm:$0xff]  ;;  %v6478_v13 = vld [vmem:[%s11154_s3 + $0x88] sm:$0xff] }
 0x515   :  { %9415 = vmatprep.subr.bf16.mxu1 %v9414_v24  ;;  %v9434_v24 = vpack.c.bf16 %v5962_v37, %v5958_v54  ;;  %v5993_v10 = vld [vmem:[#allocation7 + $0xbf0] sm:$0xff]  ;;  %v6477_v61 = vld [vmem:[%s11154_s3 + $0x80] sm:$0xff]  ;;  %v6510_v37 = vld [vmem:[%s11154_s3 + $0x188] sm:$0xff] }
 0x516   :  { %v6509_v54 = vld [vmem:[%s11154_s3 + $0x180] sm:$0xff] }
 0x517   :  { %9225 = vmatpush1.bf16.msra.mxu0 %v9224_v15  ;;  %v9244_v15 = vpack.c.bf16 %v5959_v39, %v5955_v22  ;;  %v6461_v22 = vld [vmem:[%s11154_s3] sm:$0xff]  ;;  %v6462_v39 = vld [vmem:[%s11154_s3 + $0x8] sm:$0xff] }
 0x518   :  { %9417 = vmatpush1.bf16.msra.mxu1 %v9416_v35  ;;  %9227 = vmatprep.subr.bf16.mxu0 %v9226_v52  ;;  %v9436_v35 = vpack.c.bf16 %v5961_v34, %v5957_v49  ;;  %v9246_v52 = vpack.c.bf16 %v5968_v7, %v5964_v3  ;;  %v6493_v49 = vld [vmem:[%s11154_s3 + $0x100] sm:$0xff]  ;;  %v6494_v34 = vld [vmem:[%s11154_s3 + $0x108] sm:$0xff]  ;;  %v6479_v3 = vld [vmem:[%s11154_s3 + $0x90] sm:$0xff] }
 0x519   :  { %9419 = vmatprep.subr.bf16.mxu1 %v9418_v9  ;;  %v9438_v9 = vpack.c.bf16 %v5970_v60, %v5966_v0  ;;  %v6480_v7 = vld [vmem:[%s11154_s3 + $0x98] sm:$0xff]  ;;  %v6511_v0 = vld [vmem:[%s11154_s3 + $0x190] sm:$0xff] }
 0x51a   :  { %v6512_v60 = vld [vmem:[%s11154_s3 + $0x198] sm:$0xff] }
 0x51b   :  { %9229 = vmatpush1.bf16.msra.mxu0 %v9228_v53  ;;  %v9248_v53 = vpack.c.bf16 %v5967_v56, %v5963_v29  ;;  %v6463_v29 = vld [vmem:[%s11154_s3 + $0x10] sm:$0xff]  ;;  %v6464_v56 = vld [vmem:[%s11154_s3 + $0x18] sm:$0xff] }
 0x51c   :  { %9421 = vmatpush1.bf16.msra.mxu1 %v9420_v59  ;;  %9231 = vmatprep.subr.bf16.mxu0 %v9230_v26  ;;  %v9440_v59 = vpack.c.bf16 %v5969_v16, %v5965_v48  ;;  %v9250_v26 = vpack.c.bf16 %v5976_v45, %v5972_v20  ;;  %v6495_v48 = vld [vmem:[%s11154_s3 + $0x110] sm:$0xff]  ;;  %v6496_v16 = vld [vmem:[%s11154_s3 + $0x118] sm:$0xff]  ;;  %v6481_v20 = vld [vmem:[%s11154_s3 + $0xa0] sm:$0xff] }
 0x51d   :  { %9423 = vmatprep.subr.bf16.mxu1 %v9422_v1  ;;  %v9442_v1 = vpack.c.bf16 %v5978_v12, %v5974_v57  ;;  %v6482_v45 = vld [vmem:[%s11154_s3 + $0xa8] sm:$0xff]  ;;  %v9460_v57 = vpack.c.bf16 %v6464_v56, %v6463_v29  ;;  %v9492_v12 = vpack.c.bf16 %v6496_v16, %v6495_v48  ;;  %v6504_v29 = vld [vmem:[%s11154_s3 + $0x158] sm:$0xff] }
 0x51e   :  { %v6490_v16 = vld [vmem:[%s11154_s3 + $0xe8] sm:$0xff] }
 0x51f   :  { %9233 = vmatpush1.bf16.msra.mxu0 %v9232_v19  ;;  %v9252_v19 = vpack.c.bf16 %v5975_v27, %v5971_v44 }
 0x520   :  { %9425 = vmatpush1.bf16.msra.mxu1 %v9424_v62  ;;  %9235 = vmatprep.subr.bf16.mxu0 %v9234_v8  ;;  %v9444_v62 = vpack.c.bf16 %v5977_v58, %v5973_v38  ;;  %v9254_v8 = vpack.c.bf16 %v5984_v40, %v5980_v5  ;;  %v6465_v40 = vld [vmem:[%s11154_s3 + $0x20] sm:$0xff] }
 0x521   :  { %9427 = vmatprep.subr.bf16.mxu1 %v9426_v6  ;;  %v9446_v6 = vpack.c.bf16 %v5986_v11, %v5982_v23  ;;  %v6466_v23 = vld [vmem:[%s11154_s3 + $0x28] sm:$0xff] }
 0x522   :  { %v9464_v11 = vpack.c.bf16 %v6466_v23, %v6465_v40  ;;  %v6523_v23 = vld [vmem:[%s11154_s3 + $0x1f0] sm:$0xff] }
 0x523   :  { %9237 = vmatpush1.bf16.msra.mxu0 %v9236_v14  ;;  %v9256_v14 = vpack.c.bf16 %v5983_v2, %v5979_v17  ;;  %v6497_v17 = vld [vmem:[%s11154_s3 + $0x120] sm:$0xff]  ;;  %v6498_v2 = vld [vmem:[%s11154_s3 + $0x128] sm:$0xff] }
 0x524   :  { %9429 = vmatpush1.bf16.msra.mxu1 %v9428_v55  ;;  %9239 = vmatprep.subr.bf16.mxu0 %v9238_v31  ;;  %v9448_v55 = vpack.c.bf16 %v5985_v28, %v5981_v51  ;;  %v9258_v31 = vpack.c.bf16 %v5992_v43, %v5988_v25  ;;  %v9496_v51 = vpack.c.bf16 %v6498_v2, %v6497_v17  ;;  %v6484_v28 = vld [vmem:[%s11154_s3 + $0xb8] sm:$0xff]  ;;  %v6467_v43 = vld [vmem:[%s11154_s3 + $0x30] sm:$0xff] }
 0x525   :  { %9431 = vmatprep.subr.bf16.mxu1 %v9430_v63  ;;  %v9450_v63 = vpack.c.bf16 %v5994_v46, %v5990_v33  ;;  %v6468_v33 = vld [vmem:[%s11154_s3 + $0x38] sm:$0xff] }
 0x526   :  { %v9468_v46 = vpack.c.bf16 %v6468_v33, %v6467_v43  ;;  %v6508_v17 = vld [vmem:[%s11154_s3 + $0x178] sm:$0xff] }
 0x527   :  { %9241 = vmatpush1.bf16.msra.mxu0 %v9240_v30  ;;  %v9260_v30 = vpack.c.bf16 %v5991_v4, %v5987_v36  ;;  %v6499_v36 = vld [vmem:[%s11154_s3 + $0x130] sm:$0xff]  ;;  %v6500_v4 = vld [vmem:[%s11154_s3 + $0x138] sm:$0xff] }
 0x528   :  { %9433 = vmatpush1.bf16.msra.mxu1 %v9432_v18  ;;  %9243 = vmatprep.subr.bf16.mxu0 %v9242_v47  ;;  %v9452_v18 = vpack.c.bf16 %v5993_v10, %v5989_v21  ;;  %v9454_v47 = vpack.c.bf16 %v6478_v13, %v6477_v61  ;;  %v9500_v21 = vpack.c.bf16 %v6500_v4, %v6499_v36  ;;  %v6486_v10 = vld [vmem:[%s11154_s3 + $0xc8] sm:$0xff]  ;;  %v6469_v13 = vld [vmem:[%s11154_s3 + $0x40] sm:$0xff] }
 0x529   :  { %9435 = vmatprep.subr.bf16.mxu1 %v9434_v24  ;;  %v9486_v24 = vpack.c.bf16 %v6510_v37, %v6509_v54  ;;  %v6470_v54 = vld [vmem:[%s11154_s3 + $0x48] sm:$0xff]  ;;  %v6692_v4 = vld [vmem:[%s11155_s4] sm:$0xff] }
 0x52a   :  { %v9472_v37 = vpack.c.bf16 %v6470_v54, %v6469_v13 }
 0x52b   :  { %9245 = vmatpush1.bf16.msra.mxu0 %v9244_v15  ;;  %v9456_v15 = vpack.c.bf16 %v6462_v39, %v6461_v22  ;;  %v6501_v22 = vld [vmem:[%s11154_s3 + $0x140] sm:$0xff]  ;;  %v6502_v39 = vld [vmem:[%s11154_s3 + $0x148] sm:$0xff] }
 0x52c   :  { %9437 = vmatpush1.bf16.msra.mxu1 %v9436_v35  ;;  %9247 = vmatprep.subr.bf16.mxu0 %v9246_v52  ;;  %v9488_v35 = vpack.c.bf16 %v6494_v34, %v6493_v49  ;;  %v9458_v52 = vpack.c.bf16 %v6480_v7, %v6479_v3  ;;  %v9504_v49 = vpack.c.bf16 %v6502_v39, %v6501_v22  ;;  %v6488_v34 = vld [vmem:[%s11154_s3 + $0xd8] sm:$0xff]  ;;  %v6471_v7 = vld [vmem:[%s11154_s3 + $0x50] sm:$0xff] }
 0x52d   :  { %9439 = vmatprep.subr.bf16.mxu1 %v9438_v9  ;;  %v9490_v9 = vpack.c.bf16 %v6512_v60, %v6511_v0  ;;  %v6472_v0 = vld [vmem:[%s11154_s3 + $0x58] sm:$0xff]  ;;  %v6519_v60 = vld [vmem:[%s11154_s3 + $0x1d0] sm:$0xff] }
 0x52e   :  { %v6698_v39 = vld [vmem:[%s11155_s4 + $0x30] sm:$0xff] }
 0x52f   :  { %9249 = vmatpush1.bf16.msra.mxu0 %v9248_v53  ;;  %v9462_v53 = vpack.c.bf16 %v6482_v45, %v6481_v20  ;;  %v6473_v20 = vld [vmem:[%s11154_s3 + $0x60] sm:$0xff] }
 0x530   :  { %9441 = vmatpush1.bf16.msra.mxu1 %v9440_v59  ;;  %9251 = vmatprep.subr.bf16.mxu0 %v9250_v26 }
 0x531   :  { %9443 = vmatprep.subr.bf16.mxu1 %v9442_v1 }
 0x533   :  { %9253 = vmatpush1.bf16.msra.mxu0 %v9252_v19  ;;  %v6513_v19 = vld [vmem:[%s11154_s3 + $0x1a0] sm:$0xff] }
 0x534   :  { %9445 = vmatpush1.bf16.msra.mxu1 %v9444_v62  ;;  %9255 = vmatprep.subr.bf16.mxu0 %v9254_v8  ;;  %v6514_v62 = vld [vmem:[%s11154_s3 + $0x1a8] sm:$0xff] }
 0x535   :  { %9447 = vmatprep.subr.bf16.mxu1 %v9446_v6  ;;  %v9494_v8 = vpack.c.bf16 %v6514_v62, %v6513_v19  ;;  %v6483_v6 = vld [vmem:[%s11154_s3 + $0xb0] sm:$0xff] }
 0x536   :  { %v9466_v25 = vpack.c.bf16 %v6484_v28, %v6483_v6 }
 0x537   :  { %9257 = vmatpush1.bf16.msra.mxu0 %v9256_v14  ;;  %v6515_v14 = vld [vmem:[%s11154_s3 + $0x1b0] sm:$0xff] }
 0x538   :  { %9449 = vmatpush1.bf16.msra.mxu1 %v9448_v55  ;;  %9259 = vmatprep.subr.bf16.mxu0 %v9258_v31  ;;  %v6516_v55 = vld [vmem:[%s11154_s3 + $0x1b8] sm:$0xff] }
 0x539   :  { %9451 = vmatprep.subr.bf16.mxu1 %v9450_v63  ;;  %v9498_v31 = vpack.c.bf16 %v6516_v55, %v6515_v14  ;;  %v6485_v63 = vld [vmem:[%s11154_s3 + $0xc0] sm:$0xff] }
 0x53a   :  { %v9470_v61 = vpack.c.bf16 %v6486_v10, %v6485_v63 }
 0x53b   :  { %9261 = vmatpush1.bf16.msra.mxu0 %v9260_v30  ;;  %v6517_v30 = vld [vmem:[%s11154_s3 + $0x1c0] sm:$0xff] }
 0x53c   :  { %9453 = vmatpush1.bf16.msra.mxu1 %v9452_v18  ;;  %9455 = vmatprep.subr.bf16.mxu0 %v9454_v47  ;;  %v6518_v18 = vld [vmem:[%s11154_s3 + $0x1c8] sm:$0xff] }
 0x53d   :  { %9487 = vmatprep.subr.bf16.mxu1 %v9486_v24  ;;  %v9502_v47 = vpack.c.bf16 %v6518_v18, %v6517_v30  ;;  %v6487_v24 = vld [vmem:[%s11154_s3 + $0xd0] sm:$0xff] }
 0x53e   :  { %6235 = vmatmul.mubr.f32.vlgmr.msra.gmra.mrb[30].mxu0 %v10906_v42  ;;  %v9474_v3 = vpack.c.bf16 %v6488_v34, %v6487_v24  ;;  %v9685_v34 = vmov 0.0  }
 0x53f   :  { %6448 = vmatmul.mubr.f32.vlgmr.msra.gmra.mrb[30].mxu1 %v10906_v42  ;;  %9457 = vmatpush3.bf16.msra.mxu0 %v9456_v15  ;;  %v9476_v15 = vpack.c.bf16 %v6472_v0, %v6471_v7  ;;  %v9582_v0 = vld [vmem:[#allocation9] sm:$0x3f] }
 0x540   :  { %9489 = vmatpush3.bf16.msra.mxu1 %v9488_v35  ;;  %9459 = vmatprep.subr.bf16.mxu0 %v9458_v52  ;;  %v6520_v35 = vld [vmem:[%s11154_s3 + $0x1d8] sm:$0xff]  ;;  %v6503_v52 = vld [vmem:[%s11154_s3 + $0x150] sm:$0xff] }
 0x541   :  { %9491 = vmatprep.subr.bf16.mxu1 %v9490_v9  ;;  %v9506_v56 = vpack.c.bf16 %v6520_v35, %v6519_v60  ;;  %v9508_v48 = vpack.c.bf16 %v6504_v29, %v6503_v52  ;;  %v6489_v9 = vld [vmem:[%s11154_s3 + $0xe0] sm:$0xff] }
 0x542   :  { %v9478_v45 = vpack.c.bf16 %v6490_v16, %v6489_v9 }
 0x543   :  { %9461 = vmatpush3.bf16.msra.mxu0 %v9460_v57  ;;  %v6474_v57 = vld [vmem:[%s11154_s3 + $0x68] sm:$0xff] }
 0x544   :  { %9493 = vmatpush3.bf16.msra.mxu1 %v9492_v12  ;;  %9463 = vmatprep.subr.bf16.mxu0 %v9462_v53  ;;  %v6521_v12 = vld [vmem:[%s11154_s3 + $0x1e0] sm:$0xff]  ;;  %v6522_v53 = vld [vmem:[%s11154_s3 + $0x1e8] sm:$0xff] }
 0x545   :  { %9495 = vmatprep.subr.bf16.mxu1 %v9494_v8  ;;  %v6507_v8 = vld [vmem:[%s11154_s3 + $0x170] sm:$0xff] }
 0x546   :  { %v9516_v2 = vpack.c.bf16 %v6508_v17, %v6507_v8 }
 0x547   :  { %9465 = vmatpush3.bf16.msra.mxu0 %v9464_v11  ;;  %v6524_v11 = vld [vmem:[%s11154_s3 + $0x1f8] sm:$0xff] }
 0x548   :  { %9497 = vmatpush3.bf16.msra.mxu1 %v9496_v51  ;;  %9467 = vmatprep.subr.bf16.mxu0 %v9466_v25  ;;  %v9514_v62 = vpack.c.bf16 %v6524_v11, %v6523_v23  ;;  %v9683_v51 = vmov 0.0|0.0  }
 0x549   :  { %9499 = vmatprep.subr.bf16.mxu1 %v9498_v31 }
 0x54b   :  { %9469 = vmatpush3.bf16.msra.mxu0 %v9468_v46 }
 0x54c   :  { %9501 = vmatpush3.bf16.msra.mxu1 %v9500_v21  ;;  %9471 = vmatprep.subr.bf16.mxu0 %v9470_v61  ;;  %v6693_v21 = vld [vmem:[%s11155_s4 + $0x8] sm:$0xff] }
 0x54d   :  { %9503 = vmatprep.subr.bf16.mxu1 %v9502_v47  ;;  %v9519_v54 = vpack.c.bf16 %v6693_v21, %v6692_v4  ;;  %v6697_v47 = vld [vmem:[%s11155_s4 + $0x28] sm:$0xff] }
 0x54f   :  { %9473 = vmatpush3.bf16.msra.mxu0 %v9472_v37  ;;  %v6695_v37 = vld [vmem:[%s11155_s4 + $0x18] sm:$0xff] }
 0x550   :  { %9505 = vmatpush3.bf16.msra.mxu1 %v9504_v49  ;;  %9475 = vmatprep.subr.bf16.mxu0 %v9474_v3  ;;  %v6699_v49 = vld [vmem:[%s11155_s4 + $0x38] sm:$0xff]  ;;  %v6527_v3 = vsub.s32 4, %v10242_v50 }
 0x551   :  { %v5385_v59 = vpop.f32.mrb[28].mxu0  ;;  %9507 = vmatprep.subr.bf16.mxu1 %v9506_v56  ;;  %v9528_v24 = vpack.c.bf16 %v6699_v49, %v6698_v39 }
 0x552   :  { %v5598_v26 = vpop.f32.mrb[28].mxu1  ;;  %v5387_v44 = vpop.f32.mrb[29].mxu0  ;;  %v6528_v60 = vrot.slane %v9582_v0, %v6527_v3 }
 0x553   :  { %v5603_v27 = vmax.f32 %v5385_v59, %v5387_v44  ;;  %v5600_v38 = vpop.f32.mrb[29].mxu1  ;;  %9477 = vmatpush3.bf16.msra.mxu0 %v9476_v15  ;;  %v9480_v59 = vpack.c.bf16 %v6474_v57, %v6473_v20  ;;  %v6505_v44 = vld [vmem:[%s11154_s3 + $0x160] sm:$0xff]  ;;  %v6702_v20 = vsub.s32 5, %v10242_v50 }
 0x554   :  { %v5604_v1 = vmax.f32 %v5598_v26, %v5600_v38  ;;  %v9510_v26 = vpack.c.bf16 %v6522_v53, %v6521_v12  ;;  %v6491_v38 = vld [vmem:[%s11154_s3 + $0xf0] sm:$0xff]  ;;  %9509 = vmatpush3.bf16.msra.mxu1 %v9508_v48  ;;  %9479 = vmatprep.subr.bf16.mxu0 %v9478_v45 }
 0x555   :  { %v6703_v45 = vrot.slane %v9582_v0, %v6702_v20 }
 0x556   :  { %v5605_v58 = vmax.f32 %v5603_v27, %v5604_v1  ;;  %v6506_v27 = vld [vmem:[%s11154_s3 + $0x168] sm:$0xff]  ;;  %9511 = vmatprep.subr.bf16.mxu1 %v9510_v26 }
 0x557   :  { %v9512_v1 = vpack.c.bf16 %v6506_v27, %v6505_v44  ;;  %9481 = vmatpush3.bf16.msra.mxu0 %v9480_v59 }
 0x558   :  { %v5606_v5 = vadd.f32 %v5605_v58, %v10868_v41  ;;  %v6492_v58 = vld [vmem:[%s11154_s3 + $0xf8] sm:$0xff] }
 0x559   :  { %v9482_v40 = vpack.c.bf16 %v6492_v58, %v6491_v38  ;;  %9513 = vmatpush3.bf16.msra.mxu1 %v9512_v1 }
 0x55a   :  { %v5607_v42 = vmax.f32 %v5606_v5, 0.0  ;;  %v6475_v5 = vld [vmem:[%s11154_s3 + $0x70] sm:$0xff]  ;;  %9515 = vmatprep.subr.bf16.mxu1 %v9514_v62 }
 0x55b   :  { %9483 = vmatprep.subr.bf16.mxu0 %v9482_v40 }
 0x55c   :  { %5608 = vst [vmem:[#allocation3 + $0x4] sm:$0x3] %v5607_v42  ;;  %v6476_v42 = vld [vmem:[%s11154_s3 + $0x78] sm:$0xff] }
 0x55d   :  { %v9484_v19 = vpack.c.bf16 %v6476_v42, %v6475_v5  ;;  %9517 = vmatpush3.bf16.msra.mxu1 %v9516_v2 }
 0x55f   :  { %9485 = vmatpush3.bf16.msra.mxu0 %v9484_v19 }
 0x560   :  { %9518 = vmatprep.subr.bf16.mxu0 %v9683_v51 }
 0x611   :  { %v6236_v6 = vpop.f32.mrb[30].mxu0 }
 0x612   :  { %v6449_v28 = vpop.f32.mrb[30].mxu1  ;;  %v6238_v25 = vpop.f32.mrb[31].mxu0 }
 0x613   :  { %v6454_v43 = vmax.f32 %v6236_v6, %v6238_v25  ;;  %v6451_v33 = vpop.f32.mrb[31].mxu1 }
 0x614   :  { %v6455_v46 = vmax.f32 %v6449_v28, %v6451_v33 }
 0x616   :  { %v6456_v14 = vmax.f32 %v6454_v43, %v6455_v46 }
 0x618   :  { %v6457_v55 = vadd.f32 %v6456_v14, %v10868_v41  ;;  %v6694_v41 = vld [vmem:[%s11155_s4 + $0x10] sm:$0xff] }
 0x619   :  { %v9522_v18 = vpack.c.bf16 %v6695_v37, %v6694_v41 }
 0x61a   :  { %v6458_v31 = vmax.f32 %v6457_v55, 0.0 }
 0x61c   :  { %6459 = vst [vmem:[#allocation3 + $0x6] sm:$0x3] %v6458_v31 }
 0x623   :  { %v6460_v36 = vld [vmem:[#allocation3] sm:$0xff] }
 0x624   :  { %v6537_v63 = vrot.slane %v6460_v36, %v10781_v32  ;;  %v6530_v10 = vcombine.high %v6460_v36, %v6460_v36 }
 0x626   :  { %v6545_v61 = vcombine.high %v6537_v63, %v6537_v63  ;;  %v6544_v13 = vrot.slane %v6530_v10, %v10781_v32  ;;  %v6696_v32 = vld [vmem:[%s11155_s4 + $0x20] sm:$0xff]  ;;  %s9686_s4 = smov [#allocation10]  }
 0x627   :  { %v9525_v22 = vpack.c.bf16 %v6697_v47, %v6696_v32  ;;  %s6798_s24 = sshll.u32 %s9686_s4, 4  ;;  %s6799_s24 = int_to_ptr.vmem [resolvable:$true] %s6798_s24 }
 0x628   :  { %6615 = vmatprep.mubr.f32.mxu0 %v6545_v61  ;;  %v6546_v30 = vcombine.high %v6544_v13, %v6544_v13  ;;  %s9649_s5 = scalar_lea.vmem %s6799_s24, 32  ;;  %p9654_p11 = scmp.lt.s32.totalorder %s6799_s24, %s6799_s24 }
 0x629   :  { %6616 = vmatmul.mubr.f32.vlgmr.msra.gmra.mrb[32].mxu0 %v6537_v63  ;;  %p9650_p10 = scmp.ne.s32.totalorder %s6799_s24, %s9649_s5  ;;  %p9655_p12 = scmp.lt.s32.totalorder %s9649_s5, %s9649_s5 }
 0x62a   :  { %6685 = vmatprep.mubr.f32.mxu1 %v6546_v30  ;;  %9520 = vmatpush3.bf16.msra.mxu0 %v9519_v54 }
 0x62b   :  { %6686 = vmatmul.mubr.f32.vlgmr.msra.gmra.mrb[32].mxu1 %v6544_v13  ;;  %9521 = vmatprep.subr.bf16.mxu0 %v9683_v51  ;;  %p9656_p13 = por %p9655_p12, %p9654_p11 }
 0x62c   :  { %6955 = vmatprep.mubr.msk.f32.mxu0 %vm9684_vm1, %v9685_v34 }
 0x62d   :  { %p9657_p0 = pnand %p9656_p13, %p9650_p10 }
 0x62e   :  { %9523 = vmatpush3.bf16.msra.mxu0 %v9522_v18 }
 0x62f   :  { %9524 = vmatprep.subr.bf16.mxu0 %v9683_v51 }
 0x632   :  { %9526 = vmatpush3.bf16.msra.mxu0 %v9525_v22 }
 0x633   :  { %9527 = vmatprep.subr.bf16.mxu0 %v9683_v51 }
 0x636   :  { %9529 = vmatpush3.bf16.msra.mxu0 %v9528_v24 }
 0x6fc   :  { %v6892_v7 = vpop.f32.mrb[32].mxu0 }
 0x6fd   :  { %v6893_v15 = vpop.f32.mrb[33].mxu0 }
 0x6fe   :  { %v6894_v35 = vadd.f32 %v6893_v15, %v6892_v7  ;;  %v6927_v52 = vpop.f32.mrb[32].mxu1 }
 0x6ff   :  { %v6928_v29 = vpop.f32.mrb[33].mxu1 }
 0x700   :  { %v6618_v56 = vadd.f32 %v6894_v35, %v6528_v60  ;;  %v6929_v48 = vadd.f32 %v6928_v29, %v6927_v52 }
 0x702   :  { %v6688_v9 = vadd.f32 %v6929_v48, %v6618_v56 }
 0x704   :  { %v6691_v16 = vmax.f32 %v6688_v9, 0.0 }
 0x706   :  { %6956 = vmatmul.mubr.msk.f32.vlgmr.msra.gmra.mrb[34].mxu0 %vm6704_vm2, %v6691_v16 }
 0x7d9   :  { %v6774_v57 = vpop.f32.mrb[34].mxu0 }
 0x7da   :  { %v6775_v12 = vadd.f32 %v6774_v57, %v6703_v45  ;;  %v6957_v53 = vpop.f32.mrb[35].mxu0 }
 0x7dc   :  { %v6779_v59 = vsel %vm6778_vm3, %v6775_v12, -inf }
 0x7dd   :  { %6780 = vmax.xlane.f32.xlu0 %v6779_v59 }
 0x86a   :  { %v6781_v26 = vpop.xlane.xlu0 %6780 }
 0x86b   :  { %v6782_v44 = vsub.f32 %v6775_v12, %v6781_v26 }
 0x86d   :  { %v6783_v27 = vmul.f32 1.442695, %v6782_v44 }
 0x86f   :  { %9577 = vpow2.f32 %v6783_v27 }
 0x879   :  { %v9578_v38 = vpop.eup %9577 }
 0x87a   :  { %v6785_v1 = vsel %vm6778_vm3, %v9578_v38, 0.0 }
 0x87b   :  { %6786 = vadd.xlane.f32.xlu0 %v6785_v1 }
 0x908   :  { %v6787_v58 = vpop.xlane.xlu0 %6786 }
 0x909   :  { %9579 = vlog2.f32 %v6787_v58 }
 0x913   :  { %v9580_v5 = vpop.eup %9579 }
 0x914   :  { %v6789_v50 = vmul.f32 0.6931472, %v9580_v5 }
 0x916   :  { %v6790_v42 = vsub.f32 %v6782_v44, %v6789_v50 }
 0x918   :  { %6791 = vst.msk [vmem:[#allocation10] sm:$0x3] %vm6778_vm3, %v6790_v42 }
 0x919   :  { %9660 = shalt.err (!%p9657_p0)
}
 0x91a   :  { %s9661_s11 = scalar_lea.hbm %s11157_s6, 32 }
 0x91b   :  { %p9662_p1 = scmp.ne.s32.totalorder %s11157_s6, %s9661_s11  ;;  %p9665_p2 = scmp.lt.u32.totalorder %s9661_s11, %s11157_s6 }
 0x91d   :  { %p9667_p3 = pnand %p9665_p2, %p9662_p1 }
 0x91f   :  { %9670 = shalt.err (!%p9667_p3)
}
 0x920   :  { %6801 = dma.vmem_to_hbm [thread:$0]  %s6799_s24, 32, %s11157_s6, [#allocation6]  }
 0x921   :  { %9675 = dma.done.wait [#allocation6], 32  }
 0x922   :  { %9676 = vsyncadd [#allocation6], 4294967264 }
 0x923   :  { %6805 = vsyncpa [#allocation5], 1 }
 0x924   :  { %6806 = vsyncpa [#allocation8], 1 }
 0x925   :  { %6807 = vsyncpa [#allocation6], 1 }

</bundles_post_ra>
